<compile_context>
chip_gen: v7x
topology: tpu7x:2x2x1
jax: 0.10.0
libtpu: 0.0.40
codegen_flags: <defaults>
</compile_context>

<pallas_src>
import jax
import jax.numpy as jnp
import numpy as np
from jax.experimental import pallas as pl
from jax.experimental.pallas import tpu as pltpu

# Parity permutation of the 7 conv1 output positions along each spatial axis.
_PERM = np.array([0, 2, 4, 6, 1, 3, 5])
# conv2 tap index (ki or kj in 0..2) -> start offset in the permuted 7-long axis:
# tap k needs original positions {k, k+2, k+4}, which are contiguous after _PERM.
_TAP_OFF = (0, 4, 1)


# ------------------------------ Pallas kernel -------------------------------

def _fused_cnn_kernel(p_ref, w1_ref, b1_ref, w2_ref, b2_ref, wl_ref, bl_ref,
                      o_ref):
    tb = p_ref.shape[0]

    # conv1: one MXU matmul over all (batch, output-position) rows. K=27, N=16.
    p = p_ref[...].reshape(tb * 49, 27)
    h1 = jnp.dot(p, w1_ref[...], preferred_element_type=jnp.float32)
    h1 = jnp.maximum(h1 + b1_ref[...], 0.0)                 # bias + ReLU
    h1 = h1.reshape(tb, 7, 7, 16)                           # parity-permuted spatial

    # conv2: 9 kernel taps; each tap is a static unit-stride 3x3 slice of h1
    # feeding a small dense (16 -> 32) matmul; partial products summed in VMEM.
    acc = None
    for ki in range(3):
        for kj in range(3):
            tap = h1[:, _TAP_OFF[ki]:_TAP_OFF[ki] + 3,
                        _TAP_OFF[kj]:_TAP_OFF[kj] + 3, :]    # (TB, 3, 3, 16)
            part = jnp.dot(tap.reshape(tb * 9, 16), w2_ref[ki * 3 + kj],
                           preferred_element_type=jnp.float32)
            acc = part if acc is None else acc + part
    h2 = jnp.maximum(acc + b2_ref[...], 0.0)                 # (TB*9, 32)

    # AdaptiveAvgPool2d((1,1)) + Linear(32, 2).
    pooled = jnp.sum(h2.reshape(tb, 9, 32), axis=1) * (1.0 / 9.0)   # (TB, 32)
    o_ref[...] = (jnp.dot(pooled, wl_ref[...],
                          preferred_element_type=jnp.float32) + bl_ref[...])


def fused_cnn(patches, w1, b1, w2, b2, wl, bl, *, tile_b):
    bp = patches.shape[0]
    grid = (bp // tile_b,)
    flops = 2 * bp * (49 * 27 * 16 + 9 * 9 * 16 * 32 + 32 * 2)
    bytes_accessed = 4 * (patches.size + w1.size + b1.size + w2.size
                          + b2.size + wl.size + bl.size + bp * 2)
    return pl.pallas_call(
        _fused_cnn_kernel,
        out_shape=jax.ShapeDtypeStruct((bp, 2), jnp.float32),
        grid=grid,
        in_specs=[
            # batch-tiled activations
            pl.BlockSpec((tile_b, 7, 7, 27), lambda i: (i, 0, 0, 0)),
            # weights / biases: constant index_map -> DMA'd once, VMEM-resident
            pl.BlockSpec((27, 16), lambda i: (0, 0)),
            pl.BlockSpec((1, 16), lambda i: (0, 0)),
            pl.BlockSpec((9, 16, 32), lambda i: (0, 0, 0)),
            pl.BlockSpec((1, 32), lambda i: (0, 0)),
            pl.BlockSpec((32, 2), lambda i: (0, 0)),
            pl.BlockSpec((1, 2), lambda i: (0, 0)),
        ],
        out_specs=pl.BlockSpec((tile_b, 2), lambda i: (i, 0)),
        compiler_params=pltpu.CompilerParams(
            dimension_semantics=("parallel",)),
        cost_estimate=pl.CostEstimate(flops=flops, transcendentals=0,
                                      bytes_accessed=bytes_accessed),
    )(patches, w1, b1, w2, b2, wl, bl)


# ------------------------- setup (weights only, once) ------------------------

def prepare_params(params):
    # W1[(ki*3+kj)*3 + c, o] = w1[o, c, ki, kj]  (matches patch channel layout)
    w1 = jnp.transpose(params["w1"], (2, 3, 1, 0)).reshape(27, 16)
    # W2[ki*3+kj][c, o] = w2[o, c, ki, kj]
    w2 = jnp.transpose(params["w2"], (2, 3, 1, 0)).reshape(9, 16, 32)
    return dict(w1=w1, b1=params["b1"][None, :],
                w2=w2, b2=params["b2"][None, :],
                wl=params["wl"].T, bl=params["bl"][None, :])


# ---------------------------- forward-pass wrapper ---------------------------

def _round_up(n, m):
    return ((n + m - 1) // m) * m


def _im2col_conv1(x_nchw):
    """conv1 im2col patches, (B, 7, 7, 27), spatial positions in parity order.

    Last-dim layout is (ki,kj)-major / input-channel-minor, matching W1 above.
    """
    xh = jnp.transpose(x_nchw, (0, 2, 3, 1))                 # (B, 16, 16, 3)
    cols = [xh[:, ki:ki + 13:2, kj:kj + 13:2, :]
            for ki in range(3) for kj in range(3)]
    patches = jnp.concatenate(cols, axis=-1)                 # (B, 7, 7, 27)
    patches = jnp.take(patches, _PERM, axis=1)
    return jnp.take(patches, _PERM, axis=2)


@jax.jit
def simple_cnn_forward(x, prepped):
    b = x.shape[0]
    patches = _im2col_conv1(x.astype(jnp.float32))
    tile_b = min(128, _round_up(b, 8))        # v7x-safe tile; multiple of 8 rows
    bp = _round_up(b, tile_b)
    if bp != b:
        patches = jnp.pad(patches, ((0, bp - b), (0, 0), (0, 0), (0, 0)))
    out = fused_cnn(patches, prepped["w1"], prepped["b1"], prepped["w2"],
                    prepped["b2"], prepped["wl"], prepped["bl"], tile_b=tile_b)
    return out[:b]


# --------------------------------- testing ----------------------------------

def make_params(key):
    ks = jax.random.split(key, 6)
    return {
        "w1": 0.1 * jax.random.normal(ks[0], (16, 3, 3, 3), jnp.float32),
        "b1": 0.1 * jax.random.normal(ks[1], (16,), jnp.float32),
        "w2": 0.1 * jax.random.normal(ks[2], (32, 16, 3, 3), jnp.float32),
        "b2": 0.1 * jax.random.normal(ks[3], (32,), jnp.float32),
        "wl": 0.1 * jax.random.normal(ks[4], (2, 32), jnp.float32),
        "bl": 0.1 * jax.random.normal(ks[5], (2,), jnp.float32),
    }


def reference_forward(x, params):
    # Plain-JAX reference mirroring PyTorch semantics.
    def conv(x, w, b, s):
        y = jax.lax.conv_general_dilated(
            x, w, window_strides=(s, s), padding="VALID",
            dimension_numbers=("NCHW", "OIHW", "NCHW"))
        return jax.nn.relu(y + b[None, :, None, None])
    y = conv(x, params["w1"], params["b1"], 2)
    y = conv(y, params["w2"], params["b2"], 2)
    y = jnp.mean(y, axis=(2, 3))              # AdaptiveAvgPool2d((1,1)) + Flatten
    return y @ params["wl"].T + params["bl"]


if __name__ == "__main__":
    key = jax.random.PRNGKey(0)
    kx, kp = jax.random.split(key)
    x = jax.random.normal(kx, (2, 3, 16, 16), jnp.float32)   # NCHW, like PyTorch
    params = make_params(kp)

    prepped = prepare_params(params)                  # one-time weight repack
    out = jax.block_until_ready(simple_cnn_forward(x, prepped))

    ref = jax.block_until_ready(reference_forward(x, params))
    assert out.shape == (2, 2), out.shape
    np.testing.assert_allclose(np.asarray(out), np.asarray(ref),
                               rtol=1e-4, atol=1e-4)

    print("KERNEL_OK")
</pallas_src>

<mosaic_0001>
module attributes {stable_mosaic.version = 11 : i64} {
  func.func @_fused_cnn_kernel(%arg0: i32, %arg1: memref<8x7x7x27xf32, #tpu.memory_space<vmem>>, %arg2: memref<27x16xf32, #tpu.memory_space<vmem>>, %arg3: memref<1x16xf32, #tpu.memory_space<vmem>>, %arg4: memref<9x16x32xf32, #tpu.memory_space<vmem>>, %arg5: memref<1x32xf32, #tpu.memory_space<vmem>>, %arg6: memref<32x2xf32, #tpu.memory_space<vmem>>, %arg7: memref<1x2xf32, #tpu.memory_space<vmem>>, %arg8: memref<8x2xf32, #tpu.memory_space<vmem>>) attributes {dimension_semantics = [#tpu.dimension_semantics<parallel>], iteration_bounds = array<i64: 1>, scalar_prefetch = 0 : i64, scratch_operands = 0 : i64, tpu.core_type = #tpu.core_type<tc>, window_params = [{transform_indices = @transform_0, window_bounds = array<i64: 8, 7, 7, 27>}, {pipeline_mode = #tpu.pipeline_mode<synchronous>, transform_indices = @transform_1, window_bounds = array<i64: 27, 16>}, {pipeline_mode = #tpu.pipeline_mode<synchronous>, transform_indices = @transform_2, window_bounds = array<i64: 1, 16>}, {pipeline_mode = #tpu.pipeline_mode<synchronous>, transform_indices = @transform_3, window_bounds = array<i64: 9, 16, 32>}, {pipeline_mode = #tpu.pipeline_mode<synchronous>, transform_indices = @transform_4, window_bounds = array<i64: 1, 32>}, {pipeline_mode = #tpu.pipeline_mode<synchronous>, transform_indices = @transform_5, window_bounds = array<i64: 32, 2>}, {pipeline_mode = #tpu.pipeline_mode<synchronous>, transform_indices = @transform_6, window_bounds = array<i64: 1, 2>}, {transform_indices = @transform_7, window_bounds = array<i64: 8, 2>}]} {
    %c0 = arith.constant 0 : index
    %c0_0 = arith.constant 0 : index
    %c0_1 = arith.constant 0 : index
    %c0_2 = arith.constant 0 : index
    %0 = vector.load %arg1[%c0, %c0_0, %c0_1, %c0_2] : memref<8x7x7x27xf32, #tpu.memory_space<vmem>>, vector<8x7x7x27xf32>
    %1 = vector.shape_cast %0 : vector<8x7x7x27xf32> to vector<392x27xf32>
    %c0_3 = arith.constant 0 : index
    %c0_4 = arith.constant 0 : index
    %2 = vector.load %arg2[%c0_3, %c0_4] : memref<27x16xf32, #tpu.memory_space<vmem>>, vector<27x16xf32>
    %cst = arith.constant dense<0.000000e+00> : vector<392x16xf32>
    %3 = tpu.matmul %1, %2, %cst {dimension_numbers = #tpu.dot_dimension_numbers<[1], [0], [0], [1], [0, 0, 1, 1], [], []>} : vector<392x27xf32>, vector<27x16xf32>, vector<392x16xf32> -> vector<392x16xf32>
    %c0_5 = arith.constant 0 : index
    %c0_6 = arith.constant 0 : index
    %4 = vector.load %arg3[%c0_5, %c0_6] : memref<1x16xf32, #tpu.memory_space<vmem>>, vector<1x16xf32>
    %5 = vector.broadcast %4 : vector<1x16xf32> to vector<392x16xf32>
    %6 = arith.addf %3, %5 : vector<392x16xf32>
    %cst_7 = arith.constant 0.000000e+00 : f32
    %7 = vector.broadcast %cst_7 : f32 to vector<392x16xf32>
    %8 = arith.maximumf %6, %7 : vector<392x16xf32>
    %9 = vector.shape_cast %8 : vector<392x16xf32> to vector<8x7x7x16xf32>
    %10 = vector.extract_strided_slice %9 {offsets = [0, 0, 0, 0], sizes = [8, 3, 3, 16], strides = [1, 1, 1, 1]} : vector<8x7x7x16xf32> to vector<8x3x3x16xf32>
    %11 = vector.shape_cast %10 : vector<8x3x3x16xf32> to vector<72x16xf32>
    %c0_8 = arith.constant 0 : index
    %c0_9 = arith.constant 0 : index
    %c0_10 = arith.constant 0 : index
    %12 = vector.load %arg4[%c0_8, %c0_9, %c0_10] : memref<9x16x32xf32, #tpu.memory_space<vmem>>, vector<1x16x32xf32>
    %13 = vector.shape_cast %12 : vector<1x16x32xf32> to vector<16x32xf32>
    %cst_11 = arith.constant dense<0.000000e+00> : vector<72x32xf32>
    %14 = tpu.matmul %11, %13, %cst_11 {dimension_numbers = #tpu.dot_dimension_numbers<[1], [0], [0], [1], [0, 0, 1, 1], [], []>} : vector<72x16xf32>, vector<16x32xf32>, vector<72x32xf32> -> vector<72x32xf32>
    %15 = vector.extract_strided_slice %9 {offsets = [0, 0, 4, 0], sizes = [8, 3, 3, 16], strides = [1, 1, 1, 1]} : vector<8x7x7x16xf32> to vector<8x3x3x16xf32>
    %16 = vector.shape_cast %15 : vector<8x3x3x16xf32> to vector<72x16xf32>
    %c1 = arith.constant 1 : index
    %c0_12 = arith.constant 0 : index
    %c0_13 = arith.constant 0 : index
    %17 = vector.load %arg4[%c1, %c0_12, %c0_13] : memref<9x16x32xf32, #tpu.memory_space<vmem>>, vector<1x16x32xf32>
    %18 = vector.shape_cast %17 : vector<1x16x32xf32> to vector<16x32xf32>
    %cst_14 = arith.constant dense<0.000000e+00> : vector<72x32xf32>
    %19 = tpu.matmul %16, %18, %cst_14 {dimension_numbers = #tpu.dot_dimension_numbers<[1], [0], [0], [1], [0, 0, 1, 1], [], []>} : vector<72x16xf32>, vector<16x32xf32>, vector<72x32xf32> -> vector<72x32xf32>
    %20 = arith.addf %14, %19 : vector<72x32xf32>
    %21 = vector.extract_strided_slice %9 {offsets = [0, 0, 1, 0], sizes = [8, 3, 3, 16], strides = [1, 1, 1, 1]} : vector<8x7x7x16xf32> to vector<8x3x3x16xf32>
    %22 = vector.shape_cast %21 : vector<8x3x3x16xf32> to vector<72x16xf32>
    %c2 = arith.constant 2 : index
    %c0_15 = arith.constant 0 : index
    %c0_16 = arith.constant 0 : index
    %23 = vector.load %arg4[%c2, %c0_15, %c0_16] : memref<9x16x32xf32, #tpu.memory_space<vmem>>, vector<1x16x32xf32>
    %24 = vector.shape_cast %23 : vector<1x16x32xf32> to vector<16x32xf32>
    %cst_17 = arith.constant dense<0.000000e+00> : vector<72x32xf32>
    %25 = tpu.matmul %22, %24, %cst_17 {dimension_numbers = #tpu.dot_dimension_numbers<[1], [0], [0], [1], [0, 0, 1, 1], [], []>} : vector<72x16xf32>, vector<16x32xf32>, vector<72x32xf32> -> vector<72x32xf32>
    %26 = arith.addf %20, %25 : vector<72x32xf32>
    %27 = vector.extract_strided_slice %9 {offsets = [0, 4, 0, 0], sizes = [8, 3, 3, 16], strides = [1, 1, 1, 1]} : vector<8x7x7x16xf32> to vector<8x3x3x16xf32>
    %28 = vector.shape_cast %27 : vector<8x3x3x16xf32> to vector<72x16xf32>
    %c3 = arith.constant 3 : index
    %c0_18 = arith.constant 0 : index
    %c0_19 = arith.constant 0 : index
    %29 = vector.load %arg4[%c3, %c0_18, %c0_19] : memref<9x16x32xf32, #tpu.memory_space<vmem>>, vector<1x16x32xf32>
    %30 = vector.shape_cast %29 : vector<1x16x32xf32> to vector<16x32xf32>
    %cst_20 = arith.constant dense<0.000000e+00> : vector<72x32xf32>
    %31 = tpu.matmul %28, %30, %cst_20 {dimension_numbers = #tpu.dot_dimension_numbers<[1], [0], [0], [1], [0, 0, 1, 1], [], []>} : vector<72x16xf32>, vector<16x32xf32>, vector<72x32xf32> -> vector<72x32xf32>
    %32 = arith.addf %26, %31 : vector<72x32xf32>
    %33 = vector.extract_strided_slice %9 {offsets = [0, 4, 4, 0], sizes = [8, 3, 3, 16], strides = [1, 1, 1, 1]} : vector<8x7x7x16xf32> to vector<8x3x3x16xf32>
    %34 = vector.shape_cast %33 : vector<8x3x3x16xf32> to vector<72x16xf32>
    %c4 = arith.constant 4 : index
    %c0_21 = arith.constant 0 : index
    %c0_22 = arith.constant 0 : index
    %35 = vector.load %arg4[%c4, %c0_21, %c0_22] : memref<9x16x32xf32, #tpu.memory_space<vmem>>, vector<1x16x32xf32>
    %36 = vector.shape_cast %35 : vector<1x16x32xf32> to vector<16x32xf32>
    %cst_23 = arith.constant dense<0.000000e+00> : vector<72x32xf32>
    %37 = tpu.matmul %34, %36, %cst_23 {dimension_numbers = #tpu.dot_dimension_numbers<[1], [0], [0], [1], [0, 0, 1, 1], [], []>} : vector<72x16xf32>, vector<16x32xf32>, vector<72x32xf32> -> vector<72x32xf32>
    %38 = arith.addf %32, %37 : vector<72x32xf32>
    %39 = vector.extract_strided_slice %9 {offsets = [0, 4, 1, 0], sizes = [8, 3, 3, 16], strides = [1, 1, 1, 1]} : vector<8x7x7x16xf32> to vector<8x3x3x16xf32>
    %40 = vector.shape_cast %39 : vector<8x3x3x16xf32> to vector<72x16xf32>
    %c5 = arith.constant 5 : index
    %c0_24 = arith.constant 0 : index
    %c0_25 = arith.constant 0 : index
    %41 = vector.load %arg4[%c5, %c0_24, %c0_25] : memref<9x16x32xf32, #tpu.memory_space<vmem>>, vector<1x16x32xf32>
    %42 = vector.shape_cast %41 : vector<1x16x32xf32> to vector<16x32xf32>
    %cst_26 = arith.constant dense<0.000000e+00> : vector<72x32xf32>
    %43 = tpu.matmul %40, %42, %cst_26 {dimension_numbers = #tpu.dot_dimension_numbers<[1], [0], [0], [1], [0, 0, 1, 1], [], []>} : vector<72x16xf32>, vector<16x32xf32>, vector<72x32xf32> -> vector<72x32xf32>
    %44 = arith.addf %38, %43 : vector<72x32xf32>
    %45 = vector.extract_strided_slice %9 {offsets = [0, 1, 0, 0], sizes = [8, 3, 3, 16], strides = [1, 1, 1, 1]} : vector<8x7x7x16xf32> to vector<8x3x3x16xf32>
    %46 = vector.shape_cast %45 : vector<8x3x3x16xf32> to vector<72x16xf32>
    %c6 = arith.constant 6 : index
    %c0_27 = arith.constant 0 : index
    %c0_28 = arith.constant 0 : index
    %47 = vector.load %arg4[%c6, %c0_27, %c0_28] : memref<9x16x32xf32, #tpu.memory_space<vmem>>, vector<1x16x32xf32>
    %48 = vector.shape_cast %47 : vector<1x16x32xf32> to vector<16x32xf32>
    %cst_29 = arith.constant dense<0.000000e+00> : vector<72x32xf32>
    %49 = tpu.matmul %46, %48, %cst_29 {dimension_numbers = #tpu.dot_dimension_numbers<[1], [0], [0], [1], [0, 0, 1, 1], [], []>} : vector<72x16xf32>, vector<16x32xf32>, vector<72x32xf32> -> vector<72x32xf32>
    %50 = arith.addf %44, %49 : vector<72x32xf32>
    %51 = vector.extract_strided_slice %9 {offsets = [0, 1, 4, 0], sizes = [8, 3, 3, 16], strides = [1, 1, 1, 1]} : vector<8x7x7x16xf32> to vector<8x3x3x16xf32>
    %52 = vector.shape_cast %51 : vector<8x3x3x16xf32> to vector<72x16xf32>
    %c7 = arith.constant 7 : index
    %c0_30 = arith.constant 0 : index
    %c0_31 = arith.constant 0 : index
    %53 = vector.load %arg4[%c7, %c0_30, %c0_31] : memref<9x16x32xf32, #tpu.memory_space<vmem>>, vector<1x16x32xf32>
    %54 = vector.shape_cast %53 : vector<1x16x32xf32> to vector<16x32xf32>
    %cst_32 = arith.constant dense<0.000000e+00> : vector<72x32xf32>
    %55 = tpu.matmul %52, %54, %cst_32 {dimension_numbers = #tpu.dot_dimension_numbers<[1], [0], [0], [1], [0, 0, 1, 1], [], []>} : vector<72x16xf32>, vector<16x32xf32>, vector<72x32xf32> -> vector<72x32xf32>
    %56 = arith.addf %50, %55 : vector<72x32xf32>
    %57 = vector.extract_strided_slice %9 {offsets = [0, 1, 1, 0], sizes = [8, 3, 3, 16], strides = [1, 1, 1, 1]} : vector<8x7x7x16xf32> to vector<8x3x3x16xf32>
    %58 = vector.shape_cast %57 : vector<8x3x3x16xf32> to vector<72x16xf32>
    %c8 = arith.constant 8 : index
    %c0_33 = arith.constant 0 : index
    %c0_34 = arith.constant 0 : index
    %59 = vector.load %arg4[%c8, %c0_33, %c0_34] : memref<9x16x32xf32, #tpu.memory_space<vmem>>, vector<1x16x32xf32>
    %60 = vector.shape_cast %59 : vector<1x16x32xf32> to vector<16x32xf32>
    %cst_35 = arith.constant dense<0.000000e+00> : vector<72x32xf32>
    %61 = tpu.matmul %58, %60, %cst_35 {dimension_numbers = #tpu.dot_dimension_numbers<[1], [0], [0], [1], [0, 0, 1, 1], [], []>} : vector<72x16xf32>, vector<16x32xf32>, vector<72x32xf32> -> vector<72x32xf32>
    %62 = arith.addf %56, %61 : vector<72x32xf32>
    %c0_36 = arith.constant 0 : index
    %c0_37 = arith.constant 0 : index
    %63 = vector.load %arg5[%c0_36, %c0_37] : memref<1x32xf32, #tpu.memory_space<vmem>>, vector<1x32xf32>
    %64 = vector.broadcast %63 : vector<1x32xf32> to vector<72x32xf32>
    %65 = arith.addf %62, %64 : vector<72x32xf32>
    %cst_38 = arith.constant 0.000000e+00 : f32
    %66 = vector.broadcast %cst_38 : f32 to vector<72x32xf32>
    %67 = arith.maximumf %65, %66 : vector<72x32xf32>
    %68 = vector.shape_cast %67 : vector<72x32xf32> to vector<8x9x32xf32>
    %cst_39 = arith.constant dense<0.000000e+00> : vector<8x32xf32>
    %69 = vector.multi_reduction <add>, %68, %cst_39 [1] : vector<8x9x32xf32> to vector<8x32xf32>
    %cst_40 = arith.constant 0.111111112 : f32
    %70 = vector.broadcast %cst_40 : f32 to vector<8x32xf32>
    %71 = arith.mulf %69, %70 : vector<8x32xf32>
    %c0_41 = arith.constant 0 : index
    %c0_42 = arith.constant 0 : index
    %72 = vector.load %arg6[%c0_41, %c0_42] : memref<32x2xf32, #tpu.memory_space<vmem>>, vector<32x2xf32>
    %cst_43 = arith.constant dense<0.000000e+00> : vector<8x2xf32>
    %73 = tpu.matmul %71, %72, %cst_43 {dimension_numbers = #tpu.dot_dimension_numbers<[1], [0], [0], [1], [0, 0, 1, 1], [], []>} : vector<8x32xf32>, vector<32x2xf32>, vector<8x2xf32> -> vector<8x2xf32>
    %c0_44 = arith.constant 0 : index
    %c0_45 = arith.constant 0 : index
    %74 = vector.load %arg7[%c0_44, %c0_45] : memref<1x2xf32, #tpu.memory_space<vmem>>, vector<1x2xf32>
    %75 = vector.broadcast %74 : vector<1x2xf32> to vector<8x2xf32>
    %76 = arith.addf %73, %75 : vector<8x2xf32>
    %c0_46 = arith.constant 0 : index
    %c0_47 = arith.constant 0 : index
    %77 = vector.load %arg8[%c0_46, %c0_47] : memref<8x2xf32, #tpu.memory_space<vmem>>, vector<8x2xf32>
    tpu.vector_store %arg8[%c0_46, %c0_47], %76 {strides = array<i32>} : memref<8x2xf32, #tpu.memory_space<vmem>>, vector<8x2xf32>,
    return
  }
  func.func @transform_0(%arg0: i32) -> (i32, i32, i32, i32) {
    %c0_i32 = arith.constant 0 : i32
    %c0_i32_0 = arith.constant 0 : i32
    %c0_i32_1 = arith.constant 0 : i32
    %c0_i32_2 = arith.constant 0 : i32
    return %arg0, %c0_i32, %c0_i32_0, %c0_i32_1 : i32, i32, i32, i32
  }
  func.func @transform_1(%arg0: i32) -> (i32, i32) {
    %c0_i32 = arith.constant 0 : i32
    %c0_i32_0 = arith.constant 0 : i32
    %c0_i32_1 = arith.constant 0 : i32
    return %c0_i32, %c0_i32_0 : i32, i32
  }
  func.func @transform_2(%arg0: i32) -> (i32, i32) {
    %c0_i32 = arith.constant 0 : i32
    %c0_i32_0 = arith.constant 0 : i32
    %c0_i32_1 = arith.constant 0 : i32
    return %c0_i32, %c0_i32_0 : i32, i32
  }
  func.func @transform_3(%arg0: i32) -> (i32, i32, i32) {
    %c0_i32 = arith.constant 0 : i32
    %c0_i32_0 = arith.constant 0 : i32
    %c0_i32_1 = arith.constant 0 : i32
    %c0_i32_2 = arith.constant 0 : i32
    return %c0_i32, %c0_i32_0, %c0_i32_1 : i32, i32, i32
  }
  func.func @transform_4(%arg0: i32) -> (i32, i32) {
    %c0_i32 = arith.constant 0 : i32
    %c0_i32_0 = arith.constant 0 : i32
    %c0_i32_1 = arith.constant 0 : i32
    return %c0_i32, %c0_i32_0 : i32, i32
  }
  func.func @transform_5(%arg0: i32) -> (i32, i32) {
    %c0_i32 = arith.constant 0 : i32
    %c0_i32_0 = arith.constant 0 : i32
    %c0_i32_1 = arith.constant 0 : i32
    return %c0_i32, %c0_i32_0 : i32, i32
  }
  func.func @transform_6(%arg0: i32) -> (i32, i32) {
    %c0_i32 = arith.constant 0 : i32
    %c0_i32_0 = arith.constant 0 : i32
    %c0_i32_1 = arith.constant 0 : i32
    return %c0_i32, %c0_i32_0 : i32, i32
  }
  func.func @transform_7(%arg0: i32) -> (i32, i32) {
    %c0_i32 = arith.constant 0 : i32
    %c0_i32_0 = arith.constant 0 : i32
    return %arg0, %c0_i32 : i32, i32
  }
}

</mosaic_0001>

<bundles_post_ra>
// kernel: simple_cnn_forward.1
= control target key start
LH: loop header
LB: loop body
LE: loop exit
PB: predicated region body
PF: predicated region fallthrough
CT: control target
= control target key end

     0   :  { %vm5337_vm0 = vcmask 1042432   ;;  %v20088_v0 = vmov 0.0|0.0   ;;  %v142_v4 = vlaneseq  ;;  %vm15403_vm1 = vmmov 0   ;;  %s20078_s1 = inlined_call_operand.vmem [shape: f32[27,16], index: 1, kind: input, shape index: {}]   ;;  %s20079_s0 = inlined_call_operand.vmem [shape: f32[8,7,7,27], index: 0, kind: input, shape index: {}]   ;;  %s20080_s2 = inlined_call_operand.vmem [shape: f32[1,16], index: 2, kind: input, shape index: {}]   ;;  %s20081_s3 = inlined_call_operand.vmem [shape: f32[9,16,32], index: 3, kind: input, shape index: {}]   ;;  %s20082_s5 = inlined_call_operand.vmem [shape: f32[32,2], index: 5, kind: input, shape index: {}]   ;;  %s20083_s4 = inlined_call_operand.vmem [shape: f32[1,32], index: 4, kind: input, shape index: {}]   ;;  %s20084_s6 = inlined_call_operand.vmem [shape: f32[1,2], index: 6, kind: input, shape index: {}]   ;;  %s20085_s7 = inlined_call_operand.vmem [shape: f32[8,2], index: 7, kind: output, shape index: {}]  }
   0x1   :  { %15296 = vmatprep.subr.bf16.mxu0 %v20088_v0  ;;  %v2826_v1 = vld [vmem:[%s20078_s1] sm:$0xff]  ;;  %v2827_v2 = vld [vmem:[%s20078_s1 + $0x8] sm:$0xff]  ;;  %v2828_v3 = vld [vmem:[%s20078_s1 + $0x10] sm:$0xff]  ;;  %15303 = vmatprep.subr.bf16.mxu1 %v20088_v0  ;;  %v20086_v7 = vmov 0.0   ;;  %v15405_v9 = vmov 1966171168  }
   0x2   :  { %v15297_v5 = vpack.c.bf16 %v2827_v2, %v2826_v1  ;;  %v2829_v6 = vld [vmem:[%s20078_s1 + $0x18] sm:$0x7]  ;;  %14859 = vmatprep.mubr.msk.f32.mxu0 %vm15403_vm1, %v20086_v7  ;;  %v26_v8 = vld [vmem:[%s20079_s0] sm:$0x7f]  ;;  %v140_v10 = vunpack.c.l.s4 %v15405_v9  ;;  %15010 = vmatprep.mubr.msk.f32.mxu1 %vm15403_vm1, %v20086_v7  ;;  %vm15406_vm2 = vmmov 1   ;;  %v143_v13 = vshrl.u32 %v142_v4, 7 }
   0x3   :  { %vm15469_vm3 = vmpackc.low %vm5337_vm0, %vm15406_vm2  ;;  %v27_v12 = vld [vmem:[%s20079_s0 + $0x8] sm:$0x7f]  ;;  %v28_v14 = vld [vmem:[%s20079_s0 + $0x10] sm:$0x7f]  ;;  %v15300_v15 = vpack.c.bf16 %v2829_v6, %v2828_v3  ;;  %v138_v16 = vcombine.high %v26_v8, %v26_v8  ;;  %vm5238_vm4 = vcmask 220160   ;;  %vm8596_vm5 = vcmask 130048  }
   0x4   :  { %15298 = vmatpush3.bf16.msra.mxu0 %v15297_v5  ;;  %v141_v17 = vunpack.c.0.s8 %v140_v10  ;;  %v186_v18 = vcombine.high %v27_v12, %v27_v12  ;;  %v29_v19 = vld [vmem:[%s20079_s0 + $0x18] sm:$0x7f]  ;;  %v15485_v20 = vld [vmem:[%s20079_s0 + $0x20] sm:$0x7f]  ;;  %v15490_v21 = vld [vmem:[%s20079_s0 + $0x28] sm:$0x7f]  ;;  %v234_v22 = vcombine.high %v28_v14, %v28_v14 }
   0x5   :  { %15299 = vmatprep.subr.bf16.mxu0 %v20088_v0  ;;  %v282_v23 = vcombine.high %v29_v19, %v29_v19  ;;  %v330_v24 = vcombine.high %v15485_v20, %v15485_v20  ;;  %v15498_v25 = vld [vmem:[%s20079_s0 + $0x30] sm:$0x7f]  ;;  %v15503_v26 = vld [vmem:[%s20079_s0 + $0x38] sm:$0x7f]  ;;  %v15508_v27 = vld [vmem:[%s20079_s0 + $0x40] sm:$0x7f]  ;;  %v378_v29 = vcombine.high %v15490_v21, %v15490_v21 }
   0x6   :  { %v15510_v28 = vsub.s32 %v141_v17, %v143_v13  ;;  %v426_v30 = vcombine.high %v15498_v25, %v15498_v25  ;;  %v474_v31 = vcombine.high %v15503_v26, %v15503_v26  ;;  %v15521_v32 = vld [vmem:[%s20079_s0 + $0x48] sm:$0x7f]  ;;  %v15526_v33 = vld [vmem:[%s20079_s0 + $0x50] sm:$0x7f]  ;;  %v15531_v34 = vld [vmem:[%s20079_s0 + $0x58] sm:$0x7f]  ;;  %v522_v35 = vcombine.high %v15508_v27, %v15508_v27 }
   0x7   :  { %v570_v36 = vcombine.high %v15521_v32, %v15521_v32  ;;  %v618_v37 = vcombine.high %v15526_v33, %v15526_v33  ;;  %v666_v38 = vcombine.high %v15531_v34, %v15531_v34  ;;  %vm14230_vm6 = vcmask 253952  }
   0x8   :  { %15302 = vmatpush3.bf16.msk.msra.mxu0 %vm15469_vm3, %v15300_v15  ;;  %v145_v39 = vrot.slane %v26_v8, %v15510_v28  ;;  %v152_v40 = vrot.slane %v138_v16, %v15510_v28  ;;  %v193_v41 = vrot.slane %v27_v12, %v15510_v28  ;;  %v200_v42 = vrot.slane %v186_v18, %v15510_v28 }
   0x9   :  { %v241_v43 = vrot.slane %v28_v14, %v15510_v28  ;;  %v248_v44 = vrot.slane %v234_v22, %v15510_v28  ;;  %v289_v45 = vrot.slane %v29_v19, %v15510_v28  ;;  %v15551_v46 = vrot.slane %v282_v23, %v15510_v28  ;;  %15321 = vmatprep.subr.bf16.mxu0 %v20088_v0 }
   0xa   :  { %v153_v47 = vcombine.high %v145_v39, %v145_v39  ;;  %v154_v48 = vcombine.high %v152_v40, %v152_v40  ;;  %v161_v49 = vrot.slane %v145_v39, %v15510_v28  ;;  %v168_v50 = vrot.slane %v152_v40, %v15510_v28 }
   0xb   :  { %v209_v51 = vrot.slane %v193_v41, %v15510_v28  ;;  %v201_v52 = vcombine.high %v193_v41, %v193_v41  ;;  %v202_v53 = vcombine.high %v200_v42, %v200_v42  ;;  %v216_v54 = vrot.slane %v200_v42, %v15510_v28 }
   0xc   :  { %v175_v55 = vrot.slane %v153_v47, %v15510_v28  ;;  %v182_v56 = vrot.slane %v154_v48, %v15510_v28  ;;  %v184_v57 = vcombine.high %v168_v50, %v168_v50  ;;  %v249_v58 = vcombine.high %v241_v43, %v241_v43 }
   0xd   :  { %v223_v59 = vrot.slane %v201_v52, %v15510_v28  ;;  %v230_v60 = vrot.slane %v202_v53, %v15510_v28  ;;  %v231_v61 = vcombine.high %v209_v51, %v209_v51  ;;  %v232_v62 = vcombine.high %v216_v54, %v216_v54 }
   0xe   :  { %v2837_v63 = vcombine.low %v161_v49, %v175_v55  ;;  %v14422_v1 = vcombine.high %v161_v49, %v175_v55  ;;  %v2839_v2 = vcombine.low %v168_v50, %v182_v56  ;;  %v2840_v3 = vcombine.low %v184_v57, %v209_v51 }
   0xf   :  { %v233_v4 = vcombine.high %v223_v59, %v223_v59  ;;  %v257_v5 = vrot.slane %v241_v43, %v15510_v28  ;;  %v271_v6 = vrot.slane %v249_v58, %v15510_v28  ;;  %v2886_v8 = vcombine.low %v223_v59, %v231_v61 }
  0x10   :  { %v2847_v9 = vrot.slane %v2837_v63, %v15510_v28  ;;  %v2854_v10 = vrot.slane %v14422_v1, %v15510_v28  ;;  %v2861_v11 = vrot.slane %v2839_v2, %v15510_v28  ;;  %v2868_v12 = vrot.slane %v2840_v3, %v15510_v28 }
  0x11   :  { %v2887_v13 = vcombine.low %v233_v4, %v216_v54  ;;  %v2888_v14 = vcombine.low %v230_v60, %v232_v62  ;;  %v2889_v15 = vcombine.low %v257_v5, %v271_v6  ;;  %v2896_v16 = vrot.slane %v2886_v8, %v15510_v28 }
  0x12   :  { %v2869_v17 = vcombine.low %v2847_v9, %v2854_v10  ;;  %v2870_v18 = vcombine.low %v2861_v11, %v2868_v12  ;;  %v250_v19 = vcombine.high %v248_v44, %v248_v44  ;;  %v264_v22 = vrot.slane %v248_v44, %v15510_v28 }
  0x13   :  { %v2903_v23 = vrot.slane %v2887_v13, %v15510_v28  ;;  %v2910_v39 = vrot.slane %v2888_v14, %v15510_v28  ;;  %v2917_v40 = vrot.slane %v2889_v15, %v15510_v28  ;;  %v297_v41 = vcombine.high %v289_v45, %v289_v45 }
  0x14   :  { %v2877_v42 = vrot.slane %v2869_v17, %v15510_v28  ;;  %v2884_v43 = vrot.slane %v2870_v18, %v15510_v28  ;;  %v278_v47 = vrot.slane %v250_v19, %v15510_v28  ;;  %v280_v48 = vcombine.high %v264_v22, %v264_v22 }
  0x15   :  { %v2918_v49 = vcombine.low %v2896_v16, %v2903_v23  ;;  %v2919_v50 = vcombine.low %v2910_v39, %v2917_v40  ;;  %v305_v51 = vrot.slane %v289_v45, %v15510_v28  ;;  %v319_v44 = vrot.slane %v297_v41, %v15510_v28 }
  0x16   :  { %v2885_v52 = vcombine.low %v2877_v42, %v2884_v43  ;;  %v14423_v53 = vcombine.high %v257_v5, %v271_v6  ;;  %v2936_v54 = vcombine.low %v264_v22, %v278_v47  ;;  %v298_v55 = vcombine.high %v15551_v46, %v15551_v46 }
  0x17   :  { %v2926_v56 = vrot.slane %v2918_v49, %v15510_v28  ;;  %v2933_v57 = vrot.slane %v2919_v50, %v15510_v28  ;;  %v327_v58 = vcombine.high %v305_v51, %v305_v51  ;;  %v2937_v59 = vcombine.low %v280_v48, %v305_v51 }
  0x18   :  { %14860 = vmatmul.mubr.msk.f32.vlgmr.msra.gmra.mrb[0].mxu0 %vm5238_vm4, %v2885_v52  ;;  %v2945_v60 = vrot.slane %v14423_v53, %v15510_v28  ;;  %v2952_v45 = vrot.slane %v2936_v54, %v15510_v28  ;;  %v312_v61 = vrot.slane %v15551_v46, %v15510_v28  ;;  %v326_v62 = vrot.slane %v298_v55, %v15510_v28 }
  0x19   :  { %14862 = vmatprep.mubr.msk.f32.mxu0 %vm15403_vm1, %v20086_v7  ;;  %v2934_v63 = vcombine.low %v2926_v56, %v2933_v57  ;;  %v2938_v1 = vcombine.low %v319_v44, %v327_v58  ;;  %v2959_v2 = vrot.slane %v2937_v59, %v15510_v28  ;;  %v329_v3 = vcombine.high %v319_v44, %v319_v44 }
  0x1a   :  { %v2967_v4 = vcombine.low %v2945_v60, %v2952_v45  ;;  %v328_v5 = vcombine.high %v312_v61, %v312_v61  ;;  %v337_v6 = vrot.slane %v15485_v20, %v15510_v28  ;;  %v344_v46 = vrot.slane %v330_v24, %v15510_v28 }
  0x1b   :  { %v2966_v8 = vrot.slane %v2938_v1, %v15510_v28  ;;  %v2984_v9 = vcombine.low %v329_v3, %v312_v61  ;;  %v385_v10 = vrot.slane %v15490_v21, %v15510_v28  ;;  %v392_v11 = vrot.slane %v378_v29, %v15510_v28 }
  0x1c   :  { %14863 = vmatmul.mubr.msk.f32.gmra.mrb[2].mxu0 %vm5238_vm4, %v2934_v63  ;;  %v2975_v12 = vrot.slane %v2967_v4, %v15510_v28  ;;  %v345_v13 = vcombine.high %v337_v6, %v337_v6  ;;  %v353_v14 = vrot.slane %v337_v6, %v15510_v28  ;;  %v2985_v20 = vcombine.low %v326_v62, %v328_v5 }
  0x1d   :  { %14865 = vmatprep.mubr.msk.f32.mxu0 %vm15403_vm1, %v20086_v7  ;;  %v2968_v24 = vcombine.low %v2959_v2, %v2966_v8  ;;  %v2994_v15 = vrot.slane %v2984_v9, %v15510_v28  ;;  %v346_v16 = vcombine.high %v344_v46, %v344_v46  ;;  %v360_v17 = vrot.slane %v344_v46, %v15510_v28 }
  0x1e   :  { %v367_v21 = vrot.slane %v345_v13, %v15510_v28  ;;  %v3001_v29 = vrot.slane %v2985_v20, %v15510_v28  ;;  %v393_v18 = vcombine.high %v385_v10, %v385_v10  ;;  %v401_v19 = vrot.slane %v385_v10, %v15510_v28 }
  0x1f   :  { %v2982_v22 = vrot.slane %v2968_v24, %v15510_v28  ;;  %v374_v23 = vrot.slane %v346_v16, %v15510_v28  ;;  %v376_v39 = vcombine.high %v360_v17, %v360_v17  ;;  %v408_v40 = vrot.slane %v392_v11, %v15510_v28 }
  0x20   :  { %v2986_v41 = vcombine.low %v353_v14, %v367_v21  ;;  %v14424_v42 = vcombine.high %v353_v14, %v367_v21  ;;  %v3016_v43 = vcombine.low %v2994_v15, %v3001_v29  ;;  %v415_v47 = vrot.slane %v393_v18, %v15510_v28 }
  0x21   :  { %v2983_v48 = vcombine.low %v2975_v12, %v2982_v22  ;;  %v423_v49 = vcombine.high %v401_v19, %v401_v19  ;;  %v3033_v50 = vcombine.low %v360_v17, %v374_v23  ;;  %v3034_v51 = vcombine.low %v376_v39, %v401_v19 }
  0x22   :  { %v3008_v44 = vrot.slane %v2986_v41, %v15510_v28  ;;  %v3015_v52 = vrot.slane %v14424_v42, %v15510_v28  ;;  %v3024_v53 = vrot.slane %v3016_v43, %v15510_v28  ;;  %v425_v54 = vcombine.high %v415_v47, %v415_v47 }
  0x23   :  { %14866 = vmatmul.mubr.msk.f32.gmra.mrb[4].mxu0 %vm5238_vm4, %v2983_v48  ;;  %v3035_v55 = vcombine.low %v415_v47, %v423_v49  ;;  %v3043_v56 = vrot.slane %v3033_v50, %v15510_v28  ;;  %v3050_v57 = vrot.slane %v3034_v51, %v15510_v28  ;;  %v394_v58 = vcombine.high %v392_v11, %v392_v11 }
  0x24   :  { %14868 = vmatprep.mubr.msk.f32.mxu0 %vm15403_vm1, %v20086_v7  ;;  %v3017_v59 = vcombine.low %v3008_v44, %v3015_v52  ;;  %v3036_v60 = vcombine.low %v425_v54, %v408_v40  ;;  %v424_v45 = vcombine.high %v408_v40, %v408_v40  ;;  %v433_v61 = vrot.slane %v15498_v25, %v15510_v28 }
  0x25   :  { %v3057_v62 = vrot.slane %v3035_v55, %v15510_v28  ;;  %v3065_v63 = vcombine.low %v3043_v56, %v3050_v57  ;;  %v422_v1 = vrot.slane %v394_v58, %v15510_v28  ;;  %v440_v2 = vrot.slane %v426_v30, %v15510_v28 }
  0x26   :  { %v3031_v3 = vrot.slane %v3017_v59, %v15510_v28  ;;  %v3064_v4 = vrot.slane %v3036_v60, %v15510_v28  ;;  %v441_v5 = vcombine.high %v433_v61, %v433_v61  ;;  %v449_v6 = vrot.slane %v433_v61, %v15510_v28 }
  0x27   :  { %v3073_v46 = vrot.slane %v3065_v63, %v15510_v28  ;;  %v442_v8 = vcombine.high %v440_v2, %v440_v2  ;;  %v456_v9 = vrot.slane %v440_v2, %v15510_v28  ;;  %v3082_v10 = vcombine.low %v422_v1, %v424_v45 }
  0x28   :  { %v3032_v11 = vcombine.low %v3024_v53, %v3031_v3  ;;  %v3066_v12 = vcombine.low %v3057_v62, %v3064_v4  ;;  %v463_v13 = vrot.slane %v441_v5, %v15510_v28  ;;  %v481_v25 = vrot.slane %v15503_v26, %v15510_v28 }
  0x29   :  { %v470_v30 = vrot.slane %v442_v8, %v15510_v28  ;;  %v3092_v14 = vrot.slane %v3082_v10, %v15510_v28  ;;  %v472_v20 = vcombine.high %v456_v9, %v456_v9  ;;  %v488_v24 = vrot.slane %v474_v31, %v15510_v28 }
  0x2a   :  { %14869 = vmatmul.mubr.msk.f32.gmra.mrb[6].mxu0 %vm5238_vm4, %v3032_v11  ;;  %v3080_v15 = vrot.slane %v3066_v12, %v15510_v28  ;;  %v3083_v16 = vcombine.low %v449_v6, %v463_v13  ;;  %v14425_v17 = vcombine.high %v449_v6, %v463_v13  ;;  %v489_v21 = vcombine.high %v481_v25, %v481_v25 }
  0x2b   :  { %14871 = vmatprep.mubr.msk.f32.mxu0 %vm15403_vm1, %v20086_v7  ;;  %v3085_v29 = vcombine.low %v456_v9, %v470_v30  ;;  %v490_v18 = vcombine.high %v488_v24, %v488_v24  ;;  %v497_v19 = vrot.slane %v481_v25, %v15510_v28  ;;  %v504_v22 = vrot.slane %v488_v24, %v15510_v28 }
  0x2c   :  { %v3081_v23 = vcombine.low %v3073_v46, %v3080_v15  ;;  %v3099_v26 = vrot.slane %v3083_v16, %v15510_v28  ;;  %v3106_v31 = vrot.slane %v14425_v17, %v15510_v28  ;;  %v511_v39 = vrot.slane %v489_v21, %v15510_v28 }
  0x2d   :  { %v3113_v40 = vrot.slane %v3085_v29, %v15510_v28  ;;  %v518_v41 = vrot.slane %v490_v18, %v15510_v28  ;;  %v519_v42 = vcombine.high %v497_v19, %v497_v19  ;;  %v520_v43 = vcombine.high %v504_v22, %v504_v22 }
  0x2e   :  { %14872 = vmatmul.mubr.msk.f32.gmra.mrb[8].mxu0 %vm5238_vm4, %v3081_v23  ;;  %v3114_v47 = vcombine.low %v3092_v14, %v3099_v26  ;;  %v521_v48 = vcombine.high %v511_v39, %v511_v39  ;;  %v3131_v49 = vcombine.low %v472_v20, %v497_v19  ;;  %v529_v50 = vrot.slane %v15508_v27, %v15510_v28 }
  0x2f   :  { %14874 = vmatprep.mubr.msk.f32.mxu0 %vm15403_vm1, %v20086_v7  ;;  %v3115_v51 = vcombine.low %v3106_v31, %v3113_v40  ;;  %v3132_v44 = vcombine.low %v511_v39, %v519_v42  ;;  %v3134_v52 = vcombine.low %v518_v41, %v520_v43  ;;  %v536_v53 = vrot.slane %v522_v35, %v15510_v28 }
  0x30   :  { %v3122_v54 = vrot.slane %v3114_v47, %v15510_v28  ;;  %v3133_v55 = vcombine.low %v521_v48, %v504_v22  ;;  %v3141_v56 = vrot.slane %v3131_v49, %v15510_v28  ;;  %v537_v57 = vcombine.high %v529_v50, %v529_v50 }
  0x31   :  { %v3129_v58 = vrot.slane %v3115_v51, %v15510_v28  ;;  %v3148_v59 = vrot.slane %v3132_v44, %v15510_v28  ;;  %v3162_v60 = vrot.slane %v3134_v52, %v15510_v28  ;;  %v538_v45 = vcombine.high %v536_v53, %v536_v53 }
  0x32   :  { %v3155_v61 = vrot.slane %v3133_v55, %v15510_v28  ;;  %v545_v62 = vrot.slane %v529_v50, %v15510_v28  ;;  %v552_v27 = vrot.slane %v536_v53, %v15510_v28  ;;  %v559_v35 = vrot.slane %v537_v57, %v15510_v28 }
  0x33   :  { %v3130_v63 = vcombine.low %v3122_v54, %v3129_v58  ;;  %v3163_v1 = vcombine.low %v3141_v56, %v3148_v59  ;;  %v566_v2 = vrot.slane %v538_v45, %v15510_v28  ;;  %v577_v3 = vrot.slane %v15521_v32, %v15510_v28 }
  0x34   :  { %v3164_v4 = vcombine.low %v3155_v61, %v3162_v60  ;;  %v568_v5 = vcombine.high %v552_v27, %v552_v27  ;;  %v3180_v6 = vcombine.low %v545_v62, %v559_v35  ;;  %v14426_v46 = vcombine.high %v545_v62, %v559_v35 }
  0x35   :  { %14875 = vmatmul.mubr.msk.f32.gmra.mrb[10].mxu0 %vm5238_vm4, %v3130_v63  ;;  %v3171_v8 = vrot.slane %v3163_v1, %v15510_v28  ;;  %v593_v9 = vrot.slane %v577_v3, %v15510_v28  ;;  %v3182_v10 = vcombine.low %v552_v27, %v566_v2  ;;  %v584_v11 = vrot.slane %v570_v36, %v15510_v28 }
  0x36   :  { %14877 = vmatprep.mubr.msk.f32.mxu0 %vm15403_vm1, %v20086_v7  ;;  %v3178_v12 = vrot.slane %v3164_v4, %v15510_v28  ;;  %v3190_v13 = vrot.slane %v3180_v6, %v15510_v28  ;;  %v3197_v25 = vrot.slane %v14426_v46, %v15510_v28  ;;  %v585_v30 = vcombine.high %v577_v3, %v577_v3 }
  0x37   :  { %v3183_v14 = vcombine.low %v568_v5, %v593_v9  ;;  %v3204_v20 = vrot.slane %v3182_v10, %v15510_v28  ;;  %v586_v24 = vcombine.high %v584_v11, %v584_v11  ;;  %v600_v15 = vrot.slane %v584_v11, %v15510_v28 }
  0x38   :  { %v3179_v16 = vcombine.low %v3171_v8, %v3178_v12  ;;  %v3212_v17 = vcombine.low %v3190_v13, %v3197_v25  ;;  %v607_v32 = vrot.slane %v585_v30, %v15510_v28  ;;  %v615_v36 = vcombine.high %v593_v9, %v593_v9  ;;  %v39_v12 = vld [vmem:[%s20079_s0 + $0x68] sm:$0x7f] }
  0x39   :  { %v3211_v21 = vrot.slane %v3183_v14, %v15510_v28  ;;  %v614_v29 = vrot.slane %v586_v24, %v15510_v28  ;;  %v616_v18 = vcombine.high %v600_v15, %v600_v15  ;;  %v625_v19 = vrot.slane %v15526_v33, %v15510_v28 }
  0x3a   :  { %14878 = vmatmul.mubr.msk.f32.gmra.mrb[12].mxu0 %vm5238_vm4, %v3179_v16  ;;  %v3220_v22 = vrot.slane %v3212_v17, %v15510_v28  ;;  %v617_v23 = vcombine.high %v607_v32, %v607_v32  ;;  %v3229_v26 = vcombine.low %v607_v32, %v615_v36  ;;  %v632_v31 = vrot.slane %v618_v37, %v15510_v28 }
  0x3b   :  { %14880 = vmatprep.mubr.msk.f32.mxu0 %vm15403_vm1, %v20086_v7  ;;  %v3213_v39 = vcombine.low %v3204_v20, %v3211_v21  ;;  %v633_v40 = vcombine.high %v625_v19, %v625_v19  ;;  %v641_v41 = vrot.slane %v625_v19, %v15510_v28  ;;  %v3231_v42 = vcombine.low %v614_v29, %v616_v18 }
  0x3c   :  { %v3230_v43 = vcombine.low %v617_v23, %v600_v15  ;;  %v3239_v47 = vrot.slane %v3229_v26, %v15510_v28  ;;  %v634_v48 = vcombine.high %v632_v31, %v632_v31  ;;  %v648_v49 = vrot.slane %v632_v31, %v15510_v28 }
  0x3d   :  { %v3227_v50 = vrot.slane %v3213_v39, %v15510_v28  ;;  %v655_v51 = vrot.slane %v633_v40, %v15510_v28  ;;  %v3253_v33 = vrot.slane %v3231_v42, %v15510_v28  ;;  %v673_v37 = vrot.slane %v15531_v34, %v15510_v28  ;;  %v38_v34 = vld [vmem:[%s20079_s0 + $0x60] sm:$0x7f] }
  0x3e   :  { %v3246_v44 = vrot.slane %v3230_v43, %v15510_v28  ;;  %v662_v52 = vrot.slane %v634_v48, %v15510_v28  ;;  %v664_v53 = vcombine.high %v648_v49, %v648_v49  ;;  %v680_v54 = vrot.slane %v666_v38, %v15510_v28 }
  0x3f   :  { %v3228_v55 = vcombine.low %v3220_v22, %v3227_v50  ;;  %v3232_v56 = vcombine.low %v641_v41, %v655_v51  ;;  %v681_v57 = vcombine.high %v673_v37, %v673_v37  ;;  %v689_v58 = vrot.slane %v673_v37, %v15510_v28 }
  0x40   :  { %v3261_v59 = vcombine.low %v3239_v47, %v3246_v44  ;;  %v14427_v60 = vcombine.high %v641_v41, %v655_v51  ;;  %v3279_v45 = vcombine.low %v648_v49, %v662_v52  ;;  %v682_v61 = vcombine.high %v680_v54, %v680_v54  ;;  %v40_v52 = vld [vmem:[%s20079_s0 + $0x70] sm:$0x7f] }
  0x41   :  { %14881 = vmatmul.mubr.msk.f32.gmra.mrb[14].mxu0 %vm5238_vm4, %v3228_v55  ;;  %v3260_v62 = vrot.slane %v3232_v56, %v15510_v28  ;;  %v703_v27 = vrot.slane %v681_v57, %v15510_v28  ;;  %v711_v35 = vcombine.high %v689_v58, %v689_v58  ;;  %v3280_v63 = vcombine.low %v664_v53, %v689_v58 }
  0x42   :  { %14883 = vmatprep.mubr.msk.f32.mxu0 %vm15403_vm1, %v20086_v7  ;;  %v3269_v38 = vrot.slane %v3261_v59, %v15510_v28  ;;  %v3288_v1 = vrot.slane %v14427_v60, %v15510_v28  ;;  %v3295_v2 = vrot.slane %v3279_v45, %v15510_v28  ;;  %v696_v3 = vrot.slane %v680_v54, %v15510_v28  ;;  %v41_v45 = vld [vmem:[%s20079_s0 + $0x78] sm:$0x7f] }
  0x43   :  { %v3262_v4 = vcombine.low %v3253_v33, %v3260_v62  ;;  %v3281_v5 = vcombine.low %v703_v27, %v711_v35  ;;  %v3302_v6 = vrot.slane %v3280_v63, %v15510_v28  ;;  %v710_v46 = vrot.slane %v682_v61, %v15510_v28 }
  0x44   :  { %v3310_v8 = vcombine.low %v3288_v1, %v3295_v2  ;;  %v712_v9 = vcombine.high %v696_v3, %v696_v3  ;;  %v713_v10 = vcombine.high %v703_v27, %v703_v27  ;;  %v721_v11 = vrot.slane %v38_v34, %v15510_v28 }
  0x45   :  { %v3276_v13 = vrot.slane %v3262_v4, %v15510_v28  ;;  %v3309_v25 = vrot.slane %v3281_v5, %v15510_v28  ;;  %v714_v30 = vcombine.high %v38_v34, %v38_v34  ;;  %v762_v14 = vcombine.high %v39_v12, %v39_v12 }
  0x46   :  { %v3318_v20 = vrot.slane %v3310_v8, %v15510_v28  ;;  %v729_v24 = vcombine.high %v721_v11, %v721_v11  ;;  %v737_v15 = vrot.slane %v721_v11, %v15510_v28  ;;  %v3327_v16 = vcombine.low %v713_v10, %v696_v3  ;;  %v42_v10 = vld [vmem:[%s20079_s0 + $0x80] sm:$0x7f] }
  0x47   :  { %v3277_v17 = vcombine.low %v3269_v38, %v3276_v13  ;;  %v3311_v32 = vcombine.low %v3302_v6, %v3309_v25  ;;  %v3328_v36 = vcombine.low %v710_v46, %v712_v9  ;;  %v728_v21 = vrot.slane %v714_v30, %v15510_v28 }
  0x48   :  { %v751_v29 = vrot.slane %v729_v24, %v15510_v28  ;;  %v3337_v18 = vrot.slane %v3327_v16, %v15510_v28  ;;  %v769_v19 = vrot.slane %v39_v12, %v15510_v28  ;;  %v776_v22 = vrot.slane %v762_v14, %v15510_v28 }
  0x49   :  { %14884 = vmatmul.mubr.msk.f32.gmra.mrb[16].mxu0 %vm5238_vm4, %v3277_v17  ;;  %v3325_v23 = vrot.slane %v3311_v32, %v15510_v28  ;;  %v3344_v26 = vrot.slane %v3328_v36, %v15510_v28  ;;  %v730_v31 = vcombine.high %v728_v21, %v728_v21  ;;  %v744_v39 = vrot.slane %v728_v21, %v15510_v28 }
  0x4a   :  { %14886 = vmatprep.mubr.msk.f32.mxu0 %vm15403_vm1, %v20086_v7  ;;  %v3329_v40 = vcombine.low %v737_v15, %v751_v29  ;;  %v14428_v41 = vcombine.high %v737_v15, %v751_v29  ;;  %v777_v42 = vcombine.high %v769_v19, %v769_v19  ;;  %v785_v43 = vrot.slane %v769_v19, %v15510_v28 }
  0x4b   :  { %v3326_v47 = vcombine.low %v3318_v20, %v3325_v23  ;;  %v3359_v48 = vcombine.low %v3337_v18, %v3344_v26  ;;  %v758_v49 = vrot.slane %v730_v31, %v15510_v28  ;;  %v760_v50 = vcombine.high %v744_v39, %v744_v39 }
  0x4c   :  { %v3351_v51 = vrot.slane %v3329_v40, %v15510_v28  ;;  %v3358_v33 = vrot.slane %v14428_v41, %v15510_v28  ;;  %v792_v37 = vrot.slane %v776_v22, %v15510_v28  ;;  %v799_v44 = vrot.slane %v777_v42, %v15510_v28 }
  0x4d   :  { %14887 = vmatmul.mubr.msk.f32.gmra.mrb[18].mxu0 %vm5238_vm4, %v3326_v47  ;;  %v3367_v53 = vrot.slane %v3359_v48, %v15510_v28  ;;  %v807_v54 = vcombine.high %v785_v43, %v785_v43  ;;  %v3376_v55 = vcombine.low %v744_v39, %v758_v49  ;;  %v3377_v56 = vcombine.low %v760_v50, %v785_v43 }
  0x4e   :  { %14889 = vmatprep.mubr.msk.f32.mxu0 %vm15403_vm1, %v20086_v7  ;;  %v3360_v57 = vcombine.low %v3351_v51, %v3358_v33  ;;  %v809_v58 = vcombine.high %v799_v44, %v799_v44  ;;  %v778_v59 = vcombine.high %v776_v22, %v776_v22  ;;  %v808_v60 = vcombine.high %v792_v37, %v792_v37 }
  0x4f   :  { %v3378_v61 = vcombine.low %v799_v44, %v807_v54  ;;  %v3386_v62 = vrot.slane %v3376_v55, %v15510_v28  ;;  %v3393_v27 = vrot.slane %v3377_v56, %v15510_v28  ;;  %v810_v35 = vcombine.high %v40_v52, %v40_v52 }
  0x50   :  { %v3374_v63 = vrot.slane %v3360_v57, %v15510_v28  ;;  %v3379_v34 = vcombine.low %v809_v58, %v792_v37  ;;  %v806_v38 = vrot.slane %v778_v59, %v15510_v28  ;;  %v817_v1 = vrot.slane %v40_v52, %v15510_v28  ;;  %v43_v57 = vld [vmem:[%s20079_s0 + $0x88] sm:$0x7f] }
  0x51   :  { %v3400_v2 = vrot.slane %v3378_v61, %v15510_v28  ;;  %v3408_v3 = vcombine.low %v3386_v62, %v3393_v27  ;;  %v824_v4 = vrot.slane %v810_v35, %v15510_v28  ;;  %v858_v5 = vcombine.high %v41_v45, %v41_v45 }
  0x52   :  { %v3375_v6 = vcombine.low %v3367_v53, %v3374_v63  ;;  %v3407_v46 = vrot.slane %v3379_v34, %v15510_v28  ;;  %v825_v8 = vcombine.high %v817_v1, %v817_v1  ;;  %v833_v9 = vrot.slane %v817_v1, %v15510_v28 }
  0x53   :  { %v3416_v11 = vrot.slane %v3408_v3, %v15510_v28  ;;  %v826_v12 = vcombine.high %v824_v4, %v824_v4  ;;  %v840_v13 = vrot.slane %v824_v4, %v15510_v28  ;;  %v3425_v25 = vcombine.low %v806_v38, %v808_v60 }
  0x54   :  { %14890 = vmatmul.mubr.msk.f32.gmra.mrb[20].mxu0 %vm5238_vm4, %v3375_v6  ;;  %v3409_v30 = vcombine.low %v3400_v2, %v3407_v46  ;;  %v847_v14 = vrot.slane %v825_v8, %v15510_v28  ;;  %v865_v20 = vrot.slane %v41_v45, %v15510_v28  ;;  %v872_v24 = vrot.slane %v858_v5, %v15510_v28 }
  0x55   :  { %14892 = vmatprep.mubr.msk.f32.mxu0 %vm15403_vm1, %v20086_v7  ;;  %v854_v15 = vrot.slane %v826_v12, %v15510_v28  ;;  %v3435_v16 = vrot.slane %v3425_v25, %v15510_v28  ;;  %v856_v17 = vcombine.high %v840_v13, %v840_v13  ;;  %v906_v32 = vcombine.high %v42_v10, %v42_v10 }
  0x56   :  { %v3423_v36 = vrot.slane %v3409_v30, %v15510_v28  ;;  %v3426_v21 = vcombine.low %v833_v9, %v847_v14  ;;  %v14429_v29 = vcombine.high %v833_v9, %v847_v14  ;;  %v873_v18 = vcombine.high %v865_v20, %v865_v20 }
  0x57   :  { %v3428_v19 = vcombine.low %v840_v13, %v854_v15  ;;  %v874_v22 = vcombine.high %v872_v24, %v872_v24  ;;  %v881_v23 = vrot.slane %v865_v20, %v15510_v28  ;;  %v888_v26 = vrot.slane %v872_v24, %v15510_v28 }
  0x58   :  { %v3424_v31 = vcombine.low %v3416_v11, %v3423_v36  ;;  %v3442_v39 = vrot.slane %v3426_v21, %v15510_v28  ;;  %v3449_v40 = vrot.slane %v14429_v29, %v15510_v28  ;;  %v895_v41 = vrot.slane %v873_v18, %v15510_v28 }
  0x59   :  { %v3456_v42 = vrot.slane %v3428_v19, %v15510_v28  ;;  %v902_v43 = vrot.slane %v874_v22, %v15510_v28  ;;  %v903_v47 = vcombine.high %v881_v23, %v881_v23  ;;  %v904_v48 = vcombine.high %v888_v26, %v888_v26  ;;  %v45_v19 = vld [vmem:[%s20079_s0 + $0x98] sm:$0x7f] }
  0x5a   :  { %14893 = vmatmul.mubr.msk.f32.gmra.mrb[22].mxu0 %vm5238_vm4, %v3424_v31  ;;  %v3457_v49 = vcombine.low %v3435_v16, %v3442_v39  ;;  %v905_v50 = vcombine.high %v895_v41, %v895_v41  ;;  %v3474_v51 = vcombine.low %v856_v17, %v881_v23  ;;  %v913_v33 = vrot.slane %v42_v10, %v15510_v28  ;;  %v44_v10 = vld [vmem:[%s20079_s0 + $0x90] sm:$0x7f] }
  0x5b   :  { %14895 = vmatprep.mubr.msk.f32.mxu0 %vm15403_vm1, %v20086_v7  ;;  %v3458_v37 = vcombine.low %v3449_v40, %v3456_v42  ;;  %v3475_v44 = vcombine.low %v895_v41, %v903_v47  ;;  %v3477_v52 = vcombine.low %v902_v43, %v904_v48  ;;  %v920_v53 = vrot.slane %v906_v32, %v15510_v28 }
  0x5c   :  { %v3465_v54 = vrot.slane %v3457_v49, %v15510_v28  ;;  %v3476_v55 = vcombine.low %v905_v50, %v888_v26  ;;  %v3484_v56 = vrot.slane %v3474_v51, %v15510_v28  ;;  %v921_v58 = vcombine.high %v913_v33, %v913_v33 }
  0x5d   :  { %v3472_v59 = vrot.slane %v3458_v37, %v15510_v28  ;;  %v3491_v60 = vrot.slane %v3475_v44, %v15510_v28  ;;  %v3505_v45 = vrot.slane %v3477_v52, %v15510_v28  ;;  %v922_v61 = vcombine.high %v920_v53, %v920_v53 }
  0x5e   :  { %v3498_v62 = vrot.slane %v3476_v55, %v15510_v28  ;;  %v929_v27 = vrot.slane %v913_v33, %v15510_v28  ;;  %v936_v35 = vrot.slane %v920_v53, %v15510_v28  ;;  %v943_v63 = vrot.slane %v921_v58, %v15510_v28 }
  0x5f   :  { %v3473_v34 = vcombine.low %v3465_v54, %v3472_v59  ;;  %v3506_v38 = vcombine.low %v3484_v56, %v3491_v60  ;;  %v950_v1 = vrot.slane %v922_v61, %v15510_v28  ;;  %v961_v2 = vrot.slane %v43_v57, %v15510_v28 }
  0x60   :  { %v3507_v3 = vcombine.low %v3498_v62, %v3505_v45  ;;  %v952_v4 = vcombine.high %v936_v35, %v936_v35  ;;  %v3523_v5 = vcombine.low %v929_v27, %v943_v63  ;;  %v14430_v6 = vcombine.high %v929_v27, %v943_v63 }
  0x61   :  { %14896 = vmatmul.mubr.msk.f32.gmra.mrb[24].mxu0 %vm5238_vm4, %v3473_v34  ;;  %v3514_v46 = vrot.slane %v3506_v38, %v15510_v28  ;;  %v977_v8 = vrot.slane %v961_v2, %v15510_v28  ;;  %v3525_v9 = vcombine.low %v936_v35, %v950_v1  ;;  %v954_v11 = vcombine.high %v43_v57, %v43_v57 }
  0x62   :  { %14898 = vmatprep.mubr.msk.f32.mxu0 %vm15403_vm1, %v20086_v7  ;;  %v3521_v12 = vrot.slane %v3507_v3, %v15510_v28  ;;  %v3533_v13 = vrot.slane %v3523_v5, %v15510_v28  ;;  %v3540_v25 = vrot.slane %v14430_v6, %v15510_v28  ;;  %v969_v30 = vcombine.high %v961_v2, %v961_v2 }
  0x63   :  { %v3526_v14 = vcombine.low %v952_v4, %v977_v8  ;;  %v3547_v20 = vrot.slane %v3525_v9, %v15510_v28  ;;  %v968_v24 = vrot.slane %v954_v11, %v15510_v28  ;;  %v999_v15 = vcombine.high %v977_v8, %v977_v8  ;;  %v46_v4 = vld [vmem:[%s20079_s0 + $0xa0] sm:$0x7f] }
  0x64   :  { %v3522_v16 = vcombine.low %v3514_v46, %v3521_v12  ;;  %v3555_v17 = vcombine.low %v3533_v13, %v3540_v25  ;;  %v991_v32 = vrot.slane %v969_v30, %v15510_v28  ;;  %v1009_v36 = vrot.slane %v44_v10, %v15510_v28 }
  0x65   :  { %v3554_v21 = vrot.slane %v3526_v14, %v15510_v28  ;;  %v970_v29 = vcombine.high %v968_v24, %v968_v24  ;;  %v984_v18 = vrot.slane %v968_v24, %v15510_v28  ;;  %v1002_v22 = vcombine.high %v44_v10, %v44_v10 }
  0x66   :  { %14899 = vmatmul.mubr.msk.f32.gmra.mrb[26].mxu0 %vm5238_vm4, %v3522_v16  ;;  %v3563_v23 = vrot.slane %v3555_v17, %v15510_v28  ;;  %v1001_v26 = vcombine.high %v991_v32, %v991_v32  ;;  %v1017_v31 = vcombine.high %v1009_v36, %v1009_v36  ;;  %v1025_v39 = vrot.slane %v1009_v36, %v15510_v28  ;;  %v47_v16 = vld [vmem:[%s20079_s0 + $0xa8] sm:$0x7f] }
  0x67   :  { %14901 = vmatprep.mubr.msk.f32.mxu0 %vm15403_vm1, %v20086_v7  ;;  %v3556_v40 = vcombine.low %v3547_v20, %v3554_v21  ;;  %v998_v41 = vrot.slane %v970_v29, %v15510_v28  ;;  %v1000_v42 = vcombine.high %v984_v18, %v984_v18  ;;  %v3572_v43 = vcombine.low %v991_v32, %v999_v15 }
  0x68   :  { %v1039_v47 = vrot.slane %v1017_v31, %v15510_v28  ;;  %v3573_v48 = vcombine.low %v1001_v26, %v984_v18  ;;  %v1016_v49 = vrot.slane %v1002_v22, %v15510_v28  ;;  %v1057_v50 = vrot.slane %v45_v19, %v15510_v28  ;;  %v48_v18 = vld [vmem:[%s20079_s0 + $0xb0] sm:$0x7f] }
  0x69   :  { %v3570_v51 = vrot.slane %v3556_v40, %v15510_v28  ;;  %v3574_v33 = vcombine.low %v998_v41, %v1000_v42  ;;  %v3582_v37 = vrot.slane %v3572_v43, %v15510_v28  ;;  %v1050_v44 = vcombine.high %v45_v19, %v45_v19 }
  0x6a   :  { %v3575_v52 = vcombine.low %v1025_v39, %v1039_v47  ;;  %v3589_v53 = vrot.slane %v3573_v48, %v15510_v28  ;;  %v1018_v54 = vcombine.high %v1016_v49, %v1016_v49  ;;  %v1032_v55 = vrot.slane %v1016_v49, %v15510_v28 }
  0x6b   :  { %v3571_v56 = vcombine.low %v3563_v23, %v3570_v51  ;;  %v3596_v57 = vrot.slane %v3574_v33, %v15510_v28  ;;  %v1065_v58 = vcombine.high %v1057_v50, %v1057_v50  ;;  %v1073_v59 = vrot.slane %v1057_v50, %v15510_v28 }
  0x6c   :  { %v3603_v60 = vrot.slane %v3575_v52, %v15510_v28  ;;  %v3604_v45 = vcombine.low %v3582_v37, %v3589_v53  ;;  %v1046_v61 = vrot.slane %v1018_v54, %v15510_v28  ;;  %v1048_v62 = vcombine.high %v1032_v55, %v1032_v55 }
  0x6d   :  { %14902 = vmatmul.mubr.msk.f32.gmra.mrb[28].mxu0 %vm5238_vm4, %v3571_v56  ;;  %v1087_v27 = vrot.slane %v1065_v58, %v15510_v28  ;;  %v1095_v35 = vcombine.high %v1073_v59, %v1073_v59  ;;  %v14431_v63 = vcombine.high %v1025_v39, %v1039_v47  ;;  %v1064_v34 = vrot.slane %v1050_v44, %v15510_v28 }
  0x6e   :  { %14904 = vmatprep.mubr.msk.f32.mxu0 %vm15403_vm1, %v20086_v7  ;;  %v3605_v38 = vcombine.low %v3596_v57, %v3603_v60  ;;  %v3612_v1 = vrot.slane %v3604_v45, %v15510_v28  ;;  %v3622_v2 = vcombine.low %v1032_v55, %v1046_v61  ;;  %v3623_v3 = vcombine.low %v1048_v62, %v1073_v59 }
  0x6f   :  { %v3624_v5 = vcombine.low %v1087_v27, %v1095_v35  ;;  %v3631_v6 = vrot.slane %v14431_v63, %v15510_v28  ;;  %v1066_v46 = vcombine.high %v1064_v34, %v1064_v34  ;;  %v1080_v8 = vrot.slane %v1064_v34, %v15510_v28 }
  0x70   :  { %v3619_v9 = vrot.slane %v3605_v38, %v15510_v28  ;;  %v3638_v10 = vrot.slane %v3622_v2, %v15510_v28  ;;  %v3645_v11 = vrot.slane %v3623_v3, %v15510_v28  ;;  %v1097_v12 = vcombine.high %v1087_v27, %v1087_v27 }
  0x71   :  { %v3652_v13 = vrot.slane %v3624_v5, %v15510_v28  ;;  %v1094_v25 = vrot.slane %v1066_v46, %v15510_v28  ;;  %v1096_v30 = vcombine.high %v1080_v8, %v1080_v8  ;;  %v1105_v14 = vrot.slane %v46_v4, %v15510_v28 }
  0x72   :  { %v3620_v20 = vcombine.low %v3612_v1, %v3619_v9  ;;  %v3653_v24 = vcombine.low %v3631_v6, %v3638_v10  ;;  %v3670_v15 = vcombine.low %v1097_v12, %v1080_v8  ;;  %v1098_v17 = vcombine.high %v46_v4, %v46_v4  ;;  %v49_v6 = vld [vmem:[%s20079_s0 + $0xb8] sm:$0x7f] }
  0x73   :  { %v3654_v32 = vcombine.low %v3645_v11, %v3652_v13  ;;  %v1113_v36 = vcombine.high %v1105_v14, %v1105_v14  ;;  %v1121_v21 = vrot.slane %v1105_v14, %v15510_v28  ;;  %v3671_v29 = vcombine.low %v1094_v25, %v1096_v30 }
  0x74   :  { %14905 = vmatmul.mubr.msk.f32.gmra.mrb[30].mxu0 %vm5238_vm4, %v3620_v20  ;;  %v3661_v19 = vrot.slane %v3653_v24, %v15510_v28  ;;  %v3680_v22 = vrot.slane %v3670_v15, %v15510_v28  ;;  %v1112_v23 = vrot.slane %v1098_v17, %v15510_v28  ;;  %v1146_v26 = vcombine.high %v47_v16, %v47_v16  ;;  %v50_v15 = vld [vmem:[%s20079_s0 + $0xc0] sm:$0x7f] }
  0x75   :  { %14907 = vmatprep.mubr.msk.f32.mxu0 %vm15403_vm1, %v20086_v7  ;;  %v3668_v31 = vrot.slane %v3654_v32, %v15510_v28  ;;  %v1135_v39 = vrot.slane %v1113_v36, %v15510_v28  ;;  %v3687_v40 = vrot.slane %v3671_v29, %v15510_v28  ;;  %v1153_v41 = vrot.slane %v47_v16, %v15510_v28 }
  0x76   :  { %v1114_v42 = vcombine.high %v1112_v23, %v1112_v23  ;;  %v1128_v43 = vrot.slane %v1112_v23, %v15510_v28  ;;  %v1160_v47 = vrot.slane %v1146_v26, %v15510_v28  ;;  %v1194_v48 = vcombine.high %v48_v18, %v48_v18 }
  0x77   :  { %v3669_v49 = vcombine.low %v3661_v19, %v3668_v31  ;;  %v3672_v50 = vcombine.low %v1121_v21, %v1135_v39  ;;  %v14432_v51 = vcombine.high %v1121_v21, %v1135_v39  ;;  %v3702_v33 = vcombine.low %v3680_v22, %v3687_v40 }
  0x78   :  { %v1142_v37 = vrot.slane %v1114_v42, %v15510_v28  ;;  %v1144_v44 = vcombine.high %v1128_v43, %v1128_v43  ;;  %v1161_v52 = vcombine.high %v1153_v41, %v1153_v41  ;;  %v1169_v53 = vrot.slane %v1153_v41, %v15510_v28 }
  0x79   :  { %14908 = vmatmul.mubr.msk.f32.gmra.mrb[32].mxu0 %vm5238_vm4, %v3669_v49  ;;  %v3694_v54 = vrot.slane %v3672_v50, %v15510_v28  ;;  %v3701_v55 = vrot.slane %v14432_v51, %v15510_v28  ;;  %v3710_v56 = vrot.slane %v3702_v33, %v15510_v28  ;;  %v1176_v57 = vrot.slane %v1160_v47, %v15510_v28 }
  0x7a   :  { %14910 = vmatprep.mubr.msk.f32.mxu0 %vm15403_vm1, %v20086_v7  ;;  %v1183_v58 = vrot.slane %v1161_v52, %v15510_v28  ;;  %v1191_v59 = vcombine.high %v1169_v53, %v1169_v53  ;;  %v3719_v60 = vcombine.low %v1128_v43, %v1142_v37  ;;  %v3720_v45 = vcombine.low %v1144_v44, %v1169_v53 }
  0x7b   :  { %v3703_v61 = vcombine.low %v3694_v54, %v3701_v55  ;;  %v1162_v62 = vcombine.high %v1160_v47, %v1160_v47  ;;  %v1192_v27 = vcombine.high %v1176_v57, %v1176_v57  ;;  %v1201_v35 = vrot.slane %v48_v18, %v15510_v28 }
  0x7c   :  { %v1193_v63 = vcombine.high %v1183_v58, %v1183_v58  ;;  %v3721_v34 = vcombine.low %v1183_v58, %v1191_v59  ;;  %v3729_v38 = vrot.slane %v3719_v60, %v15510_v28  ;;  %v3736_v1 = vrot.slane %v3720_v45, %v15510_v28 }
  0x7d   :  { %v3717_v2 = vrot.slane %v3703_v61, %v15510_v28  ;;  %v1190_v3 = vrot.slane %v1162_v62, %v15510_v28  ;;  %v1208_v4 = vrot.slane %v1194_v48, %v15510_v28  ;;  %v1209_v5 = vcombine.high %v1201_v35, %v1201_v35 }
  0x7e   :  { %v3722_v46 = vcombine.low %v1193_v63, %v1176_v57  ;;  %v3743_v8 = vrot.slane %v3721_v34, %v15510_v28  ;;  %v3751_v9 = vcombine.low %v3729_v38, %v3736_v1  ;;  %v1217_v10 = vrot.slane %v1201_v35, %v15510_v28  ;;  %v51_v57 = vld [vmem:[%s20079_s0 + $0xc8] sm:$0x7f] }
  0x7f   :  { %v3718_v11 = vcombine.low %v3710_v56, %v3717_v2  ;;  %v1210_v12 = vcombine.high %v1208_v4, %v1208_v4  ;;  %v1224_v13 = vrot.slane %v1208_v4, %v15510_v28  ;;  %v1231_v25 = vrot.slane %v1209_v5, %v15510_v28 }
  0x80   :  { %v3750_v30 = vrot.slane %v3722_v46, %v15510_v28  ;;  %v3759_v14 = vrot.slane %v3751_v9, %v15510_v28  ;;  %v3768_v20 = vcombine.low %v1190_v3, %v1192_v27  ;;  %v1242_v24 = vcombine.high %v49_v6, %v49_v6 }
  0x81   :  { %14911 = vmatmul.mubr.msk.f32.gmra.mrb[34].mxu0 %vm5238_vm4, %v3718_v11  ;;  %v1238_v16 = vrot.slane %v1210_v12, %v15510_v28  ;;  %v3769_v17 = vcombine.low %v1217_v10, %v1231_v25  ;;  %v14433_v32 = vcombine.high %v1217_v10, %v1231_v25  ;;  %v1240_v36 = vcombine.high %v1224_v13, %v1224_v13 }
  0x82   :  { %14913 = vmatprep.mubr.msk.f32.mxu0 %vm15403_vm1, %v20086_v7  ;;  %v3752_v21 = vcombine.low %v3743_v8, %v3750_v30  ;;  %v3778_v29 = vrot.slane %v3768_v20, %v15510_v28  ;;  %v1249_v18 = vrot.slane %v49_v6, %v15510_v28  ;;  %v1256_v19 = vrot.slane %v1242_v24, %v15510_v28 }
  0x83   :  { %v3771_v22 = vcombine.low %v1224_v13, %v1238_v16  ;;  %v3785_v23 = vrot.slane %v3769_v17, %v15510_v28  ;;  %v3792_v26 = vrot.slane %v14433_v32, %v15510_v28  ;;  %v1290_v31 = vcombine.high %v50_v15, %v50_v15 }
  0x84   :  { %v3766_v39 = vrot.slane %v3752_v21, %v15510_v28  ;;  %v1257_v40 = vcombine.high %v1249_v18, %v1249_v18  ;;  %v1258_v41 = vcombine.high %v1256_v19, %v1256_v19  ;;  %v1265_v42 = vrot.slane %v1249_v18, %v15510_v28 }
  0x85   :  { %v3799_v43 = vrot.slane %v3771_v22, %v15510_v28  ;;  %v3800_v47 = vcombine.low %v3778_v29, %v3785_v23  ;;  %v1272_v48 = vrot.slane %v1256_v19, %v15510_v28  ;;  %v1297_v49 = vrot.slane %v50_v15, %v15510_v28  ;;  %v52_v15 = vld [vmem:[%s20079_s0 + $0xd0] sm:$0x7f] }
  0x86   :  { %v3767_v50 = vcombine.low %v3759_v14, %v3766_v39  ;;  %v1279_v51 = vrot.slane %v1257_v40, %v15510_v28  ;;  %v1286_v33 = vrot.slane %v1258_v41, %v15510_v28  ;;  %v1287_v37 = vcombine.high %v1265_v42, %v1265_v42  ;;  %v53_v40 = vld [vmem:[%s20079_s0 + $0xd8] sm:$0x7f] }
  0x87   :  { %v3801_v44 = vcombine.low %v3792_v26, %v3799_v43  ;;  %v3808_v52 = vrot.slane %v3800_v47, %v15510_v28  ;;  %v1288_v53 = vcombine.high %v1272_v48, %v1272_v48  ;;  %v3817_v54 = vcombine.low %v1240_v36, %v1265_v42 }
  0x88   :  { %14914 = vmatmul.mubr.msk.f32.gmra.mrb[36].mxu0 %vm5238_vm4, %v3767_v50  ;;  %v1289_v55 = vcombine.high %v1279_v51, %v1279_v51  ;;  %v3818_v56 = vcombine.low %v1279_v51, %v1287_v37  ;;  %v1304_v58 = vrot.slane %v1290_v31, %v15510_v28  ;;  %v1305_v59 = vcombine.high %v1297_v49, %v1297_v49 }
  0x89   :  { %14916 = vmatprep.mubr.msk.f32.mxu0 %vm15403_vm1, %v20086_v7  ;;  %v3815_v60 = vrot.slane %v3801_v44, %v15510_v28  ;;  %v3820_v45 = vcombine.low %v1286_v33, %v1288_v53  ;;  %v3827_v61 = vrot.slane %v3817_v54, %v15510_v28  ;;  %v1313_v62 = vrot.slane %v1297_v49, %v15510_v28 }
  0x8a   :  { %v3819_v27 = vcombine.low %v1289_v55, %v1272_v48  ;;  %v3834_v35 = vrot.slane %v3818_v56, %v15510_v28  ;;  %v1306_v63 = vcombine.high %v1304_v58, %v1304_v58  ;;  %v1320_v34 = vrot.slane %v1304_v58, %v15510_v28  ;;  %v15980_v48 = vld [vmem:[%s20079_s0 + $0xe0] sm:$0x7f] }
  0x8b   :  { %v3816_v38 = vcombine.low %v3808_v52, %v3815_v60  ;;  %v3848_v1 = vrot.slane %v3820_v45, %v15510_v28  ;;  %v1327_v2 = vrot.slane %v1305_v59, %v15510_v28  ;;  %v1345_v3 = vrot.slane %v51_v57, %v15510_v28 }
  0x8c   :  { %v3841_v4 = vrot.slane %v3819_v27, %v15510_v28  ;;  %v3849_v5 = vcombine.low %v3827_v61, %v3834_v35  ;;  %v1334_v6 = vrot.slane %v1306_v63, %v15510_v28  ;;  %v1336_v46 = vcombine.high %v1320_v34, %v1320_v34 }
  0x8d   :  { %14917 = vmatmul.mubr.msk.f32.gmra.mrb[38].mxu0 %vm5238_vm4, %v3816_v38  ;;  %v1361_v8 = vrot.slane %v1345_v3, %v15510_v28  ;;  %v3866_v9 = vcombine.low %v1313_v62, %v1327_v2  ;;  %v14434_v10 = vcombine.high %v1313_v62, %v1327_v2  ;;  %v1338_v11 = vcombine.high %v51_v57, %v51_v57 }
  0x8e   :  { %14919 = vmatprep.mubr.msk.f32.mxu0 %vm15403_vm1, %v20086_v7  ;;  %v3850_v12 = vcombine.low %v3841_v4, %v3848_v1  ;;  %v3857_v13 = vrot.slane %v3849_v5, %v15510_v28  ;;  %v3868_v25 = vcombine.low %v1320_v34, %v1334_v6  ;;  %v1353_v30 = vcombine.high %v1345_v3, %v1345_v3 }
  0x8f   :  { %v3869_v14 = vcombine.low %v1336_v46, %v1361_v8  ;;  %v3876_v20 = vrot.slane %v3866_v9, %v15510_v28  ;;  %v3883_v24 = vrot.slane %v14434_v10, %v15510_v28  ;;  %v1352_v16 = vrot.slane %v1338_v11, %v15510_v28 }
  0x90   :  { %v3864_v17 = vrot.slane %v3850_v12, %v15510_v28  ;;  %v3890_v32 = vrot.slane %v3868_v25, %v15510_v28  ;;  %v1375_v36 = vrot.slane %v1353_v30, %v15510_v28  ;;  %v1383_v21 = vcombine.high %v1361_v8, %v1361_v8 }
  0x91   :  { %v3897_v29 = vrot.slane %v3869_v14, %v15510_v28  ;;  %v3898_v18 = vcombine.low %v3876_v20, %v3883_v24  ;;  %v1354_v19 = vcombine.high %v1352_v16, %v1352_v16  ;;  %v1368_v22 = vrot.slane %v1352_v16, %v15510_v28 }
  0x92   :  { %v3865_v23 = vcombine.low %v3857_v13, %v3864_v17  ;;  %v1385_v26 = vcombine.high %v1375_v36, %v1375_v36  ;;  %v1393_v31 = vrot.slane %v52_v15, %v15510_v28  ;;  %v3915_v39 = vcombine.low %v1375_v36, %v1383_v21 }
  0x93   :  { %v3899_v41 = vcombine.low %v3890_v32, %v3897_v29  ;;  %v3906_v42 = vrot.slane %v3898_v18, %v15510_v28  ;;  %v1382_v43 = vrot.slane %v1354_v19, %v15510_v28  ;;  %v1384_v47 = vcombine.high %v1368_v22, %v1368_v22 }
  0x94   :  { %14920 = vmatmul.mubr.msk.f32.gmra.mrb[40].mxu0 %vm5238_vm4, %v3865_v23  ;;  %v1401_v49 = vcombine.high %v1393_v31, %v1393_v31  ;;  %v1409_v50 = vrot.slane %v1393_v31, %v15510_v28  ;;  %v3916_v51 = vcombine.low %v1385_v26, %v1368_v22  ;;  %v3925_v33 = vrot.slane %v3915_v39, %v15510_v28  ;;  %v55_v23 = vld [vmem:[%s20079_s0 + $0xe8] sm:$0x7f] }
  0x95   :  { %14922 = vmatprep.mubr.msk.f32.mxu0 %vm15403_vm1, %v20086_v7  ;;  %v3913_v37 = vrot.slane %v3899_v41, %v15510_v28  ;;  %v3917_v44 = vcombine.low %v1382_v43, %v1384_v47  ;;  %v1386_v52 = vcombine.high %v52_v15, %v52_v15  ;;  %v1441_v53 = vrot.slane %v53_v40, %v15510_v28 }
  0x96   :  { %v1423_v54 = vrot.slane %v1401_v49, %v15510_v28  ;;  %v3932_v55 = vrot.slane %v3916_v51, %v15510_v28  ;;  %v1434_v56 = vcombine.high %v53_v40, %v53_v40  ;;  %v1489_v57 = vrot.slane %v15980_v48, %v15510_v28 }
  0x97   :  { %v3914_v58 = vcombine.low %v3906_v42, %v3913_v37  ;;  %v3939_v59 = vrot.slane %v3917_v44, %v15510_v28  ;;  %v1400_v60 = vrot.slane %v1386_v52, %v15510_v28  ;;  %v1449_v45 = vcombine.high %v1441_v53, %v1441_v53 }
  0x98   :  { %v3918_v61 = vcombine.low %v1409_v50, %v1423_v54  ;;  %v3947_v62 = vcombine.low %v3925_v33, %v3932_v55  ;;  %v1457_v27 = vrot.slane %v1441_v53, %v15510_v28  ;;  %v14435_v35 = vcombine.high %v1409_v50, %v1423_v54  ;;  %v56_v54 = vld [vmem:[%s20079_s0 + $0xf0] sm:$0x7f] }
  0x99   :  { %14923 = vmatmul.mubr.msk.f32.gmra.mrb[42].mxu0 %vm5238_vm4, %v3914_v58  ;;  %v1402_v63 = vcombine.high %v1400_v60, %v1400_v60  ;;  %v1416_v34 = vrot.slane %v1400_v60, %v15510_v28  ;;  %v1471_v38 = vrot.slane %v1449_v45, %v15510_v28  ;;  %v1448_v1 = vrot.slane %v1434_v56, %v15510_v28 }
  0x9a   :  { %14925 = vmatprep.mubr.msk.f32.mxu0 %vm15403_vm1, %v20086_v7  ;;  %v3946_v2 = vrot.slane %v3918_v61, %v15510_v28  ;;  %v3955_v3 = vrot.slane %v3947_v62, %v15510_v28  ;;  %v1479_v4 = vcombine.high %v1457_v27, %v1457_v27  ;;  %v3974_v5 = vrot.slane %v14435_v35, %v15510_v28 }
  0x9b   :  { %v1430_v6 = vrot.slane %v1402_v63, %v15510_v28  ;;  %v1432_v46 = vcombine.high %v1416_v34, %v1416_v34  ;;  %v1450_v8 = vcombine.high %v1448_v1, %v1448_v1  ;;  %v1464_v9 = vrot.slane %v1448_v1, %v15510_v28 }
  0x9c   :  { %v3948_v10 = vcombine.low %v3939_v59, %v3946_v2  ;;  %v3967_v11 = vcombine.low %v1471_v38, %v1479_v4  ;;  %v1481_v12 = vcombine.high %v1471_v38, %v1471_v38  ;;  %v1497_v13 = vcombine.high %v1489_v57, %v1489_v57 }
  0x9d   :  { %v3965_v25 = vcombine.low %v1416_v34, %v1430_v6  ;;  %v3966_v30 = vcombine.low %v1432_v46, %v1457_v27  ;;  %v1478_v14 = vrot.slane %v1450_v8, %v15510_v28  ;;  %v1480_v20 = vcombine.high %v1464_v9, %v1464_v9  ;;  %v57_v34 = vld [vmem:[%s20079_s0 + $0xf8] sm:$0x7f] }
  0x9e   :  { %v3962_v24 = vrot.slane %v3948_v10, %v15510_v28  ;;  %v3995_v15 = vrot.slane %v3967_v11, %v15510_v28  ;;  %v1505_v16 = vrot.slane %v1489_v57, %v15510_v28  ;;  %v1519_v17 = vrot.slane %v1497_v13, %v15510_v28 }
  0x9f   :  { %v3981_v32 = vrot.slane %v3965_v25, %v15510_v28  ;;  %v3988_v36 = vrot.slane %v3966_v30, %v15510_v28  ;;  %v4013_v21 = vcombine.low %v1481_v12, %v1464_v9  ;;  %v4014_v29 = vcombine.low %v1478_v14, %v1480_v20 }
  0xa0   :  { %v3963_v18 = vcombine.low %v3955_v3, %v3962_v24  ;;  %v4015_v19 = vcombine.low %v1505_v16, %v1519_v17  ;;  %v14436_v22 = vcombine.high %v1505_v16, %v1519_v17  ;;  %v1482_v26 = vcombine.high %v15980_v48, %v15980_v48 }
  0xa1   :  { %v3996_v31 = vcombine.low %v3974_v5, %v3981_v32  ;;  %v3997_v39 = vcombine.low %v3988_v36, %v3995_v15  ;;  %v4023_v40 = vrot.slane %v4013_v21, %v15510_v28  ;;  %v4030_v41 = vrot.slane %v4014_v29, %v15510_v28 }
  0xa2   :  { %14926 = vmatmul.mubr.msk.f32.gmra.mrb[44].mxu0 %vm5238_vm4, %v3963_v18  ;;  %v4037_v42 = vrot.slane %v4015_v19, %v15510_v28  ;;  %v4044_v43 = vrot.slane %v14436_v22, %v15510_v28  ;;  %v1496_v47 = vrot.slane %v1482_v26, %v15510_v28  ;;  %v1530_v49 = vcombine.high %v55_v23, %v55_v23 }
  0xa3   :  { %14928 = vmatprep.mubr.msk.f32.mxu0 %vm15403_vm1, %v20086_v7  ;;  %v4004_v48 = vrot.slane %v3996_v31, %v15510_v28  ;;  %v4011_v50 = vrot.slane %v3997_v39, %v15510_v28  ;;  %v4045_v51 = vcombine.low %v4023_v40, %v4030_v41  ;;  %v1537_v33 = vrot.slane %v55_v23, %v15510_v28 }
  0xa4   :  { %v4046_v37 = vcombine.low %v4037_v42, %v4044_v43  ;;  %v1498_v44 = vcombine.high %v1496_v47, %v1496_v47  ;;  %v1512_v52 = vrot.slane %v1496_v47, %v15510_v28  ;;  %v1544_v53 = vrot.slane %v1530_v49, %v15510_v28 }
  0xa5   :  { %v4012_v55 = vcombine.low %v4004_v48, %v4011_v50  ;;  %v4053_v56 = vrot.slane %v4045_v51, %v15510_v28  ;;  %v1545_v57 = vcombine.high %v1537_v33, %v1537_v33  ;;  %v1553_v58 = vrot.slane %v1537_v33, %v15510_v28  ;;  %v58_v50 = vld [vmem:[%s20079_s0 + $0x100] sm:$0x7f] }
  0xa6   :  { %v4060_v59 = vrot.slane %v4046_v37, %v15510_v28  ;;  %v1526_v60 = vrot.slane %v1498_v44, %v15510_v28  ;;  %v1528_v45 = vcombine.high %v1512_v52, %v1512_v52  ;;  %v1560_v61 = vrot.slane %v1544_v53, %v15510_v28 }
  0xa7   :  { %14929 = vmatmul.mubr.msk.f32.gmra.mrb[46].mxu0 %vm5238_vm4, %v4012_v55  ;;  %v1567_v62 = vrot.slane %v1545_v57, %v15510_v28  ;;  %v1575_v27 = vcombine.high %v1553_v58, %v1553_v58  ;;  %v1546_v35 = vcombine.high %v1544_v53, %v1544_v53  ;;  %v1578_v63 = vcombine.high %v56_v54, %v56_v54 }
  0xa8   :  { %14931 = vmatprep.mubr.msk.f32.mxu0 %vm15403_vm1, %v20086_v7  ;;  %v4061_v38 = vcombine.low %v4053_v56, %v4060_v59  ;;  %v4062_v1 = vcombine.low %v1512_v52, %v1526_v60  ;;  %v4063_v2 = vcombine.low %v1528_v45, %v1553_v58  ;;  %v1576_v3 = vcombine.high %v1560_v61, %v1560_v61  ;;  %v59_v59 = vld [vmem:[%s20079_s0 + $0x108] sm:$0x7f] }
  0xa9   :  { %v1577_v4 = vcombine.high %v1567_v62, %v1567_v62  ;;  %v4064_v5 = vcombine.low %v1567_v62, %v1575_v27  ;;  %v1574_v6 = vrot.slane %v1546_v35, %v15510_v28  ;;  %v1585_v46 = vrot.slane %v56_v54, %v15510_v28 }
  0xaa   :  { %v4072_v8 = vrot.slane %v4062_v1, %v15510_v28  ;;  %v4079_v9 = vrot.slane %v4063_v2, %v15510_v28  ;;  %v1592_v10 = vrot.slane %v1578_v63, %v15510_v28  ;;  %v1626_v11 = vcombine.high %v57_v34, %v57_v34 }
  0xab   :  { %14932 = vmatmul.mubr.msk.f32.gmra.mrb[48].mxu0 %vm5238_vm4, %v4061_v38  ;;  %v4065_v12 = vcombine.low %v1577_v4, %v1560_v61  ;;  %v4086_v13 = vrot.slane %v4064_v5, %v15510_v28  ;;  %v1593_v25 = vcombine.high %v1585_v46, %v1585_v46  ;;  %v1601_v30 = vrot.slane %v1585_v46, %v15510_v28 }
  0xac   :  { %14934 = vmatprep.mubr.msk.f32.mxu0 %vm15403_vm1, %v20086_v7  ;;  %v4094_v14 = vcombine.low %v4072_v8, %v4079_v9  ;;  %v1594_v20 = vcombine.high %v1592_v10, %v1592_v10  ;;  %v1608_v24 = vrot.slane %v1592_v10, %v15510_v28  ;;  %v4111_v15 = vcombine.low %v1574_v6, %v1576_v3 }
  0xad   :  { %v4093_v16 = vrot.slane %v4065_v12, %v15510_v28  ;;  %v1615_v17 = vrot.slane %v1593_v25, %v15510_v28  ;;  %v1633_v32 = vrot.slane %v57_v34, %v15510_v28  ;;  %v1640_v36 = vrot.slane %v1626_v11, %v15510_v28 }
  0xae   :  { %v4102_v21 = vrot.slane %v4094_v14, %v15510_v28  ;;  %v1622_v29 = vrot.slane %v1594_v20, %v15510_v28  ;;  %v4121_v18 = vrot.slane %v4111_v15, %v15510_v28  ;;  %v1624_v19 = vcombine.high %v1608_v24, %v1608_v24 }
  0xaf   :  { %v4095_v22 = vcombine.low %v4086_v13, %v4093_v16  ;;  %v4112_v23 = vcombine.low %v1601_v30, %v1615_v17  ;;  %v14437_v26 = vcombine.high %v1601_v30, %v1615_v17  ;;  %v1641_v31 = vcombine.high %v1633_v32, %v1633_v32 }
  0xb0   :  { %v4114_v39 = vcombine.low %v1608_v24, %v1622_v29  ;;  %v1642_v40 = vcombine.high %v1640_v36, %v1640_v36  ;;  %v1649_v41 = vrot.slane %v1633_v32, %v15510_v28  ;;  %v1656_v42 = vrot.slane %v1640_v36, %v15510_v28  ;;  %v60_v36 = vld [vmem:[%s20079_s0 + $0x110] sm:$0x7f] }
  0xb1   :  { %v4109_v43 = vrot.slane %v4095_v22, %v15510_v28  ;;  %v4128_v47 = vrot.slane %v4112_v23, %v15510_v28  ;;  %v4135_v49 = vrot.slane %v14437_v26, %v15510_v28  ;;  %v1663_v48 = vrot.slane %v1641_v31, %v15510_v28 }
  0xb2   :  { %v4142_v51 = vrot.slane %v4114_v39, %v15510_v28  ;;  %v1670_v33 = vrot.slane %v1642_v40, %v15510_v28  ;;  %v1671_v37 = vcombine.high %v1649_v41, %v1649_v41  ;;  %v1672_v44 = vcombine.high %v1656_v42, %v1656_v42 }
  0xb3   :  { %v4110_v52 = vcombine.low %v4102_v21, %v4109_v43  ;;  %v4143_v53 = vcombine.low %v4121_v18, %v4128_v47  ;;  %v1673_v54 = vcombine.high %v1663_v48, %v1663_v48  ;;  %v4160_v55 = vcombine.low %v1624_v19, %v1649_v41 }
  0xb4   :  { %v4144_v56 = vcombine.low %v4135_v49, %v4142_v51  ;;  %v4161_v57 = vcombine.low %v1663_v48, %v1671_v37  ;;  %v4163_v58 = vcombine.low %v1670_v33, %v1672_v44  ;;  %v1674_v60 = vcombine.high %v58_v50, %v58_v50  ;;  %v61_v51 = vld [vmem:[%s20079_s0 + $0x118] sm:$0x7f]  ;;  %v16122_v37 = vld [vmem:[%s20079_s0 + $0x120] sm:$0x7f] }
  0xb5   :  { %14935 = vmatmul.mubr.msk.f32.gmra.mrb[50].mxu0 %vm5238_vm4, %v4110_v52  ;;  %v4151_v45 = vrot.slane %v4143_v53, %v15510_v28  ;;  %v4162_v61 = vcombine.low %v1673_v54, %v1656_v42  ;;  %v4170_v62 = vrot.slane %v4160_v55, %v15510_v28  ;;  %v1681_v27 = vrot.slane %v58_v50, %v15510_v28 }
  0xb6   :  { %14937 = vmatprep.mubr.msk.f32.mxu0 %vm15403_vm1, %v20086_v7  ;;  %v4158_v35 = vrot.slane %v4144_v56, %v15510_v28  ;;  %v4177_v63 = vrot.slane %v4161_v57, %v15510_v28  ;;  %v4191_v34 = vrot.slane %v4163_v58, %v15510_v28  ;;  %v1688_v38 = vrot.slane %v1674_v60, %v15510_v28 }
  0xb7   :  { %v4184_v1 = vrot.slane %v4162_v61, %v15510_v28  ;;  %v1689_v2 = vcombine.high %v1681_v27, %v1681_v27  ;;  %v1697_v3 = vrot.slane %v1681_v27, %v15510_v28  ;;  %v1729_v4 = vrot.slane %v59_v59, %v15510_v28 }
  0xb8   :  { %v4159_v5 = vcombine.low %v4151_v45, %v4158_v35  ;;  %v4192_v6 = vcombine.low %v4170_v62, %v4177_v63  ;;  %v1690_v46 = vcombine.high %v1688_v38, %v1688_v38  ;;  %v1704_v8 = vrot.slane %v1688_v38, %v15510_v28 }
  0xb9   :  { %v4193_v9 = vcombine.low %v4184_v1, %v4191_v34  ;;  %v1711_v10 = vrot.slane %v1689_v2, %v15510_v28  ;;  %v1745_v11 = vrot.slane %v1729_v4, %v15510_v28  ;;  %v1722_v12 = vcombine.high %v59_v59, %v59_v59 }
  0xba   :  { %14938 = vmatmul.mubr.msk.f32.gmra.mrb[52].mxu0 %vm5238_vm4, %v4159_v5  ;;  %v4200_v13 = vrot.slane %v4192_v6, %v15510_v28  ;;  %v1718_v25 = vrot.slane %v1690_v46, %v15510_v28  ;;  %v1720_v30 = vcombine.high %v1704_v8, %v1704_v8  ;;  %v1737_v14 = vcombine.high %v1729_v4, %v1729_v4 }
  0xbb   :  { %14940 = vmatprep.mubr.msk.f32.mxu0 %vm15403_vm1, %v20086_v7  ;;  %v4207_v20 = vrot.slane %v4193_v9, %v15510_v28  ;;  %v4209_v24 = vcombine.low %v1697_v3, %v1711_v10  ;;  %v14438_v15 = vcombine.high %v1697_v3, %v1711_v10  ;;  %v1736_v16 = vrot.slane %v1722_v12, %v15510_v28 }
  0xbc   :  { %v4211_v17 = vcombine.low %v1704_v8, %v1718_v25  ;;  %v4212_v32 = vcombine.low %v1720_v30, %v1745_v11  ;;  %v1759_v21 = vrot.slane %v1737_v14, %v15510_v28  ;;  %v1767_v29 = vcombine.high %v1745_v11, %v1745_v11 }
  0xbd   :  { %v4208_v18 = vcombine.low %v4200_v13, %v4207_v20  ;;  %v4219_v19 = vrot.slane %v4209_v24, %v15510_v28  ;;  %v4226_v22 = vrot.slane %v14438_v15, %v15510_v28  ;;  %v1738_v23 = vcombine.high %v1736_v16, %v1736_v16 }
  0xbe   :  { %v4233_v26 = vrot.slane %v4211_v17, %v15510_v28  ;;  %v4240_v31 = vrot.slane %v4212_v32, %v15510_v28  ;;  %v1752_v39 = vrot.slane %v1736_v16, %v15510_v28  ;;  %v1769_v40 = vcombine.high %v1759_v21, %v1759_v21 }
  0xbf   :  { %14941 = vmatmul.mubr.msk.f32.gmra.mrb[54].mxu0 %vm5238_vm4, %v4208_v18  ;;  %v4241_v41 = vcombine.low %v4219_v19, %v4226_v22  ;;  %v1766_v42 = vrot.slane %v1738_v23, %v15510_v28  ;;  %v1777_v43 = vrot.slane %v60_v36, %v15510_v28  ;;  %v4258_v47 = vcombine.low %v1759_v21, %v1767_v29 }
  0xc0   :  { %14943 = vmatprep.mubr.msk.f32.mxu0 %vm15403_vm1, %v20086_v7  ;;  %v4242_v49 = vcombine.low %v4233_v26, %v4240_v31  ;;  %v1768_v48 = vcombine.high %v1752_v39, %v1752_v39  ;;  %v4259_v50 = vcombine.low %v1769_v40, %v1752_v39  ;;  %v1770_v33 = vcombine.high %v60_v36, %v60_v36  ;;  %v63_v31 = vld [vmem:[%s20079_s0 + $0x128] sm:$0x7f] }
  0xc1   :  { %v4249_v44 = vrot.slane %v4241_v41, %v15510_v28  ;;  %v1785_v52 = vcombine.high %v1777_v43, %v1777_v43  ;;  %v1793_v53 = vrot.slane %v1777_v43, %v15510_v28  ;;  %v4268_v54 = vrot.slane %v4258_v47, %v15510_v28  ;;  %v64_v43 = vld [vmem:[%s20079_s0 + $0x130] sm:$0x7f] }
  0xc2   :  { %v4256_v55 = vrot.slane %v4242_v49, %v15510_v28  ;;  %v4260_v56 = vcombine.low %v1766_v42, %v1768_v48  ;;  %v4275_v57 = vrot.slane %v4259_v50, %v15510_v28  ;;  %v1784_v58 = vrot.slane %v1770_v33, %v15510_v28 }
  0xc3   :  { %v1807_v59 = vrot.slane %v1785_v52, %v15510_v28  ;;  %v1825_v60 = vrot.slane %v61_v51, %v15510_v28  ;;  %v1818_v45 = vcombine.high %v61_v51, %v61_v51  ;;  %v1873_v61 = vrot.slane %v16122_v37, %v15510_v28 }
  0xc4   :  { %v4257_v62 = vcombine.low %v4249_v44, %v4256_v55  ;;  %v4282_v27 = vrot.slane %v4260_v56, %v15510_v28  ;;  %v4290_v35 = vcombine.low %v4268_v54, %v4275_v57  ;;  %v1786_v63 = vcombine.high %v1784_v58, %v1784_v58 }
  0xc5   :  { %v4261_v34 = vcombine.low %v1793_v53, %v1807_v59  ;;  %v1800_v38 = vrot.slane %v1784_v58, %v15510_v28  ;;  %v1833_v1 = vcombine.high %v1825_v60, %v1825_v60  ;;  %v1841_v2 = vrot.slane %v1825_v60, %v15510_v28 }
  0xc6   :  { %14944 = vmatmul.mubr.msk.f32.gmra.mrb[56].mxu0 %vm5238_vm4, %v4257_v62  ;;  %v4298_v3 = vrot.slane %v4290_v35, %v15510_v28  ;;  %v1814_v4 = vrot.slane %v1786_v63, %v15510_v28  ;;  %v14439_v5 = vcombine.high %v1793_v53, %v1807_v59  ;;  %v1832_v6 = vrot.slane %v1818_v45, %v15510_v28 }
  0xc7   :  { %14946 = vmatprep.mubr.msk.f32.mxu0 %vm15403_vm1, %v20086_v7  ;;  %v4289_v46 = vrot.slane %v4261_v34, %v15510_v28  ;;  %v1816_v8 = vcombine.high %v1800_v38, %v1800_v38  ;;  %v1855_v9 = vrot.slane %v1833_v1, %v15510_v28  ;;  %v1863_v10 = vcombine.high %v1841_v2, %v1841_v2 }
  0xc8   :  { %v4308_v11 = vcombine.low %v1800_v38, %v1814_v4  ;;  %v4317_v12 = vrot.slane %v14439_v5, %v15510_v28  ;;  %v1834_v13 = vcombine.high %v1832_v6, %v1832_v6  ;;  %v1848_v25 = vrot.slane %v1832_v6, %v15510_v28 }
  0xc9   :  { %v4291_v30 = vcombine.low %v4282_v27, %v4289_v46  ;;  %v4309_v14 = vcombine.low %v1816_v8, %v1841_v2  ;;  %v4310_v20 = vcombine.low %v1855_v9, %v1863_v10  ;;  %v1865_v24 = vcombine.high %v1855_v9, %v1855_v9 }
  0xca   :  { %v4324_v15 = vrot.slane %v4308_v11, %v15510_v28  ;;  %v1862_v16 = vrot.slane %v1834_v13, %v15510_v28  ;;  %v1864_v17 = vcombine.high %v1848_v25, %v1848_v25  ;;  %v1881_v32 = vcombine.high %v1873_v61, %v1873_v61 }
  0xcb   :  { %v4305_v36 = vrot.slane %v4291_v30, %v15510_v28  ;;  %v4331_v21 = vrot.slane %v4309_v14, %v15510_v28  ;;  %v4338_v29 = vrot.slane %v4310_v20, %v15510_v28  ;;  %v1889_v18 = vrot.slane %v1873_v61, %v15510_v28 }
  0xcc   :  { %v4339_v19 = vcombine.low %v4317_v12, %v4324_v15  ;;  %v1903_v22 = vrot.slane %v1881_v32, %v15510_v28  ;;  %v4356_v23 = vcombine.low %v1865_v24, %v1848_v25  ;;  %v4357_v26 = vcombine.low %v1862_v16, %v1864_v17  ;;  %v65_v12 = vld [vmem:[%s20079_s0 + $0x138] sm:$0x7f] }
  0xcd   :  { %v4306_v39 = vcombine.low %v4298_v3, %v4305_v36  ;;  %v4340_v40 = vcombine.low %v4331_v21, %v4338_v29  ;;  %v1866_v41 = vcombine.high %v16122_v37, %v16122_v37  ;;  %v1914_v42 = vcombine.high %v63_v31, %v63_v31 }
  0xce   :  { %v4347_v47 = vrot.slane %v4339_v19, %v15510_v28  ;;  %v4358_v49 = vcombine.low %v1889_v18, %v1903_v22  ;;  %v14440_v48 = vcombine.high %v1889_v18, %v1903_v22  ;;  %v4366_v50 = vrot.slane %v4356_v23, %v15510_v28  ;;  %v66_v23 = vld [vmem:[%s20079_s0 + $0x140] sm:$0x7f] }
  0xcf   :  { %14947 = vmatmul.mubr.msk.f32.gmra.mrb[58].mxu0 %vm5238_vm4, %v4306_v39  ;;  %v4354_v51 = vrot.slane %v4340_v40, %v15510_v28  ;;  %v4373_v33 = vrot.slane %v4357_v26, %v15510_v28  ;;  %v1880_v44 = vrot.slane %v1866_v41, %v15510_v28  ;;  %v1921_v37 = vrot.slane %v63_v31, %v15510_v28 }
  0xd0   :  { %14949 = vmatprep.mubr.msk.f32.mxu0 %vm15403_vm1, %v20086_v7  ;;  %v4380_v52 = vrot.slane %v4358_v49, %v15510_v28  ;;  %v4387_v53 = vrot.slane %v14440_v48, %v15510_v28  ;;  %v1928_v54 = vrot.slane %v1914_v42, %v15510_v28  ;;  %v1962_v55 = vcombine.high %v64_v43, %v64_v43 }
  0xd1   :  { %v4355_v56 = vcombine.low %v4347_v47, %v4354_v51  ;;  %v4388_v57 = vcombine.low %v4366_v50, %v4373_v33  ;;  %v1882_v58 = vcombine.high %v1880_v44, %v1880_v44  ;;  %v1896_v59 = vrot.slane %v1880_v44, %v15510_v28 }
  0xd2   :  { %v4389_v60 = vcombine.low %v4380_v52, %v4387_v53  ;;  %v1929_v45 = vcombine.high %v1921_v37, %v1921_v37  ;;  %v1937_v61 = vrot.slane %v1921_v37, %v15510_v28  ;;  %v1944_v62 = vrot.slane %v1928_v54, %v15510_v28 }
  0xd3   :  { %14950 = vmatmul.mubr.msk.f32.gmra.mrb[60].mxu0 %vm5238_vm4, %v4355_v56  ;;  %v4396_v27 = vrot.slane %v4388_v57, %v15510_v28  ;;  %v1910_v35 = vrot.slane %v1882_v58, %v15510_v28  ;;  %v1912_v63 = vcombine.high %v1896_v59, %v1896_v59  ;;  %v1930_v34 = vcombine.high %v1928_v54, %v1928_v54 }
  0xd4   :  { %14952 = vmatprep.mubr.msk.f32.mxu0 %vm15403_vm1, %v20086_v7  ;;  %v4403_v38 = vrot.slane %v4389_v60, %v15510_v28  ;;  %v1951_v1 = vrot.slane %v1929_v45, %v15510_v28  ;;  %v1959_v2 = vcombine.high %v1937_v61, %v1937_v61  ;;  %v1960_v3 = vcombine.high %v1944_v62, %v1944_v62  ;;  %v67_v45 = vld [vmem:[%s20079_s0 + $0x148] sm:$0x7f] }
  0xd5   :  { %v4405_v4 = vcombine.low %v1896_v59, %v1910_v35  ;;  %v4406_v5 = vcombine.low %v1912_v63, %v1937_v61  ;;  %v1958_v6 = vrot.slane %v1930_v34, %v15510_v28  ;;  %v1969_v46 = vrot.slane %v64_v43, %v15510_v28 }
  0xd6   :  { %v4404_v8 = vcombine.low %v4396_v27, %v4403_v38  ;;  %v1961_v9 = vcombine.high %v1951_v1, %v1951_v1  ;;  %v4407_v10 = vcombine.low %v1951_v1, %v1959_v2  ;;  %v1976_v11 = vrot.slane %v1962_v55, %v15510_v28 }
  0xd7   :  { %v4415_v13 = vrot.slane %v4405_v4, %v15510_v28  ;;  %v4422_v25 = vrot.slane %v4406_v5, %v15510_v28  ;;  %v1977_v30 = vcombine.high %v1969_v46, %v1969_v46  ;;  %v1985_v14 = vrot.slane %v1969_v46, %v15510_v28 }
  0xd8   :  { %14953 = vmatmul.mubr.msk.f32.gmra.mrb[62].mxu0 %vm5238_vm4, %v4404_v8  ;;  %v4408_v20 = vcombine.low %v1961_v9, %v1944_v62  ;;  %v4429_v24 = vrot.slane %v4407_v10, %v15510_v28  ;;  %v1978_v15 = vcombine.high %v1976_v11, %v1976_v11  ;;  %v1992_v16 = vrot.slane %v1976_v11, %v15510_v28 }
  0xd9   :  { %14955 = vmatprep.mubr.msk.f32.mxu0 %vm15403_vm1, %v20086_v7  ;;  %v4437_v17 = vcombine.low %v4415_v13, %v4422_v25  ;;  %v1999_v32 = vrot.slane %v1977_v30, %v15510_v28  ;;  %v4454_v36 = vcombine.low %v1958_v6, %v1960_v3  ;;  %v2010_v21 = vcombine.high %v65_v12, %v65_v12 }
  0xda   :  { %v4436_v29 = vrot.slane %v4408_v20, %v15510_v28  ;;  %v2006_v18 = vrot.slane %v1978_v15, %v15510_v28  ;;  %v2008_v19 = vcombine.high %v1992_v16, %v1992_v16  ;;  %v2017_v22 = vrot.slane %v65_v12, %v15510_v28 }
  0xdb   :  { %v4445_v26 = vrot.slane %v4437_v17, %v15510_v28  ;;  %v4455_v31 = vcombine.low %v1985_v14, %v1999_v32  ;;  %v14441_v39 = vcombine.high %v1985_v14, %v1999_v32  ;;  %v4464_v40 = vrot.slane %v4454_v36, %v15510_v28 }
  0xdc   :  { %v4438_v41 = vcombine.low %v4429_v24, %v4436_v29  ;;  %v4457_v42 = vcombine.low %v1992_v16, %v2006_v18  ;;  %v2024_v43 = vrot.slane %v2010_v21, %v15510_v28  ;;  %v2025_v47 = vcombine.high %v2017_v22, %v2017_v22 }
  0xdd   :  { %v4471_v49 = vrot.slane %v4455_v31, %v15510_v28  ;;  %v4478_v48 = vrot.slane %v14441_v39, %v15510_v28  ;;  %v2033_v50 = vrot.slane %v2017_v22, %v15510_v28  ;;  %v2058_v51 = vcombine.high %v66_v23, %v66_v23  ;;  %v68_v22 = vld [vmem:[%s20079_s0 + $0x150] sm:$0x7f] }
  0xde   :  { %v4452_v33 = vrot.slane %v4438_v41, %v15510_v28  ;;  %v4485_v44 = vrot.slane %v4457_v42, %v15510_v28  ;;  %v2026_v37 = vcombine.high %v2024_v43, %v2024_v43  ;;  %v2040_v52 = vrot.slane %v2024_v43, %v15510_v28  ;;  %v69_v42 = vld [vmem:[%s20079_s0 + $0x158] sm:$0x7f] }
  0xdf   :  { %v4486_v53 = vcombine.low %v4464_v40, %v4471_v49  ;;  %v2047_v54 = vrot.slane %v2025_v47, %v15510_v28  ;;  %v2055_v55 = vcombine.high %v2033_v50, %v2033_v50  ;;  %v4503_v56 = vcombine.low %v2008_v19, %v2033_v50 }
  0xe0   :  { %v4453_v57 = vcombine.low %v4445_v26, %v4452_v33  ;;  %v4487_v58 = vcombine.low %v4478_v48, %v4485_v44  ;;  %v2054_v59 = vrot.slane %v2026_v37, %v15510_v28  ;;  %v2056_v60 = vcombine.high %v2040_v52, %v2040_v52 }
  0xe1   :  { %v4494_v61 = vrot.slane %v4486_v53, %v15510_v28  ;;  %v2057_v62 = vcombine.high %v2047_v54, %v2047_v54  ;;  %v4504_v27 = vcombine.low %v2047_v54, %v2055_v55  ;;  %v4513_v35 = vrot.slane %v4503_v56, %v15510_v28 }
  0xe2   :  { %14956 = vmatmul.mubr.msk.f32.gmra.mrb[64].mxu0 %vm5238_vm4, %v4453_v57  ;;  %v4501_v63 = vrot.slane %v4487_v58, %v15510_v28  ;;  %v4506_v34 = vcombine.low %v2054_v59, %v2056_v60  ;;  %v2065_v38 = vrot.slane %v66_v23, %v15510_v28  ;;  %v2072_v1 = vrot.slane %v2058_v51, %v15510_v28 }
  0xe3   :  { %14958 = vmatprep.mubr.msk.f32.mxu0 %vm15403_vm1, %v20086_v7  ;;  %v4505_v2 = vcombine.low %v2057_v62, %v2040_v52  ;;  %v4520_v3 = vrot.slane %v4504_v27, %v15510_v28  ;;  %v2113_v4 = vrot.slane %v67_v45, %v15510_v28  ;;  %v2106_v5 = vcombine.high %v67_v45, %v67_v45 }
  0xe4   :  { %v4502_v6 = vcombine.low %v4494_v61, %v4501_v63  ;;  %v4534_v46 = vrot.slane %v4506_v34, %v15510_v28  ;;  %v2073_v8 = vcombine.high %v2065_v38, %v2065_v38  ;;  %v2074_v9 = vcombine.high %v2072_v1, %v2072_v1 }
  0xe5   :  { %v4527_v10 = vrot.slane %v4505_v2, %v15510_v28  ;;  %v4535_v11 = vcombine.low %v4513_v35, %v4520_v3  ;;  %v2081_v12 = vrot.slane %v2065_v38, %v15510_v28  ;;  %v2088_v13 = vrot.slane %v2072_v1, %v15510_v28 }
  0xe6   :  { %14959 = vmatmul.mubr.msk.f32.gmra.mrb[66].mxu0 %vm5238_vm4, %v4502_v6  ;;  %v2095_v25 = vrot.slane %v2073_v8, %v15510_v28  ;;  %v2102_v30 = vrot.slane %v2074_v9, %v15510_v28  ;;  %v2129_v14 = vrot.slane %v2113_v4, %v15510_v28  ;;  %v2120_v20 = vrot.slane %v2106_v5, %v15510_v28 }
  0xe7   :  { %14961 = vmatprep.mubr.msk.f32.mxu0 %vm15403_vm1, %v20086_v7  ;;  %v4536_v24 = vcombine.low %v4527_v10, %v4534_v46  ;;  %v4543_v15 = vrot.slane %v4535_v11, %v15510_v28  ;;  %v2104_v16 = vcombine.high %v2088_v13, %v2088_v13  ;;  %v2121_v17 = vcombine.high %v2113_v4, %v2113_v4 }
  0xe8   :  { %v4552_v32 = vcombine.low %v2081_v12, %v2095_v25  ;;  %v14442_v36 = vcombine.high %v2081_v12, %v2095_v25  ;;  %v4554_v21 = vcombine.low %v2088_v13, %v2102_v30  ;;  %v2122_v29 = vcombine.high %v2120_v20, %v2120_v20  ;;  %v70_v25 = vld [vmem:[%s20079_s0 + $0x160] sm:$0x7f] }
  0xe9   :  { %v4550_v18 = vrot.slane %v4536_v24, %v15510_v28  ;;  %v4555_v19 = vcombine.low %v2104_v16, %v2129_v14  ;;  %v2136_v23 = vrot.slane %v2120_v20, %v15510_v28  ;;  %v2143_v26 = vrot.slane %v2121_v17, %v15510_v28 }
  0xea   :  { %v4562_v31 = vrot.slane %v4552_v32, %v15510_v28  ;;  %v4569_v39 = vrot.slane %v14442_v36, %v15510_v28  ;;  %v4576_v40 = vrot.slane %v4554_v21, %v15510_v28  ;;  %v2150_v41 = vrot.slane %v2122_v29, %v15510_v28 }
  0xeb   :  { %v4551_v43 = vcombine.low %v4543_v15, %v4550_v18  ;;  %v4583_v47 = vrot.slane %v4555_v19, %v15510_v28  ;;  %v2151_v49 = vcombine.high %v2129_v14, %v2129_v14  ;;  %v2152_v48 = vcombine.high %v2136_v23, %v2136_v23  ;;  %v16255_v50 = vpop.f32.mrb[0].mxu0 }
  0xec   :  { %v4584_v51 = vcombine.low %v4562_v31, %v4569_v39  ;;  %v2153_v33 = vcombine.high %v2143_v26, %v2143_v26  ;;  %v2161_v44 = vrot.slane %v68_v22, %v15510_v28  ;;  %v2154_v37 = vcombine.high %v68_v22, %v68_v22  ;;  %v14861_v52 = vpop.f32.mrb[1].mxu0 }
  0xed   :  { %14962 = vmatmul.mubr.msk.f32.gmra.mrb[68].mxu0 %vm5238_vm4, %v4551_v43  ;;  %v4585_v53 = vcombine.low %v4576_v40, %v4583_v47  ;;  %v4601_v54 = vcombine.low %v2143_v26, %v2151_v49  ;;  %v4603_v55 = vcombine.low %v2150_v41, %v2152_v48  ;;  %v2209_v56 = vrot.slane %v69_v42, %v15510_v28 }
  0xee   :  { %14964 = vmatprep.mubr.msk.f32.mxu0 %vm15403_vm1, %v20086_v7  ;;  %v4592_v57 = vrot.slane %v4584_v51, %v15510_v28  ;;  %v2169_v58 = vcombine.high %v2161_v44, %v2161_v44  ;;  %v2177_v59 = vrot.slane %v2161_v44, %v15510_v28  ;;  %v4602_v60 = vcombine.low %v2153_v33, %v2136_v23  ;;  %v71_v33 = vld [vmem:[%s20079_s0 + $0x168] sm:$0x7f] }
  0xef   :  { %v4599_v45 = vrot.slane %v4585_v53, %v15510_v28  ;;  %v4611_v61 = vrot.slane %v4601_v54, %v15510_v28  ;;  %v4625_v62 = vrot.slane %v4603_v55, %v15510_v28  ;;  %v2168_v27 = vrot.slane %v2154_v37, %v15510_v28  ;;  %v16268_v35 = vpop.f32.mrb[2].mxu0 }
  0xf0   :  { %v2191_v63 = vrot.slane %v2169_v58, %v15510_v28  ;;  %v4618_v34 = vrot.slane %v4602_v60, %v15510_v28  ;;  %v2217_v38 = vcombine.high %v2209_v56, %v2209_v56  ;;  %v2225_v1 = vrot.slane %v2209_v56, %v15510_v28  ;;  %v14864_v2 = vpop.f32.mrb[3].mxu0 }
  0xf1   :  { %v4600_v3 = vcombine.low %v4592_v57, %v4599_v45  ;;  %v2170_v4 = vcombine.high %v2168_v27, %v2168_v27  ;;  %v2184_v5 = vrot.slane %v2168_v27, %v15510_v28  ;;  %v2202_v6 = vcombine.high %v69_v42, %v69_v42 }
  0xf2   :  { %v4604_v46 = vcombine.low %v2177_v59, %v2191_v63  ;;  %v4633_v8 = vcombine.low %v4611_v61, %v4618_v34  ;;  %v2239_v9 = vrot.slane %v2217_v38, %v15510_v28  ;;  %v2247_v10 = vcombine.high %v2225_v1, %v2225_v1  ;;  %v72_v38 = vld [vmem:[%s20079_s0 + $0x170] sm:$0x7f] }
  0xf3   :  { %14965 = vmatmul.mubr.msk.f32.gmra.mrb[70].mxu0 %vm5238_vm4, %v4600_v3  ;;  %v2198_v11 = vrot.slane %v2170_v4, %v15510_v28  ;;  %v2200_v12 = vcombine.high %v2184_v5, %v2184_v5  ;;  %v14443_v13 = vcombine.high %v2177_v59, %v2191_v63  ;;  %v2216_v30 = vrot.slane %v2202_v6, %v15510_v28 }
  0xf4   :  { %14967 = vmatprep.mubr.msk.f32.mxu0 %vm15403_vm1, %v20086_v7  ;;  %v4632_v14 = vrot.slane %v4604_v46, %v15510_v28  ;;  %v4641_v20 = vrot.slane %v4633_v8, %v15510_v28  ;;  %v4653_v24 = vcombine.low %v2239_v9, %v2247_v10  ;;  %v2249_v15 = vcombine.high %v2239_v9, %v2239_v9 }
  0xf5   :  { %v4651_v16 = vcombine.low %v2184_v5, %v2198_v11  ;;  %v4652_v17 = vcombine.low %v2200_v12, %v2225_v1  ;;  %v4660_v32 = vrot.slane %v14443_v13, %v15510_v28  ;;  %v2218_v36 = vcombine.high %v2216_v30, %v2216_v30 }
  0xf6   :  { %v4634_v21 = vcombine.low %v4625_v62, %v4632_v14  ;;  %v4681_v29 = vrot.slane %v4653_v24, %v15510_v28  ;;  %v2232_v18 = vrot.slane %v2216_v30, %v15510_v28  ;;  %v2257_v19 = vrot.slane %v70_v25, %v15510_v28  ;;  %v16289_v22 = vpop.f32.mrb[4].mxu0 }
  0xf7   :  { %v4667_v23 = vrot.slane %v4651_v16, %v15510_v28  ;;  %v4674_v26 = vrot.slane %v4652_v17, %v15510_v28  ;;  %v2246_v31 = vrot.slane %v2218_v36, %v15510_v28  ;;  %v2250_v39 = vcombine.high %v70_v25, %v70_v25  ;;  %v14867_v40 = vpop.f32.mrb[5].mxu0 }
  0xf8   :  { %v4648_v41 = vrot.slane %v4634_v21, %v15510_v28  ;;  %v2248_v42 = vcombine.high %v2232_v18, %v2232_v18  ;;  %v2265_v43 = vcombine.high %v2257_v19, %v2257_v19  ;;  %v2273_v47 = vrot.slane %v2257_v19, %v15510_v28 }
  0xf9   :  { %v4682_v49 = vcombine.low %v4660_v32, %v4667_v23  ;;  %v4683_v48 = vcombine.low %v4674_v26, %v4681_v29  ;;  %v4699_v51 = vcombine.low %v2249_v15, %v2232_v18  ;;  %v2264_v44 = vrot.slane %v2250_v39, %v15510_v28  ;;  %v73_v26 = vld [vmem:[%s20079_s0 + $0x178] sm:$0x7f] }
  0xfa   :  { %v4649_v37 = vcombine.low %v4641_v20, %v4648_v41  ;;  %v2287_v52 = vrot.slane %v2265_v43, %v15510_v28  ;;  %v4700_v53 = vcombine.low %v2246_v31, %v2248_v42  ;;  %v2298_v54 = vcombine.high %v71_v33, %v71_v33 }
  0xfb   :  { %v4690_v55 = vrot.slane %v4682_v49, %v15510_v28  ;;  %v4697_v56 = vrot.slane %v4683_v48, %v15510_v28  ;;  %v4709_v57 = vrot.slane %v4699_v51, %v15510_v28  ;;  %v2266_v58 = vcombine.high %v2264_v44, %v2264_v44 }
  0xfc   :  { %14968 = vmatmul.mubr.msk.f32.gmra.mrb[72].mxu0 %vm5238_vm4, %v4649_v37  ;;  %v4701_v59 = vcombine.low %v2273_v47, %v2287_v52  ;;  %v14444_v60 = vcombine.high %v2273_v47, %v2287_v52  ;;  %v4716_v45 = vrot.slane %v4700_v53, %v15510_v28  ;;  %v2280_v61 = vrot.slane %v2264_v44, %v15510_v28 }
  0xfd   :  { %14970 = vmatprep.mubr.msk.f32.mxu0 %vm15403_vm1, %v20086_v7  ;;  %v4698_v62 = vcombine.low %v4690_v55, %v4697_v56  ;;  %v2294_v27 = vrot.slane %v2266_v58, %v15510_v28  ;;  %v2305_v63 = vrot.slane %v71_v33, %v15510_v28  ;;  %v2312_v34 = vrot.slane %v2298_v54, %v15510_v28  ;;  %v16315_v1 = vpop.f32.mrb[6].mxu0 }
  0xfe   :  { %v4723_v2 = vrot.slane %v4701_v59, %v15510_v28  ;;  %v4730_v3 = vrot.slane %v14444_v60, %v15510_v28  ;;  %v4731_v4 = vcombine.low %v4709_v57, %v4716_v45  ;;  %v2296_v5 = vcombine.high %v2280_v61, %v2280_v61  ;;  %v14870_v6 = vpop.f32.mrb[7].mxu0 }
  0xff   :  { %v2313_v46 = vcombine.high %v2305_v63, %v2305_v63  ;;  %v2321_v8 = vrot.slane %v2305_v63, %v15510_v28  ;;  %v2328_v9 = vrot.slane %v2312_v34, %v15510_v28  ;;  %v4748_v10 = vcombine.low %v2280_v61, %v2294_v27 }
 0x100   :  { %14971 = vmatmul.mubr.msk.f32.gmra.mrb[74].mxu0 %vm5238_vm4, %v4698_v62  ;;  %v4732_v11 = vcombine.low %v4723_v2, %v4730_v3  ;;  %v4739_v12 = vrot.slane %v4731_v4, %v15510_v28  ;;  %v2314_v13 = vcombine.high %v2312_v34, %v2312_v34  ;;  %v2346_v25 = vcombine.high %v72_v38, %v72_v38 }
 0x101   :  { %14973 = vmatprep.mubr.msk.f32.mxu0 %vm15403_vm1, %v20086_v7  ;;  %v2335_v30 = vrot.slane %v2313_v46, %v15510_v28  ;;  %v2343_v14 = vcombine.high %v2321_v8, %v2321_v8  ;;  %v4749_v20 = vcombine.low %v2296_v5, %v2321_v8  ;;  %v4758_v24 = vrot.slane %v4748_v10, %v15510_v28  ;;  %v16327_v15 = vpop.f32.mrb[8].mxu0  ;;  %v74_v46 = vld [vmem:[%s20079_s0 + $0x180] sm:$0x7f] }
 0x102   :  { %v4746_v16 = vrot.slane %v4732_v11, %v15510_v28  ;;  %v2342_v17 = vrot.slane %v2314_v13, %v15510_v28  ;;  %v2344_v32 = vcombine.high %v2328_v9, %v2328_v9  ;;  %v2353_v36 = vrot.slane %v72_v38, %v15510_v28  ;;  %v14873_v21 = vpop.f32.mrb[9].mxu0 }
 0x103   :  { %v2345_v29 = vcombine.high %v2335_v30, %v2335_v30  ;;  %v4750_v18 = vcombine.low %v2335_v30, %v2343_v14  ;;  %v4765_v19 = vrot.slane %v4749_v20, %v15510_v28  ;;  %v2360_v23 = vrot.slane %v2346_v25, %v15510_v28  ;;  %v75_v14 = vld [vmem:[%s20079_s0 + $0x188] sm:$0x7f] }
 0x104   :  { %v4747_v31 = vcombine.low %v4739_v12, %v4746_v16  ;;  %v2361_v39 = vcombine.high %v2353_v36, %v2353_v36  ;;  %v2369_v40 = vrot.slane %v2353_v36, %v15510_v28  ;;  %v4797_v41 = vcombine.low %v2342_v17, %v2344_v32 }
 0x105   :  { %v4751_v42 = vcombine.low %v2345_v29, %v2328_v9  ;;  %v4772_v43 = vrot.slane %v4750_v18, %v15510_v28  ;;  %v4780_v47 = vcombine.low %v4758_v24, %v4765_v19  ;;  %v2362_v49 = vcombine.high %v2360_v23, %v2360_v23 }
 0x106   :  { %14974 = vmatmul.mubr.msk.f32.gmra.mrb[76].mxu0 %vm5238_vm4, %v4747_v31  ;;  %v2376_v48 = vrot.slane %v2360_v23, %v15510_v28  ;;  %v2383_v51 = vrot.slane %v2361_v39, %v15510_v28  ;;  %v4807_v33 = vrot.slane %v4797_v41, %v15510_v28  ;;  %v2394_v44 = vcombine.high %v73_v26, %v73_v26 }
 0x107   :  { %14976 = vmatprep.mubr.msk.f32.mxu0 %vm15403_vm1, %v20086_v7  ;;  %v4779_v37 = vrot.slane %v4751_v42, %v15510_v28  ;;  %v4788_v52 = vrot.slane %v4780_v47, %v15510_v28  ;;  %v2390_v53 = vrot.slane %v2362_v49, %v15510_v28  ;;  %v2401_v54 = vrot.slane %v73_v26, %v15510_v28 }
 0x108   :  { %v4798_v55 = vcombine.low %v2369_v40, %v2383_v51  ;;  %v14445_v56 = vcombine.high %v2369_v40, %v2383_v51  ;;  %v2392_v57 = vcombine.high %v2376_v48, %v2376_v48  ;;  %v2408_v58 = vrot.slane %v2394_v44, %v15510_v28  ;;  %v16350_v59 = vpop.f32.mrb[10].mxu0 }
 0x109   :  { %v4781_v60 = vcombine.low %v4772_v43, %v4779_v37  ;;  %v4800_v45 = vcombine.low %v2376_v48, %v2390_v53  ;;  %v2409_v61 = vcombine.high %v2401_v54, %v2401_v54  ;;  %v2417_v62 = vrot.slane %v2401_v54, %v15510_v28  ;;  %v14876_v27 = vpop.f32.mrb[11].mxu0 }
 0x10a   :  { %v4814_v63 = vrot.slane %v4798_v55, %v15510_v28  ;;  %v4821_v34 = vrot.slane %v14445_v56, %v15510_v28  ;;  %v2410_v38 = vcombine.high %v2408_v58, %v2408_v58  ;;  %v2424_v2 = vrot.slane %v2408_v58, %v15510_v28 }
 0x10b   :  { %v4795_v3 = vrot.slane %v4781_v60, %v15510_v28  ;;  %v4828_v4 = vrot.slane %v4800_v45, %v15510_v28  ;;  %v2431_v5 = vrot.slane %v2409_v61, %v15510_v28  ;;  %v2439_v6 = vcombine.high %v2417_v62, %v2417_v62 }
 0x10c   :  { %v4829_v8 = vcombine.low %v4807_v33, %v4814_v63  ;;  %v2438_v9 = vrot.slane %v2410_v38, %v15510_v28  ;;  %v2440_v10 = vcombine.high %v2424_v2, %v2424_v2  ;;  %v4846_v11 = vcombine.low %v2392_v57, %v2417_v62 }
 0x10d   :  { %v4796_v12 = vcombine.low %v4788_v52, %v4795_v3  ;;  %v4830_v13 = vcombine.low %v4821_v34, %v4828_v4  ;;  %v2441_v25 = vcombine.high %v2431_v5, %v2431_v5  ;;  %v4847_v30 = vcombine.low %v2431_v5, %v2439_v6  ;;  %v16366_v20 = vpop.f32.mrb[12].mxu0  ;;  %v76_v34 = vld [vmem:[%s20079_s0 + $0x190] sm:$0x7f] }
 0x10e   :  { %v4837_v24 = vrot.slane %v4829_v8, %v15510_v28  ;;  %v4849_v16 = vcombine.low %v2438_v9, %v2440_v10  ;;  %v4856_v17 = vrot.slane %v4846_v11, %v15510_v28  ;;  %v2442_v32 = vcombine.high %v74_v46, %v74_v46  ;;  %v14879_v36 = vpop.f32.mrb[13].mxu0 }
 0x10f   :  { %14977 = vmatmul.mubr.msk.f32.gmra.mrb[78].mxu0 %vm5238_vm4, %v4796_v12  ;;  %v4844_v21 = vrot.slane %v4830_v13, %v15510_v28  ;;  %v4848_v29 = vcombine.low %v2441_v25, %v2424_v2  ;;  %v4863_v18 = vrot.slane %v4847_v30, %v15510_v28  ;;  %v2449_v19 = vrot.slane %v74_v46, %v15510_v28  ;;  %v77_v46 = vld [vmem:[%s20079_s0 + $0x198] sm:$0x7f] }
 0x110   :  { %14979 = vmatprep.mubr.msk.f32.mxu0 %vm15403_vm1, %v20086_v7  ;;  %v4877_v23 = vrot.slane %v4849_v16, %v15510_v28  ;;  %v2456_v26 = vrot.slane %v2442_v32, %v15510_v28  ;;  %v2497_v31 = vrot.slane %v75_v14, %v15510_v28  ;;  %v2490_v39 = vcombine.high %v75_v14, %v75_v14 }
 0x111   :  { %v4845_v40 = vcombine.low %v4837_v24, %v4844_v21  ;;  %v4870_v41 = vrot.slane %v4848_v29, %v15510_v28  ;;  %v4878_v42 = vcombine.low %v4856_v17, %v4863_v18  ;;  %v2457_v43 = vcombine.high %v2449_v19, %v2449_v19 }
 0x112   :  { %v2458_v47 = vcombine.high %v2456_v26, %v2456_v26  ;;  %v2465_v49 = vrot.slane %v2449_v19, %v15510_v28  ;;  %v2472_v48 = vrot.slane %v2456_v26, %v15510_v28  ;;  %v2513_v51 = vrot.slane %v2497_v31, %v15510_v28 }
 0x113   :  { %14980 = vmatmul.mubr.msk.f32.gmra.mrb[80].mxu0 %vm5238_vm4, %v4845_v40  ;;  %v4879_v33 = vcombine.low %v4870_v41, %v4877_v23  ;;  %v4886_v44 = vrot.slane %v4878_v42, %v15510_v28  ;;  %v2479_v37 = vrot.slane %v2457_v43, %v15510_v28  ;;  %v2504_v52 = vrot.slane %v2490_v39, %v15510_v28 }
 0x114   :  { %14982 = vmatprep.mubr.msk.f32.mxu0 %vm15403_vm1, %v20086_v7  ;;  %v2486_v53 = vrot.slane %v2458_v47, %v15510_v28  ;;  %v2488_v54 = vcombine.high %v2472_v48, %v2472_v48  ;;  %v2505_v55 = vcombine.high %v2497_v31, %v2497_v31  ;;  %v2535_v56 = vcombine.high %v2513_v51, %v2513_v51  ;;  %v16390_v57 = vpop.f32.mrb[14].mxu0 }
 0x115   :  { %v4893_v58 = vrot.slane %v4879_v33, %v15510_v28  ;;  %v4895_v60 = vcombine.low %v2465_v49, %v2479_v37  ;;  %v14446_v45 = vcombine.high %v2465_v49, %v2479_v37  ;;  %v2506_v61 = vcombine.high %v2504_v52, %v2504_v52  ;;  %v14882_v62 = vpop.f32.mrb[15].mxu0 }
 0x116   :  { %v4897_v27 = vcombine.low %v2472_v48, %v2486_v53  ;;  %v4898_v63 = vcombine.low %v2488_v54, %v2513_v51  ;;  %v2520_v38 = vrot.slane %v2504_v52, %v15510_v28  ;;  %v2527_v2 = vrot.slane %v2505_v55, %v15510_v28 }
 0x117   :  { %v4894_v3 = vcombine.low %v4886_v44, %v4893_v58  ;;  %v4905_v4 = vrot.slane %v4895_v60, %v15510_v28  ;;  %v4912_v5 = vrot.slane %v14446_v45, %v15510_v28  ;;  %v2534_v6 = vrot.slane %v2506_v61, %v15510_v28 }
 0x118   :  { %v4919_v8 = vrot.slane %v4897_v27, %v15510_v28  ;;  %v4926_v9 = vrot.slane %v4898_v63, %v15510_v28  ;;  %v2536_v10 = vcombine.high %v2520_v38, %v2520_v38  ;;  %v2537_v11 = vcombine.high %v2527_v2, %v2527_v2 }
 0x119   :  { %14983 = vmatmul.mubr.msk.f32.gmra.mrb[82].mxu0 %vm5238_vm4, %v4894_v3  ;;  %v4927_v12 = vcombine.low %v4905_v4, %v4912_v5  ;;  %v2545_v13 = vrot.slane %v76_v34, %v15510_v28  ;;  %v4944_v25 = vcombine.low %v2527_v2, %v2535_v56  ;;  %v2538_v30 = vcombine.high %v76_v34, %v76_v34  ;;  %v78_v56 = vld [vmem:[%s20079_s0 + $0x1a0] sm:$0x7f] }
 0x11a   :  { %14985 = vmatprep.mubr.msk.f32.mxu0 %vm15403_vm1, %v20086_v7  ;;  %v4928_v14 = vcombine.low %v4919_v8, %v4926_v9  ;;  %v4945_v24 = vcombine.low %v2537_v11, %v2520_v38  ;;  %v4946_v16 = vcombine.low %v2534_v6, %v2536_v10  ;;  %v2593_v17 = vrot.slane %v77_v46, %v15510_v28 }
 0x11b   :  { %v4935_v32 = vrot.slane %v4927_v12, %v15510_v28  ;;  %v2553_v36 = vcombine.high %v2545_v13, %v2545_v13  ;;  %v2561_v21 = vrot.slane %v2545_v13, %v15510_v28  ;;  %v4954_v29 = vrot.slane %v4944_v25, %v15510_v28 }
 0x11c   :  { %v4942_v18 = vrot.slane %v4928_v14, %v15510_v28  ;;  %v4961_v19 = vrot.slane %v4945_v24, %v15510_v28  ;;  %v4968_v23 = vrot.slane %v4946_v16, %v15510_v28  ;;  %v2552_v26 = vrot.slane %v2538_v30, %v15510_v28  ;;  %v16418_v31 = vpop.f32.mrb[16].mxu0 }
 0x11d   :  { %v2575_v39 = vrot.slane %v2553_v36, %v15510_v28  ;;  %v2601_v40 = vcombine.high %v2593_v17, %v2593_v17  ;;  %v2609_v41 = vrot.slane %v2593_v17, %v15510_v28  ;;  %v2586_v42 = vcombine.high %v77_v46, %v77_v46  ;;  %v14885_v43 = vpop.f32.mrb[17].mxu0  ;;  %v79_v17 = vld [vmem:[%s20079_s0 + $0x1a8] sm:$0x7f] }
 0x11e   :  { %v4943_v47 = vcombine.low %v4935_v32, %v4942_v18  ;;  %v4976_v49 = vcombine.low %v4954_v29, %v4961_v19  ;;  %v2554_v48 = vcombine.high %v2552_v26, %v2552_v26  ;;  %v2568_v51 = vrot.slane %v2552_v26, %v15510_v28 }
 0x11f   :  { %v4947_v33 = vcombine.low %v2561_v21, %v2575_v39  ;;  %v2623_v44 = vrot.slane %v2601_v40, %v15510_v28  ;;  %v2631_v37 = vcombine.high %v2609_v41, %v2609_v41  ;;  %v14447_v52 = vcombine.high %v2561_v21, %v2575_v39 }
 0x120   :  { %14986 = vmatmul.mubr.msk.f32.gmra.mrb[84].mxu0 %vm5238_vm4, %v4943_v47  ;;  %v4984_v53 = vrot.slane %v4976_v49, %v15510_v28  ;;  %v2582_v54 = vrot.slane %v2554_v48, %v15510_v28  ;;  %v2584_v55 = vcombine.high %v2568_v51, %v2568_v51  ;;  %v2600_v58 = vrot.slane %v2586_v42, %v15510_v28  ;;  %v16431_v60 = vpop.f32.mrb[18].mxu0 }
 0x121   :  { %14988 = vmatprep.mubr.msk.f32.mxu0 %vm15403_vm1, %v20086_v7  ;;  %v4975_v45 = vrot.slane %v4947_v33, %v15510_v28  ;;  %v4996_v61 = vcombine.low %v2623_v44, %v2631_v37  ;;  %v5003_v62 = vrot.slane %v14447_v52, %v15510_v28  ;;  %v2633_v27 = vcombine.high %v2623_v44, %v2623_v44  ;;  %v14888_v63 = vpop.f32.mrb[19].mxu0  ;;  %v16468_v37 = vld [vmem:[%s20080_s2] ss:$0 sm:$0xff] }
 0x122   :  { %v4994_v34 = vcombine.low %v2568_v51, %v2582_v54  ;;  %v4995_v38 = vcombine.low %v2584_v55, %v2609_v41  ;;  %v2602_v2 = vcombine.high %v2600_v58, %v2600_v58  ;;  %v2616_v3 = vrot.slane %v2600_v58, %v15510_v28 }
 0x123   :  { %v4977_v4 = vcombine.low %v4968_v23, %v4975_v45  ;;  %v5024_v5 = vrot.slane %v4996_v61, %v15510_v28  ;;  %v2641_v6 = vrot.slane %v78_v56, %v15510_v28  ;;  %v2634_v46 = vcombine.high %v78_v56, %v78_v56 }
 0x124   :  { %v5010_v8 = vrot.slane %v4994_v34, %v15510_v28  ;;  %v5017_v9 = vrot.slane %v4995_v38, %v15510_v28  ;;  %v2630_v10 = vrot.slane %v2602_v2, %v15510_v28  ;;  %v2632_v11 = vcombine.high %v2616_v3, %v2616_v3 }
 0x125   :  { %v4991_v12 = vrot.slane %v4977_v4, %v15510_v28  ;;  %v2649_v13 = vcombine.high %v2641_v6, %v2641_v6  ;;  %v2657_v25 = vrot.slane %v2641_v6, %v15510_v28  ;;  %v5042_v30 = vcombine.low %v2633_v27, %v2616_v3 }
 0x126   :  { %v5025_v14 = vcombine.low %v5003_v62, %v5010_v8  ;;  %v5026_v24 = vcombine.low %v5017_v9, %v5024_v5  ;;  %v5043_v16 = vcombine.low %v2630_v10, %v2632_v11  ;;  %v2648_v32 = vrot.slane %v2634_v46, %v15510_v28 }
 0x127   :  { %v4992_v36 = vcombine.low %v4984_v53, %v4991_v12  ;;  %v2671_v21 = vrot.slane %v2649_v13, %v15510_v28  ;;  %v5052_v29 = vrot.slane %v5042_v30, %v15510_v28  ;;  %v2682_v18 = vcombine.high %v79_v17, %v79_v17  ;;  %v16451_v19 = vpop.f32.mrb[20].mxu0 }
 0x128   :  { %v5033_v23 = vrot.slane %v5025_v14, %v15510_v28  ;;  %v5040_v26 = vrot.slane %v5026_v24, %v15510_v28  ;;  %v5059_v39 = vrot.slane %v5043_v16, %v15510_v28  ;;  %v2650_v40 = vcombine.high %v2648_v32, %v2648_v32  ;;  %v14891_v41 = vpop.f32.mrb[21].mxu0 }
 0x129   :  { %14989 = vmatmul.mubr.msk.f32.gmra.mrb[86].mxu0 %vm5238_vm4, %v4992_v36  ;;  %v5044_v42 = vcombine.low %v2657_v25, %v2671_v21  ;;  %v14448_v43 = vcombine.high %v2657_v25, %v2671_v21  ;;  %v2664_v47 = vrot.slane %v2648_v32, %v15510_v28  ;;  %v2689_v49 = vrot.slane %v79_v17, %v15510_v28 }
 0x12a   :  { %14991 = vmatprep.mubr.msk.f32.mxu0 %vm15403_vm1, %v20086_v7  ;;  %v5041_v48 = vcombine.low %v5033_v23, %v5040_v26  ;;  %v5074_v51 = vcombine.low %v5052_v29, %v5059_v39  ;;  %v2678_v33 = vrot.slane %v2650_v40, %v15510_v28  ;;  %v16463_v44 = vrot.slane %v2682_v18, %v15510_v28 }
 0x12b   :  { %v5066_v52 = vrot.slane %v5044_v42, %v15510_v28  ;;  %v5073_v53 = vrot.slane %v14448_v43, %v15510_v28  ;;  %v2680_v54 = vcombine.high %v2664_v47, %v2664_v47  ;;  %v2697_v55 = vcombine.high %v2689_v49, %v2689_v49 }
 0x12c   :  { %v5082_v56 = vrot.slane %v5074_v51, %v15510_v28  ;;  %v2705_v58 = vrot.slane %v2689_v49, %v15510_v28  ;;  %v16476_v45 = vrot.slane %v16463_v44, %v15510_v28  ;;  %v5091_v61 = vcombine.low %v2664_v47, %v2678_v33 }
 0x12d   :  { %14992 = vmatmul.mubr.msk.f32.gmra.mrb[88].mxu0 %vm5238_vm4, %v5041_v48  ;;  %v5075_v62 = vcombine.low %v5066_v52, %v5073_v53  ;;  %v2719_v27 = vrot.slane %v2697_v55, %v15510_v28  ;;  %v5408_v63 = vadd.f32 %v16468_v37, %v16255_v50  ;;  %v5413_v34 = vadd.f32 %v16468_v37, %v16268_v35  ;;  %v16484_v38 = vpop.f32.mrb[22].mxu0 }
 0x12e   :  { %14994 = vmatprep.mubr.msk.f32.mxu0 %vm15403_vm1, %v20086_v7  ;;  %v2727_v2 = vcombine.high %v2705_v58, %v2705_v58  ;;  %v5092_v3 = vcombine.low %v2680_v54, %v2705_v58  ;;  %v5101_v4 = vrot.slane %v5091_v61, %v15510_v28  ;;  %v14894_v5 = vpop.f32.mrb[23].mxu0  ;;  %v5418_v35 = vadd.f32 %v16468_v37, %v16289_v22 }
 0x12f   :  { %v5089_v6 = vrot.slane %v5075_v62, %v15510_v28  ;;  %v2729_v46 = vcombine.high %v2719_v27, %v2719_v27  ;;  %v5651_v8 = vmax.f32 %v5408_v63, 0.0  ;;  %v5652_v9 = vmax.f32 %v5413_v34, 0.0 }
 0x130   :  { %v5093_v10 = vcombine.low %v2719_v27, %v2727_v2  ;;  %v5108_v50 = vrot.slane %v5092_v3, %v15510_v28  ;;  %v5653_v34 = vmax.f32 %v5418_v35, 0.0  ;;  %vm14228_vm7 = vcmask 261120  }
 0x131   :  { %v5090_v11 = vcombine.low %v5082_v56, %v5089_v6  ;;  %v5094_v12 = vcombine.low %v2729_v46, %v16476_v45  ;;  %v5749_v13 = vcombine.high %v5651_v8, %v5651_v8  ;;  %v5756_v25 = vrot.slane %v5651_v8, %v15510_v28 }
 0x132   :  { %v5115_v30 = vrot.slane %v5093_v10, %v15510_v28  ;;  %v5123_v14 = vcombine.low %v5101_v4, %v5108_v50  ;;  %v5798_v24 = vcombine.high %v5652_v9, %v5652_v9  ;;  %v5805_v16 = vrot.slane %v5652_v9, %v15510_v28 }
 0x133   :  { %14995 = vmatmul.mubr.msk.f32.gmra.mrb[90].mxu0 %vm5238_vm4, %v5090_v11  ;;  %v5122_v17 = vrot.slane %v5094_v12, %v15510_v28  ;;  %v5763_v32 = vrot.slane %v5749_v13, %v15510_v28  ;;  %v5764_v36 = vcombine.high %v5756_v25, %v5756_v25  ;;  %v5772_v22 = vrot.slane %v5756_v25, %v15510_v28 }
 0x134   :  { %14997 = vmatprep.mubr.msk.f32.mxu0 %vm15403_vm1, %v20086_v7  ;;  %v5131_v21 = vrot.slane %v5123_v14, %v15510_v28  ;;  %v5812_v29 = vrot.slane %v5798_v24, %v15510_v28  ;;  %v5813_v18 = vcombine.high %v5805_v16, %v5805_v16  ;;  %v5821_v23 = vrot.slane %v5805_v16, %v15510_v28  ;;  %v16506_v26 = vpop.f32.mrb[24].mxu0 }
 0x135   :  { %v5124_v39 = vcombine.low %v5115_v30, %v5122_v17  ;;  %v5765_v40 = vcombine.high %v5763_v32, %v5763_v32  ;;  %v16509_v41 = vrot.slane %v5763_v32, %v15510_v28  ;;  %v5786_v42 = vrot.slane %v5764_v36, %v15510_v28  ;;  %v14897_v43 = vpop.f32.mrb[25].mxu0 }
 0x136   :  { %v5794_v47 = vcombine.high %v5772_v22, %v5772_v22  ;;  %v5814_v49 = vcombine.high %v5812_v29, %v5812_v29  ;;  %v16513_v48 = vrot.slane %v5812_v29, %v15510_v28  ;;  %v16516_v51 = vrot.slane %v5813_v18, %v15510_v28 }
 0x137   :  { %v5138_v33 = vrot.slane %v5124_v39, %v15510_v28  ;;  %v5793_v52 = vrot.slane %v5765_v40, %v15510_v28  ;;  %v5796_v53 = vcombine.high %v5786_v42, %v5786_v42  ;;  %v8725_v54 = vcombine.low %v5772_v22, %v5786_v42 }
 0x138   :  { %v16520_v55 = vcombine.low %v5786_v42, %v5794_v47  ;;  %v16523_v56 = vrot.slane %v5814_v49, %v15510_v28  ;;  %v5843_v58 = vcombine.high %v5821_v23, %v5821_v23  ;;  %v5844_v61 = vcombine.high %v16513_v48, %v16513_v48 }
 0x139   :  { %v5139_v62 = vcombine.low %v5131_v21, %v5138_v33  ;;  %v5797_v27 = vcombine.high %v5793_v52, %v5793_v52  ;;  %v14529_v63 = vcombine.high %v5772_v22, %v5793_v52  ;;  %v16527_v2 = vpop.f32.mrb[26].mxu0  ;;  %v8155_v3 = vcombine.low %v16509_v41, %v5793_v52 }
 0x13a   :  { %20249 = vst [vmem:[#allocation2_spill] sm:$0xff] %v16520_v55  ;;  %v8735_v4 = vrot.slane %v8725_v54, %v15510_v28  ;;  %v5845_v5 = vcombine.high %v16516_v51, %v16516_v51  ;;  %v5423_v6 = vadd.f32 %v16468_v37, %v16315_v1  ;;  %v14900_v46 = vpop.f32.mrb[27].mxu0  ;;  %v8727_v10 = vcombine.low %v5821_v23, %v16516_v51 }
 0x13b   :  { %14998 = vmatmul.mubr.msk.f32.gmra.mrb[92].mxu0 %vm5238_vm4, %v5139_v62  ;;  %v8742_v8 = vrot.slane %v14529_v63, %v15510_v28  ;;  %v14530_v50 = vcombine.high %v16513_v48, %v16523_v56  ;;  %v16542_v35 = vcombine.low %v5796_v53, %v5821_v23  ;;  %v16545_v11 = vcombine.low %v16516_v51, %v5843_v58 }
 0x13c   :  { %v11621_v12 = vcombine.low %v5797_v27, %v5821_v23  ;;  %v11622_v1 = vcombine.low %v16516_v51, %v5844_v61  ;;  %15000 = vmatprep.mubr.msk.f32.mxu0 %vm15403_vm1, %v20086_v7  ;;  %v16551_v25 = vrot.slane %v8727_v10, %v15510_v28  ;;  %v12138_v14 = vcombine.low %v5845_v5, %v16513_v48 }
 0x13d   :  { %20250 = vst [vmem:[#allocation3_spill] sm:$0xff] %v16542_v35  ;;  %20251 = vst [vmem:[#allocation4_spill] sm:$0xff] %v16545_v11  ;;  %v8757_v13 = vcombine.low %v8735_v4, %v8742_v8  ;;  %v16554_v30 = vrot.slane %v14530_v50, %v15510_v28  ;;  %v16558_v24 = vrot.slane %v8155_v3, %v15510_v28  ;;  %v5654_v33 = vmax.f32 %v5423_v6, 0.0 }
 0x13e   :  { %v11630_v17 = vrot.slane %v11621_v12, %v15510_v28  ;;  %v11637_v32 = vrot.slane %v11622_v1, %v15510_v28  ;;  %v14660_v29 = vcombine.high %v5821_v23, %v16523_v56  ;;  %v5847_v40 = vcombine.high %v5653_v34, %v5653_v34 }
 0x13f   :  { %20252 = vst [vmem:[#allocation5_spill] sm:$0xff] %v16554_v30  ;;  %v16572_v18 = vrot.slane %v8757_v13, %v15510_v28  ;;  %v5854_v42 = vrot.slane %v5653_v34, %v15510_v28  ;;  %v12148_v47 = vrot.slane %v12138_v14, %v15510_v28  ;;  %v5846_v49 = vcombine.high %v16523_v56, %v16523_v56 }
 0x140   :  { %v16574_v39 = vcombine.low %v11630_v17, %v11637_v32  ;;  %v16577_v43 = vpop.f32.mrb[28].mxu0  ;;  %v5428_v52 = vadd.f32 %v16468_v37, %v16327_v15  ;;  %v16585_v53 = vrot.slane %v14660_v29, %v15510_v28  ;;  %v5861_v54 = vrot.slane %v5847_v40, %v15510_v28 }
 0x141   :  { %20253 = vst [vmem:[#allocation6_spill] sm:$0xff] %v16572_v18  ;;  %v14903_v23 = vpop.f32.mrb[29].mxu0  ;;  %v5862_v58 = vcombine.high %v5854_v42, %v5854_v42  ;;  %v16589_v61 = vrot.slane %v5854_v42, %v15510_v28  ;;  %v5896_v62 = vcombine.high %v5654_v33, %v5654_v33  ;;  %v5903_v27 = vrot.slane %v5654_v33, %v15510_v28 }
 0x142   :  { %v5433_v63 = vadd.f32 %v16468_v37, %v16350_v59  ;;  %v2698_v34 = vcombine.high %v16463_v44, %v16463_v44  ;;  %v5863_v15 = vcombine.high %v5861_v54, %v5861_v54  ;;  %v16597_v3 = vrot.slane %v5861_v54, %v15510_v28 }
 0x143   :  { %20254 = vst [vmem:[#allocation7_spill] sm:$0xff] %v16589_v61  ;;  %v16600_v4 = vrot.slane %v5862_v58, %v15510_v28  ;;  %v5892_v5 = vcombine.high %v16589_v61, %v16589_v61  ;;  %v9300_v6 = vcombine.low %v5846_v49, %v16589_v61  ;;  %v5910_v46 = vrot.slane %v5896_v62, %v15510_v28 }
 0x144   :  { %v5911_v8 = vcombine.high %v5903_v27, %v5903_v27  ;;  %v5655_v10 = vmax.f32 %v5428_v52, 0.0  ;;  %v16607_v59 = vrot.slane %v5863_v15, %v15510_v28  ;;  %v5893_v44 = vcombine.high %v16597_v3, %v16597_v3 }
 0x145   :  { %v5894_v50 = vcombine.high %v16600_v4, %v16600_v4  ;;  %v16614_v12 = vrot.slane %v5903_v27, %v15510_v28  ;;  %v12139_v1 = vcombine.low %v16523_v56, %v5892_v5  ;;  %v12720_v13 = vcombine.low %v16589_v61, %v16600_v4 }
 0x146   :  { %v5912_v14 = vcombine.high %v5910_v46, %v5910_v46  ;;  %v5656_v17 = vmax.f32 %v5433_v63, 0.0  ;;  %v16624_v40 = vcombine.low %v16607_v59, %v5893_v44  ;;  %v14661_v49 = vcombine.high %v16597_v3, %v16607_v59 }
 0x147   :  { %v16619_v32 = vpop.f32.mrb[30].mxu0  ;;  %v12140_v42 = vcombine.low %v5894_v50, %v16597_v3  ;;  %v16630_v52 = vrot.slane %v9300_v6, %v15510_v28  ;;  %v12155_v23 = vrot.slane %v12139_v1, %v15510_v28  ;;  %v5926_v54 = vrot.slane %v5910_v46, %v15510_v28 }
 0x148   :  { %v14906_v33 = vpop.f32.mrb[31].mxu0  ;;  %v16635_v58 = vrot.slane %v5911_v8, %v15510_v28  ;;  %v16638_v62 = vrot.slane %v12720_v13, %v15510_v28  ;;  %v16641_v27 = vrot.slane %v14661_v49, %v15510_v28  ;;  %v5940_v63 = vrot.slane %v5912_v14, %v15510_v28 }
 0x149   :  { %20255 = vst [vmem:[#allocation8_spill] sm:$0xff] %v16630_v52  ;;  %v5941_v15 = vcombine.high %v16614_v12, %v16614_v12  ;;  %v11644_v6 = vrot.slane %v16624_v40, %v15510_v28  ;;  %v5942_v46 = vcombine.high %v5926_v54, %v5926_v54  ;;  %v12170_v8 = vcombine.low %v12148_v47, %v12155_v23 }
 0x14a   :  { %v9878_v1 = vcombine.low %v5926_v54, %v5940_v63  ;;  %v12162_v33 = vrot.slane %v12140_v42, %v15510_v28  ;;  %v5945_v9 = vcombine.high %v5655_v10, %v5655_v10  ;;  %v5944_v23 = vcombine.high %v5940_v63, %v5940_v63 }
 0x14b   :  { %v12141_v13 = vcombine.low %v16635_v58, %v5941_v15  ;;  %v11040_v49 = vcombine.low %v5940_v63, %v5942_v46  ;;  %v12178_v21 = vrot.slane %v12170_v8, %v15510_v28  ;;  %v5952_v22 = vrot.slane %v5655_v10, %v15510_v28 }
 0x14c   :  { %v16655_v14 = vpop.f32.mrb[32].mxu0  ;;  %v5994_v36 = vcombine.high %v5656_v17, %v5656_v17  ;;  %v9888_v44 = vrot.slane %v9878_v1, %v15510_v28  ;;  %v5959_v15 = vrot.slane %v5945_v9, %v15510_v28  ;;  %v6001_v46 = vrot.slane %v5656_v17, %v15510_v28 }
 0x14d   :  { %v14909_v40 = vpop.f32.mrb[33].mxu0  ;;  %v12169_v47 = vrot.slane %v12141_v13, %v15510_v28  ;;  %v11050_v5 = vrot.slane %v11040_v49, %v15510_v28  ;;  %v5960_v42 = vcombine.high %v5952_v22, %v5952_v22  ;;  %v5968_v63 = vrot.slane %v5952_v22, %v15510_v28 }
 0x14e   :  { %v6008_v8 = vrot.slane %v5994_v36, %v15510_v28  ;;  %v2726_v40 = vrot.slane %v2698_v34, %v15510_v28  ;;  %v5961_v29 = vcombine.high %v5959_v15, %v5959_v15  ;;  %v5975_v10 = vrot.slane %v5959_v15, %v15510_v28 }
 0x14f   :  { %v12171_v50 = vcombine.low %v12162_v33, %v12169_v47  ;;  %v6009_v13 = vcombine.high %v6001_v46, %v6001_v46  ;;  %v5982_v49 = vrot.slane %v5960_v42, %v15510_v28  ;;  %v6017_v9 = vrot.slane %v6001_v46, %v15510_v28 }
 0x150   :  { %v6010_v7 = vcombine.high %v6008_v8, %v6008_v8  ;;  %v5989_v17 = vrot.slane %v5961_v29, %v15510_v28  ;;  %v5991_v33 = vcombine.high %v5975_v10, %v5975_v10  ;;  %v11041_v47 = vcombine.low %v5944_v23, %v5975_v10 }
 0x151   :  { %v12185_v1 = vrot.slane %v12171_v50, %v15510_v28  ;;  %v6031_v36 = vrot.slane %v6009_v13, %v15510_v28  ;;  %v14569_v16 = vcombine.high %v5926_v54, %v5982_v49  ;;  %v10459_v22 = vcombine.low %v5968_v63, %v5982_v49 }
 0x152   :  { %v16677_v15 = vrot.slane %v6010_v7, %v15510_v28  ;;  %v9880_v50 = vcombine.low %v5975_v10, %v5989_v17  ;;  %v14598_v42 = vcombine.high %v5968_v63, %v5989_v17  ;;  %v11042_v11 = vcombine.low %v5989_v17, %v5991_v33 }
 0x153   :  { %v16674_v34 = vcombine.low %v12178_v21, %v12185_v1  ;;  %v11057_v46 = vrot.slane %v11041_v47, %v15510_v28  ;;  %v9895_v29 = vrot.slane %v14569_v16, %v15510_v28  ;;  %v16684_v23 = vrot.slane %v6008_v8, %v15510_v28  ;;  %v80_v16 = vld [vmem:[%s20079_s0 + $0x1b0] sm:$0x7f] }
 0x154   :  { %v16679_v0 = vpop.f32.mrb[34].mxu0  ;;  %v6041_v21 = vcombine.high %v6031_v36, %v6031_v36  ;;  %v14570_v13 = vcombine.high %v6017_v9, %v6031_v36  ;;  %v10469_v54 = vrot.slane %v10459_v22, %v15510_v28  ;;  %v10476_v7 = vrot.slane %v14598_v42, %v15510_v28 }
 0x155   :  { %20256 = vst [vmem:[#allocation9_spill] sm:$0xff] %v16674_v34  ;;  %v14912_v55 = vpop.f32.mrb[35].mxu0  ;;  %20257 = vst [vmem:[#allocation10_spill] sm:$0xff] %v16684_v23  ;;  %v16688_v1 = vcombine.low %v11050_v5, %v11057_v46  ;;  %v9902_v10 = vrot.slane %v9880_v50, %v15510_v28  ;;  %v9910_v63 = vcombine.low %v9888_v44, %v9895_v29  ;;  %vm14329_vm8 = vcmask 1041409  }
 0x156   :  { %v9909_v49 = vrot.slane %v14570_v13, %v15510_v28  ;;  %v10461_v17 = vcombine.low %v6017_v9, %v6031_v36  ;;  %v14599_v55 = vcombine.high %v16684_v23, %v16677_v15  ;;  %v16698_v8 = vcombine.low %v16630_v52, %v11644_v6 }
 0x157   :  { %20258 = vst [vmem:[#allocation11_spill] sm:$0xff] %v16688_v1  ;;  %v11064_v33 = vrot.slane %v11042_v11, %v15510_v28  ;;  %v11043_v5 = vcombine.low %v6041_v21, %v16684_v23  ;;  %v2728_v44 = vcombine.high %v16476_v45, %v16476_v45  ;;  %v10491_v47 = vcombine.low %v10469_v54, %v10476_v7 }
 0x158   :  { %v9911_v22 = vcombine.low %v9902_v10, %v9909_v49  ;;  %v10483_v9 = vrot.slane %v10461_v17, %v15510_v28  ;;  %v10490_v36 = vrot.slane %v14599_v55, %v15510_v28  ;;  %v16707_v50 = vrot.slane %v9910_v63, %v15510_v28  ;;  %v14500_v17 = vld [vmem:[%s20081_s3 + $0x10] sm:$0xff]  ;;  %v14501_v55 = vld [vmem:[%s20081_s3 + $0x18] sm:$0xff] }
 0x159   :  { %v11071_v42 = vrot.slane %v11043_v5, %v15510_v28  ;;  %v2730_v6 = vcombine.high %v80_v16, %v80_v16  ;;  %v2737_v46 = vrot.slane %v80_v16, %v15510_v28  ;;  %v5140_v21 = vcombine.low %v2726_v40, %v2728_v44 }
 0x15a   :  { %20259 = vst [vmem:[#allocation12_spill] sm:$0xff] %v16707_v50  ;;  %v16714_v29 = vrot.slane %v9911_v22, %v15510_v28  ;;  %v10492_v45 = vcombine.low %v10483_v9, %v10490_v36  ;;  %v5438_v13 = vadd.f32 %v16468_v37, %v16366_v20  ;;  %v16729_v40 = vrot.slane %v10491_v47, %v15510_v28  ;;  %v81_v47 = vld [vmem:[%s20079_s0 + $0x1b8] sm:$0x7f] }
 0x15b   :  { %v16711_v11 = vpop.f32.mrb[36].mxu0  ;;  %v16718_v7 = vcombine.low %v11064_v33, %v11071_v42  ;;  %v2744_v10 = vrot.slane %v2730_v6, %v15510_v28  ;;  %v2745_v63 = vcombine.high %v2737_v46, %v2737_v46  ;;  %v2753_v49 = vrot.slane %v2737_v46, %v15510_v28 }
 0x15c   :  { %20260 = vst [vmem:[#allocation13_spill] sm:$0xff] %v16714_v29  ;;  %v14915_v54 = vpop.f32.mrb[37].mxu0  ;;  %20262 = vst [vmem:[#allocation15_spill] sm:$0xff] %v16729_v40  ;;  %v16734_v16 = vrot.slane %v10492_v45, %v15510_v28  ;;  %v5657_v33 = vmax.f32 %v5438_v13, 0.0  ;;  %v15304_v46 = vpack.c.bf16 %v14501_v55, %v14500_v17  ;;  %v2778_v36 = vcombine.high %v81_v47, %v81_v47 }
 0x15d   :  { %20261 = vst [vmem:[#allocation14_spill] sm:$0xff] %v16718_v7  ;;  %v2746_v44 = vcombine.high %v2744_v10, %v2744_v10  ;;  %v2760_v22 = vrot.slane %v2744_v10, %v15510_v28  ;;  %v2767_v9 = vrot.slane %v2745_v63, %v15510_v28  ;;  %v5150_v10 = vrot.slane %v5140_v21, %v15510_v28 }
 0x15e   :  { %20263 = vst [vmem:[#allocation16_spill] sm:$0xff] %v16734_v16  ;;  %v6043_v42 = vcombine.high %v5657_v33, %v5657_v33  ;;  %v6050_v6 = vrot.slane %v5657_v33, %v15510_v28  ;;  %15305 = vmatpush3.bf16.msra.mxu1 %v15304_v46  ;;  %v2785_v33 = vrot.slane %v81_v47, %v15510_v28  ;;  %vm14331_vm9 = vcmask 1042434  }
 0x15f   :  { %v2774_v13 = vrot.slane %v2746_v44, %v15510_v28  ;;  %v5141_v54 = vcombine.low %v2753_v49, %v2767_v9  ;;  %v14449_v20 = vcombine.high %v2753_v49, %v2767_v9  ;;  %v20264_v44 = vmov 0.0|0.0  }
 0x160   :  { %v16746_v45 = vpop.f32.mrb[38].mxu0  ;;  %v6057_v5 = vrot.slane %v6043_v42, %v15510_v28  ;;  %v6058_v34 = vcombine.high %v6050_v6, %v6050_v6  ;;  %v16752_v29 = vrot.slane %v6050_v6, %v15510_v28  ;;  %15306 = vmatprep.subr.bf16.mxu1 %v20264_v44  ;;  %vm14333_vm10 = vcmask 1043459  }
 0x161   :  { %v14918_v63 = vpop.f32.mrb[39].mxu0  ;;  %v5143_v16 = vcombine.low %v2760_v22, %v2774_v13  ;;  %v5157_v17 = vrot.slane %v5141_v54, %v15510_v28  ;;  %v5164_v55 = vrot.slane %v14449_v20, %v15510_v28  ;;  %v2792_v13 = vrot.slane %v2778_v36, %v15510_v28 }
 0x162   :  { %v6059_v49 = vcombine.high %v6057_v5, %v6057_v5  ;;  %v6073_v21 = vrot.slane %v6057_v5, %v15510_v28  ;;  %v16760_v9 = vrot.slane %v6058_v34, %v15510_v28  ;;  %v6088_v42 = vcombine.high %v16752_v29, %v16752_v29 }
 0x163   :  { %v5171_v6 = vrot.slane %v5143_v16, %v15510_v28  ;;  %v5172_v46 = vcombine.low %v5150_v10, %v5157_v17  ;;  %v2793_v54 = vcombine.high %v2785_v33, %v2785_v33  ;;  %v2794_v10 = vcombine.high %v2792_v13, %v2792_v13 }
 0x164   :  { %20265 = vst [vmem:[#allocation17_spill] sm:$0xff] %v16760_v9  ;;  %v6087_v20 = vrot.slane %v6059_v49, %v15510_v28  ;;  %v6090_v47 = vcombine.high %v16760_v9, %v16760_v9  ;;  %v14531_v34 = vcombine.high %v16752_v29, %v16760_v9  ;;  %v16775_v16 = vcombine.low %v16600_v4, %v6088_v42 }
 0x165   :  { %v5173_v63 = vcombine.low %v5164_v55, %v5171_v6  ;;  %v5180_v40 = vrot.slane %v5172_v46, %v15510_v28  ;;  %v2776_v5 = vcombine.high %v2760_v22, %v2760_v22  ;;  %v2801_v55 = vrot.slane %v2785_v33, %v15510_v28  ;;  %v14636_v46 = vld [vmem:[%s20081_s3 + $0x60] sm:$0xff] }
 0x166   :  { %20266 = vst [vmem:[#allocation18_spill] sm:$0xff] %v16775_v16  ;;  %v8204_v49 = vcombine.low %v16597_v3, %v6087_v20  ;;  %v16782_v50 = vcombine.low %v6090_v47, %v6073_v21  ;;  %v2808_v6 = vrot.slane %v2792_v13, %v15510_v28  ;;  %v2815_v42 = vrot.slane %v2793_v54, %v15510_v28  ;;  %v14637_v3 = vld [vmem:[%s20081_s3 + $0x68] sm:$0xff] }
 0x167   :  { %v16777_v36 = vpop.f32.mrb[40].mxu0  ;;  %v5187_v52 = vrot.slane %v5173_v63, %v15510_v28  ;;  %v14504_v47 = vcombine.high %v6073_v21, %v6087_v20  ;;  %v2822_v33 = vrot.slane %v2794_v10, %v15510_v28  ;;  %v2823_v63 = vcombine.high %v2801_v55, %v2801_v55 }
 0x168   :  { %20267 = vst [vmem:[#allocation19_spill] sm:$0xff] %v16782_v50  ;;  %v14921_v1 = vpop.f32.mrb[41].mxu0  ;;  %v16795_v22 = vrot.slane %v8204_v49, %v15510_v28  ;;  %v2824_v54 = vcombine.high %v2808_v6, %v2808_v6  ;;  %v2825_v17 = vcombine.high %v2815_v42, %v2815_v42  ;;  %v5189_v7 = vcombine.low %v2776_v5, %v2801_v55 }
 0x169   :  { %v16798_v1 = vrot.slane %v14531_v34, %v15510_v28  ;;  %v5188_v13 = vcombine.low %v5180_v40, %v5187_v52  ;;  %v5443_v16 = vadd.f32 %v16468_v37, %v16390_v57  ;;  %v16803_v35 = vpack.c.bf16 %v14637_v3, %v14636_v46 }
 0x16a   :  { %v14502_v21 = vcombine.high %v16509_v41, %v16516_v51  ;;  %v5190_v34 = vcombine.low %v2815_v42, %v2823_v63  ;;  %v5191_v49 = vcombine.low %v2825_v17, %v2808_v6  ;;  %v5192_v10 = vcombine.low %v2822_v33, %v2824_v54 }
 0x16b   :  { %20268 = vst [vmem:[#allocation20_spill] sm:$0xff] %v16798_v1  ;;  %20269 = vst [vmem:[#allocation21_spill] sm:$0xff] %v16803_v35  ;;  %15001 = vmatmul.mubr.msk.f32.gmra.mrb[94].mxu0 %vm5238_vm4, %v5188_v13  ;;  %v20270_v52 = vcombine.low %v16513_v48, %v16523_v56  ;;  %v20271_v55 = vmov 0.0   ;;  %v5199_v57 = vrot.slane %v5189_v7, %v15510_v28  ;;  %v5658_v46 = vmax.f32 %v5443_v16, 0.0 }
 0x16c   :  { %v16807_v20 = vpop.f32.mrb[42].mxu0  ;;  %15003 = vmatprep.mubr.msk.f32.mxu0 %vm15403_vm1, %v20271_v55  ;;  %15323 = vmatpush3.bf16.msra.mxu0 %v16803_v35  ;;  %v8172_v41 = vrot.slane %v14502_v21, %v15510_v28  ;;  %v20272_v51 = vcombine.high %v16589_v61, %v16600_v4  ;;  %v16824_v6 = vrot.slane %v14504_v47, %v15510_v28  ;;  %vm14335_vm11 = vcmask 1044484  }
 0x16d   :  { %v8179_v40 = vrot.slane %v20270_v52, %v15510_v28  ;;  %v14924_v5 = vpop.f32.mrb[43].mxu0  ;;  %v5206_v48 = vrot.slane %v5190_v34, %v15510_v28  ;;  %v5213_v56 = vrot.slane %v5191_v49, %v15510_v28  ;;  %v5220_v42 = vrot.slane %v5192_v10, %v15510_v28  ;;  %15327 = vmatprep.subr.bf16.mxu0 %v20264_v44 }
 0x16e   :  { %v8186_v17 = vrot.slane %v20272_v51, %v15510_v28  ;;  %v6092_v7 = vcombine.high %v5658_v46, %v5658_v46  ;;  %v6099_v16 = vrot.slane %v5658_v46, %v15510_v28  ;;  %v8187_v3 = vcombine.low %v16558_v24, %v8172_v41 }
 0x16f   :  { %v5221_v13 = vcombine.low %v5199_v57, %v5206_v48  ;;  %v5222_v4 = vcombine.low %v5213_v56, %v5220_v42  ;;  %v11653_v47 = vrot.slane %v16574_v39, %v15510_v28  ;;  %v11660_v63 = vrot.slane %v16698_v8, %v15510_v28 }
 0x170   :  { %v8188_v33 = vcombine.low %v8179_v40, %v8186_v17  ;;  %v6106_v21 = vrot.slane %v6092_v7, %v15510_v28  ;;  %v6107_v34 = vcombine.high %v6099_v16, %v6099_v16  ;;  %v8195_v49 = vrot.slane %v8187_v3, %v15510_v28 }
 0x171   :  { %v5229_v10 = vrot.slane %v5221_v13, %v15510_v28  ;;  %v5236_v24 = vrot.slane %v5222_v4, %v15510_v28  ;;  %v11661_v40 = vcombine.low %v11653_v47, %v11660_v63  ;;  %v5448_v8 = vadd.f32 %v16468_v37, %v16418_v31 }
 0x172   :  { %v8202_v52 = vrot.slane %v8188_v33, %v15510_v28  ;;  %v6108_v5 = vcombine.high %v6106_v21, %v6106_v21  ;;  %v16844_v39 = vrot.slane %v6106_v21, %v15510_v28  ;;  %v5453_v41 = vadd.f32 %v16468_v37, %v16431_v60 }
 0x173   :  { %v5237_v57 = vcombine.low %v5229_v10, %v5236_v24  ;;  %v5458_v51 = vadd.f32 %v16468_v37, %v16451_v19  ;;  %v16855_v48 = vrot.slane %v6099_v16, %v15510_v28  ;;  %v20275_v31 = vcombine.high %v16635_v58, %v16635_v58 }
 0x174   :  { %20273 = vst [vmem:[#allocation22_spill] sm:$0xff] %v16844_v39  ;;  %v8203_v46 = vcombine.low %v8195_v49, %v8202_v52  ;;  %v16858_v56 = vrot.slane %v6108_v5, %v15510_v28  ;;  %v5659_v7 = vmax.f32 %v5448_v8, 0.0  ;;  %v16868_v60 = vrot.slane %v6107_v34, %v15510_v28 }
 0x175   :  { %v16852_v17 = vpop.f32.mrb[44].mxu0  ;;  %v16864_v42 = vcombine.low %v20275_v31, %v16844_v39  ;;  %15004 = vmatmul.mubr.msk.f32.gmra.mrb[96].mxu0 %vm5238_vm4, %v5237_v57  ;;  %v5660_v16 = vmax.f32 %v5453_v41, 0.0  ;;  %v5661_v33 = vmax.f32 %v5458_v51, 0.0  ;;  %v5463_v4 = vadd.f32 %v16468_v37, %v16484_v38 }
 0x176   :  { %20274 = vst [vmem:[#allocation23_spill] sm:$0xff] %v16858_v56  ;;  %v14927_v3 = vpop.f32.mrb[45].mxu0  ;;  %15011 = vmatmul.mubr.msk.f32.vlgmr.msra.gmra.mrb[0].mxu1 %vm8596_vm5, %v8203_v46  ;;  %15196 = vmatprep.mubr.msk.f32.mxu0 %vm15403_vm1, %v20271_v55  ;;  %v6141_v58 = vcombine.high %v5659_v7, %v5659_v7  ;;  %v6148_v13 = vrot.slane %v5659_v7, %v15510_v28  ;;  %vm14337_vm12 = vcmask 1045509   ;;  %vm14339_vm13 = vcmask 1046534  }
 0x177   :  { %20276 = vst [vmem:[#allocation24_spill] sm:$0xff] %v16864_v42  ;;  %v16880_v47 = vadd.f32 %v16468_v37, %v16506_v26  ;;  %v6190_v63 = vcombine.high %v5660_v16, %v5660_v16  ;;  %v6197_v21 = vrot.slane %v5660_v16, %v15510_v28  ;;  %v6239_v34 = vcombine.high %v5661_v33, %v5661_v33 }
 0x178   :  { %v6246_v49 = vrot.slane %v5661_v33, %v15510_v28  ;;  %15013 = vmatprep.mubr.msk.f32.mxu1 %vm15403_vm1, %v20271_v55  ;;  %v6155_v38 = vrot.slane %v6141_v58, %v15510_v28  ;;  %v6156_v52 = vcombine.high %v6148_v13, %v6148_v13  ;;  %v16895_v5 = vrot.slane %v6148_v13, %v15510_v28 }
 0x179   :  { %15197 = vmatmul.mubr.msk.f32.vlgmr.msra.gmra.mrb[98].mxu0 %vm8596_vm5, %v11661_v40  ;;  %v6204_v8 = vrot.slane %v6190_v63, %v15510_v28  ;;  %v6205_v57 = vcombine.high %v6197_v21, %v6197_v21  ;;  %v6253_v46 = vrot.slane %v6239_v34, %v15510_v28  ;;  %v6213_v3 = vrot.slane %v6197_v21, %v15510_v28 }
 0x17a   :  { %v16891_v26 = vpop.f32.mrb[46].mxu0  ;;  %20277 = vst [vmem:[#allocation25_spill] sm:$0xff] %v16895_v5  ;;  %v6157_v51 = vcombine.high %v6155_v38, %v6155_v38  ;;  %v16900_v31 = vrot.slane %v6155_v38, %v15510_v28  ;;  %v16903_v7 = vrot.slane %v6156_v52, %v15510_v28  ;;  %15199 = vmatprep.mubr.msk.f32.mxu0 %vm15403_vm1, %v20271_v55  ;;  %v5662_v24 = vmax.f32 %v5463_v4, 0.0 }
 0x17b   :  { %v14930_v41 = vpop.f32.mrb[47].mxu0  ;;  %v6206_v40 = vcombine.high %v6204_v8, %v6204_v8  ;;  %v16909_v16 = vrot.slane %v6204_v8, %v15510_v28  ;;  %v6227_v33 = vrot.slane %v6205_v57, %v15510_v28  ;;  %v6254_v58 = vcombine.high %v6246_v49, %v6246_v49 }
 0x17c   :  { %20278 = vst [vmem:[#allocation26_spill] sm:$0xff] %v16903_v7  ;;  %v16913_v13 = vrot.slane %v6157_v51, %v15510_v28  ;;  %v6187_v63 = vcombine.high %v16900_v31, %v16900_v31  ;;  %v6188_v34 = vcombine.high %v16903_v7, %v16903_v7  ;;  %v6255_v21 = vcombine.high %v6253_v46, %v6253_v46 }
 0x17d   :  { %20279 = vst [vmem:[#allocation27_spill] sm:$0xff] %v16909_v16  ;;  %v16922_v52 = vrot.slane %v6206_v40, %v15510_v28  ;;  %v6236_v8 = vcombine.high %v16909_v16, %v16909_v16  ;;  %v6237_v57 = vcombine.high %v6227_v33, %v6227_v33  ;;  %v12801_v41 = vcombine.low %v6213_v3, %v6227_v33 }
 0x17e   :  { %v16919_v38 = vpop.f32.mrb[48].mxu0  ;;  %v6189_v54 = vcombine.high %v16913_v13, %v16913_v13  ;;  %v6235_v10 = vcombine.high %v6213_v3, %v6213_v3  ;;  %v16931_v35 = vcombine.low %v16903_v7, %v6187_v63  ;;  %v16934_v40 = vcombine.low %v6188_v34, %v16900_v31 }
 0x17f   :  { %20280 = vst [vmem:[#allocation28_spill] sm:$0xff] %v16922_v52  ;;  %v14933_v19 = vpop.f32.mrb[49].mxu0  ;;  %v11089_v33 = vcombine.low %v16677_v15, %v6236_v8  ;;  %v16944_v50 = vcombine.low %v6237_v57, %v16909_v16  ;;  %v6238_v4 = vcombine.high %v16922_v52, %v16922_v52  ;;  %v6262_v63 = vrot.slane %v6246_v49, %v15510_v28 }
 0x180   :  { %20281 = vst [vmem:[#allocation29_spill] sm:$0xff] %v16934_v40  ;;  %v16941_v51 = vcombine.low %v6189_v54, %v6213_v3  ;;  %v16950_v34 = vrot.slane %v6253_v46, %v15510_v28  ;;  %v6276_v42 = vrot.slane %v6254_v58, %v15510_v28  ;;  %v16954_v15 = vrot.slane %v6255_v21, %v15510_v28 }
 0x181   :  { %20282 = vst [vmem:[#allocation30_spill] sm:$0xff] %v16944_v50  ;;  %v16959_v3 = vcombine.low %v16913_v13, %v6235_v10  ;;  %v16962_v8 = vrot.slane %v12801_v41, %v15510_v28  ;;  %v6288_v57 = vcombine.high %v5662_v24, %v5662_v24  ;;  %v11090_v19 = vcombine.low %v6238_v4, %v6262_v63 }
 0x182   :  { %20283 = vst [vmem:[#allocation31_spill] sm:$0xff] %v16950_v34  ;;  %20284 = vst [vmem:[#allocation32_spill] sm:$0xff] %v16954_v15  ;;  %v6285_v46 = vcombine.high %v16950_v34, %v16950_v34  ;;  %v10508_v58 = vcombine.low %v16752_v29, %v6276_v42  ;;  %v14600_v21 = vcombine.high %v6262_v63, %v6276_v42  ;;  %v5663_v29 = vmax.f32 %v16880_v47, 0.0 }
 0x183   :  { %20285 = vst [vmem:[#allocation33_spill] sm:$0xff] %v16959_v3  ;;  %20286 = vst [vmem:[#allocation34_spill] sm:$0xff] %v16962_v8  ;;  %v6287_v54 = vcombine.high %v16954_v15, %v16954_v15  ;;  %v6295_v10 = vrot.slane %v5662_v24, %v15510_v28  ;;  %v6302_v3 = vrot.slane %v6288_v57, %v15510_v28  ;;  %vm14341_vm14 = vcmask 1047559  }
 0x184   :  { %v16974_v41 = vrot.slane %v10508_v58, %v15510_v28  ;;  %v16977_v40 = vrot.slane %v14600_v21, %v15510_v28  ;;  %v16980_v49 = vcombine.low %v16954_v15, %v6285_v46  ;;  %v11099_v42 = vrot.slane %v11089_v33, %v15510_v28 }
 0x185   :  { %v11106_v4 = vrot.slane %v11090_v19, %v15510_v28  ;;  %v6303_v63 = vcombine.high %v6295_v10, %v6295_v10  ;;  %v6304_v50 = vcombine.high %v6302_v3, %v6302_v3  ;;  %v16990_v58 = vrot.slane %v6302_v3, %v15510_v28 }
 0x186   :  { %20287 = vst [vmem:[#allocation35_spill] sm:$0xff] %v16974_v41  ;;  %20288 = vst [vmem:[#allocation36_spill] sm:$0xff] %v16977_v40  ;;  %v6337_v21 = vcombine.high %v5663_v29, %v5663_v29  ;;  %v6344_v46 = vrot.slane %v5663_v29, %v15510_v28  ;;  %v6311_v47 = vrot.slane %v6295_v10, %v15510_v28  ;;  %vm14415_vm15 = vcmask 15360  }
 0x187   :  { %20289 = vst [vmem:[#allocation37_spill] sm:$0xff] %v16980_v49  ;;  %20290 = vst [vmem:[#allocation38_spill] sm:$0xff] %v16990_v58  ;;  %v16993_v16 = vcombine.low %v11099_v42, %v11106_v4  ;;  %v6325_v33 = vrot.slane %v6303_v63, %v15510_v28  ;;  %v16998_v19 = vrot.slane %v6304_v50, %v15510_v28 }
 0x188   :  { %v16985_v24 = vpop.f32.mrb[50].mxu0  ;;  %v6334_v52 = vcombine.high %v16990_v58, %v16990_v58  ;;  %v17003_v57 = vcombine.low %v6287_v54, %v16990_v58  ;;  %v6351_v3 = vrot.slane %v6337_v21, %v15510_v28  ;;  %v6352_v40 = vcombine.high %v6344_v46, %v6344_v46 }
 0x189   :  { %v14936_v49 = vpop.f32.mrb[51].mxu0  ;;  %20291 = vst [vmem:[#allocation39_spill] sm:$0xff] %v16993_v16  ;;  %20292 = vst [vmem:[#allocation40_spill] sm:$0xff] %v16998_v19  ;;  %v14572_v29 = vcombine.high %v16950_v34, %v6325_v33  ;;  %v10510_v10 = vcombine.low %v6311_v47, %v6325_v33  ;;  %v14601_v42 = vcombine.high %v6311_v47, %v16998_v19 }
 0x18a   :  { %20293 = vst [vmem:[#allocation41_spill] sm:$0xff] %v17003_v57  ;;  %v17013_v4 = vcombine.low %v16998_v19, %v6334_v52  ;;  %v6353_v63 = vcombine.high %v6351_v3, %v6351_v3  ;;  %v8823_v54 = vcombine.low %v16895_v5, %v16903_v7  ;;  %v6360_v49 = vrot.slane %v6344_v46, %v15510_v28 }
 0x18b   :  { %v17020_v16 = vrot.slane %v14601_v42, %v15510_v28  ;;  %v17024_v33 = vrot.slane %v6351_v3, %v15510_v28  ;;  %v6374_v47 = vrot.slane %v6352_v40, %v15510_v28  ;;  %v17028_v52 = vrot.slane %v14572_v29, %v15510_v28 }
 0x18c   :  { %20294 = vst [vmem:[#allocation42_spill] sm:$0xff] %v17013_v4  ;;  %v17031_v4 = vrot.slane %v6353_v63, %v15510_v28  ;;  %v5473_v57 = vadd.f32 %v16468_v37, %v16527_v2  ;;  %v14505_v42 = vcombine.high %v16844_v39, %v16903_v7  ;;  %v17038_v46 = vrot.slane %v10510_v10, %v15510_v28 }
 0x18d   :  { %v17017_v21 = vpop.f32.mrb[52].mxu0  ;;  %20295 = vst [vmem:[#allocation43_spill] sm:$0xff] %v17020_v16  ;;  %20296 = vst [vmem:[#allocation44_spill] sm:$0xff] %v17024_v33  ;;  %v6384_v3 = vcombine.high %v6374_v47, %v6374_v47  ;;  %v14533_v41 = vcombine.high %v6360_v49, %v6374_v47  ;;  %v10557_v19 = vcombine.low %v6360_v49, %v6374_v47 }
 0x18e   :  { %v14939_v50 = vpop.f32.mrb[53].mxu0  ;;  %20297 = vst [vmem:[#allocation45_spill] sm:$0xff] %v17028_v52  ;;  %20298 = vst [vmem:[#allocation46_spill] sm:$0xff] %v17031_v4  ;;  %v14506_v40 = vcombine.high %v17024_v33, %v17031_v4  ;;  %v5664_v29 = vmax.f32 %v5473_v57, 0.0  ;;  %v8235_v2 = vrot.slane %v14505_v42, %v15510_v28  ;;  %v17050_v10 = vrot.slane %v8823_v54, %v15510_v28 }
 0x18f   :  { %20299 = vst [vmem:[#allocation47_spill] sm:$0xff] %v17038_v46  ;;  %v20300_v50 = vcombine.low %v16844_v39, %v16858_v56  ;;  %v17053_v58 = vcombine.low %v6384_v3, %v17024_v33  ;;  %v8236_v49 = vcombine.low %v16795_v22, %v16824_v6  ;;  %v17060_v47 = vrot.slane %v14533_v41, %v15510_v28 }
 0x190   :  { %20301 = vst [vmem:[#allocation48_spill] sm:$0xff] %v17050_v10  ;;  %v6393_v42 = vrot.slane %v5664_v29, %v15510_v28  ;;  %v17064_v52 = vrot.slane %v14506_v40, %v15510_v28  ;;  %v17067_v54 = vrot.slane %v10557_v19, %v15510_v28  ;;  %v6137_v3 = vcombine.high %v16855_v48, %v16855_v48 }
 0x191   :  { %v8228_v63 = vrot.slane %v20300_v50, %v15510_v28  ;;  %20302 = vst [vmem:[#allocation49_spill] sm:$0xff] %v17053_v58  ;;  %20303 = vst [vmem:[#allocation50_spill] sm:$0xff] %v17060_v47  ;;  %v6386_v50 = vcombine.high %v5664_v29, %v5664_v29  ;;  %v20305_v22 = vcombine.high %v16607_v59, %v16607_v59 }
 0x192   :  { %v17057_v57 = vpop.f32.mrb[54].mxu0  ;;  %20304 = vst [vmem:[#allocation51_spill] sm:$0xff] %v17067_v54  ;;  %v6401_v16 = vcombine.high %v6393_v42, %v6393_v42  ;;  %v6409_v29 = vrot.slane %v6393_v42, %v15510_v28  ;;  %v8244_v40 = vrot.slane %v8236_v49, %v15510_v28  ;;  %v9348_v19 = vcombine.low %v16868_v60, %v6137_v3 }
 0x193   :  { %v8237_v39 = vcombine.low %v8228_v63, %v8235_v2  ;;  %v14942_v15 = vpop.f32.mrb[55].mxu0  ;;  %v11662_v6 = vcombine.low %v20305_v22, %v16855_v48  ;;  %v6400_v41 = vrot.slane %v6386_v50, %v15510_v28  ;;  %v20306_v63 = vcombine.high %v16858_v56, %v16858_v56 }
 0x194   :  { %v11685_v59 = vrot.slane %v16931_v35, %v15510_v28  ;;  %v17090_v42 = vrot.slane %v6401_v16, %v15510_v28  ;;  %v17095_v3 = vrot.slane %v9348_v19, %v15510_v28 }
 0x195   :  { %v8251_v15 = vrot.slane %v8237_v39, %v15510_v28  ;;  %v11663_v2 = vcombine.low %v20306_v63, %v16895_v5  ;;  %v6402_v22 = vcombine.high %v6400_v41, %v6400_v41  ;;  %v17087_v50 = vrot.slane %v6400_v41, %v15510_v28 }
 0x196   :  { %20308 = vst [vmem:[#allocation53_spill] sm:$0xff] %v17090_v42  ;;  %v17092_v39 = vcombine.high %v6409_v29, %v6409_v29  ;;  %20310 = vst [vmem:[#allocation55_spill] sm:$0xff] %v17095_v3  ;;  %v11671_v54 = vrot.slane %v11662_v6, %v15510_v28  ;;  %v5478_v63 = vadd.f32 %v16468_v37, %v16577_v43 }
 0x197   :  { %20307 = vst [vmem:[#allocation52_spill] sm:$0xff] %v17087_v50  ;;  %v8252_v49 = vcombine.low %v8244_v40, %v8251_v15  ;;  %v17101_v35 = vrot.slane %v6402_v22, %v15510_v28  ;;  %v17105_v41 = vcombine.high %v17090_v42, %v17090_v42  ;;  %v11678_v15 = vrot.slane %v11663_v2, %v15510_v28 }
 0x198   :  { %20309 = vst [vmem:[#allocation54_spill] sm:$0xff] %v17092_v39  ;;  %v14534_v19 = vcombine.high %v6409_v29, %v17090_v42  ;;  %v11686_v43 = vcombine.low %v11671_v54, %v17095_v3 }
 0x199   :  { %20311 = vst [vmem:[#allocation56_spill] sm:$0xff] %v17101_v35  ;;  %20312 = vst [vmem:[#allocation57_spill] sm:$0xff] %v17105_v41  ;;  %v17110_v40 = vpop.f32.mrb[56].mxu0  ;;  %15014 = vmatmul.mubr.msk.f32.gmra.mrb[2].mxu1 %vm8596_vm5, %v8252_v49  ;;  %v8255_v2 = vcombine.low %v6409_v29, %v17101_v35  ;;  %v11687_v34 = vcombine.low %v11678_v15, %v11685_v59  ;;  %v17138_v59 = vld [vmem:[%s20080_s2] ss:$0 sm:$0xff]  ;;  %v6434_v6 = vcombine.high %v17101_v35, %v17101_v35 }
 0x19a   :  { %v14945_v22 = vpop.f32.mrb[57].mxu0  ;;  %15016 = vmatprep.mubr.msk.f32.mxu1 %vm15403_vm1, %v20271_v55  ;;  %v17129_v49 = vrot.slane %v14534_v19, %v15510_v28  ;;  %v11694_v16 = vrot.slane %v11686_v43, %v15510_v28  ;;  %v5483_v15 = vadd.f32 %v17138_v59, %v16619_v32  ;;  %v5488_v19 = vadd.f32 %v17138_v59, %v16655_v14 }
 0x19b   :  { %v5665_v22 = vmax.f32 %v5478_v63, 0.0  ;;  %v11701_v29 = vrot.slane %v11687_v34, %v15510_v28  ;;  %v5493_v34 = vadd.f32 %v17138_v59, %v16679_v0  ;;  %v17150_v43 = vrot.slane %v8255_v2, %v15510_v28 }
 0x19c   :  { %20313 = vst [vmem:[#allocation58_spill] sm:$0xff] %v17129_v49  ;;  %v5666_v37 = vmax.f32 %v5483_v15, 0.0  ;;  %v5667_v23 = vmax.f32 %v5488_v19, 0.0  ;;  %v17155_v14 = vadd.f32 %v17138_v59, %v16711_v11  ;;  %v20315_v11 = vcombine.low %v16900_v31, %v16913_v13 }
 0x19d   :  { %v6435_v54 = vcombine.high %v5665_v22, %v5665_v22  ;;  %v6442_v63 = vrot.slane %v5665_v22, %v15510_v28  ;;  %v11702_v46 = vcombine.low %v11694_v16, %v11701_v29  ;;  %v5668_v7 = vmax.f32 %v5493_v34, 0.0 }
 0x19e   :  { %v6484_v22 = vcombine.high %v5666_v37, %v5666_v37  ;;  %v6491_v3 = vrot.slane %v5666_v37, %v15510_v28  ;;  %v6533_v0 = vcombine.high %v5667_v23, %v5667_v23  ;;  %v6540_v2 = vrot.slane %v5667_v23, %v15510_v28 }
 0x19f   :  { %v6449_v32 = vrot.slane %v6435_v54, %v15510_v28  ;;  %v6450_v4 = vcombine.high %v6442_v63, %v6442_v63  ;;  %15200 = vmatmul.mubr.msk.f32.gmra.mrb[100].mxu0 %vm8596_vm5, %v11702_v46  ;;  %v17161_v16 = vrot.slane %v6442_v63, %v15510_v28  ;;  %v17170_v29 = vrot.slane %v20315_v11, %v15510_v28 }
 0x1a0   :  { %15202 = vmatprep.mubr.msk.f32.mxu0 %vm15403_vm1, %v20271_v55  ;;  %v6498_v37 = vrot.slane %v6484_v22, %v15510_v28  ;;  %v6499_v15 = vcombine.high %v6491_v3, %v6491_v3  ;;  %v6547_v19 = vrot.slane %v6533_v0, %v15510_v28  ;;  %v6582_v11 = vcombine.high %v5668_v7, %v5668_v7 }
 0x1a1   :  { %v6451_v58 = vcombine.high %v6449_v32, %v6449_v32  ;;  %20314 = vst [vmem:[#allocation59_spill] sm:$0xff] %v17161_v16  ;;  %v17164_v54 = vrot.slane %v6449_v32, %v15510_v28  ;;  %v17177_v23 = vrot.slane %v6450_v4, %v15510_v28  ;;  %v6548_v32 = vcombine.high %v6540_v2, %v6540_v2 }
 0x1a2   :  { %v17174_v46 = vpop.f32.mrb[58].mxu0  ;;  %v6500_v47 = vcombine.high %v6498_v37, %v6498_v37  ;;  %v17187_v33 = vrot.slane %v6491_v3, %v15510_v28  ;;  %v17190_v4 = vrot.slane %v6499_v15, %v15510_v28  ;;  %v6549_v22 = vcombine.high %v6547_v19, %v6547_v19 }
 0x1a3   :  { %20316 = vst [vmem:[#allocation60_spill] sm:$0xff] %v17177_v23  ;;  %v14948_v63 = vpop.f32.mrb[59].mxu0  ;;  %v17182_v34 = vrot.slane %v6451_v58, %v15510_v28  ;;  %v6481_v31 = vcombine.high %v17164_v54, %v17164_v54  ;;  %v17193_v1 = vcombine.low %v6434_v6, %v17164_v54  ;;  %v6570_v61 = vrot.slane %v6548_v32, %v15510_v28 }
 0x1a4   :  { %20317 = vst [vmem:[#allocation61_spill] sm:$0xff] %v17187_v33  ;;  %v6514_v63 = vrot.slane %v6498_v37, %v15510_v28  ;;  %v17204_v3 = vrot.slane %v6500_v47, %v15510_v28  ;;  %v6531_v15 = vcombine.high %v17190_v4, %v17190_v4  ;;  %v12842_v6 = vcombine.low %v17187_v33, %v17190_v4 }
 0x1a5   :  { %20318 = vst [vmem:[#allocation62_spill] sm:$0xff] %v17193_v1  ;;  %v17196_v0 = vcombine.low %v17182_v34, %v6481_v31  ;;  %v6483_v58 = vcombine.high %v17182_v34, %v17182_v34  ;;  %v17211_v1 = vrot.slane %v6547_v19, %v15510_v28  ;;  %v6556_v37 = vrot.slane %v6540_v2, %v15510_v28 }
 0x1a6   :  { %v17201_v9 = vpop.f32.mrb[60].mxu0  ;;  %20320 = vst [vmem:[#allocation64_spill] sm:$0xff] %v17204_v3  ;;  %v17219_v47 = vrot.slane %v6549_v22, %v15510_v28  ;;  %v14573_v56 = vcombine.high %v6514_v63, %v17204_v3  ;;  %v17222_v18 = vcombine.low %v6531_v15, %v6514_v63  ;;  %v6532_v30 = vcombine.high %v17204_v3, %v17204_v3 }
 0x1a7   :  { %20319 = vst [vmem:[#allocation63_spill] sm:$0xff] %v17196_v0  ;;  %20321 = vst [vmem:[#allocation65_spill] sm:$0xff] %v17211_v1  ;;  %v14951_v31 = vpop.f32.mrb[61].mxu0  ;;  %v17214_v0 = vcombine.low %v6483_v58, %v17187_v33  ;;  %v6589_v19 = vrot.slane %v5668_v7, %v15510_v28  ;;  %v6579_v2 = vcombine.high %v17211_v1, %v17211_v1 }
 0x1a8   :  { %20322 = vst [vmem:[#allocation66_spill] sm:$0xff] %v17219_v47  ;;  %20323 = vst [vmem:[#allocation67_spill] sm:$0xff] %v17222_v18  ;;  %v17230_v31 = vrot.slane %v12842_v6, %v15510_v28  ;;  %v9978_v32 = vcombine.low %v6556_v37, %v17219_v47  ;;  %v17236_v22 = vrot.slane %v14573_v56, %v15510_v28 }
 0x1a9   :  { %v14602_v15 = vcombine.high %v6556_v37, %v6570_v61  ;;  %v11140_v58 = vcombine.low %v6570_v61, %v6579_v2  ;;  %v6596_v8 = vrot.slane %v6582_v11, %v15510_v28  ;;  %v17252_v63 = vcombine.low %v6532_v30, %v6556_v37 }
 0x1aa   :  { %20324 = vst [vmem:[#allocation68_spill] sm:$0xff] %v17230_v31  ;;  %20325 = vst [vmem:[#allocation69_spill] sm:$0xff] %v17236_v22  ;;  %v6581_v31 = vcombine.high %v17219_v47, %v17219_v47  ;;  %v17250_v22 = vrot.slane %v9978_v32, %v15510_v28  ;;  %v6597_v49 = vcombine.high %v6589_v19, %v6589_v19  ;;  %v5669_v2 = vmax.f32 %v17155_v14, 0.0 }
 0x1ab   :  { %v17242_v3 = vpop.f32.mrb[62].mxu0  ;;  %20327 = vst [vmem:[#allocation71_spill] sm:$0xff] %v17252_v63  ;;  %v6605_v7 = vrot.slane %v6589_v19, %v15510_v28  ;;  %v17256_v10 = vrot.slane %v14602_v15, %v15510_v28  ;;  %v6598_v5 = vcombine.high %v6596_v8, %v6596_v8  ;;  %v17259_v61 = vrot.slane %v6596_v8, %v15510_v28 }
 0x1ac   :  { %v14954_v56 = vpop.f32.mrb[63].mxu0  ;;  %20326 = vst [vmem:[#allocation70_spill] sm:$0xff] %v17250_v22  ;;  %v11162_v11 = vrot.slane %v11140_v58, %v15510_v28  ;;  %v20330_v30 = vcombine.high %v17087_v50, %v17101_v35  ;;  %v6631_v8 = vcombine.high %v5669_v2, %v5669_v2  ;;  %v6638_v6 = vrot.slane %v5669_v2, %v15510_v28 }
 0x1ad   :  { %20328 = vst [vmem:[#allocation72_spill] sm:$0xff] %v17256_v10  ;;  %20329 = vst [vmem:[#allocation73_spill] sm:$0xff] %v17259_v61  ;;  %v6619_v56 = vrot.slane %v6597_v49, %v15510_v28  ;;  %v11141_v32 = vcombine.low %v6581_v31, %v6605_v7  ;;  %v17269_v19 = vrot.slane %v6598_v5, %v15510_v28 }
 0x1ae   :  { %v8284_v37 = vrot.slane %v20330_v30, %v15510_v28  ;;  %v6628_v15 = vcombine.high %v17259_v61, %v17259_v61  ;;  %v8285_v31 = vcombine.low %v17170_v29, %v17064_v52  ;;  %v6645_v18 = vrot.slane %v6631_v8, %v15510_v28 }
 0x1af   :  { %20331 = vst [vmem:[#allocation74_spill] sm:$0xff] %v17269_v19  ;;  %v10559_v14 = vcombine.low %v17211_v1, %v6619_v56  ;;  %v14603_v58 = vcombine.high %v6605_v7, %v6619_v56  ;;  %v11169_v49 = vrot.slane %v11141_v32, %v15510_v28  ;;  %v6646_v35 = vcombine.high %v6638_v6, %v6638_v6 }
 0x1b0   :  { %v17281_v5 = vcombine.low %v17269_v19, %v6628_v15  ;;  %v6482_v52 = vcombine.high %v17177_v23, %v17177_v23  ;;  %v6647_v29 = vcombine.high %v6645_v18, %v6645_v18  ;;  %v17295_v56 = vrot.slane %v6645_v18, %v15510_v28 }
 0x1b1   :  { %v17285_v10 = vrot.slane %v10559_v14, %v15510_v28  ;;  %v17288_v2 = vrot.slane %v14603_v58, %v15510_v28  ;;  %v17290_v7 = vcombine.low %v11162_v11, %v11169_v49  ;;  %v6668_v32 = vrot.slane %v6646_v35, %v15510_v28 }
 0x1b2   :  { %20332 = vst [vmem:[#allocation75_spill] sm:$0xff] %v17281_v5  ;;  %20336 = vst [vmem:[#allocation79_spill] sm:$0xff] %v17295_v56  ;;  %v8286_v15 = vcombine.low %v17150_v43, %v8284_v37  ;;  %v17302_v14 = vrot.slane %v6638_v6, %v15510_v28  ;;  %v5503_v11 = vadd.f32 %v17138_v59, %v16746_v45 }
 0x1b3   :  { %20333 = vst [vmem:[#allocation76_spill] sm:$0xff] %v17285_v10  ;;  %20334 = vst [vmem:[#allocation77_spill] sm:$0xff] %v17288_v2  ;;  %v6480_v58 = vcombine.high %v17161_v16, %v17161_v16  ;;  %v17311_v18 = vrot.slane %v6647_v29, %v15510_v28  ;;  %v6677_v35 = vcombine.high %v17295_v56, %v17295_v56 }
 0x1b4   :  { %20335 = vst [vmem:[#allocation78_spill] sm:$0xff] %v17290_v7  ;;  %20337 = vst [vmem:[#allocation80_spill] sm:$0xff] %v17302_v14  ;;  %v14535_v43 = vcombine.high %v17161_v16, %v6668_v32  ;;  %v8293_v37 = vrot.slane %v8285_v31, %v15510_v28  ;;  %v10606_v30 = vcombine.low %v17302_v14, %v6668_v32  ;;  %v5670_v8 = vmax.f32 %v5503_v11, 0.0 }
 0x1b5   :  { %v17308_v49 = vpop.f32.mrb[64].mxu0  ;;  %20338 = vst [vmem:[#allocation81_spill] sm:$0xff] %v17311_v18  ;;  %v8300_v45 = vrot.slane %v8286_v15, %v15510_v28  ;;  %v9444_v63 = vcombine.low %v17177_v23, %v6480_v58  ;;  %v17327_v2 = vcombine.low %v17311_v18, %v6677_v35  ;;  %v17330_v31 = vcombine.low %v6482_v52, %v17295_v56 }
 0x1b6   :  { %v14957_v6 = vpop.f32.mrb[65].mxu0  ;;  %v6680_v15 = vcombine.high %v5670_v8, %v5670_v8  ;;  %v6687_v11 = vrot.slane %v5670_v8, %v15510_v28  ;;  %v11705_v5 = vcombine.low %v17105_v41, %v17161_v16  ;;  %v20342_v35 = vcombine.low %v17090_v42, %v17092_v39 }
 0x1b7   :  { %20339 = vst [vmem:[#allocation82_spill] sm:$0xff] %v17327_v2  ;;  %20340 = vst [vmem:[#allocation83_spill] sm:$0xff] %v17330_v31  ;;  %v8301_v32 = vcombine.low %v8293_v37, %v8300_v45  ;;  %v17336_v6 = vrot.slane %v9444_v63, %v15510_v28  ;;  %v5508_v52 = vadd.f32 %v17138_v59, %v16777_v36 }
 0x1b8   :  { %v11719_v7 = vrot.slane %v20342_v35, %v15510_v28  ;;  %v17347_v45 = vrot.slane %v14535_v43, %v15510_v28  ;;  %v6694_v63 = vrot.slane %v6680_v15, %v15510_v28  ;;  %v6695_v8 = vcombine.high %v6687_v11, %v6687_v11 }
 0x1b9   :  { %v17333_v58 = vpop.f32.mrb[66].mxu0  ;;  %20341 = vst [vmem:[#allocation84_spill] sm:$0xff] %v17336_v6  ;;  %15017 = vmatmul.mubr.msk.f32.gmra.mrb[4].mxu1 %vm8596_vm5, %v8301_v32  ;;  %v6703_v29 = vrot.slane %v6687_v11, %v15510_v28  ;;  %v17353_v10 = vrot.slane %v10606_v30, %v15510_v28  ;;  %v11726_v22 = vrot.slane %v11705_v5, %v15510_v28 }
 0x1ba   :  { %v14960_v37 = vpop.f32.mrb[67].mxu0  ;;  %20343 = vst [vmem:[#allocation85_spill] sm:$0xff] %v17347_v45  ;;  %v20345_v35 = vrot.slane %v16941_v51, %v15510_v28  ;;  %15019 = vmatprep.mubr.msk.f32.mxu1 %vm15403_vm1, %v20271_v55  ;;  %v6696_v43 = vcombine.high %v6694_v63, %v6694_v63  ;;  %v17362_v32 = vrot.slane %v6695_v8, %v15510_v28 }
 0x1bb   :  { %20344 = vst [vmem:[#allocation86_spill] sm:$0xff] %v17353_v10  ;;  %v5671_v37 = vmax.f32 %v5508_v52, 0.0  ;;  %v6725_v15 = vcombine.high %v6703_v29, %v6703_v29  ;;  %v5513_v11 = vadd.f32 %v17138_v59, %v16807_v20  ;;  %v11728_v30 = vcombine.low %v11726_v22, %v17336_v6 }
 0x1bc   :  { %v11727_v36 = vcombine.low %v20345_v35, %v11719_v7  ;;  %20346 = vst [vmem:[#allocation87_spill] sm:$0xff] %v17362_v32  ;;  %v5518_v51 = vadd.f32 %v17138_v59, %v16852_v17  ;;  %v17371_v7 = vrot.slane %v6696_v43, %v15510_v28  ;;  %v8304_v52 = vcombine.low %v6703_v29, %v17362_v32 }
 0x1bd   :  { %v6729_v10 = vcombine.high %v5671_v37, %v5671_v37  ;;  %v6736_v5 = vrot.slane %v5671_v37, %v15510_v28  ;;  %v14536_v8 = vcombine.high %v6703_v29, %v17362_v32  ;;  %v17377_v47 = vcombine.low %v17190_v4, %v6725_v15 }
 0x1be   :  { %20347 = vst [vmem:[#allocation88_spill] sm:$0xff] %v17371_v7  ;;  %v11735_v35 = vrot.slane %v11727_v36, %v15510_v28  ;;  %v11742_v22 = vrot.slane %v11728_v30, %v15510_v28  ;;  %v17386_v43 = vrot.slane %v6694_v63, %v15510_v28  ;;  %v6728_v36 = vcombine.high %v17371_v7, %v17371_v7 }
 0x1bf   :  { %v6743_v37 = vrot.slane %v6729_v10, %v15510_v28  ;;  %v6744_v4 = vcombine.high %v6736_v5, %v6736_v5  ;;  %v17393_v20 = vrot.slane %v6736_v5, %v15510_v28  ;;  %v17399_v30 = vrot.slane %v8304_v52, %v15510_v28 }
 0x1c0   :  { %v17383_v17 = vpop.f32.mrb[68].mxu0  ;;  %20348 = vst [vmem:[#allocation89_spill] sm:$0xff] %v17386_v43  ;;  %v11743_v1 = vcombine.low %v11735_v35, %v11742_v22  ;;  %v17402_v63 = vrot.slane %v14536_v8, %v15510_v28  ;;  %v5672_v2 = vmax.f32 %v5513_v11, 0.0  ;;  %v5673_v22 = vmax.f32 %v5518_v51, 0.0 }
 0x1c1   :  { %v14963_v15 = vpop.f32.mrb[69].mxu0  ;;  %v6745_v6 = vcombine.high %v6743_v37, %v6743_v37  ;;  %20349 = vst [vmem:[#allocation90_spill] sm:$0xff] %v17393_v20  ;;  %v17396_v10 = vrot.slane %v6743_v37, %v15510_v28  ;;  %v17405_v29 = vrot.slane %v6744_v4, %v15510_v28  ;;  %v17413_v5 = vcombine.high %v17393_v20, %v17393_v20 }
 0x1c2   :  { %20351 = vst [vmem:[#allocation92_spill] sm:$0xff] %v17402_v63  ;;  %15203 = vmatmul.mubr.msk.f32.gmra.mrb[102].mxu0 %vm8596_vm5, %v11743_v1  ;;  %v6630_v52 = vcombine.high %v17269_v19, %v17269_v19  ;;  %v17434_v15 = vcombine.low %v6728_v36, %v17393_v20  ;;  %v6785_v19 = vrot.slane %v5672_v2, %v15510_v28 }
 0x1c3   :  { %20350 = vst [vmem:[#allocation91_spill] sm:$0xff] %v17396_v10  ;;  %20352 = vst [vmem:[#allocation93_spill] sm:$0xff] %v17405_v29  ;;  %v17409_v35 = vrot.slane %v6745_v6, %v15510_v28  ;;  %v17423_v1 = vcombine.high %v17405_v29, %v17405_v29  ;;  %v6778_v6 = vcombine.high %v5672_v2, %v5672_v2  ;;  %15205 = vmatprep.mubr.msk.f32.mxu0 %vm15403_vm1, %v20271_v55 }
 0x1c4   :  { %20354 = vst [vmem:[#allocation95_spill] sm:$0xff] %v17413_v5  ;;  %20356 = vst [vmem:[#allocation97_spill] sm:$0xff] %v17434_v15  ;;  %v6827_v4 = vcombine.high %v5673_v22, %v5673_v22  ;;  %v6834_v36 = vrot.slane %v5673_v22, %v15510_v28  ;;  %v5523_v15 = vadd.f32 %v17138_v59, %v16891_v26 }
 0x1c5   :  { %20353 = vst [vmem:[#allocation94_spill] sm:$0xff] %v17409_v35  ;;  %20355 = vst [vmem:[#allocation96_spill] sm:$0xff] %v17423_v1  ;;  %v6792_v31 = vrot.slane %v6778_v6, %v15510_v28  ;;  %v6777_v51 = vcombine.high %v17409_v35, %v17409_v35  ;;  %v6793_v39 = vcombine.high %v6785_v19, %v6785_v19 }
 0x1c6   :  { %v17436_v8 = vpop.f32.mrb[70].mxu0  ;;  %v6801_v37 = vrot.slane %v6785_v19, %v15510_v28  ;;  %v6842_v11 = vcombine.high %v6834_v36, %v6834_v36  ;;  %v6850_v63 = vrot.slane %v6834_v36, %v15510_v28  ;;  %v5528_v6 = vadd.f32 %v17138_v59, %v16919_v38 }
 0x1c7   :  { %v14966_v41 = vpop.f32.mrb[71].mxu0  ;;  %v6794_v45 = vcombine.high %v6792_v31, %v6792_v31  ;;  %v6808_v2 = vrot.slane %v6792_v31, %v15510_v28  ;;  %v17456_v56 = vrot.slane %v6793_v39, %v15510_v28  ;;  %v5674_v36 = vmax.f32 %v5523_v15, 0.0 }
 0x1c8   :  { %v6841_v41 = vrot.slane %v6827_v4, %v15510_v28  ;;  %v6823_v26 = vcombine.high %v6801_v37, %v6801_v37  ;;  %v11785_v33 = vcombine.low %v17423_v1, %v6801_v37  ;;  %v6872_v39 = vcombine.high %v6850_v63, %v6850_v63 }
 0x1c9   :  { %20357 = vst [vmem:[#allocation98_spill] sm:$0xff] %v17456_v56  ;;  %v6822_v22 = vrot.slane %v6794_v45, %v15510_v28  ;;  %v6824_v42 = vcombine.high %v6808_v2, %v6808_v2  ;;  %v17460_v19 = vcombine.low %v6777_v51, %v6808_v2  ;;  %v14666_v50 = vcombine.high %v6801_v37, %v17456_v56 }
 0x1ca   :  { %v6843_v31 = vcombine.high %v6841_v41, %v6841_v41  ;;  %v17470_v45 = vcombine.low %v17456_v56, %v6823_v26  ;;  %v6857_v51 = vrot.slane %v6841_v41, %v15510_v28  ;;  %v17475_v2 = vrot.slane %v6842_v11, %v15510_v28 }
 0x1cb   :  { %20358 = vst [vmem:[#allocation99_spill] sm:$0xff] %v17460_v19  ;;  %v14575_v4 = vcombine.high %v17259_v61, %v6822_v22  ;;  %v17465_v16 = vcombine.low %v6822_v22, %v6824_v42  ;;  %v17478_v38 = vrot.slane %v11785_v33, %v15510_v28  ;;  %v17491_v41 = vcombine.low %v6630_v52, %v6850_v63 }
 0x1cc   :  { %20360 = vst [vmem:[#allocation101_spill] sm:$0xff] %v17475_v2  ;;  %v6871_v22 = vrot.slane %v6843_v31, %v15510_v28  ;;  %v10027_v37 = vcombine.low %v6850_v63, %v17475_v2  ;;  %v17496_v42 = vrot.slane %v14666_v50, %v15510_v28  ;;  %v17499_v19 = vcombine.low %v17475_v2, %v6872_v39 }
 0x1cd   :  { %20359 = vst [vmem:[#allocation100_spill] sm:$0xff] %v17465_v16  ;;  %v17486_v26 = vrot.slane %v14575_v4, %v15510_v28  ;;  %20362 = vst [vmem:[#allocation103_spill] sm:$0xff] %v17491_v41  ;;  %v6876_v1 = vcombine.high %v5674_v36, %v5674_v36  ;;  %v6883_v56 = vrot.slane %v5674_v36, %v15510_v28  ;;  %v5675_v52 = vmax.f32 %v5528_v6, 0.0 }
 0x1ce   :  { %20363 = vst [vmem:[#allocation104_spill] sm:$0xff] %v17496_v42  ;;  %v14576_v31 = vcombine.high %v6857_v51, %v6871_v22  ;;  %20364 = vst [vmem:[#allocation105_spill] sm:$0xff] %v17499_v19  ;;  %v10608_v4 = vcombine.low %v6857_v51, %v6871_v22  ;;  %v17503_v11 = vrot.slane %v10027_v37, %v15510_v28 }
 0x1cf   :  { %v17483_v15 = vpop.f32.mrb[72].mxu0  ;;  %20361 = vst [vmem:[#allocation102_spill] sm:$0xff] %v17486_v26  ;;  %v6875_v26 = vcombine.high %v6871_v22, %v6871_v22  ;;  %v14509_v50 = vcombine.high %v17386_v43, %v17371_v7  ;;  %v6890_v39 = vrot.slane %v6876_v1, %v15510_v28  ;;  %v6891_v61 = vcombine.high %v6883_v56, %v6883_v56 }
 0x1d0   :  { %v14969_v33 = vpop.f32.mrb[73].mxu0  ;;  %20365 = vst [vmem:[#allocation106_spill] sm:$0xff] %v17503_v11  ;;  %v6899_v51 = vrot.slane %v6883_v56, %v15510_v28  ;;  %v20366_v36 = vcombine.low %v17164_v54, %v17182_v34  ;;  %v6925_v16 = vcombine.high %v5675_v52, %v5675_v52  ;;  %v6932_v63 = vrot.slane %v5675_v52, %v15510_v28 }
 0x1d1   :  { %v20367_v6 = vcombine.high %v17164_v54, %v17311_v18  ;;  %v8333_v19 = vrot.slane %v14509_v50, %v15510_v28  ;;  %v6892_v1 = vcombine.high %v6890_v39, %v6890_v39  ;;  %v17524_v2 = vrot.slane %v6890_v39, %v15510_v28 }
 0x1d2   :  { %v8312_v22 = vrot.slane %v20366_v36, %v15510_v28  ;;  %v6913_v56 = vrot.slane %v6891_v61, %v15510_v28  ;;  %v17527_v14 = vcombine.low %v6875_v26, %v6899_v51  ;;  %v17530_v34 = vrot.slane %v14576_v31, %v15510_v28 }
 0x1d3   :  { %v17509_v33 = vpop.f32.mrb[74].mxu0  ;;  %v8319_v41 = vrot.slane %v20367_v6, %v15510_v28  ;;  %20368 = vst [vmem:[#allocation107_spill] sm:$0xff] %v17524_v2  ;;  %v6939_v52 = vrot.slane %v6925_v16, %v15510_v28  ;;  %v6940_v36 = vcombine.high %v6932_v63, %v6932_v63  ;;  %v17534_v54 = vrot.slane %v10608_v4, %v15510_v28 }
 0x1d4   :  { %v14972_v37 = vpop.f32.mrb[75].mxu0  ;;  %20369 = vst [vmem:[#allocation108_spill] sm:$0xff] %v17527_v14  ;;  %20370 = vst [vmem:[#allocation109_spill] sm:$0xff] %v17530_v34  ;;  %v17537_v50 = vrot.slane %v6892_v1, %v15510_v28  ;;  %v6922_v39 = vcombine.high %v17524_v2, %v17524_v2  ;;  %v14605_v6 = vcombine.high %v6899_v51, %v6913_v56 }
 0x1d5   :  { %v8334_v37 = vcombine.low %v8312_v22, %v8319_v41  ;;  %20371 = vst [vmem:[#allocation110_spill] sm:$0xff] %v17534_v54  ;;  %v6941_v61 = vcombine.high %v6939_v52, %v6939_v52  ;;  %v6948_v26 = vrot.slane %v6932_v63, %v15510_v28  ;;  %v17543_v31 = vrot.slane %v6939_v52, %v15510_v28 }
 0x1d6   :  { %20372 = vst [vmem:[#allocation111_spill] sm:$0xff] %v17537_v50  ;;  %v6962_v16 = vrot.slane %v6940_v36, %v15510_v28  ;;  %v10074_v41 = vcombine.low %v6899_v51, %v17537_v50  ;;  %v11236_v22 = vcombine.low %v6913_v56, %v6922_v39  ;;  %v8335_v1 = vcombine.low %v17399_v30, %v8333_v19 }
 0x1d7   :  { %20373 = vst [vmem:[#allocation112_spill] sm:$0xff] %v17543_v31  ;;  %v6924_v63 = vcombine.high %v17537_v50, %v17537_v50  ;;  %v17557_v52 = vrot.slane %v6941_v61, %v15510_v28  ;;  %v17564_v4 = vrot.slane %v14605_v6, %v15510_v28  ;;  %v6971_v30 = vcombine.high %v17543_v31, %v17543_v31 }
 0x1d8   :  { %v10655_v36 = vcombine.low %v17524_v2, %v6962_v16  ;;  %v17561_v51 = vrot.slane %v10074_v41, %v15510_v28  ;;  %v14606_v19 = vcombine.high %v6948_v26, %v6962_v16  ;;  %v11246_v56 = vrot.slane %v11236_v22, %v15510_v28 }
 0x1d9   :  { %v17546_v11 = vpop.f32.mrb[76].mxu0  ;;  %20374 = vst [vmem:[#allocation113_spill] sm:$0xff] %v17557_v52  ;;  %20376 = vst [vmem:[#allocation115_spill] sm:$0xff] %v17564_v4  ;;  %v8342_v61 = vrot.slane %v8334_v37, %v15510_v28  ;;  %v11237_v34 = vcombine.low %v6924_v63, %v6948_v26  ;;  %v8349_v6 = vrot.slane %v8335_v1, %v15510_v28 }
 0x1da   :  { %v14975_v54 = vpop.f32.mrb[77].mxu0  ;;  %20375 = vst [vmem:[#allocation114_spill] sm:$0xff] %v17561_v51  ;;  %v17572_v39 = vrot.slane %v10655_v36, %v15510_v28  ;;  %v17576_v41 = vrot.slane %v14606_v19, %v15510_v28  ;;  %v5533_v14 = vadd.f32 %v17138_v59, %v16985_v24  ;;  %v20379_v16 = vcombine.high %v17362_v32, %v17362_v32 }
 0x1db   :  { %v11760_v36 = vrot.slane %v17377_v47, %v15510_v28  ;;  %v20380_v37 = vcombine.low %v17405_v29, %v17413_v5  ;;  %v5538_v26 = vadd.f32 %v17138_v59, %v17017_v21  ;;  %v11253_v24 = vrot.slane %v11237_v34, %v15510_v28 }
 0x1dc   :  { %20377 = vst [vmem:[#allocation116_spill] sm:$0xff] %v17572_v39  ;;  %20378 = vst [vmem:[#allocation117_spill] sm:$0xff] %v17576_v41  ;;  %v9447_v22 = vcombine.low %v20379_v16, %v17386_v43  ;;  %v8350_v63 = vcombine.low %v8342_v61, %v8349_v6  ;;  %v5676_v54 = vmax.f32 %v5533_v14, 0.0  ;;  %v20382_v47 = vrot.slane %v17214_v0, %v15510_v28 }
 0x1dd   :  { %v11767_v19 = vrot.slane %v20380_v37, %v15510_v28  ;;  %v5677_v51 = vmax.f32 %v5538_v26, 0.0  ;;  %v5543_v37 = vadd.f32 %v17138_v59, %v17057_v57  ;;  %v17606_v50 = vcombine.low %v11246_v56, %v11253_v24 }
 0x1de   :  { %v17597_v16 = vrot.slane %v9447_v22, %v15510_v28  ;;  %v11768_v4 = vcombine.low %v20382_v47, %v11760_v36  ;;  %15020 = vmatmul.mubr.msk.f32.gmra.mrb[6].mxu1 %vm8596_vm5, %v8350_v63  ;;  %v6974_v34 = vcombine.high %v5676_v54, %v5676_v54  ;;  %v6981_v14 = vrot.slane %v5676_v54, %v15510_v28 }
 0x1df   :  { %20383 = vst [vmem:[#allocation119_spill] sm:$0xff] %v17606_v50  ;;  %v17613_v6 = vcombine.low %v17557_v52, %v6971_v30  ;;  %v7023_v22 = vcombine.high %v5677_v51, %v5677_v51  ;;  %v7030_v57 = vrot.slane %v5677_v51, %v15510_v28  ;;  %15022 = vmatprep.mubr.msk.f32.mxu1 %vm15403_vm1, %v20271_v55  ;;  %v5678_v54 = vmax.f32 %v5543_v37, 0.0 }
 0x1e0   :  { %20381 = vst [vmem:[#allocation118_spill] sm:$0xff] %v17597_v16  ;;  %v11769_v0 = vcombine.low %v17597_v16, %v11767_v19  ;;  %v6988_v36 = vrot.slane %v6974_v34, %v15510_v28  ;;  %v6989_v26 = vcombine.high %v6981_v14, %v6981_v14  ;;  %v11776_v24 = vrot.slane %v11768_v4, %v15510_v28 }
 0x1e1   :  { %20384 = vst [vmem:[#allocation120_spill] sm:$0xff] %v17613_v6  ;;  %v7037_v30 = vrot.slane %v7023_v22, %v15510_v28  ;;  %v7038_v47 = vcombine.high %v7030_v57, %v7030_v57  ;;  %v17624_v19 = vrot.slane %v7030_v57, %v15510_v28  ;;  %v6997_v51 = vrot.slane %v6981_v14, %v15510_v28 }
 0x1e2   :  { %v17610_v61 = vpop.f32.mrb[78].mxu0  ;;  %v11783_v63 = vrot.slane %v11769_v0, %v15510_v28  ;;  %v6990_v1 = vcombine.high %v6988_v36, %v6988_v36  ;;  %v17628_v21 = vrot.slane %v6989_v26, %v15510_v28  ;;  %v5548_v34 = vadd.f32 %v17138_v59, %v17110_v40 }
 0x1e3   :  { %v14978_v56 = vpop.f32.mrb[79].mxu0  ;;  %20385 = vst [vmem:[#allocation121_spill] sm:$0xff] %v17624_v19  ;;  %v7039_v37 = vcombine.high %v7037_v30, %v7037_v30  ;;  %v17635_v0 = vrot.slane %v7038_v47, %v15510_v28  ;;  %v7072_v22 = vcombine.high %v5678_v54, %v5678_v54  ;;  %v17646_v41 = vrot.slane %v6988_v36, %v15510_v28 }
 0x1e4   :  { %20386 = vst [vmem:[#allocation122_spill] sm:$0xff] %v17628_v21  ;;  %v11784_v4 = vcombine.low %v11776_v24, %v11783_v63  ;;  %v17638_v57 = vrot.slane %v6990_v1, %v15510_v28  ;;  %v7021_v14 = vcombine.high %v17628_v21, %v17628_v21  ;;  %v8353_v26 = vcombine.low %v6997_v51, %v17628_v21 }
 0x1e5   :  { %20387 = vst [vmem:[#allocation123_spill] sm:$0xff] %v17635_v0  ;;  %20389 = vst [vmem:[#allocation125_spill] sm:$0xff] %v17646_v41  ;;  %v17650_v24 = vrot.slane %v7037_v30, %v15510_v28  ;;  %v7068_v1 = vcombine.high %v17624_v19, %v17624_v19  ;;  %v7086_v40 = vrot.slane %v7072_v22, %v15510_v28 }
 0x1e6   :  { %v17632_v56 = vpop.f32.mrb[80].mxu0  ;;  %20388 = vst [vmem:[#allocation124_spill] sm:$0xff] %v17638_v57  ;;  %15206 = vmatmul.mubr.msk.f32.gmra.mrb[104].mxu0 %vm8596_vm5, %v11784_v4  ;;  %v14511_v63 = vcombine.high %v6997_v51, %v17638_v57  ;;  %v7022_v47 = vcombine.high %v17638_v57, %v17638_v57  ;;  %v17667_v30 = vrot.slane %v8353_v26, %v15510_v28  ;;  %v5679_v4 = vmax.f32 %v5548_v34, 0.0 }
 0x1e7   :  { %v14981_v50 = vpop.f32.mrb[81].mxu0  ;;  %15208 = vmatprep.mubr.msk.f32.mxu0 %vm15403_vm1, %v20271_v55  ;;  %v7079_v51 = vrot.slane %v5678_v54, %v15510_v28  ;;  %v5553_v2 = vadd.f32 %v17138_v59, %v17174_v46  ;;  %v7088_v16 = vcombine.high %v7086_v40, %v7086_v40  ;;  %v17687_v54 = vrot.slane %v7086_v40, %v15510_v28 }
 0x1e8   :  { %v17653_v50 = vrot.slane %v7039_v37, %v15510_v28  ;;  %v17670_v37 = vcombine.low %v7021_v14, %v17646_v41  ;;  %v17675_v39 = vrot.slane %v14511_v63, %v15510_v28  ;;  %v17690_v63 = vcombine.low %v17638_v57, %v7068_v1 }
 0x1e9   :  { %v7087_v26 = vcombine.high %v7079_v51, %v7079_v51  ;;  %v17684_v14 = vrot.slane %v7079_v51, %v15510_v28  ;;  %20392 = vst [vmem:[#allocation128_spill] sm:$0xff] %v17687_v54  ;;  %v17693_v5 = vcombine.low %v7022_v47, %v17624_v19  ;;  %v7121_v34 = vcombine.high %v5679_v4, %v5679_v4 }
 0x1ea   :  { %20390 = vst [vmem:[#allocation126_spill] sm:$0xff] %v17653_v50  ;;  %v7071_v36 = vcombine.high %v17653_v50, %v17653_v50  ;;  %v7128_v46 = vrot.slane %v5679_v4, %v15510_v28  ;;  %v17700_v52 = vrot.slane %v7088_v16, %v15510_v28  ;;  %v7118_v40 = vcombine.high %v17687_v54, %v17687_v54 }
 0x1eb   :  { %20391 = vst [vmem:[#allocation127_spill] sm:$0xff] %v17684_v14  ;;  %20393 = vst [vmem:[#allocation129_spill] sm:$0xff] %v17693_v5  ;;  %v17697_v21 = vrot.slane %v7087_v26, %v15510_v28  ;;  %v5680_v51 = vmax.f32 %v5553_v2, 0.0  ;;  %v7117_v4 = vcombine.high %v17684_v14, %v17684_v14  ;;  %v5558_v41 = vadd.f32 %v17138_v59, %v17201_v9 }
 0x1ec   :  { %v17681_v6 = vpop.f32.mrb[82].mxu0  ;;  %v7136_v47 = vcombine.high %v7128_v46, %v7128_v46  ;;  %v7144_v5 = vrot.slane %v7128_v46, %v15510_v28  ;;  %v17715_v31 = vcombine.low %v7071_v36, %v17684_v14  ;;  %v17718_v2 = vcombine.low %v17700_v52, %v7118_v40 }
 0x1ed   :  { %v14984_v22 = vpop.f32.mrb[83].mxu0  ;;  %20394 = vst [vmem:[#allocation130_spill] sm:$0xff] %v17697_v21  ;;  %v7170_v26 = vcombine.high %v5680_v51, %v5680_v51  ;;  %v7177_v42 = vrot.slane %v5680_v51, %v15510_v28  ;;  %v17737_v43 = vcombine.low %v17697_v21, %v7117_v4 }
 0x1ee   :  { %v7135_v22 = vrot.slane %v7121_v34, %v15510_v28  ;;  %20395 = vst [vmem:[#allocation131_spill] sm:$0xff] %v17715_v31  ;;  %20396 = vst [vmem:[#allocation132_spill] sm:$0xff] %v17718_v2  ;;  %v7158_v46 = vrot.slane %v7136_v47, %v15510_v28  ;;  %v7166_v54 = vcombine.high %v7144_v5, %v7144_v5 }
 0x1ef   :  { %v7184_v47 = vrot.slane %v7170_v26, %v15510_v28  ;;  %v7193_v32 = vrot.slane %v7177_v42, %v15510_v28 }
 0x1f0   :  { %v7137_v1 = vcombine.high %v7135_v22, %v7135_v22  ;;  %v17724_v18 = vrot.slane %v7135_v22, %v15510_v28  ;;  %v10076_v31 = vcombine.low %v7144_v5, %v7158_v46  ;;  %v7168_v40 = vcombine.high %v7158_v46, %v7158_v46 }
 0x1f1   :  { %v17732_v57 = vcombine.low %v7158_v46, %v7166_v54  ;;  %v7185_v22 = vcombine.high %v7177_v42, %v7177_v42  ;;  %v7186_v23 = vcombine.high %v7184_v47, %v7184_v47  ;;  %v7215_v54 = vcombine.high %v7193_v32, %v7193_v32 }
 0x1f2   :  { %20397 = vst [vmem:[#allocation133_spill] sm:$0xff] %v17724_v18  ;;  %v7165_v36 = vrot.slane %v7137_v1, %v15510_v28  ;;  %v5681_v1 = vmax.f32 %v5558_v41, 0.0  ;;  %v17746_v26 = vrot.slane %v10076_v31, %v15510_v28  ;;  %v7200_v42 = vrot.slane %v7184_v47, %v15510_v28 }
 0x1f3   :  { %v17727_v16 = vpop.f32.mrb[84].mxu0  ;;  %20398 = vst [vmem:[#allocation134_spill] sm:$0xff] %v17732_v57  ;;  %v17743_v9 = vrot.slane %v7185_v22, %v15510_v28 }
 0x1f4   :  { %v14987_v34 = vpop.f32.mrb[85].mxu0  ;;  %v14578_v51 = vcombine.high %v7144_v5, %v7165_v36  ;;  %v10657_v7 = vcombine.low %v17724_v18, %v7165_v36  ;;  %20400 = vst [vmem:[#allocation136_spill] sm:$0xff] %v17746_v26  ;;  %v7219_v4 = vcombine.high %v5681_v1, %v5681_v1  ;;  %v7214_v5 = vrot.slane %v7186_v23, %v15510_v28 }
 0x1f5   :  { %20399 = vst [vmem:[#allocation135_spill] sm:$0xff] %v17743_v9  ;;  %v17749_v34 = vcombine.low %v7168_v40, %v7193_v32  ;;  %v10123_v41 = vcombine.low %v7193_v32, %v17743_v9  ;;  %v17756_v36 = vcombine.low %v17743_v9, %v7215_v54  ;;  %v7226_v40 = vrot.slane %v5681_v1, %v15510_v28 }
 0x1f6   :  { %v17759_v22 = vrot.slane %v14578_v51, %v15510_v28  ;;  %v17762_v31 = vrot.slane %v10657_v7, %v15510_v28  ;;  %v7233_v47 = vrot.slane %v7219_v4, %v15510_v28  ;;  %v14579_v29 = vcombine.high %v7200_v42, %v7214_v5 }
 0x1f7   :  { %20401 = vst [vmem:[#allocation137_spill] sm:$0xff] %v17749_v34  ;;  %20402 = vst [vmem:[#allocation138_spill] sm:$0xff] %v17756_v36  ;;  %v10704_v23 = vcombine.low %v7200_v42, %v7214_v5  ;;  %v7218_v2 = vcombine.high %v7214_v5, %v7214_v5  ;;  %v20405_v32 = vcombine.low %v17393_v20, %v17409_v35 }
 0x1f8   :  { %20403 = vst [vmem:[#allocation139_spill] sm:$0xff] %v17759_v22  ;;  %20404 = vst [vmem:[#allocation140_spill] sm:$0xff] %v17762_v31  ;;  %v7234_v54 = vcombine.high %v7226_v40, %v7226_v40  ;;  %v7235_v36 = vcombine.high %v7233_v47, %v7233_v47  ;;  %v17771_v51 = vrot.slane %v7226_v40, %v15510_v28 }
 0x1f9   :  { %v8361_v46 = vrot.slane %v20405_v32, %v15510_v28  ;;  %v17774_v7 = vrot.slane %v7233_v47, %v15510_v28  ;;  %v17779_v1 = vrot.slane %v10123_v41, %v15510_v28  ;;  %v17782_v42 = vrot.slane %v14579_v29, %v15510_v28 }
 0x1fa   :  { %20406 = vst [vmem:[#allocation141_spill] sm:$0xff] %v17771_v51  ;;  %v20410_v5 = vcombine.high %v17396_v10, %v17409_v35  ;;  %v17791_v47 = vrot.slane %v7234_v54, %v15510_v28  ;;  %v17794_v31 = vrot.slane %v7235_v36, %v15510_v28  ;;  %v17799_v29 = vcombine.low %v7218_v2, %v17771_v51 }
 0x1fb   :  { %20407 = vst [vmem:[#allocation142_spill] sm:$0xff] %v17774_v7  ;;  %20408 = vst [vmem:[#allocation143_spill] sm:$0xff] %v17779_v1  ;;  %v7265_v41 = vcombine.high %v17774_v7, %v17774_v7  ;;  %v20413_v4 = vcombine.low %v17667_v30, %v17675_v39  ;;  %v11802_v54 = vrot.slane %v17470_v45, %v15510_v28 }
 0x1fc   :  { %v17776_v57 = vpop.f32.mrb[86].mxu0  ;;  %20409 = vst [vmem:[#allocation144_spill] sm:$0xff] %v17782_v42  ;;  %v8368_v40 = vrot.slane %v20410_v5, %v15510_v28  ;;  %20411 = vst [vmem:[#allocation145_spill] sm:$0xff] %v17794_v31  ;;  %v5563_v5 = vadd.f32 %v17138_v59, %v17242_v3  ;;  %v17810_v36 = vrot.slane %v10704_v23, %v15510_v28 }
 0x1fd   :  { %v14990_v32 = vpop.f32.mrb[87].mxu0  ;;  %20412 = vst [vmem:[#allocation146_spill] sm:$0xff] %v17799_v29  ;;  %v8398_v35 = vrot.slane %v20413_v4, %v15510_v28  ;;  %v14608_v2 = vcombine.high %v17771_v51, %v17791_v47  ;;  %v9544_v30 = vcombine.low %v17653_v50, %v7265_v41  ;;  %v11817_v34 = vcombine.low %v17478_v38, %v11802_v54 }
 0x1fe   :  { %v8383_v9 = vcombine.low %v8361_v46, %v8368_v40  ;;  %20414 = vst [vmem:[#allocation147_spill] sm:$0xff] %v17810_v36  ;;  %v11809_v46 = vrot.slane %v17670_v37, %v15510_v28  ;;  %v5682_v23 = vmax.f32 %v5563_v5, 0.0  ;;  %v7267_v32 = vcombine.high %v17794_v31, %v17794_v31 }
 0x1ff   :  { %v11816_v37 = vrot.slane %v17690_v63, %v15510_v28  ;;  %v17835_v41 = vrot.slane %v14608_v2, %v15510_v28  ;;  %v5578_v40 = vadd.f32 %v17138_v59, %v17383_v17  ;;  %v11825_v2 = vrot.slane %v11817_v34, %v15510_v28 }
 0x200   :  { %v17818_v39 = vpop.f32.mrb[88].mxu0  ;;  %v8391_v45 = vrot.slane %v8383_v9, %v15510_v28  ;;  %v7268_v18 = vcombine.high %v5682_v23, %v5682_v23  ;;  %v7275_v3 = vrot.slane %v5682_v23, %v15510_v28  ;;  %v5568_v9 = vadd.f32 %v17138_v59, %v17308_v49 }
 0x201   :  { %v14993_v4 = vpop.f32.mrb[89].mxu0  ;;  %20415 = vst [vmem:[#allocation148_spill] sm:$0xff] %v17835_v41  ;;  %v11818_v5 = vcombine.low %v11809_v46, %v11816_v37  ;;  %v9566_v49 = vrot.slane %v9544_v30, %v15510_v28 }
 0x202   :  { %v8399_v36 = vcombine.low %v8391_v45, %v8398_v35  ;;  %v5573_v4 = vadd.f32 %v17138_v59, %v17333_v58  ;;  %v7282_v35 = vrot.slane %v7268_v18, %v15510_v28  ;;  %v7283_v38 = vcombine.high %v7275_v3, %v7275_v3 }
 0x203   :  { %v7291_v63 = vrot.slane %v7275_v3, %v15510_v28  ;;  %v5683_v54 = vmax.f32 %v5568_v9, 0.0  ;;  %v11832_v46 = vrot.slane %v11818_v5, %v15510_v28  ;;  %v5685_v18 = vmax.f32 %v5578_v40, 0.0 }
 0x204   :  { %15023 = vmatmul.mubr.msk.f32.gmra.mrb[8].mxu1 %vm8596_vm5, %v8399_v36  ;;  %v5684_v45 = vmax.f32 %v5573_v4, 0.0  ;;  %v7305_v17 = vrot.slane %v7283_v38, %v15510_v28  ;;  %v5583_v3 = vadd.f32 %v17138_v59, %v17436_v8  ;;  %v7284_v5 = vcombine.high %v7282_v35, %v7282_v35 }
 0x205   :  { %15025 = vmatprep.mubr.msk.f32.mxu1 %vm15403_vm1, %v20271_v55  ;;  %v9545_v36 = vcombine.low %v7267_v32, %v7291_v63  ;;  %v11833_v37 = vcombine.low %v11825_v2, %v11832_v46  ;;  %v7317_v30 = vcombine.high %v5683_v54, %v5683_v54  ;;  %v7324_v34 = vrot.slane %v5683_v54, %v15510_v28 }
 0x206   :  { %v17849_v58 = vpop.f32.mrb[90].mxu0  ;;  %v7366_v9 = vcombine.high %v5684_v45, %v5684_v45  ;;  %v8402_v4 = vcombine.low %v17684_v14, %v7305_v17  ;;  %v14513_v29 = vcombine.high %v7291_v63, %v7305_v17  ;;  %v7373_v59 = vrot.slane %v5684_v45, %v15510_v28 }
 0x207   :  { %v14996_v23 = vpop.f32.mrb[91].mxu0  ;;  %v9573_v41 = vrot.slane %v9545_v36, %v15510_v28  ;;  %15209 = vmatmul.mubr.msk.f32.gmra.mrb[106].mxu0 %vm8596_vm5, %v11833_v37  ;;  %v7331_v32 = vrot.slane %v7317_v30, %v15510_v28  ;;  %v7332_v40 = vcombine.high %v7324_v34, %v7324_v34  ;;  %v17860_v38 = vrot.slane %v7324_v34, %v15510_v28 }
 0x208   :  { %v17864_v8 = vrot.slane %v8402_v4, %v15510_v28  ;;  %v17867_v54 = vrot.slane %v14513_v29, %v15510_v28  ;;  %v7380_v63 = vrot.slane %v7366_v9, %v15510_v28  ;;  %15211 = vmatprep.mubr.msk.f32.mxu0 %vm15403_vm1, %v20271_v55  ;;  %v17875_v46 = vrot.slane %v7282_v35, %v15510_v28 }
 0x209   :  { %v17869_v2 = vcombine.low %v9566_v49, %v9573_v41  ;;  %v7333_v17 = vcombine.high %v7331_v32, %v7331_v32  ;;  %v17878_v36 = vrot.slane %v7332_v40, %v15510_v28  ;;  %v7362_v45 = vcombine.high %v17860_v38, %v17860_v38 }
 0x20a   :  { %v20417_v41 = vcombine.high %v17700_v52, %v17700_v52  ;;  %v7381_v23 = vcombine.high %v7373_v59, %v7373_v59  ;;  %v7382_v37 = vcombine.high %v7380_v63, %v7380_v63  ;;  %v17891_v35 = vrot.slane %v7284_v5, %v15510_v28 }
 0x20b   :  { %20416 = vst [vmem:[#allocation149_spill] sm:$0xff] %v17869_v2  ;;  %v17894_v30 = vrot.slane %v7331_v32, %v15510_v28  ;;  %v17897_v34 = vrot.slane %v7333_v17, %v15510_v28  ;;  %v17904_v52 = vcombine.low %v17878_v36, %v7362_v45  ;;  %v7389_v40 = vrot.slane %v7373_v59, %v15510_v28 }
 0x20c   :  { %v17888_v49 = vcombine.low %v20417_v41, %v17860_v38  ;;  %v7396_v41 = vrot.slane %v7380_v63, %v15510_v28  ;;  %v17909_v5 = vrot.slane %v7381_v23, %v15510_v28  ;;  %v7410_v9 = vrot.slane %v7382_v37, %v15510_v28 }
 0x20d   :  { %20419 = vst [vmem:[#allocation151_spill] sm:$0xff] %v17904_v52  ;;  %v7365_v29 = vcombine.high %v17897_v34, %v17897_v34  ;;  %v7411_v1 = vcombine.high %v7389_v40, %v7389_v40 }
 0x20e   :  { %20418 = vst [vmem:[#allocation150_spill] sm:$0xff] %v17888_v49  ;;  %v17901_v4 = vpop.f32.mrb[92].mxu0  ;;  %20420 = vst [vmem:[#allocation152_spill] sm:$0xff] %v17909_v5  ;;  %v7415_v49 = vcombine.high %v5685_v18, %v5685_v18  ;;  %v7412_v45 = vcombine.high %v7396_v41, %v7396_v41  ;;  %v7413_v59 = vcombine.high %v17909_v5, %v17909_v5 }
 0x20f   :  { %v14999_v32 = vpop.f32.mrb[93].mxu0  ;;  %v8451_v63 = vcombine.low %v7389_v40, %v17909_v5  ;;  %v17923_v17 = vcombine.low %v7365_v29, %v7389_v40  ;;  %v12974_v52 = vcombine.low %v7396_v41, %v7410_v9  ;;  %v7414_v42 = vcombine.high %v7410_v9, %v7410_v9 }
 0x210   :  { %v17929_v26 = vcombine.low %v17909_v5, %v7412_v45  ;;  %v17934_v2 = vcombine.low %v17897_v34, %v7411_v1  ;;  %v17936_v23 = vcombine.low %v7413_v59, %v7396_v41  ;;  %v7422_v32 = vrot.slane %v5685_v18, %v15510_v28 }
 0x211   :  { %20421 = vst [vmem:[#allocation153_spill] sm:$0xff] %v17923_v17  ;;  %v17926_v37 = vrot.slane %v8451_v63, %v15510_v28  ;;  %v7429_v29 = vrot.slane %v7415_v49, %v15510_v28  ;;  %v17943_v40 = vrot.slane %v12974_v52, %v15510_v28  ;;  %v5686_v45 = vmax.f32 %v5583_v3, 0.0  ;;  %v17948_v63 = vld [vmem:[%s20080_s2] ss:$0 sm:$0xff] }
 0x212   :  { %20422 = vst [vmem:[#allocation154_spill] sm:$0xff] %v17929_v26  ;;  %v5588_v1 = vadd.f32 %v17948_v63, %v17483_v15  ;;  %v7430_v41 = vcombine.high %v7422_v32, %v7422_v32  ;;  %v7438_v18 = vrot.slane %v7422_v32, %v15510_v28  ;;  %v14512_v49 = vcombine.high %v17650_v24, %v17653_v50 }
 0x213   :  { %20423 = vst [vmem:[#allocation155_spill] sm:$0xff] %v17943_v40  ;;  %v7431_v59 = vcombine.high %v7429_v29, %v7429_v29  ;;  %v7445_v9 = vrot.slane %v7429_v29, %v15510_v28  ;;  %v7464_v52 = vcombine.high %v5686_v45, %v5686_v45  ;;  %v7471_v3 = vrot.slane %v5686_v45, %v15510_v28 }
 0x214   :  { %v5687_v22 = vmax.f32 %v5588_v1, 0.0  ;;  %v17958_v17 = vrot.slane %v7430_v41, %v15510_v28  ;;  %v7460_v31 = vcombine.high %v7438_v18, %v7438_v18  ;;  %v17961_v15 = vcombine.low %v7414_v42, %v7438_v18 }
 0x215   :  { %v7459_v26 = vrot.slane %v7431_v59, %v15510_v28  ;;  %v7478_v40 = vrot.slane %v7464_v52, %v15510_v28  ;;  %v7479_v32 = vcombine.high %v7471_v3, %v7471_v3  ;;  %v7487_v5 = vrot.slane %v7471_v3, %v15510_v28 }
 0x216   :  { %20424 = vst [vmem:[#allocation156_spill] sm:$0xff] %v17958_v17  ;;  %20425 = vst [vmem:[#allocation157_spill] sm:$0xff] %v17961_v15  ;;  %v7513_v14 = vcombine.high %v5687_v22, %v5687_v22  ;;  %v7462_v29 = vcombine.high %v17958_v17, %v17958_v17  ;;  %v14580_v1 = vcombine.high %v7438_v18, %v17958_v17 }
 0x217   :  { %v10706_v41 = vcombine.low %v17774_v7, %v7459_v26  ;;  %v14609_v59 = vcombine.high %v7445_v9, %v7459_v26  ;;  %v17972_v42 = vcombine.low %v17791_v47, %v7460_v31  ;;  %v7480_v50 = vcombine.high %v7478_v40, %v7478_v40 }
 0x218   :  { %v8417_v52 = vrot.slane %v14512_v49, %v15510_v28  ;;  %v17976_v3 = vrot.slane %v14580_v1, %v15510_v28  ;;  %v17978_v10 = vcombine.low %v7462_v29, %v7445_v9  ;;  %v20429_v18 = vcombine.low %v17624_v19, %v17635_v0 }
 0x219   :  { %20426 = vst [vmem:[#allocation158_spill] sm:$0xff] %v17972_v42  ;;  %v17987_v26 = vrot.slane %v10706_v41, %v15510_v28  ;;  %v7501_v31 = vrot.slane %v7479_v32, %v15510_v28  ;;  %v7508_v47 = vrot.slane %v7480_v50, %v15510_v28  ;;  %v7509_v49 = vcombine.high %v7487_v5, %v7487_v5 }
 0x21a   :  { %20427 = vst [vmem:[#allocation159_spill] sm:$0xff] %v17976_v3  ;;  %20428 = vst [vmem:[#allocation160_spill] sm:$0xff] %v17978_v10  ;;  %v8410_v45 = vrot.slane %v20429_v18, %v15510_v28  ;;  %v17992_v1 = vrot.slane %v14609_v59, %v15510_v28  ;;  %v17995_v9 = vrot.slane %v7478_v40, %v15510_v28 }
 0x21b   :  { %20430 = vst [vmem:[#allocation161_spill] sm:$0xff] %v17987_v26  ;;  %v7520_v29 = vrot.slane %v5687_v22, %v15510_v28  ;;  %v7527_v20 = vrot.slane %v7513_v14, %v15510_v28  ;;  %v10172_v41 = vcombine.low %v7487_v5, %v7501_v31  ;;  %v18001_v15 = vcombine.low %v7501_v31, %v7509_v49 }
 0x21c   :  { %20431 = vst [vmem:[#allocation162_spill] sm:$0xff] %v17992_v1  ;;  %20432 = vst [vmem:[#allocation163_spill] sm:$0xff] %v17995_v9  ;;  %v8432_v32 = vcombine.low %v8410_v45, %v8417_v52  ;;  %v7511_v42 = vcombine.high %v7501_v31, %v7501_v31  ;;  %v14581_v1 = vcombine.high %v7487_v5, %v7508_v47 }
 0x21d   :  { %20433 = vst [vmem:[#allocation164_spill] sm:$0xff] %v18001_v15  ;;  %v7528_v50 = vcombine.high %v7520_v29, %v7520_v29  ;;  %v7529_v26 = vcombine.high %v7527_v20, %v7527_v20  ;;  %v7536_v59 = vrot.slane %v7520_v29, %v15510_v28  ;;  %v18005_v40 = vrot.slane %v10172_v41, %v15510_v28 }
 0x21e   :  { %v10753_v22 = vcombine.low %v17995_v9, %v7508_v47  ;;  %v7543_v14 = vrot.slane %v7527_v20, %v15510_v28  ;;  %v8440_v52 = vrot.slane %v8432_v32, %v15510_v28  ;;  %v20437_v5 = vcombine.low %v17864_v8, %v17867_v54 }
 0x21f   :  { %20434 = vst [vmem:[#allocation165_spill] sm:$0xff] %v18005_v40  ;;  %v18010_v3 = vrot.slane %v7528_v50, %v15510_v28  ;;  %v7557_v49 = vrot.slane %v7529_v26, %v15510_v28  ;;  %v7558_v18 = vcombine.high %v7536_v59, %v7536_v59  ;;  %v18013_v45 = vcombine.low %v7511_v42, %v7536_v59 }
 0x220   :  { %v8447_v31 = vrot.slane %v20437_v5, %v15510_v28  ;;  %v7070_v47 = vcombine.high %v17635_v0, %v17635_v0  ;;  %v7314_v20 = vcombine.high %v17875_v46, %v17875_v46  ;;  %v18028_v32 = vrot.slane %v14581_v1, %v15510_v28 }
 0x221   :  { %20435 = vst [vmem:[#allocation166_spill] sm:$0xff] %v18010_v3  ;;  %20436 = vst [vmem:[#allocation167_spill] sm:$0xff] %v18013_v45  ;;  %v14542_v29 = vcombine.high %v7543_v14, %v7557_v49  ;;  %v10174_v41 = vcombine.low %v7536_v59, %v18010_v3  ;;  %v10755_v26 = vcombine.low %v7543_v14, %v7557_v49 }
 0x222   :  { %20438 = vst [vmem:[#allocation168_spill] sm:$0xff] %v18028_v32  ;;  %v18031_v50 = vcombine.low %v18010_v3, %v7558_v18  ;;  %v8448_v8 = vcombine.low %v8440_v52, %v8447_v31  ;;  %v9543_v54 = vcombine.low %v7070_v47, %v17650_v24  ;;  %v18035_v5 = vrot.slane %v10753_v22, %v15510_v28 }
 0x223   :  { %v18038_v15 = vrot.slane %v14542_v29, %v15510_v28  ;;  %v9591_v14 = vcombine.low %v17891_v35, %v7314_v20  ;;  %v20443_v18 = vcombine.high %v17697_v21, %v17697_v21  ;;  %v11842_v22 = vrot.slane %v17737_v43, %v15510_v28 }
 0x224   :  { %20439 = vst [vmem:[#allocation169_spill] sm:$0xff] %v18031_v50  ;;  %20440 = vst [vmem:[#allocation170_spill] sm:$0xff] %v18035_v5  ;;  %15026 = vmatmul.mubr.msk.f32.gmra.mrb[10].mxu1 %vm8596_vm5, %v8448_v8  ;;  %v18045_v1 = vrot.slane %v9543_v54, %v15510_v28  ;;  %v5593_v31 = vadd.f32 %v17948_v63, %v17509_v33  ;;  %v18056_v47 = vrot.slane %v10174_v41, %v15510_v28 }
 0x225   :  { %20441 = vst [vmem:[#allocation171_spill] sm:$0xff] %v18038_v15  ;;  %v11835_v52 = vcombine.low %v20443_v18, %v17875_v46  ;;  %v18059_v20 = vrot.slane %v9591_v14, %v15510_v28  ;;  %v5598_v29 = vadd.f32 %v17948_v63, %v17546_v11  ;;  %v5603_v8 = vadd.f32 %v17948_v63, %v17610_v61 }
 0x226   :  { %20442 = vst [vmem:[#allocation172_spill] sm:$0xff] %v18045_v1  ;;  %20444 = vst [vmem:[#allocation173_spill] sm:$0xff] %v18056_v47  ;;  %15028 = vmatprep.mubr.msk.f32.mxu1 %vm15403_vm1, %v20271_v55  ;;  %v18068_v43 = vrot.slane %v10755_v26, %v15510_v28  ;;  %v11850_v41 = vcombine.low %v18045_v1, %v11842_v22  ;;  %v5688_v54 = vmax.f32 %v5593_v31, 0.0 }
 0x227   :  { %20445 = vst [vmem:[#allocation174_spill] sm:$0xff] %v18059_v20  ;;  %v11849_v33 = vrot.slane %v11835_v52, %v15510_v28  ;;  %v7561_v18 = vcombine.high %v7557_v49, %v7557_v49  ;;  %v5689_v14 = vmax.f32 %v5598_v29, 0.0  ;;  %v5690_v59 = vmax.f32 %v5603_v8, 0.0 }
 0x228   :  { %20446 = vst [vmem:[#allocation175_spill] sm:$0xff] %v18068_v43  ;;  %v5608_v11 = vadd.f32 %v17948_v63, %v17632_v56  ;;  %v7562_v61 = vcombine.high %v5688_v54, %v5688_v54  ;;  %v7569_v45 = vrot.slane %v5688_v54, %v15510_v28  ;;  %v5613_v26 = vadd.f32 %v17948_v63, %v17681_v6 }
 0x229   :  { %v11851_v42 = vcombine.low %v11849_v33, %v18059_v20  ;;  %v11858_v50 = vrot.slane %v11850_v41, %v15510_v28  ;;  %v7611_v52 = vcombine.high %v5689_v14, %v5689_v14  ;;  %v7618_v22 = vrot.slane %v5689_v14, %v15510_v28 }
 0x22a   :  { %v5618_v49 = vadd.f32 %v17948_v63, %v17727_v16  ;;  %v7576_v56 = vrot.slane %v7562_v61, %v15510_v28  ;;  %v7577_v29 = vcombine.high %v7569_v45, %v7569_v45  ;;  %v7660_v8 = vcombine.high %v5690_v59, %v5690_v59 }
 0x22b   :  { %v11865_v31 = vrot.slane %v11851_v42, %v15510_v28  ;;  %v7585_v33 = vrot.slane %v7569_v45, %v15510_v28  ;;  %v7625_v54 = vrot.slane %v7611_v52, %v15510_v28  ;;  %v7626_v10 = vcombine.high %v7618_v22, %v7618_v22 }
 0x22c   :  { %v18087_v6 = vrot.slane %v7618_v22, %v15510_v28  ;;  %v7578_v5 = vcombine.high %v7576_v56, %v7576_v56  ;;  %v18090_v14 = vrot.slane %v7576_v56, %v15510_v28  ;;  %v7599_v16 = vrot.slane %v7577_v29, %v15510_v28 }
 0x22d   :  { %v11866_v41 = vcombine.low %v11858_v50, %v11865_v31  ;;  %v18093_v42 = vcombine.low %v7561_v18, %v7585_v33  ;;  %v7627_v61 = vcombine.high %v7625_v54, %v7625_v54  ;;  %v18096_v43 = vrot.slane %v7626_v10, %v15510_v28 }
 0x22e   :  { %v7667_v45 = vrot.slane %v5690_v59, %v15510_v28  ;;  %v18101_v52 = vrot.slane %v7578_v5, %v15510_v28  ;;  %v18105_v50 = vcombine.high %v18090_v14, %v18090_v14  ;;  %v14515_v22 = vcombine.high %v7585_v33, %v7599_v16 }
 0x22f   :  { %20447 = vst [vmem:[#allocation176_spill] sm:$0xff] %v18093_v42  ;;  %15212 = vmatmul.mubr.msk.f32.gmra.mrb[108].mxu0 %vm8596_vm5, %v11866_v41  ;;  %v7656_v18 = vcombine.high %v18087_v6, %v18087_v6  ;;  %v18110_v31 = vrot.slane %v7625_v54, %v15510_v28  ;;  %v18113_v10 = vrot.slane %v7627_v61, %v15510_v28  ;;  %v5692_v40 = vmax.f32 %v5613_v26, 0.0 }
 0x230   :  { %v7674_v5 = vrot.slane %v7660_v8, %v15510_v28  ;;  %15214 = vmatprep.mubr.msk.f32.mxu0 %vm15403_vm1, %v20271_v55  ;;  %v9068_v56 = vcombine.low %v7585_v33, %v18101_v52  ;;  %v9640_v41 = vcombine.low %v7599_v16, %v18105_v50  ;;  %v18127_v61 = vrot.slane %v14515_v22, %v15510_v28 }
 0x231   :  { %v18133_v8 = vcombine.high %v18101_v52, %v18101_v52  ;;  %v18136_v33 = vcombine.low %v18096_v43, %v7656_v18  ;;  %v7658_v22 = vcombine.high %v18096_v43, %v18096_v43  ;;  %v7675_v54 = vcombine.high %v7667_v45, %v7667_v45 }
 0x232   :  { %v18145_v3 = vrot.slane %v9068_v56, %v15510_v28  ;;  %v7676_v9 = vcombine.high %v7674_v5, %v7674_v5  ;;  %v18150_v18 = vrot.slane %v7667_v45, %v15510_v28  ;;  %v5691_v16 = vmax.f32 %v5608_v11, 0.0 }
 0x233   :  { %20448 = vst [vmem:[#allocation177_spill] sm:$0xff] %v18133_v8  ;;  %20449 = vst [vmem:[#allocation178_spill] sm:$0xff] %v18136_v33  ;;  %v18153_v33 = vrot.slane %v9640_v41, %v15510_v28  ;;  %v18156_v29 = vrot.slane %v7675_v54, %v15510_v28  ;;  %v18159_v32 = vrot.slane %v7674_v5, %v15510_v28  ;;  %v5693_v11 = vmax.f32 %v5618_v49, 0.0 }
 0x234   :  { %20450 = vst [vmem:[#allocation179_spill] sm:$0xff] %v18145_v3  ;;  %v18162_v56 = vrot.slane %v7676_v9, %v15510_v28  ;;  %v7705_v59 = vcombine.high %v18150_v18, %v18150_v18  ;;  %v18167_v45 = vcombine.low %v7658_v22, %v18150_v18  ;;  %v7709_v17 = vcombine.high %v5691_v16, %v5691_v16 }
 0x235   :  { %20451 = vst [vmem:[#allocation180_spill] sm:$0xff] %v18153_v33  ;;  %20452 = vst [vmem:[#allocation181_spill] sm:$0xff] %v18159_v32  ;;  %v7707_v41 = vcombine.high %v18156_v29, %v18156_v29  ;;  %v7716_v54 = vrot.slane %v5691_v16, %v15510_v28  ;;  %v7758_v51 = vcombine.high %v5692_v40, %v5692_v40 }
 0x236   :  { %20453 = vst [vmem:[#allocation182_spill] sm:$0xff] %v18167_v45  ;;  %v18175_v5 = vcombine.low %v18156_v29, %v7705_v59  ;;  %v7708_v9 = vcombine.high %v18162_v56, %v18162_v56  ;;  %v7723_v42 = vrot.slane %v7709_v17, %v15510_v28  ;;  %v7765_v59 = vrot.slane %v5692_v40, %v15510_v28 }
 0x237   :  { %v18182_v45 = vcombine.low %v7707_v41, %v18159_v32  ;;  %v7724_v16 = vcombine.high %v7716_v54, %v7716_v54  ;;  %v7732_v26 = vrot.slane %v7716_v54, %v15510_v28  ;;  %v7807_v22 = vcombine.high %v5693_v11, %v5693_v11 }
 0x238   :  { %20454 = vst [vmem:[#allocation183_spill] sm:$0xff] %v18175_v5  ;;  %v7772_v5 = vrot.slane %v7758_v51, %v15510_v28  ;;  %v7725_v20 = vcombine.high %v7723_v42, %v7723_v42  ;;  %v7814_v41 = vrot.slane %v5693_v11, %v15510_v28  ;;  %v7773_v17 = vcombine.high %v7765_v59, %v7765_v59 }
 0x239   :  { %v18191_v1 = vrot.slane %v7724_v16, %v15510_v28  ;;  %v18194_v33 = vcombine.low %v7708_v9, %v7732_v26  ;;  %v7781_v3 = vrot.slane %v7765_v59, %v15510_v28  ;;  %v18198_v49 = vrot.slane %v7723_v42, %v15510_v28 }
 0x23a   :  { %v7774_v8 = vcombine.high %v7772_v5, %v7772_v5  ;;  %v7753_v40 = vrot.slane %v7725_v20, %v15510_v28  ;;  %v18207_v11 = vrot.slane %v7773_v17, %v15510_v28  ;;  %v7788_v7 = vrot.slane %v7772_v5, %v15510_v28 }
 0x23b   :  { %20455 = vst [vmem:[#allocation184_spill] sm:$0xff] %v18191_v1  ;;  %20456 = vst [vmem:[#allocation185_spill] sm:$0xff] %v18194_v33  ;;  %v7756_v51 = vcombine.high %v18191_v1, %v18191_v1  ;;  %v14582_v54 = vcombine.high %v7732_v26, %v18191_v1  ;;  %v7803_v15 = vcombine.high %v7781_v3, %v7781_v3 }
 0x23c   :  { %20457 = vst [vmem:[#allocation186_spill] sm:$0xff] %v18198_v49  ;;  %20458 = vst [vmem:[#allocation187_spill] sm:$0xff] %v18207_v11  ;;  %v7802_v9 = vrot.slane %v7774_v8, %v15510_v28  ;;  %v14611_v20 = vcombine.high %v18198_v49, %v7753_v40  ;;  %v7821_v26 = vrot.slane %v7807_v22, %v15510_v28 }
 0x23d   :  { %v18213_v42 = vrot.slane %v14582_v54, %v15510_v28  ;;  %v7805_v16 = vcombine.high %v18207_v11, %v18207_v11  ;;  %v14583_v8 = vcombine.high %v7781_v3, %v18207_v11  ;;  %v18230_v22 = vcombine.low %v7753_v40, %v7803_v15 }
 0x23e   :  { %v18210_v59 = vpop.f32.mrb[94].mxu0  ;;  %v10802_v19 = vcombine.low %v7781_v3, %v7802_v9  ;;  %v14612_v32 = vcombine.high %v7788_v7, %v7802_v9  ;;  %v7822_v17 = vcombine.high %v7814_v41, %v7814_v41  ;;  %v8150_v3 = vld [vmem:[%s20081_s3] sm:$0xff]  ;;  %v7823_v40 = vcombine.high %v7821_v26, %v7821_v26 }
 0x23f   :  { %20459 = vst [vmem:[#allocation188_spill] sm:$0xff] %v18210_v59  ;;  %20460 = vst [vmem:[#allocation189_spill] sm:$0xff] %v18213_v42  ;;  %v15002_v1 = vpop.f32.mrb[95].mxu0  ;;  %v18226_v59 = vcombine.low %v7756_v51, %v18198_v49  ;;  %v18235_v21 = vcombine.low %v7805_v16, %v7788_v7  ;;  %v8151_v51 = vld [vmem:[%s20081_s3 + $0x8] sm:$0xff]  ;;  %v18244_v54 = vrot.slane %v14583_v8, %v15510_v28 }
 0x240   :  { %20462 = vst [vmem:[#allocation191_spill] sm:$0xff] %v18230_v22  ;;  %v18233_v1 = vrot.slane %v14611_v20, %v15510_v28  ;;  %v18247_v15 = vrot.slane %v10802_v19, %v15510_v28  ;;  %v18250_v9 = vrot.slane %v7814_v41, %v15510_v28  ;;  %v18253_v7 = vrot.slane %v7821_v26, %v15510_v28 }
 0x241   :  { %20461 = vst [vmem:[#allocation190_spill] sm:$0xff] %v18226_v59  ;;  %20464 = vst [vmem:[#allocation193_spill] sm:$0xff] %v18235_v21  ;;  %v18256_v16 = vrot.slane %v7822_v17, %v15510_v28  ;;  %v20468_v20 = vcombine.low %v17860_v38, %v17878_v36  ;;  %v20469_v19 = vcombine.high %v17860_v38, %v17897_v34 }
 0x242   :  { %20463 = vst [vmem:[#allocation192_spill] sm:$0xff] %v18233_v1  ;;  %20465 = vst [vmem:[#allocation194_spill] sm:$0xff] %v18244_v54  ;;  %v7851_v33 = vrot.slane %v7823_v40, %v15510_v28  ;;  %v7852_v41 = vcombine.high %v18250_v9, %v18250_v9  ;;  %v8482_v26 = vcombine.low %v17926_v37, %v18127_v61 }
 0x243   :  { %20466 = vst [vmem:[#allocation195_spill] sm:$0xff] %v18247_v15  ;;  %20467 = vst [vmem:[#allocation196_spill] sm:$0xff] %v18253_v7  ;;  %v8459_v5 = vrot.slane %v20468_v20, %v15510_v28  ;;  %v8466_v8 = vrot.slane %v20469_v19, %v15510_v28  ;;  %v15307_v17 = vpack.c.bf16 %v8151_v51, %v8150_v3  ;;  %v14659_v51 = vld [vmem:[%s20081_s3 + $0x88] sm:$0xff] }
 0x244   :  { %v18272_v22 = vrot.slane %v14612_v32, %v15510_v28  ;;  %v10223_v20 = vcombine.low %v18250_v9, %v18256_v16  ;;  %v20471_v38 = vcombine.high %v17878_v36, %v17878_v36  ;;  %v14544_v40 = vcombine.high %v18110_v31, %v7851_v33 }
 0x245   :  { %v8481_v59 = vcombine.low %v8459_v5, %v8466_v8  ;;  %v10804_v15 = vcombine.low %v18253_v7, %v7851_v33  ;;  %v18283_v1 = vcombine.low %v18256_v16, %v7852_v41  ;;  %v8496_v37 = vrot.slane %v8482_v26, %v15510_v28  ;;  %15308 = vmatpush3.bf16.msra.mxu1 %v15307_v17  ;;  %v14658_v33 = vld [vmem:[%s20081_s3 + $0x80] sm:$0xff] }
 0x246   :  { %20470 = vst [vmem:[#allocation197_spill] sm:$0xff] %v18272_v22  ;;  %v11867_v19 = vcombine.low %v20471_v38, %v17894_v30  ;;  %v11884_v3 = vrot.slane %v17934_v2, %v15510_v28  ;;  %15309 = vmatprep.subr.bf16.mxu1 %v20264_v44  ;;  %v18306_v26 = vrot.slane %v10223_v20, %v15510_v28 }
 0x247   :  { %20472 = vst [vmem:[#allocation198_spill] sm:$0xff] %v18283_v1  ;;  %v8489_v61 = vrot.slane %v8481_v59, %v15510_v28  ;;  %v11891_v2 = vrot.slane %v17936_v23, %v15510_v28  ;;  %v20476_v17 = vcombine.low %v18101_v52, %v18105_v50  ;;  %v18315_v21 = vrot.slane %v14544_v40, %v15510_v28 }
 0x248   :  { %v11877_v5 = vrot.slane %v11867_v19, %v15510_v28  ;;  %v18299_v8 = vpop.f32.mrb[96].mxu0  ;;  %20475 = vst [vmem:[#allocation201_spill] sm:$0xff] %v18306_v26  ;;  %v5623_v59 = vadd.f32 %v17948_v63, %v17776_v57  ;;  %v15328_v22 = vpack.c.bf16 %v14659_v51, %v14658_v33  ;;  %v12743_v23 = vcombine.low %v16551_v25, %v16585_v53 }
 0x249   :  { %20473 = vst [vmem:[#allocation199_spill] sm:$0xff] %v18299_v8  ;;  %v18301_v41 = vpop.f32.mrb[0].mxu1  ;;  %v11898_v38 = vrot.slane %v20476_v17, %v15510_v28  ;;  %v15005_v19 = vpop.f32.mrb[97].mxu0  ;;  %20477 = vst [vmem:[#allocation202_spill] sm:$0xff] %v18315_v21  ;;  %v20478_v50 = vcombine.low %v16638_v62, %v16641_v27  ;;  %v12760_v57 = vcombine.low %v16614_v12, %v16868_v60  ;;  %v20480_v27 = vld [vmem:[#allocation25_spill] sm:$0xff] }
 0x24a   :  { %20474 = vst [vmem:[#allocation200_spill] sm:$0xff] %v18301_v41  ;;  %v15012_v32 = vpop.f32.mrb[1].mxu1  ;;  %v8497_v41 = vcombine.low %v8489_v61, %v8496_v37  ;;  %v11899_v1 = vcombine.low %v11877_v5, %v11884_v3  ;;  %v5628_v37 = vadd.f32 %v17948_v63, %v17818_v39  ;;  %15329 = vmatpush3.bf16.msra.mxu0 %v15328_v22 }
 0x24b   :  { %v11900_v20 = vcombine.low %v11891_v2, %v11898_v38  ;;  %v12758_v17 = vrot.slane %v20478_v50, %v15510_v28  ;;  %v5694_v32 = vmax.f32 %v5623_v59, 0.0  ;;  %v12751_v5 = vrot.slane %v12743_v23, %v15510_v28 }
 0x24c   :  { %15029 = vmatmul.mubr.msk.f32.gmra.mrb[12].mxu1 %vm8596_vm5, %v8497_v41  ;;  %v11907_v40 = vrot.slane %v11899_v1, %v15510_v28  ;;  %v18331_v61 = vpop.f32.mrb[98].mxu0  ;;  %v14662_v62 = vcombine.high %v16855_v48, %v16868_v60  ;;  %v14663_v1 = vcombine.high %v20480_v27, %v16913_v13  ;;  %v5695_v51 = vmax.f32 %v5628_v37, 0.0 }
 0x24d   :  { %20479 = vst [vmem:[#allocation203_spill] sm:$0xff] %v18331_v61  ;;  %v11914_v53 = vrot.slane %v11900_v20, %v15510_v28  ;;  %v15198_v3 = vpop.f32.mrb[99].mxu0  ;;  %v7856_v33 = vcombine.high %v5694_v32, %v5694_v32  ;;  %v7863_v39 = vrot.slane %v5694_v32, %v15510_v28  ;;  %v12769_v12 = vrot.slane %v12760_v57, %v15510_v28 }
 0x24e   :  { %15031 = vmatprep.mubr.msk.f32.mxu1 %vm15403_vm1, %v20271_v55  ;;  %v12759_v22 = vcombine.low %v12751_v5, %v12758_v17  ;;  %v12776_v59 = vrot.slane %v14662_v62, %v15510_v28  ;;  %v12783_v2 = vrot.slane %v14663_v1, %v15510_v28  ;;  %v7905_v20 = vcombine.high %v5695_v51, %v5695_v51  ;;  %v20483_v1 = vld [vmem:[#allocation48_spill] sm:$0xff] }
 0x24f   :  { %v11915_v41 = vcombine.low %v11907_v40, %v11914_v53  ;;  %v7870_v38 = vrot.slane %v7856_v33, %v15510_v28  ;;  %v7871_v19 = vcombine.high %v7863_v39, %v7863_v39  ;;  %v7879_v13 = vrot.slane %v7863_v39, %v15510_v28 }
 0x250   :  { %v18348_v23 = vrot.slane %v10804_v15, %v15510_v28  ;;  %v7659_v50 = vcombine.high %v18113_v10, %v18113_v10  ;;  %v7912_v17 = vrot.slane %v5695_v51, %v15510_v28  ;;  %v12784_v40 = vcombine.low %v12769_v12, %v12776_v59 }
 0x251   :  { %15215 = vmatmul.mubr.msk.f32.gmra.mrb[110].mxu0 %vm8596_vm5, %v11915_v41  ;;  %v7872_v32 = vcombine.high %v7870_v38, %v7870_v38  ;;  %v18355_v37 = vrot.slane %v7870_v38, %v15510_v28  ;;  %v18358_v57 = vrot.slane %v7871_v19, %v15510_v28  ;;  %v7901_v53 = vcombine.high %v7879_v13, %v7879_v13  ;;  %v20486_v19 = vld [vmem:[#allocation60_spill] sm:$0xff] }
 0x252   :  { %20481 = vst [vmem:[#allocation204_spill] sm:$0xff] %v18348_v23  ;;  %15258 = vmatprep.mubr.msk.f32.mxu0 %vm15403_vm1, %v20271_v55  ;;  %v18362_v15 = vcombine.low %v7659_v50, %v7879_v13  ;;  %v7919_v5 = vrot.slane %v7905_v20, %v15510_v28  ;;  %v7920_v62 = vcombine.high %v7912_v17, %v7912_v17  ;;  %v20487_v20 = vld [vmem:[#allocation52_spill] sm:$0xff] }
 0x253   :  { %v12785_v3 = vcombine.low %v20483_v1, %v12783_v2  ;;  %v18367_v33 = vrot.slane %v7872_v32, %v15510_v28  ;;  %v7902_v39 = vcombine.high %v18355_v37, %v18355_v37  ;;  %v5633_v12 = vadd.f32 %v17948_v63, %v17849_v58 }
 0x254   :  { %20482 = vst [vmem:[#allocation205_spill] sm:$0xff] %v18362_v15  ;;  %v9117_v41 = vcombine.low %v7879_v13, %v18358_v57  ;;  %v18377_v59 = vcombine.low %v18358_v57, %v7901_v53  ;;  %v7921_v2 = vcombine.high %v7919_v5, %v7919_v5  ;;  %v18381_v38 = vrot.slane %v7919_v5, %v15510_v28 }
 0x255   :  { %15259 = vmatmul.mubr.msk.f32.vlgmr.msra.gmra.mrb[112].mxu0 %vm8596_vm5, %v12759_v22  ;;  %v18390_v13 = vrot.slane %v7912_v17, %v15510_v28  ;;  %v11918_v22 = vcombine.low %v18162_v56, %v7902_v39  ;;  %v18396_v50 = vrot.slane %v7920_v62, %v15510_v28  ;;  %v12792_v5 = vrot.slane %v12784_v40, %v15510_v28  ;;  %v20492_v40 = vld [vmem:[#allocation59_spill] sm:$0xff] }
 0x256   :  { %20484 = vst [vmem:[#allocation48_spill] sm:$0xff] %v18377_v59  ;;  %15261 = vmatprep.mubr.msk.f32.mxu0 %vm15403_vm1, %v20271_v55  ;;  %v18399_v32 = vrot.slane %v7921_v2, %v15510_v28  ;;  %v18403_v53 = vcombine.high %v18381_v38, %v18381_v38  ;;  %v12799_v17 = vrot.slane %v12785_v3, %v15510_v28  ;;  %v5696_v58 = vmax.f32 %v5633_v12, 0.0  ;;  %v20493_v12 = vld [vmem:[#allocation58_spill] sm:$0xff] }
 0x257   :  { %v12802_v51 = vcombine.low %v20487_v20, %v20486_v19  ;;  %v18412_v62 = vrot.slane %v9117_v41, %v15510_v28  ;;  %v11939_v2 = vrot.slane %v11918_v22, %v15510_v28  ;;  %v7952_v61 = vcombine.high %v18396_v50, %v18396_v50 }
 0x258   :  { %20485 = vst [vmem:[#allocation206_spill] sm:$0xff] %v18403_v53  ;;  %v12800_v23 = vcombine.low %v12792_v5, %v12799_v17  ;;  %v20489_v39 = vrot.slane %v18182_v45, %v15510_v28  ;;  %v7954_v54 = vcombine.high %v5696_v58, %v5696_v58  ;;  %v7961_v26 = vrot.slane %v5696_v58, %v15510_v28  ;;  %v20494_v5 = vld [vmem:[#allocation34_spill] sm:$0xff]  ;;  %v20500_v53 = vld [vmem:[#allocation89_spill] sm:$0xff] }
 0x259   :  { %20488 = vst [vmem:[#allocation60_spill] sm:$0xff] %v18412_v62  ;;  %v18429_v22 = vcombine.low %v7952_v61, %v18381_v38  ;;  %v14664_v3 = vcombine.high %v20492_v40, %v20486_v19  ;;  %v12817_v11 = vrot.slane %v12802_v51, %v15510_v28  ;;  %v12825_v17 = vcombine.low %v20494_v5, %v20493_v12 }
 0x25a   :  { %v18426_v41 = vcombine.low %v20489_v39, %v11939_v2  ;;  %15262 = vmatmul.mubr.msk.f32.gmra.mrb[114].mxu0 %vm8596_vm5, %v12800_v23  ;;  %v5638_v45 = vadd.f32 %v17948_v63, %v17901_v4  ;;  %v7968_v39 = vrot.slane %v7954_v54, %v15510_v28  ;;  %v7969_v2 = vcombine.high %v7961_v26, %v7961_v26  ;;  %v20496_v4 = vld [vmem:[#allocation90_spill] sm:$0xff]  ;;  %v20497_v63 = vld [vmem:[#allocation93_spill] sm:$0xff] }
 0x25b   :  { %20491 = vst [vmem:[#allocation208_spill] sm:$0xff] %v18429_v22  ;;  %v18444_v58 = vrot.slane %v7961_v26, %v15510_v28  ;;  %15264 = vmatprep.mubr.msk.f32.mxu0 %vm15403_vm1, %v20271_v55  ;;  %v18450_v23 = vcombine.high %v18399_v32, %v18399_v32  ;;  %v12824_v51 = vrot.slane %v14664_v3, %v15510_v28 }
 0x25c   :  { %20490 = vst [vmem:[#allocation207_spill] sm:$0xff] %v18426_v41  ;;  %v5697_v5 = vmax.f32 %v5638_v45, 0.0  ;;  %v20498_v61 = vcombine.high %v20496_v4, %v20497_v63  ;;  %v7970_v54 = vcombine.high %v7968_v39, %v7968_v39  ;;  %v18460_v26 = vrot.slane %v7968_v39, %v15510_v28 }
 0x25d   :  { %20495 = vst [vmem:[#allocation59_spill] sm:$0xff] %v18450_v23  ;;  %v18463_v41 = vrot.slane %v7969_v2, %v15510_v28  ;;  %v7999_v49 = vcombine.high %v18444_v58, %v18444_v58  ;;  %v12826_v42 = vcombine.low %v12817_v11, %v12824_v51  ;;  %v12833_v3 = vrot.slane %v12825_v17, %v15510_v28  ;;  %v20499_v2 = vld [vmem:[#allocation88_spill] sm:$0xff] }
 0x25e   :  { %v18457_v22 = vrot.slane %v20498_v61, %v15510_v28  ;;  %v8003_v45 = vcombine.high %v5697_v5, %v5697_v5  ;;  %v8010_v47 = vrot.slane %v5697_v5, %v15510_v28  ;;  %v18470_v4 = vrot.slane %v7970_v54, %v15510_v28  ;;  %v20506_v23 = vld [vmem:[#allocation124_spill] sm:$0xff] }
 0x25f   :  { %v8000_v61 = vcombine.high %v18460_v26, %v18460_v26  ;;  %v12844_v15 = vcombine.low %v20500_v53, %v20499_v2  ;;  %v18481_v17 = vcombine.low %v18463_v41, %v7999_v49  ;;  %v12840_v51 = vrot.slane %v12826_v42, %v15510_v28  ;;  %v20503_v42 = vld [vmem:[#allocation61_spill] sm:$0xff] }
 0x260   :  { %v8001_v5 = vcombine.high %v18463_v41, %v18463_v41  ;;  %v8017_v2 = vrot.slane %v8003_v45, %v15510_v28  ;;  %v8018_v20 = vcombine.high %v8010_v47, %v8010_v47  ;;  %v8026_v49 = vrot.slane %v8010_v47, %v15510_v28 }
 0x261   :  { %20501 = vst [vmem:[#allocation58_spill] sm:$0xff] %v18481_v17  ;;  %v18491_v59 = vcombine.low %v18470_v4, %v8000_v61  ;;  %v12841_v11 = vcombine.low %v12833_v3, %v12840_v51  ;;  %v20504_v17 = vld [vmem:[#allocation87_spill] sm:$0xff]  ;;  %v12865_v39 = vrot.slane %v12844_v15, %v15510_v28  ;;  %v20507_v61 = vld [vmem:[#allocation125_spill] sm:$0xff]  ;;  %v20508_v51 = vld [vmem:[#allocation68_spill] sm:$0xff]  ;;  %v20509_v15 = vcombine.high %v18256_v16, %v18256_v16 }
 0x262   :  { %v20505_v27 = vcombine.high %v20503_v42, %v20504_v17  ;;  %v8019_v21 = vcombine.high %v8017_v2, %v8017_v2  ;;  %v18500_v54 = vrot.slane %v8017_v2, %v15510_v28  ;;  %v18507_v3 = vrot.slane %v8018_v20, %v15510_v28  ;;  %v20512_v16 = vld [vmem:[#allocation91_spill] sm:$0xff] }
 0x263   :  { %20502 = vst [vmem:[#allocation34_spill] sm:$0xff] %v18491_v59  ;;  %v8970_v59 = vcombine.low %v20507_v61, %v20506_v23  ;;  %15265 = vmatmul.mubr.msk.f32.gmra.mrb[116].mxu0 %vm8596_vm5, %v12841_v11  ;;  %v8048_v47 = vcombine.high %v8026_v49, %v8026_v49  ;;  %v12532_v45 = vcombine.low %v8001_v5, %v8026_v49 }
 0x264   :  { %v12858_v8 = vrot.slane %v20505_v27, %v15510_v28  ;;  %v18511_v27 = vrot.slane %v8019_v21, %v15510_v28  ;;  %v8049_v2 = vcombine.high %v18500_v54, %v18500_v54  ;;  %v18519_v17 = vcombine.low %v20509_v15, %v18500_v54  ;;  %15267 = vmatprep.mubr.msk.f32.mxu0 %vm15403_vm1, %v20271_v55 }
 0x265   :  { %v12867_v20 = vcombine.low %v12865_v39, %v18457_v22  ;;  %v12533_v5 = vcombine.low %v18507_v3, %v8048_v47  ;;  %v18541_v21 = vrot.slane %v8970_v59, %v15510_v28  ;;  %v14667_v47 = vcombine.high %v20507_v61, %v17635_v0 }
 0x266   :  { %v12866_v62 = vcombine.low %v20508_v51, %v12858_v8  ;;  %20510 = vst [vmem:[#allocation90_spill] sm:$0xff] %v18519_v17  ;;  %v18534_v49 = vcombine.low %v18511_v27, %v8049_v2  ;;  %v12554_v51 = vrot.slane %v12532_v45, %v15510_v28  ;;  %v20513_v8 = vld [vmem:[#allocation98_spill] sm:$0xff]  ;;  %v20516_v45 = vcombine.high %v18087_v6, %v18096_v43 }
 0x267   :  { %v12881_v39 = vrot.slane %v12867_v20, %v15510_v28  ;;  %v12561_v15 = vrot.slane %v12533_v5, %v15510_v28  ;;  %v20514_v2 = vcombine.low %v20512_v16, %v20513_v8  ;;  %v20519_v8 = vcombine.low %v18150_v18, %v18156_v29 }
 0x268   :  { %20511 = vst [vmem:[#allocation93_spill] sm:$0xff] %v18534_v49  ;;  %v12874_v42 = vrot.slane %v12866_v62, %v15510_v28  ;;  %v20515_v62 = vcombine.low %v18090_v14, %v18096_v43  ;;  %v8515_v59 = vrot.slane %v20516_v45, %v15510_v28  ;;  %v20521_v43 = vld [vmem:[#allocation104_spill] sm:$0xff] }
 0x269   :  { %v12892_v49 = vrot.slane %v20514_v2, %v15510_v28  ;;  %v18559_v17 = vcombine.low %v12554_v51, %v12561_v15  ;;  %v20520_v2 = vcombine.high %v18150_v18, %v18358_v57  ;;  %v20522_v51 = vld [vmem:[#allocation126_spill] sm:$0xff]  ;;  %v14669_v18 = vcombine.high %v17875_v46, %v17891_v35 }
 0x26a   :  { %v12882_v11 = vcombine.low %v12874_v42, %v12881_v39  ;;  %v8508_v20 = vrot.slane %v20515_v62, %v15510_v28  ;;  %v12906_v42 = vrot.slane %v14667_v47, %v15510_v28  ;;  %v8522_v39 = vrot.slane %v20519_v8, %v15510_v28  ;;  %v20523_v47 = vld [vmem:[#allocation128_spill] sm:$0xff]  ;;  %v20525_v57 = vld [vmem:[#allocation130_spill] sm:$0xff] }
 0x26b   :  { %20518 = vst [vmem:[#allocation61_spill] sm:$0xff] %v18559_v17  ;;  %v8529_v62 = vrot.slane %v20520_v2, %v15510_v28  ;;  %v12907_v45 = vcombine.low %v12892_v49, %v20521_v43  ;;  %v12924_v15 = vcombine.low %v17650_v24, %v20522_v51  ;;  %v12926_v17 = vcombine.low %v20523_v47, %v17891_v35 }
 0x26c   :  { %v18557_v5 = vpop.f32.mrb[2].mxu1  ;;  %15268 = vmatmul.mubr.msk.f32.gmra.mrb[118].mxu0 %vm8596_vm5, %v12882_v11  ;;  %v12908_v29 = vcombine.low %v18541_v21, %v12906_v42 }
 0x26d   :  { %20517 = vst [vmem:[#allocation89_spill] sm:$0xff] %v18557_v5  ;;  %v15015_v7 = vpop.f32.mrb[3].mxu1  ;;  %v8530_v5 = vcombine.low %v8508_v20, %v8515_v59  ;;  %15270 = vmatprep.mubr.msk.f32.mxu0 %vm15403_vm1, %v20271_v55  ;;  %v8531_v8 = vcombine.low %v8522_v39, %v8529_v62  ;;  %v12915_v20 = vrot.slane %v12907_v45, %v15510_v28 }
 0x26e   :  { %v20524_v7 = vld [vmem:[#allocation127_spill] sm:$0xff]  ;;  %v12934_v2 = vrot.slane %v12924_v15, %v15510_v28  ;;  %v12948_v43 = vrot.slane %v12926_v17, %v15510_v28  ;;  %v12922_v51 = vrot.slane %v12908_v29, %v15510_v28  ;;  %v12955_v39 = vrot.slane %v14669_v18, %v15510_v28 }
 0x26f   :  { %v20526_v11 = vcombine.high %v20524_v7, %v20525_v57  ;;  %v8538_v59 = vrot.slane %v8530_v5, %v15510_v28  ;;  %v8545_v42 = vrot.slane %v8531_v8, %v15510_v28  ;;  %v9021_v62 = vcombine.low %v17894_v30, %v17897_v34  ;;  %v20528_v5 = vld [vmem:[#allocation152_spill] sm:$0xff] }
 0x270   :  { %v20527_v45 = vcombine.high %v18090_v14, %v18101_v52  ;;  %v20529_v17 = vcombine.high %v17894_v30, %v20528_v5  ;;  %v20530_v29 = vcombine.low %v18355_v37, %v18367_v33  ;;  %v12923_v18 = vcombine.low %v12915_v20, %v12922_v51  ;;  %v20532_v52 = vld [vmem:[#allocation155_spill] sm:$0xff] }
 0x271   :  { %v12941_v49 = vrot.slane %v20526_v11, %v15510_v28  ;;  %v8546_v57 = vcombine.low %v8538_v59, %v8545_v42  ;;  %v12957_v11 = vcombine.low %v12948_v43, %v12955_v39  ;;  %v20533_v5 = vcombine.high %v18390_v13, %v18396_v50 }
 0x272   :  { %v18598_v7 = vrot.slane %v20527_v45, %v15510_v28  ;;  %v12981_v15 = vrot.slane %v20529_v17, %v15510_v28  ;;  %v8557_v8 = vrot.slane %v20530_v29, %v15510_v28  ;;  %v20534_v20 = vcombine.low %v18381_v38, %v18463_v41  ;;  %15271 = vmatmul.mubr.msk.f32.gmra.mrb[120].mxu0 %vm8596_vm5, %v12923_v18 }
 0x273   :  { %v12956_v47 = vcombine.low %v12934_v2, %v12941_v49  ;;  %v18609_v49 = vrot.slane %v9021_v62, %v15510_v28  ;;  %v18611_v2 = vpop.f32.mrb[100].mxu0  ;;  %v8564_v17 = vrot.slane %v20533_v5, %v15510_v28  ;;  %15032 = vmatmul.mubr.msk.f32.gmra.mrb[14].mxu1 %vm8596_vm5, %v8546_v57  ;;  %v12971_v51 = vrot.slane %v12957_v11, %v15510_v28  ;;  %v14556_v5 = vld [vmem:[%s20081_s3 + $0x20] sm:$0xff] }
 0x274   :  { %20531 = vst [vmem:[#allocation87_spill] sm:$0xff] %v18611_v2  ;;  %v12990_v45 = vcombine.low %v20532_v52, %v18598_v7  ;;  %v8571_v59 = vrot.slane %v20534_v20, %v15510_v28  ;;  %v15201_v43 = vpop.f32.mrb[101].mxu0  ;;  %v20535_v39 = vcombine.high %v18444_v58, %v18463_v41  ;;  %15273 = vmatprep.mubr.msk.f32.mxu0 %vm15403_vm1, %v20271_v55  ;;  %v20536_v52 = vld [vmem:[#allocation181_spill] sm:$0xff] }
 0x275   :  { %v12964_v14 = vrot.slane %v12956_v47, %v15510_v28  ;;  %v12989_v42 = vcombine.low %v18609_v49, %v12981_v15  ;;  %15034 = vmatprep.mubr.msk.f32.mxu1 %vm15403_vm1, %v20271_v55  ;;  %v8579_v29 = vcombine.low %v8557_v8, %v8564_v17  ;;  %v14671_v18 = vcombine.high %v18110_v31, %v18113_v10 }
 0x276   :  { %v8578_v62 = vrot.slane %v20535_v39, %v15510_v28  ;;  %v13004_v47 = vrot.slane %v12990_v45, %v15510_v28  ;;  %v14672_v41 = vcombine.high %v20536_v52, %v18367_v33  ;;  %v14557_v45 = vld [vmem:[%s20081_s3 + $0x28] sm:$0xff] }
 0x277   :  { %v12972_v57 = vcombine.low %v12964_v14, %v12971_v51  ;;  %v12997_v15 = vrot.slane %v12989_v42, %v15510_v28  ;;  %v8587_v8 = vrot.slane %v8579_v29, %v15510_v28  ;;  %v20537_v14 = vcombine.low %v18087_v6, %v18113_v10 }
 0x278   :  { %v8580_v11 = vcombine.low %v8571_v59, %v8578_v62  ;;  %v13023_v20 = vrot.slane %v14671_v18, %v15510_v28  ;;  %v20538_v59 = vcombine.low %v20536_v52, %v18162_v56  ;;  %v13037_v39 = vrot.slane %v14672_v41, %v15510_v28  ;;  %v20539_v62 = vld [vmem:[#allocation5_spill] sm:$0xff] }
 0x279   :  { %v13016_v17 = vrot.slane %v20537_v14, %v15510_v28  ;;  %15274 = vmatmul.mubr.msk.f32.gmra.mrb[122].mxu0 %vm8596_vm5, %v12972_v57  ;;  %v13005_v51 = vcombine.low %v12997_v15, %v13004_v47  ;;  %v20540_v29 = vcombine.low %v16551_v25, %v20539_v62  ;;  %v15310_v14 = vpack.c.bf16 %v14557_v45, %v14556_v5  ;;  %v20543_v25 = vld [vmem:[#allocation6_spill] sm:$0xff]  ;;  %v20548_v62 = vld [vmem:[#allocation17_spill] sm:$0xff] }
 0x27a   :  { %v13030_v43 = vrot.slane %v20538_v59, %v15510_v28  ;;  %v8594_v42 = vrot.slane %v8580_v11, %v15510_v28  ;;  %15276 = vmatprep.mubr.msk.f32.mxu0 %vm15403_vm1, %v20271_v55  ;;  %v20541_v56 = vcombine.high %v18381_v38, %v18399_v32  ;;  %v20542_v47 = vcombine.low %v18390_v13, %v18396_v50 }
 0x27b   :  { %v8772_v2 = vrot.slane %v20540_v29, %v15510_v28  ;;  %v13038_v18 = vcombine.low %v13016_v17, %v13023_v20  ;;  %v20544_v17 = vcombine.low %v18444_v58, %v18470_v4  ;;  %v20545_v38 = vcombine.high %v18460_v26, %v18470_v4 }
 0x27c   :  { %v18671_v57 = vrot.slane %v20541_v56, %v15510_v28  ;;  %v13064_v15 = vrot.slane %v20542_v47, %v15510_v28  ;;  %v8595_v11 = vcombine.low %v8587_v8, %v8594_v42  ;;  %v13039_v52 = vcombine.low %v13030_v43, %v13037_v39  ;;  %v20546_v43 = vld [vmem:[#allocation23_spill] sm:$0xff] }
 0x27d   :  { %v8773_v41 = vcombine.low %v20543_v25, %v8772_v2  ;;  %v13071_v5 = vrot.slane %v20544_v17, %v15510_v28  ;;  %v13046_v45 = vrot.slane %v13038_v18, %v15510_v28  ;;  %v13078_v20 = vrot.slane %v20545_v38, %v15510_v28  ;;  %15277 = vmatmul.mubr.msk.f32.gmra.mrb[124].mxu0 %vm8596_vm5, %v13005_v51  ;;  %v20547_v39 = vld [vmem:[#allocation7_spill] sm:$0xff]  ;;  %v20552_v25 = vld [vmem:[#allocation53_spill] sm:$0xff] }
 0x27e   :  { %v13079_v59 = vcombine.low %v13064_v15, %v18671_v57  ;;  %v8776_v8 = vcombine.low %v16855_v48, %v16868_v60  ;;  %15035 = vmatmul.mubr.msk.f32.gmra.mrb[16].mxu1 %vm8596_vm5, %v8595_v11  ;;  %v13053_v2 = vrot.slane %v13039_v52, %v15510_v28  ;;  %v14532_v42 = vcombine.high %v16855_v48, %v20546_v43  ;;  %v20550_v48 = vld [vmem:[#allocation20_spill] sm:$0xff] }
 0x27f   :  { %v20549_v29 = vcombine.low %v20547_v39, %v20548_v62  ;;  %15279 = vmatprep.mubr.msk.f32.mxu0 %vm15403_vm1, %v20271_v55  ;;  %15041 = vmatprep.mubr.msk.f32.mxu1 %vm15403_vm1, %v20271_v55  ;;  %v13080_v18 = vcombine.low %v13071_v5, %v13078_v20  ;;  %v20551_v52 = vld [vmem:[#allocation44_spill] sm:$0xff]  ;;  %v20554_v62 = vld [vmem:[#allocation50_spill] sm:$0xff] }
 0x280   :  { %v13087_v51 = vrot.slane %v13079_v59, %v15510_v28  ;;  %v8798_v56 = vrot.slane %v8776_v8, %v15510_v28  ;;  %v13054_v47 = vcombine.low %v13046_v45, %v13053_v2  ;;  %v8805_v15 = vrot.slane %v14532_v42, %v15510_v28  ;;  %v20556_v45 = vld [vmem:[#allocation79_spill] sm:$0xff]  ;;  %v20557_v8 = vld [vmem:[#allocation81_spill] sm:$0xff] }
 0x281   :  { %v8784_v4 = vrot.slane %v20549_v29, %v15510_v28  ;;  %v20553_v17 = vcombine.low %v20551_v52, %v20552_v25  ;;  %v13094_v39 = vrot.slane %v13080_v18, %v15510_v28  ;;  %v20555_v5 = vcombine.low %v20483_v1, %v20554_v62  ;;  %v20564_v52 = vld [vmem:[#allocation85_spill] sm:$0xff] }
 0x282   :  { %v8872_v59 = vcombine.low %v20492_v40, %v20486_v19  ;;  %v20558_v2 = vcombine.low %v20556_v45, %v20557_v8  ;;  %15280 = vmatmul.mubr.msk.f32.gmra.mrb[126].mxu0 %vm8596_vm5, %v13054_v47  ;;  %15042 = vmatmul.mubr.msk.f32.vlgmr.msra.gmra.mrb[18].mxu1 %vm8596_vm5, %v8773_v41  ;;  %v8807_v29 = vcombine.low %v8798_v56, %v8805_v15  ;;  %v20559_v40 = vld [vmem:[#allocation92_spill] sm:$0xff]  ;;  %v20562_v15 = vld [vmem:[#allocation113_spill] sm:$0xff] }
 0x283   :  { %v8806_v11 = vcombine.low %v8784_v4, %v20550_v48  ;;  %v8847_v38 = vrot.slane %v20553_v17, %v15510_v28  ;;  %v8863_v20 = vrot.slane %v20555_v5, %v15510_v28  ;;  %15311 = vmatpush3.bf16.msra.mxu1 %v15310_v14  ;;  %15282 = vmatprep.mubr.msk.f32.mxu0 %vm15403_vm1, %v20271_v55  ;;  %v20561_v56 = vld [vmem:[#allocation112_spill] sm:$0xff]  ;;  %v20567_v5 = vld [vmem:[#allocation121_spill] sm:$0xff] }
 0x284   :  { %v8896_v42 = vrot.slane %v20558_v2, %v15510_v28  ;;  %v13095_v1 = vcombine.low %v13087_v51, %v13094_v39  ;;  %v8882_v19 = vrot.slane %v8872_v59, %v15510_v28  ;;  %15044 = vmatprep.mubr.msk.f32.mxu1 %vm15403_vm1, %v20271_v55  ;;  %v8821_v47 = vrot.slane %v8807_v29, %v15510_v28 }
 0x285   :  { %v8814_v4 = vrot.slane %v8806_v11, %v15510_v28  ;;  %v8856_v18 = vcombine.low %v8847_v38, %v20493_v12  ;;  %v20560_v12 = vcombine.low %v20500_v53, %v20497_v63  ;;  %v20563_v51 = vcombine.low %v20561_v56, %v20562_v15  ;;  %v20565_v38 = vld [vmem:[#allocation122_spill] sm:$0xff]  ;;  %15312 = vmatprep.subr.bf16.mxu1 %v20264_v44 }
 0x286   :  { %v8905_v48 = vcombine.low %v8896_v42, %v20559_v40  ;;  %v8904_v25 = vcombine.low %v8882_v19, %v20564_v52  ;;  %v20566_v39 = vcombine.high %v20561_v56, %v20565_v38  ;;  %v20568_v59 = vcombine.high %v20567_v5, %v17635_v0  ;;  %15283 = vmatmul.mubr.msk.f32.gmra.mrb[128].mxu0 %vm8596_vm5, %v13095_v1  ;;  %v20569_v42 = vld [vmem:[#allocation145_spill] sm:$0xff]  ;;  %v20615_v0 = vld [vmem:[#allocation120_spill] sm:$0xff] }
 0x287   :  { %v8870_v41 = vrot.slane %v8856_v18, %v15510_v28  ;;  %v8931_v14 = vrot.slane %v20560_v12, %v15510_v28  ;;  %v8945_v11 = vrot.slane %v20563_v51, %v15510_v28  ;;  %v8822_v45 = vcombine.low %v8814_v4, %v8821_v47  ;;  %v20574_v47 = vld [vmem:[#allocation171_spill] sm:$0xff] }
 0x288   :  { %v8919_v17 = vrot.slane %v8905_v48, %v15510_v28  ;;  %v8952_v62 = vrot.slane %v20566_v39, %v15510_v28  ;;  %v8987_v63 = vrot.slane %v20568_v59, %v15510_v28  ;;  %v20570_v29 = vcombine.low %v17650_v24, %v20569_v42  ;;  %v20571_v48 = vld [vmem:[#allocation142_spill] sm:$0xff] }
 0x289   :  { %v8871_v8 = vcombine.low %v8863_v20, %v8870_v41  ;;  %v8953_v2 = vcombine.low %v8931_v14, %v18457_v22  ;;  %v8912_v19 = vrot.slane %v8904_v25, %v15510_v28  ;;  %v20572_v12 = vcombine.high %v20571_v48, %v20569_v42  ;;  %15045 = vmatmul.mubr.msk.f32.gmra.mrb[20].mxu1 %vm8596_vm5, %v8822_v45  ;;  %v20579_v48 = vld [vmem:[#allocation202_spill] sm:$0xff] }
 0x28a   :  { %v8994_v18 = vrot.slane %v20570_v29, %v15510_v28  ;;  %v8954_v40 = vcombine.low %v8945_v11, %v8952_v62  ;;  %v9002_v51 = vcombine.low %v18541_v21, %v8987_v63  ;;  %v10270_v20 = vcombine.low %v18500_v54, %v18511_v27  ;;  %15047 = vmatprep.mubr.msk.f32.mxu1 %vm15403_vm1, %v20271_v55 }
 0x28b   :  { %v9001_v56 = vrot.slane %v20572_v12, %v15510_v28  ;;  %v9019_v22 = vcombine.low %v17875_v46, %v17891_v35  ;;  %v20573_v4 = vcombine.high %v17875_v46, %v17878_v36  ;;  %v9052_v41 = vcombine.low %v18609_v49, %v20574_v47  ;;  %v20575_v36 = vld [vmem:[#allocation179_spill] sm:$0xff] }
 0x28c   :  { %v8920_v21 = vcombine.low %v8912_v19, %v8919_v17  ;;  %v8961_v14 = vrot.slane %v8953_v2, %v15510_v28  ;;  %v8968_v54 = vrot.slane %v8954_v40, %v15510_v28  ;;  %v18781_v52 = vrot.slane %v9002_v51, %v15510_v28  ;;  %v20577_v2 = vld [vmem:[#allocation188_spill] sm:$0xff]  ;;  %v20580_v51 = vld [vmem:[#allocation199_spill] sm:$0xff] }
 0x28d   :  { %v9036_v1 = vrot.slane %v20573_v4, %v15510_v28  ;;  %v9003_v11 = vcombine.low %v8994_v18, %v9001_v56  ;;  %v9029_v25 = vrot.slane %v9019_v22, %v15510_v28  ;;  %v9070_v46 = vcombine.low %v18110_v31, %v18113_v10  ;;  %15048 = vmatmul.mubr.msk.f32.gmra.mrb[22].mxu1 %vm8596_vm5, %v8871_v8  ;;  %v20578_v18 = vld [vmem:[#allocation60_spill] sm:$0xff]  ;;  %v18817_v4 = vpop.f32.mrb[4].mxu1 }
 0x28e   :  { %v9100_v49 = vcombine.low %v20575_v36, %v18598_v7  ;;  %v8969_v38 = vcombine.low %v8961_v14, %v8968_v54  ;;  %v9119_v17 = vcombine.low %v18390_v13, %v18399_v32  ;;  %v20576_v62 = vcombine.high %v18355_v37, %v18367_v33  ;;  %v15401_v7 = vld [vmem:[%s20080_s2] ss:$0 sm:$0xff]  ;;  %15050 = vmatprep.mubr.msk.f32.mxu1 %vm15403_vm1, %v20271_v55 }
 0x28f   :  { %v9017_v39 = vrot.slane %v9003_v11, %v15510_v28  ;;  %v9051_v59 = vcombine.low %v9029_v25, %v9036_v1  ;;  %v18797_v63 = vrot.slane %v9052_v41, %v15510_v28  ;;  %v9092_v45 = vrot.slane %v9070_v46, %v15510_v28  ;;  %20581 = vst [vmem:[#allocation124_spill] sm:$0xff] %v18817_v4  ;;  %v20582_v41 = vld [vmem:[#allocation3_spill] sm:$0xff]  ;;  %v20584_v54 = vld [vmem:[#allocation2_spill] sm:$0xff]  ;;  %v20586_v25 = vld [vmem:[#allocation8_spill] sm:$0xff] }
 0x290   :  { %v9134_v5 = vrot.slane %v20576_v62, %v15510_v28  ;;  %v5643_v42 = vadd.f32 %v15401_v7, %v20577_v2  ;;  %v18808_v29 = vrot.slane %v9100_v49, %v15510_v28  ;;  %v9141_v8 = vrot.slane %v9119_v17, %v15510_v28  ;;  %v20587_v46 = vld [vmem:[#allocation4_spill] sm:$0xff] }
 0x291   :  { %v9018_v37 = vcombine.low %v18781_v52, %v9017_v39  ;;  %v18813_v40 = vrot.slane %v9051_v59, %v15510_v28  ;;  %v9101_v12 = vcombine.low %v9092_v45, %v20579_v48  ;;  %v5648_v22 = vadd.f32 %v15401_v7, %v20580_v51  ;;  %v15018_v39 = vpop.f32.mrb[5].mxu1  ;;  %15051 = vmatmul.mubr.msk.f32.gmra.mrb[24].mxu1 %vm8596_vm5, %v8920_v21 }
 0x292   :  { %v9149_v19 = vcombine.low %v20578_v18, %v9134_v5  ;;  %v5698_v56 = vmax.f32 %v5643_v42, 0.0  ;;  %v9150_v1 = vcombine.low %v9141_v8, %v18671_v57  ;;  %v20583_v14 = vrot.slane %v20582_v41, %v15510_v28  ;;  %15053 = vmatprep.mubr.msk.f32.mxu1 %vm15403_vm1, %v20271_v55  ;;  %v20601_v18 = vld [vmem:[#allocation57_spill] sm:$0xff] }
 0x293   :  { %v20585_v11 = vrot.slane %v20584_v54, %v15510_v28  ;;  %v20588_v36 = vrot.slane %v20587_v46, %v15510_v28  ;;  %v9067_v57 = vcombine.low %v18813_v40, %v18797_v63  ;;  %v18837_v17 = vrot.slane %v9101_v12, %v15510_v28 }
 0x294   :  { %v18821_v47 = vrot.slane %v9149_v19, %v15510_v28  ;;  %v8052_v62 = vcombine.high %v5698_v56, %v5698_v56  ;;  %v8059_v5 = vrot.slane %v5698_v56, %v15510_v28  ;;  %v18843_v59 = vrot.slane %v9150_v1, %v15510_v28 }
 0x295   :  { %v9329_v52 = vcombine.low %v20585_v11, %v20583_v14  ;;  %v9330_v49 = vcombine.low %v20588_v36, %v20586_v25  ;;  %v5699_v45 = vmax.f32 %v5648_v22, 0.0  ;;  %15054 = vmatmul.mubr.msk.f32.gmra.mrb[26].mxu1 %vm8596_vm5, %v8969_v38  ;;  %v18862_v22 = vrot.slane %v10270_v20, %v15510_v28  ;;  %v18875_v39 = vpop.f32.mrb[102].mxu0 }
 0x296   :  { %v8066_v2 = vrot.slane %v8052_v62, %v15510_v28  ;;  %v8067_v42 = vcombine.high %v8059_v5, %v8059_v5  ;;  %v8075_v8 = vrot.slane %v8059_v5, %v15510_v28  ;;  %15056 = vmatprep.mubr.msk.f32.mxu1 %vm15403_vm1, %v20271_v55  ;;  %v6139_v38 = vcombine.high %v16868_v60, %v16868_v60 }
 0x297   :  { %v9337_v7 = vrot.slane %v9329_v52, %v15510_v28  ;;  %v9344_v21 = vrot.slane %v9330_v49, %v15510_v28  ;;  %v8101_v19 = vcombine.high %v5699_v45, %v5699_v45  ;;  %v8108_v40 = vrot.slane %v5699_v45, %v15510_v28  ;;  %20589 = vst [vmem:[#allocation125_spill] sm:$0xff] %v18875_v39 }
 0x298   :  { %v8068_v12 = vcombine.high %v8066_v2, %v8066_v2  ;;  %v18858_v56 = vrot.slane %v8066_v2, %v15510_v28  ;;  %v8089_v51 = vrot.slane %v8067_v42, %v15510_v28 }
 0x299   :  { %v18854_v48 = vcombine.low %v9337_v7, %v9344_v21  ;;  %v8115_v1 = vrot.slane %v8101_v19, %v15510_v28  ;;  %v8116_v41 = vcombine.high %v8108_v40, %v8108_v40  ;;  %v8124_v14 = vrot.slane %v8108_v40, %v15510_v28  ;;  %15057 = vmatmul.mubr.msk.f32.gmra.mrb[28].mxu1 %vm8596_vm5, %v9018_v37  ;;  %v18891_v7 = vld [vmem:[%s20081_s3 + $0x30] sm:$0xff]  ;;  %v18896_v37 = vld [vmem:[%s20081_s3 + $0x38] sm:$0xff]  ;;  %v15204_v21 = vpop.f32.mrb[103].mxu0 }
 0x29a   :  { %v8096_v54 = vrot.slane %v8068_v12, %v15510_v28  ;;  %v8099_v11 = vcombine.high %v8089_v51, %v8089_v51  ;;  %v14585_v52 = vcombine.high %v8075_v8, %v8089_v51  ;;  %v10851_v25 = vcombine.low %v8075_v8, %v8089_v51  ;;  %15059 = vmatprep.mubr.msk.f32.mxu1 %vm15403_vm1, %v20271_v55 }
 0x29b   :  { %v8117_v46 = vcombine.high %v8115_v1, %v8115_v1  ;;  %v8131_v20 = vrot.slane %v8115_v1, %v15510_v28  ;;  %v18873_v36 = vrot.slane %v8116_v41, %v15510_v28  ;;  %v8146_v49 = vcombine.high %v8124_v14, %v8124_v14  ;;  %v20590_v1 = vld [vmem:[#allocation25_spill] sm:$0xff] }
 0x29c   :  { %v18879_v62 = vrot.slane %v14585_v52, %v15510_v28  ;;  %v14614_v60 = vcombine.high %v18858_v56, %v8096_v54  ;;  %v18883_v5 = vrot.slane %v10851_v25, %v15510_v28  ;;  %v18886_v45 = vcombine.low %v8099_v11, %v18858_v56 }
 0x29d   :  { %v8145_v2 = vrot.slane %v8117_v46, %v15510_v28  ;;  %v8148_v42 = vcombine.high %v18873_v36, %v18873_v36  ;;  %v14586_v19 = vcombine.high %v8124_v14, %v18873_v36  ;;  %v18911_v51 = vcombine.low %v8096_v54, %v8146_v49  ;;  %15060 = vmatmul.mubr.msk.f32.gmra.mrb[30].mxu1 %vm8596_vm5, %v9067_v57  ;;  %v20592_v54 = vld [vmem:[#allocation18_spill] sm:$0xff] }
 0x29e   :  { %v18909_v12 = vrot.slane %v14614_v60, %v15510_v28  ;;  %v9349_v41 = vcombine.low %v6139_v38, %v20590_v1  ;;  %v20591_v11 = vcombine.high %v18250_v9, %v18507_v3  ;;  %v15313_v21 = vpack.c.bf16 %v18896_v37, %v18891_v7  ;;  %15062 = vmatprep.mubr.msk.f32.mxu1 %vm15403_vm1, %v20271_v55  ;;  %v20594_v7 = vld [vmem:[#allocation19_spill] sm:$0xff]  ;;  %v20599_v9 = vld [vmem:[#allocation54_spill] sm:$0xff] }
 0x29f   :  { %v10853_v25 = vcombine.low %v8124_v14, %v8145_v2  ;;  %v18920_v46 = vcombine.low %v8148_v42, %v8131_v20  ;;  %v14615_v60 = vcombine.high %v8131_v20, %v8145_v2  ;;  %v9356_v49 = vrot.slane %v20592_v54, %v15510_v28  ;;  %v20593_v14 = vld [vmem:[#allocation49_spill] sm:$0xff]  ;;  %v20596_v42 = vld [vmem:[#allocation55_spill] sm:$0xff]  ;;  %v20598_v54 = vld [vmem:[#allocation46_spill] sm:$0xff] }
 0x2a0   :  { %v18918_v52 = vrot.slane %v20591_v11, %v15510_v28  ;;  %v9377_v38 = vrot.slane %v9349_v41, %v15510_v28  ;;  %v6186_v40 = vcombine.high %v20590_v1, %v20590_v1  ;;  %v18935_v3 = vrot.slane %v14586_v19, %v15510_v28  ;;  %v20597_v41 = vld [vmem:[#allocation26_spill] sm:$0xff] }
 0x2a1   :  { %v18938_v57 = vrot.slane %v10853_v25, %v15510_v28  ;;  %v9412_v20 = vrot.slane %v20593_v14, %v15510_v28  ;;  %v20595_v37 = vrot.slane %v20594_v7, %v15510_v28  ;;  %v20600_v8 = vcombine.low %v20598_v54, %v20599_v9  ;;  %v20602_v25 = vld [vmem:[#allocation52_spill] sm:$0xff]  ;;  %v20604_v14 = vld [vmem:[#allocation83_spill] sm:$0xff]  ;;  %v20605_v7 = vld [vmem:[#allocation82_spill] sm:$0xff] }
 0x2a2   :  { %v9379_v1 = vcombine.low %v20596_v42, %v9377_v38  ;;  %v9395_v11 = vcombine.low %v20597_v41, %v6186_v40  ;;  %v20603_v63 = vcombine.low %v20601_v18, %v20602_v25  ;;  %v9461_v4 = vrot.slane %v20604_v14, %v15510_v28  ;;  %v20609_v42 = vld [vmem:[#allocation95_spill] sm:$0xff]  ;;  %v20612_v14 = vld [vmem:[#allocation118_spill] sm:$0xff] }
 0x2a3   :  { %v9378_v2 = vcombine.low %v9356_v49, %v20595_v37  ;;  %v9419_v19 = vrot.slane %v20600_v8, %v15510_v28  ;;  %v9468_v49 = vrot.slane %v20605_v7, %v15510_v28  ;;  %v20606_v40 = vcombine.high %v20562_v15, %v20562_v15  ;;  %v20608_v37 = vld [vmem:[#allocation88_spill] sm:$0xff] }
 0x2a4   :  { %v9426_v39 = vrot.slane %v20603_v63, %v15510_v28  ;;  %v20607_v9 = vcombine.low %v18808_v29, %v18837_v17  ;;  %v18968_v8 = vrot.slane %v14615_v60, %v15510_v28  ;;  %v9405_v18 = vrot.slane %v9395_v11, %v15510_v28  ;;  %v20611_v29 = vld [vmem:[#allocation84_spill] sm:$0xff] }
 0x2a5   :  { %v9496_v38 = vcombine.low %v20606_v40, %v20507_v61  ;;  %v20610_v41 = vcombine.low %v20608_v37, %v20609_v42  ;;  %v9476_v17 = vcombine.low %v20611_v29, %v9461_v4  ;;  %v9477_v7 = vcombine.low %v9468_v49, %v20612_v14  ;;  %v20613_v60 = vld [vmem:[#allocation96_spill] sm:$0xff] }
 0x2a6   :  { %15063 = vmatmul.mubr.msk.f32.gmra.mrb[32].mxu1 %vm8596_vm5, %v20607_v9  ;;  %v9428_v15 = vcombine.low %v9419_v19, %v9426_v39  ;;  %v20614_v40 = vcombine.low %v20613_v60, %v20512_v16  ;;  %v9393_v11 = vrot.slane %v9379_v1, %v15510_v28  ;;  %v9427_v63 = vcombine.low %v9405_v18, %v9412_v20 }
 0x2a7   :  { %v9503_v54 = vrot.slane %v20610_v41, %v15510_v28  ;;  %15065 = vmatprep.mubr.msk.f32.mxu1 %vm15403_vm1, %v20271_v55  ;;  %v9517_v37 = vrot.slane %v20615_v0, %v15510_v28  ;;  %v9524_v42 = vrot.slane %v9496_v38, %v15510_v28  ;;  %v9484_v39 = vrot.slane %v9476_v17, %v15510_v28 }
 0x2a8   :  { %v9510_v9 = vrot.slane %v20614_v40, %v15510_v28  ;;  %v9442_v41 = vrot.slane %v9428_v15, %v15510_v28  ;;  %v9491_v4 = vrot.slane %v9477_v7, %v15510_v28  ;;  %v20616_v49 = vcombine.low %v18821_v47, %v18843_v59  ;;  %v20617_v7 = vld [vmem:[#allocation177_spill] sm:$0xff] }
 0x2a9   :  { %v9386_v1 = vrot.slane %v9378_v2, %v15510_v28  ;;  %v9435_v20 = vrot.slane %v9427_v63, %v15510_v28  ;;  %v9526_v18 = vcombine.low %v9517_v37, %v9524_v42  ;;  %v7020_v0 = vcombine.high %v20507_v61, %v20507_v61  ;;  %v20621_v42 = vld [vmem:[#allocation172_spill] sm:$0xff] }
 0x2aa   :  { %v9525_v19 = vcombine.low %v9503_v54, %v9510_v9  ;;  %15066 = vmatmul.mubr.msk.f32.gmra.mrb[34].mxu1 %vm8596_vm5, %v20616_v49  ;;  %v19002_v38 = vcombine.low %v9484_v39, %v9491_v4  ;;  %v7316_v47 = vcombine.high %v17891_v35, %v17891_v35  ;;  %v7363_v59 = vcombine.high %v17894_v30, %v17894_v30  ;;  %v20623_v4 = vld [vmem:[#allocation149_spill] sm:$0xff]  ;;  %v20624_v49 = vld [vmem:[#allocation174_spill] sm:$0xff] }
 0x2ab   :  { %15072 = vmatprep.mubr.msk.f32.mxu1 %vm15403_vm1, %v20271_v55  ;;  %v9443_v2 = vcombine.low %v9435_v20, %v9442_v41  ;;  %v9540_v63 = vrot.slane %v9526_v18, %v15510_v28  ;;  %v9542_v15 = vcombine.low %v20506_v23, %v7020_v0  ;;  %v7657_v61 = vcombine.high %v18110_v31, %v18110_v31  ;;  %v20625_v20 = vld [vmem:[#allocation176_spill] sm:$0xff] }
 0x2ac   :  { %v9533_v54 = vrot.slane %v9525_v19, %v15510_v28  ;;  %v9394_v29 = vcombine.low %v9386_v1, %v9393_v11  ;;  %v9592_v17 = vcombine.low %v7316_v47, %v17894_v30  ;;  %v9593_v14 = vcombine.low %v17897_v34, %v7363_v59  ;;  %v19064_v59 = vld [vmem:[%s20081_s3 + $0x48] sm:$0xff] }
 0x2ad   :  { %v20618_v35 = vcombine.low %v20617_v7, %v18087_v6  ;;  %v9552_v23 = vrot.slane %v9542_v15, %v15510_v28  ;;  %v9642_v9 = vcombine.low %v18113_v10, %v7657_v61  ;;  %v20619_v30 = vcombine.high %v18367_v33, %v18367_v33 }
 0x2ae   :  { %15073 = vmatmul.mubr.msk.f32.vlgmr.msra.gmra.mrb[36].mxu1 %vm8596_vm5, %v18854_v48  ;;  %v19021_v40 = vcombine.low %v9533_v54, %v9540_v63  ;;  %v9608_v34 = vrot.slane %v9592_v17, %v15510_v28  ;;  %v9615_v6 = vrot.slane %v9593_v14, %v15510_v28  ;;  %v20620_v48 = vld [vmem:[#allocation180_spill] sm:$0xff]  ;;  %v20622_v10 = vcombine.low %v20617_v7, %v18110_v31  ;;  %v19059_v31 = vld [vmem:[%s20081_s3 + $0x40] sm:$0xff]  ;;  %v20628_v63 = vld [vmem:[#allocation205_spill] sm:$0xff] }
 0x2af   :  { %v9657_v60 = vrot.slane %v20618_v35, %v15510_v28  ;;  %v9690_v11 = vcombine.low %v20619_v30, %v18390_v13  ;;  %15314 = vmatpush3.bf16.msra.mxu1 %v15313_v21  ;;  %15075 = vmatprep.mubr.msk.f32.mxu1 %vm15403_vm1, %v20271_v55  ;;  %v9574_v41 = vcombine.low %v9552_v23, %v20621_v42  ;;  %v20627_v54 = vld [vmem:[#allocation48_spill] sm:$0xff]  ;;  %v20630_v14 = vld [vmem:[#allocation206_spill] sm:$0xff] }
 0x2b0   :  { %v19036_v39 = vrot.slane %v9642_v9, %v15510_v28  ;;  %v19042_v33 = vrot.slane %v20622_v10, %v15510_v28  ;;  %15315 = vmatprep.subr.bf16.mxu1 %v20264_v44  ;;  %v9589_v19 = vrot.slane %v20623_v4, %v15510_v28  ;;  %v9623_v1 = vcombine.low %v20624_v49, %v9608_v34  ;;  %v20634_v4 = vld [vmem:[#allocation10_spill] sm:$0xff] }
 0x2b1   :  { %v9672_v37 = vcombine.low %v20620_v48, %v9657_v60  ;;  %v19045_v21 = vrot.slane %v9690_v11, %v15510_v28  ;;  %v20626_v18 = vrot.slane %v20625_v20, %v15510_v28  ;;  %v9699_v47 = vrot.slane %v20627_v54, %v15510_v28  ;;  %v20632_v60 = vld [vmem:[#allocation59_spill] sm:$0xff]  ;;  %v20702_v17 = vld [vmem:[#allocation110_spill] sm:$0xff] }
 0x2b2   :  { %15076 = vmatmul.mubr.msk.f32.gmra.mrb[38].mxu1 %vm8596_vm5, %v9394_v29  ;;  %v20629_v15 = vrot.slane %v20628_v63, %v15510_v28  ;;  %v20631_v7 = vcombine.low %v18396_v50, %v20630_v14  ;;  %v20633_v23 = vcombine.low %v20632_v60, %v18444_v58  ;;  %v9582_v29 = vrot.slane %v9574_v41, %v15510_v28  ;;  %v20635_v41 = vld [vmem:[#allocation28_spill] sm:$0xff] }
 0x2b3   :  { %v9624_v0 = vcombine.low %v9615_v6, %v20626_v18  ;;  %15078 = vmatprep.mubr.msk.f32.mxu1 %vm15403_vm1, %v20271_v55  ;;  %v9631_v30 = vrot.slane %v9623_v1, %v15510_v28  ;;  %v9680_v11 = vrot.slane %v9672_v37, %v15510_v28  ;;  %v9721_v34 = vcombine.low %v9699_v47, %v19045_v21  ;;  %v20637_v37 = vld [vmem:[#allocation27_spill] sm:$0xff]  ;;  %v20640_v47 = vld [vmem:[#allocation32_spill] sm:$0xff] }
 0x2b4   :  { %v9673_v61 = vcombine.low %v19036_v39, %v20629_v15  ;;  %v9713_v35 = vrot.slane %v20631_v7, %v15510_v28  ;;  %v9720_v9 = vrot.slane %v20633_v23, %v15510_v28  ;;  %v9590_v42 = vcombine.low %v9582_v29, %v9589_v19  ;;  %v20639_v19 = vld [vmem:[#allocation31_spill] sm:$0xff]  ;;  %v20643_v7 = vld [vmem:[#allocation40_spill] sm:$0xff]  ;;  %v20646_v29 = vld [vmem:[#allocation66_spill] sm:$0xff] }
 0x2b5   :  { %v9638_v6 = vrot.slane %v9624_v0, %v15510_v28  ;;  %v9729_v10 = vrot.slane %v9721_v34, %v15510_v28  ;;  %v20636_v49 = vcombine.low %v20634_v4, %v20635_v41  ;;  %v20638_v20 = vcombine.high %v20637_v37, %v20635_v41  ;;  %v20652_v37 = vld [vmem:[#allocation106_spill] sm:$0xff] }
 0x2b6   :  { %v9687_v50 = vrot.slane %v9673_v61, %v15510_v28  ;;  %v9722_v48 = vcombine.low %v9713_v35, %v9720_v9  ;;  %15079 = vmatmul.mubr.msk.f32.gmra.mrb[40].mxu1 %vm8596_vm5, %v9443_v2  ;;  %v20641_v63 = vcombine.low %v20639_v19, %v20640_v47  ;;  %v20642_v61 = vld [vmem:[#allocation38_spill] sm:$0xff]  ;;  %v20645_v2 = vld [vmem:[#allocation65_spill] sm:$0xff] }
 0x2b7   :  { %v9937_v1 = vrot.slane %v20636_v49, %v15510_v28  ;;  %v9944_v18 = vrot.slane %v20638_v20, %v15510_v28  ;;  %v20644_v35 = vcombine.low %v20642_v61, %v20643_v7  ;;  %15081 = vmatprep.mubr.msk.f32.mxu1 %vm15403_vm1, %v20271_v55  ;;  %v20651_v49 = vld [vmem:[#allocation109_spill] sm:$0xff] }
 0x2b8   :  { %v19101_v0 = vcombine.low %v9680_v11, %v9687_v50  ;;  %v9736_v54 = vrot.slane %v9722_v48, %v15510_v28  ;;  %v9951_v15 = vrot.slane %v20641_v63, %v15510_v28  ;;  %v20647_v11 = vcombine.high %v20645_v2, %v20646_v29  ;;  %v20648_v50 = vld [vmem:[#allocation73_spill] sm:$0xff]  ;;  %v20649_v48 = vld [vmem:[#allocation74_spill] sm:$0xff] }
 0x2b9   :  { %v9986_v23 = vrot.slane %v20644_v35, %v15510_v28  ;;  %v9959_v9 = vcombine.low %v9937_v1, %v9944_v18  ;;  %v20650_v4 = vcombine.low %v20648_v50, %v20649_v48  ;;  %v10058_v20 = vcombine.low %v20652_v37, %v20651_v49  ;;  %v20653_v47 = vld [vmem:[#allocation45_spill] sm:$0xff]  ;;  %v20655_v1 = vld [vmem:[#allocation107_spill] sm:$0xff]  ;;  %v20659_v48 = vld [vmem:[#allocation102_spill] sm:$0xff] }
 0x2ba   :  { %v10007_v34 = vrot.slane %v20647_v11, %v15510_v28  ;;  %v19124_v19 = vcombine.low %v9729_v10, %v9736_v54  ;;  %v9960_v63 = vcombine.low %v9951_v15, %v20653_v47  ;;  %v20654_v61 = vld [vmem:[#allocation69_spill] sm:$0xff]  ;;  %v20656_v18 = vld [vmem:[#allocation111_spill] sm:$0xff]  ;;  %v20658_v11 = vld [vmem:[#allocation70_spill] sm:$0xff]  ;;  %15082 = vmatmul.mubr.msk.f32.gmra.mrb[42].mxu1 %vm8596_vm5, %v19002_v38 }
 0x2bb   :  { %v10035_v41 = vrot.slane %v20650_v4, %v15510_v28  ;;  %v10008_v7 = vcombine.low %v9986_v23, %v20654_v61  ;;  %v20657_v35 = vcombine.high %v20655_v1, %v20656_v18  ;;  %v19133_v29 = vrot.slane %v9959_v9, %v15510_v28  ;;  %v20660_v15 = vld [vmem:[#allocation114_spill] sm:$0xff]  ;;  %v20661_v9 = vld [vmem:[#allocation139_spill] sm:$0xff]  ;;  %v20662_v37 = vld [vmem:[#allocation136_spill] sm:$0xff]  ;;  %15084 = vmatprep.mubr.msk.f32.mxu1 %vm15403_vm1, %v20271_v55 }
 0x2bc   :  { %v10009_v50 = vcombine.low %v20658_v11, %v10007_v34  ;;  %v19138_v49 = vrot.slane %v10058_v20, %v15510_v28  ;;  %v19143_v10 = vrot.slane %v9960_v63, %v15510_v28  ;;  %v10107_v47 = vcombine.low %v20662_v37, %v20661_v9  ;;  %v20663_v38 = vld [vmem:[#allocation141_spill] sm:$0xff]  ;;  %v20664_v20 = vld [vmem:[#allocation156_spill] sm:$0xff]  ;;  %v20667_v1 = vld [vmem:[#allocation143_spill] sm:$0xff] }
 0x2bd   :  { %v10091_v2 = vrot.slane %v20657_v35, %v15510_v28  ;;  %v10057_v4 = vcombine.low %v10035_v41, %v20659_v48  ;;  %v19146_v54 = vrot.slane %v10008_v7, %v15510_v28  ;;  %v20665_v63 = vcombine.low %v20663_v38, %v20664_v20  ;;  %v20666_v7 = vld [vmem:[#allocation144_spill] sm:$0xff]  ;;  %v19165_v35 = vpop.f32.mrb[6].mxu1 }
 0x2be   :  { %v19154_v34 = vrot.slane %v10009_v50, %v15510_v28  ;;  %v10155_v18 = vcombine.low %v20667_v1, %v20666_v7  ;;  %20668 = vst [vmem:[#allocation68_spill] sm:$0xff] %v19165_v35  ;;  %v19173_v50 = vrot.slane %v10107_v47, %v15510_v28  ;;  %v20669_v48 = vld [vmem:[#allocation168_spill] sm:$0xff]  ;;  %v15021_v9 = vpop.f32.mrb[7].mxu1  ;;  %v9639_v37 = vcombine.low %v9631_v30, %v9638_v6  ;;  %v20672_v1 = vld [vmem:[#allocation173_spill] sm:$0xff] }
 0x2bf   :  { %v10106_v23 = vcombine.low %v20660_v15, %v10091_v2  ;;  %v19157_v41 = vrot.slane %v10057_v4, %v15510_v28  ;;  %v10147_v61 = vrot.slane %v20665_v63, %v15510_v28  ;;  %v20670_v4 = vld [vmem:[#allocation165_spill] sm:$0xff]  ;;  %v20671_v63 = vld [vmem:[#allocation159_spill] sm:$0xff]  ;;  %15085 = vmatmul.mubr.msk.f32.gmra.mrb[44].mxu1 %vm8596_vm5, %v19021_v40  ;;  %v20683_v38 = vld [vmem:[#allocation36_spill] sm:$0xff] }
 0x2c0   :  { %v10204_v15 = vcombine.low %v20670_v4, %v20669_v48  ;;  %v20673_v30 = vld [vmem:[#allocation189_spill] sm:$0xff]  ;;  %v20675_v4 = vld [vmem:[#allocation186_spill] sm:$0xff]  ;;  %v20676_v9 = vld [vmem:[#allocation187_spill] sm:$0xff]  ;;  %15087 = vmatprep.mubr.msk.f32.mxu1 %vm15403_vm1, %v20271_v55  ;;  %v19202_v40 = vrot.slane %v10155_v18, %v15510_v28  ;;  %v20681_v18 = vcombine.low %v18862_v22, %v18879_v62 }
 0x2c1   :  { %v19170_v11 = vrot.slane %v10106_v23, %v15510_v28  ;;  %v10156_v7 = vcombine.low %v10147_v61, %v20671_v63  ;;  %v20674_v6 = vcombine.low %v20672_v1, %v20673_v30  ;;  %v20677_v20 = vcombine.low %v20675_v4, %v20676_v9  ;;  %v20678_v63 = vld [vmem:[#allocation201_spill] sm:$0xff] }
 0x2c2   :  { %v19187_v47 = vrot.slane %v10204_v15, %v15510_v28  ;;  %v10254_v23 = vcombine.low %v20678_v63, %v18918_v52  ;;  %v20679_v1 = vcombine.low %v18858_v56, %v18873_v36  ;;  %v19220_v9 = vrot.slane %v20681_v18, %v15510_v28  ;;  %v19244_v18 = vpop.f32.mrb[104].mxu0  ;;  %v20694_v56 = vld [vmem:[#allocation77_spill] sm:$0xff] }
 0x2c3   :  { %v19193_v48 = vrot.slane %v20674_v6, %v15510_v28  ;;  %v10231_v61 = vrot.slane %v20677_v20, %v15510_v28  ;;  %v19205_v15 = vrot.slane %v10156_v7, %v15510_v28  ;;  %v20680_v6 = vld [vmem:[#allocation194_spill] sm:$0xff]  ;;  %v20682_v7 = vld [vmem:[#allocation35_spill] sm:$0xff]  ;;  %15088 = vmatmul.mubr.msk.f32.gmra.mrb[46].mxu1 %vm8596_vm5, %v9590_v42  ;;  %20690 = vst [vmem:[#allocation104_spill] sm:$0xff] %v19244_v18  ;;  %v20709_v35 = vld [vmem:[#allocation117_spill] sm:$0xff] }
 0x2c4   :  { %v10294_v30 = vrot.slane %v20679_v1, %v15510_v28  ;;  %v20684_v52 = vcombine.low %v20682_v7, %v20683_v38  ;;  %v19231_v36 = vrot.slane %v10254_v23, %v15510_v28  ;;  %v20686_v1 = vld [vmem:[#allocation47_spill] sm:$0xff]  ;;  %v20691_v7 = vld [vmem:[#allocation72_spill] sm:$0xff]  ;;  %15090 = vmatprep.mubr.msk.f32.mxu1 %vm15403_vm1, %v20271_v55 }
 0x2c5   :  { %v10253_v4 = vcombine.low %v10231_v61, %v20680_v6  ;;  %v20687_v6 = vld [vmem:[#allocation43_spill] sm:$0xff]  ;;  %v20693_v23 = vld [vmem:[#allocation76_spill] sm:$0xff] }
 0x2c6   :  { %v19226_v63 = vrot.slane %v20684_v52, %v15510_v28  ;;  %v10303_v61 = vcombine.low %v10294_v30, %v18935_v3  ;;  %v20688_v22 = vcombine.low %v20686_v1, %v20687_v6  ;;  %v20692_v52 = vld [vmem:[#allocation51_spill] sm:$0xff]  ;;  %v20695_v3 = vcombine.low %v20693_v23, %v20694_v56  ;;  %v20697_v1 = vld [vmem:[#allocation80_spill] sm:$0xff]  ;;  %v20698_v6 = vld [vmem:[#allocation101_spill] sm:$0xff] }
 0x2c7   :  { %v19242_v38 = vrot.slane %v10253_v4, %v15510_v28  ;;  %v10589_v20 = vcombine.low %v20692_v52, %v20691_v7  ;;  %v15207_v4 = vpop.f32.mrb[105].mxu0  ;;  %v20701_v52 = vld [vmem:[#allocation115_spill] sm:$0xff]  ;;  %v20703_v23 = vld [vmem:[#allocation133_spill] sm:$0xff]  ;;  %15091 = vmatmul.mubr.msk.f32.gmra.mrb[48].mxu1 %vm8596_vm5, %v9639_v37 }
 0x2c8   :  { %20685 = vst [vmem:[#allocation91_spill] sm:$0xff] %v19226_v63  ;;  %v19238_v62 = vrot.slane %v20688_v22, %v15510_v28  ;;  %v19252_v30 = vrot.slane %v20695_v3, %v15510_v28  ;;  %v20699_v22 = vcombine.high %v20697_v1, %v20698_v6  ;;  %v19261_v42 = vrot.slane %v10303_v61, %v15510_v28  ;;  %v20704_v3 = vld [vmem:[#allocation135_spill] sm:$0xff]  ;;  %v20707_v61 = vld [vmem:[#allocation86_spill] sm:$0xff]  ;;  %v20708_v4 = vld [vmem:[#allocation116_spill] sm:$0xff] }
 0x2c9   :  { %v10639_v56 = vcombine.low %v20702_v17, %v20701_v52  ;;  %v20705_v58 = vcombine.high %v20703_v23, %v20704_v3  ;;  %v19274_v6 = vrot.slane %v10589_v20, %v15510_v28  ;;  %v20710_v7 = vcombine.low %v20708_v4, %v20709_v35  ;;  %v20713_v3 = vld [vmem:[#allocation148_spill] sm:$0xff]  ;;  %v20714_v1 = vld [vmem:[#allocation147_spill] sm:$0xff]  ;;  %15093 = vmatprep.mubr.msk.f32.mxu1 %vm15403_vm1, %v20271_v55 }
 0x2ca   :  { %20689 = vst [vmem:[#allocation98_spill] sm:$0xff] %v19238_v62  ;;  %20696 = vst [vmem:[#allocation126_spill] sm:$0xff] %v19252_v30  ;;  %v10623_v2 = vrot.slane %v20699_v22, %v15510_v28  ;;  %v10736_v20 = vcombine.low %v20714_v1, %v20713_v3  ;;  %v20717_v17 = vld [vmem:[#allocation163_spill] sm:$0xff]  ;;  %v20722_v1 = vld [vmem:[#allocation192_spill] sm:$0xff] }
 0x2cb   :  { %20700 = vst [vmem:[#allocation128_spill] sm:$0xff] %v19261_v42  ;;  %v10686_v18 = vrot.slane %v20705_v58, %v15510_v28  ;;  %20706 = vst [vmem:[#allocation127_spill] sm:$0xff] %v19274_v6  ;;  %v19281_v62 = vrot.slane %v20710_v7, %v15510_v28  ;;  %v19286_v52 = vrot.slane %v10639_v56, %v15510_v28  ;;  %v20712_v58 = vld [vmem:[#allocation140_spill] sm:$0xff]  ;;  %v20715_v7 = vld [vmem:[#allocation162_spill] sm:$0xff]  ;;  %15094 = vmatmul.mubr.msk.f32.gmra.mrb[50].mxu1 %vm8596_vm5, %v19101_v0 }
 0x2cc   :  { %v10638_v22 = vcombine.low %v20707_v61, %v10623_v2  ;;  %v20716_v61 = vld [vmem:[#allocation161_spill] sm:$0xff]  ;;  %v20718_v56 = vld [vmem:[#allocation166_spill] sm:$0xff]  ;;  %v19309_v37 = vrot.slane %v10736_v20, %v15510_v28  ;;  %v20724_v3 = vld [vmem:[#allocation196_spill] sm:$0xff]  ;;  %15096 = vmatprep.mubr.msk.f32.mxu1 %vm15403_vm1, %v20271_v55 }
 0x2cd   :  { %20711 = vst [vmem:[#allocation130_spill] sm:$0xff] %v19281_v62  ;;  %v10688_v23 = vcombine.low %v20712_v58, %v10686_v18  ;;  %v10737_v4 = vcombine.low %v20716_v61, %v20715_v7  ;;  %v20719_v63 = vcombine.high %v20717_v17, %v20718_v56  ;;  %v20725_v7 = vcombine.high %v20724_v3, %v18511_v27  ;;  %v20727_v56 = vld [vmem:[#allocation170_spill] sm:$0xff]  ;;  %v20728_v2 = vld [vmem:[#allocation197_spill] sm:$0xff]  ;;  %v20729_v30 = vld [vmem:[#allocation195_spill] sm:$0xff] }
 0x2ce   :  { %v19295_v35 = vrot.slane %v10638_v22, %v15510_v28  ;;  %20721 = vst [vmem:[#allocation155_spill] sm:$0xff] %v19309_v37  ;;  %v20723_v22 = vld [vmem:[#allocation175_spill] sm:$0xff]  ;;  %v10834_v20 = vcombine.low %v20729_v30, %v20728_v2  ;;  %v10884_v3 = vcombine.low %v18938_v57, %v18968_v8  ;;  %v20734_v2 = vcombine.low %v18883_v5, %v18909_v12  ;;  %v20738_v0 = vld [vmem:[#allocation14_spill] sm:$0xff]  ;;  %v20743_v5 = vld [vmem:[#allocation37_spill] sm:$0xff] }
 0x2cf   :  { %v10770_v42 = vrot.slane %v20719_v63, %v15510_v28  ;;  %v19306_v18 = vrot.slane %v10688_v23, %v15510_v28  ;;  %v10786_v58 = vcombine.low %v20723_v22, %v20722_v1  ;;  %v10833_v61 = vrot.slane %v20725_v7, %v15510_v28  ;;  %v20731_v22 = vld [vmem:[#allocation204_spill] sm:$0xff]  ;;  %15097 = vmatmul.mubr.msk.f32.gmra.mrb[52].mxu1 %vm8596_vm5, %v19124_v19  ;;  %v20755_v19 = vld [vmem:[#allocation119_spill] sm:$0xff] }
 0x2d0   :  { %v19320_v17 = vrot.slane %v10737_v4, %v15510_v28  ;;  %v19341_v30 = vrot.slane %v10834_v20, %v15510_v28  ;;  %v19355_v8 = vrot.slane %v10884_v3, %v15510_v28  ;;  %v20739_v7 = vrot.slane %v20738_v0, %v15510_v28  ;;  %v20745_v3 = vld [vmem:[#allocation39_spill] sm:$0xff]  ;;  %15103 = vmatprep.mubr.msk.f32.mxu1 %vm15403_vm1, %v20271_v55  ;;  %v20764_v37 = vld [vmem:[#allocation160_spill] sm:$0xff] }
 0x2d1   :  { %20720 = vst [vmem:[#allocation152_spill] sm:$0xff] %v19306_v18  ;;  %v10785_v23 = vcombine.low %v20727_v56, %v10770_v42  ;;  %v19328_v1 = vrot.slane %v10786_v58, %v15510_v28  ;;  %v10835_v27 = vcombine.low %v20731_v22, %v10833_v61  ;;  %v19347_v58 = vrot.slane %v20734_v2, %v15510_v28  ;;  %v20740_v61 = vld [vmem:[#allocation11_spill] sm:$0xff]  ;;  %v20744_v22 = vld [vmem:[#allocation41_spill] sm:$0xff]  ;;  %v20746_v42 = vld [vmem:[#allocation42_spill] sm:$0xff] }
 0x2d2   :  { %20726 = vst [vmem:[#allocation181_spill] sm:$0xff] %v19320_v17  ;;  %20733 = vst [vmem:[#allocation23_spill] sm:$0xff] %v19341_v30  ;;  %v20741_v56 = vrot.slane %v20740_v61, %v15510_v28  ;;  %v11113_v12 = vrot.slane %v20743_v5, %v15510_v28  ;;  %v11129_v2 = vrot.slane %v20745_v3, %v15510_v28  ;;  %v20748_v20 = vld [vmem:[#allocation75_spill] sm:$0xff]  ;;  %v20767_v62 = vld [vmem:[#allocation12_spill] sm:$0xff] }
 0x2d3   :  { %20730 = vst [vmem:[#allocation5_spill] sm:$0xff] %v19328_v1  ;;  %v19338_v4 = vrot.slane %v10785_v23, %v15510_v28  ;;  %20735 = vst [vmem:[#allocation7_spill] sm:$0xff] %v19347_v58  ;;  %v19352_v57 = vrot.slane %v10835_v27, %v15510_v28  ;;  %v11120_v27 = vrot.slane %v20744_v22, %v15510_v28  ;;  %v20749_v3 = vld [vmem:[#allocation71_spill] sm:$0xff]  ;;  %v20758_v58 = vld [vmem:[#allocation108_spill] sm:$0xff] }
 0x2d4   :  { %20737 = vst [vmem:[#allocation20_spill] sm:$0xff] %v19355_v8  ;;  %v19363_v23 = vcombine.low %v20741_v56, %v20739_v7  ;;  %v11148_v0 = vrot.slane %v20746_v42, %v15510_v28  ;;  %v20747_v56 = vld [vmem:[#allocation78_spill] sm:$0xff]  ;;  %v11197_v6 = vrot.slane %v20748_v20, %v15510_v28  ;;  %v20750_v63 = vrot.slane %v20749_v3, %v15510_v28 }
 0x2d5   :  { %20732 = vst [vmem:[#allocation6_spill] sm:$0xff] %v19338_v4  ;;  %20736 = vst [vmem:[#allocation17_spill] sm:$0xff] %v19352_v57  ;;  %v11185_v5 = vrot.slane %v20747_v56, %v15510_v28  ;;  %v11122_v22 = vcombine.low %v11113_v12, %v11120_v27  ;;  %v20752_v57 = vld [vmem:[#allocation134_spill] sm:$0xff]  ;;  %v20753_v56 = vld [vmem:[#allocation103_spill] sm:$0xff]  ;;  %v11276_v12 = vrot.slane %v20755_v19, %v15510_v28 }
 0x2d6   :  { %20742 = vst [vmem:[#allocation44_spill] sm:$0xff] %v19363_v23  ;;  %v11170_v42 = vcombine.low %v11148_v0, %v20750_v63  ;;  %v20751_v23 = vld [vmem:[#allocation105_spill] sm:$0xff]  ;;  %v11260_v7 = vrot.slane %v20752_v57, %v15510_v28  ;;  %v20754_v20 = vrot.slane %v20753_v56, %v15510_v28  ;;  %v20756_v27 = vld [vmem:[#allocation138_spill] sm:$0xff]  ;;  %v20759_v30 = vrot.slane %v20758_v58, %v15510_v28 }
 0x2d7   :  { %v11211_v61 = vrot.slane %v20751_v23, %v15510_v28  ;;  %v11295_v3 = vrot.slane %v20756_v27, %v15510_v28  ;;  %v20757_v63 = vld [vmem:[#allocation158_spill] sm:$0xff]  ;;  %v11136_v23 = vrot.slane %v11122_v22, %v15510_v28  ;;  %v20760_v4 = vld [vmem:[#allocation137_spill] sm:$0xff] }
 0x2d8   :  { %v11219_v8 = vcombine.low %v11197_v6, %v20754_v20  ;;  %v11309_v0 = vrot.slane %v20757_v63, %v15510_v28  ;;  %v11178_v57 = vrot.slane %v11170_v42, %v15510_v28  ;;  %v20761_v6 = vrot.slane %v20760_v4, %v15510_v28  ;;  %v20762_v19 = vld [vmem:[#allocation146_spill] sm:$0xff]  ;;  %v20766_v42 = vld [vmem:[#allocation164_spill] sm:$0xff]  ;;  %v20768_v58 = vld [vmem:[#allocation13_spill] sm:$0xff] }
 0x2d9   :  { %v11220_v1 = vcombine.low %v11211_v61, %v20759_v30  ;;  %v20763_v27 = vrot.slane %v20762_v19, %v15510_v28  ;;  %v20765_v63 = vrot.slane %v20764_v37, %v15510_v28  ;;  %v11344_v18 = vrot.slane %v20766_v42, %v15510_v28 }
 0x2da   :  { %v11269_v56 = vcombine.low %v11260_v7, %v20761_v6  ;;  %v11227_v20 = vrot.slane %v11219_v8, %v15510_v28  ;;  %v20769_v30 = vcombine.low %v20767_v62, %v20768_v58  ;;  %v19424_v4 = vcombine.low %v11129_v2, %v11136_v23  ;;  %v20771_v2 = vld [vmem:[#allocation169_spill] sm:$0xff]  ;;  %v20772_v23 = vld [vmem:[#allocation190_spill] sm:$0xff] }
 0x2db   :  { %v11317_v17 = vcombine.low %v11295_v3, %v20763_v27  ;;  %v11318_v22 = vcombine.low %v11309_v0, %v20765_v63  ;;  %v19426_v61 = vcombine.low %v11178_v57, %v11185_v5  ;;  %v11234_v8 = vrot.slane %v11220_v1, %v15510_v28  ;;  %v20776_v27 = vld [vmem:[#allocation198_spill] sm:$0xff] }
 0x2dc   :  { %15104 = vmatmul.mubr.msk.f32.vlgmr.msra.gmra.mrb[54].mxu1 %vm8596_vm5, %v20769_v30  ;;  %v11283_v7 = vrot.slane %v11269_v56, %v15510_v28  ;;  %v20770_v37 = vpack.c.bf16 %v19064_v59, %v19059_v31  ;;  %v11358_v0 = vrot.slane %v20771_v2, %v15510_v28  ;;  %v11365_v31 = vrot.slane %v20772_v23, %v15510_v28  ;;  %v20773_v59 = vld [vmem:[#allocation167_spill] sm:$0xff]  ;;  %v20780_v30 = vld [vmem:[#allocation93_spill] sm:$0xff] }
 0x2dd   :  { %15106 = vmatprep.mubr.msk.f32.mxu1 %vm15403_vm1, %v20271_v55  ;;  %v11325_v3 = vrot.slane %v11317_v17, %v15510_v28  ;;  %v11332_v62 = vrot.slane %v11318_v22, %v15510_v28  ;;  %v19440_v5 = vcombine.low %v11227_v20, %v11234_v8  ;;  %v20774_v57 = vrot.slane %v20773_v59, %v15510_v28  ;;  %v20775_v17 = vld [vmem:[#allocation191_spill] sm:$0xff]  ;;  %v20777_v20 = vld [vmem:[#allocation90_spill] sm:$0xff] }
 0x2de   :  { %15317 = vmatpush3.bf16.msra.mxu1 %v20770_v37  ;;  %v19442_v1 = vcombine.low %v11276_v12, %v11283_v7  ;;  %v11393_v19 = vrot.slane %v20775_v17, %v15510_v28  ;;  %v11407_v63 = vrot.slane %v20776_v27, %v15510_v28  ;;  %v11414_v22 = vrot.slane %v20777_v20, %v15510_v28  ;;  %v20781_v37 = vld [vmem:[#allocation193_spill] sm:$0xff] }
 0x2df   :  { %15318 = vmatprep.subr.bf16.mxu1 %v20264_v44  ;;  %v11366_v6 = vcombine.low %v11344_v18, %v20774_v57  ;;  %v19449_v56 = vcombine.low %v11325_v3, %v11332_v62  ;;  %v20778_v12 = vcombine.low %v19042_v33, %v19036_v39  ;;  %v20779_v58 = vcombine.low %v19133_v29, %v19143_v10  ;;  %v20783_v10 = vld [vmem:[#allocation207_spill] sm:$0xff] }
 0x2e0   :  { %v11367_v18 = vcombine.low %v11358_v0, %v11365_v31  ;;  %v11442_v8 = vrot.slane %v20780_v30, %v15510_v28  ;;  %v11449_v7 = vrot.slane %v18886_v45, %v15510_v28  ;;  %v20782_v3 = vrot.slane %v20781_v37, %v15510_v28 }
 0x2e1   :  { %v11948_v42 = vrot.slane %v20778_v12, %v15510_v28  ;;  %15107 = vmatmul.mubr.msk.f32.gmra.mrb[56].mxu1 %vm8596_vm5, %v20779_v58  ;;  %v11416_v33 = vcombine.low %v11407_v63, %v11414_v22  ;;  %v11456_v29 = vrot.slane %v18911_v51, %v15510_v28  ;;  %v11955_v62 = vrot.slane %v20783_v10, %v15510_v28  ;;  %v20788_v22 = vld [vmem:[#allocation22_spill] sm:$0xff]  ;;  %v19530_v10 = vpop.f32.mrb[8].mxu1 }
 0x2e2   :  { %15109 = vmatprep.mubr.msk.f32.mxu1 %vm15403_vm1, %v20271_v55  ;;  %v11415_v39 = vcombine.low %v11393_v19, %v20782_v3  ;;  %v11374_v2 = vrot.slane %v11366_v6, %v15510_v28  ;;  %v11381_v0 = vrot.slane %v11367_v18, %v15510_v28  ;;  %v11464_v23 = vcombine.low %v11442_v8, %v11449_v7  ;;  %v20791_v18 = vld [vmem:[#allocation29_spill] sm:$0xff] }
 0x2e3   :  { %v11957_v45 = vcombine.low %v18399_v32, %v20630_v14  ;;  %v11430_v59 = vrot.slane %v11416_v33, %v15510_v28  ;;  %v20784_v57 = vrot.slane %v18920_v46, %v15510_v28  ;;  %v19487_v51 = vcombine.low %v11948_v42, %v11955_v62  ;;  %v20792_v8 = vld [vmem:[#allocation33_spill] sm:$0xff] }
 0x2e4   :  { %v11423_v31 = vrot.slane %v11415_v39, %v15510_v28  ;;  %v20785_v19 = vcombine.low %v19146_v54, %v19154_v34  ;;  %v19493_v6 = vcombine.low %v11374_v2, %v11381_v0  ;;  %v11472_v27 = vrot.slane %v11464_v23, %v15510_v28  ;;  %v20787_v34 = vld [vmem:[#allocation34_spill] sm:$0xff] }
 0x2e5   :  { %v11465_v17 = vcombine.low %v11456_v29, %v20784_v57  ;;  %v11966_v32 = vrot.slane %v11957_v45, %v15510_v28  ;;  %v20786_v14 = vcombine.low %v20632_v60, %v18460_v26  ;;  %v11980_v20 = vrot.slane %v20787_v34, %v15510_v28  ;;  %v20790_v26 = vld [vmem:[#allocation24_spill] sm:$0xff]  ;;  %v20796_v0 = vld [vmem:[#allocation62_spill] sm:$0xff]  ;;  %v20797_v45 = vld [vmem:[#allocation63_spill] sm:$0xff] }
 0x2e6   :  { %15110 = vmatmul.mubr.msk.f32.gmra.mrb[58].mxu1 %vm8596_vm5, %v20785_v19  ;;  %v19503_v46 = vcombine.low %v11423_v31, %v11430_v59  ;;  %v20789_v12 = vcombine.high %v20788_v22, %v20788_v22  ;;  %v12197_v60 = vrot.slane %v20790_v26, %v15510_v28  ;;  %v12211_v30 = vrot.slane %v20791_v18, %v15510_v28  ;;  %v20801_v22 = vld [vmem:[#allocation30_spill] sm:$0xff] }
 0x2e7   :  { %v11973_v63 = vrot.slane %v20786_v14, %v15510_v28  ;;  %15112 = vmatprep.mubr.msk.f32.mxu1 %vm15403_vm1, %v20271_v55  ;;  %v11479_v54 = vrot.slane %v11465_v17, %v15510_v28  ;;  %v11981_v58 = vcombine.low %v19045_v21, %v11966_v32  ;;  %v12218_v7 = vrot.slane %v20792_v8, %v15510_v28  ;;  %v20799_v32 = vld [vmem:[#allocation94_spill] sm:$0xff] }
 0x2e8   :  { %v12188_v42 = vcombine.low %v20546_v43, %v20789_v12  ;;  %v20793_v33 = vcombine.high %v20602_v25, %v20602_v25  ;;  %v20794_v43 = vld [vmem:[#allocation56_spill] sm:$0xff]  ;;  %v20795_v21 = vcombine.low %v19157_v41, %v19138_v49  ;;  %v12260_v23 = vrot.slane %v20796_v0, %v15510_v28  ;;  %v15024_v25 = vpop.f32.mrb[9].mxu1 }
 0x2e9   :  { %v19519_v37 = vcombine.low %v11472_v27, %v11479_v54  ;;  %v11982_v3 = vcombine.low %v11973_v63, %v11980_v20  ;;  %v11989_v62 = vrot.slane %v11981_v58, %v15510_v28  ;;  %v12220_v2 = vcombine.low %v12211_v30, %v12218_v7  ;;  %v20800_v63 = vld [vmem:[#allocation97_spill] sm:$0xff]  ;;  %v19569_v7 = vpop.f32.mrb[106].mxu0 }
 0x2ea   :  { %v12204_v39 = vrot.slane %v12188_v42, %v15510_v28  ;;  %v12237_v29 = vcombine.low %v20794_v43, %v20793_v33  ;;  %15113 = vmatmul.mubr.msk.f32.gmra.mrb[60].mxu1 %vm8596_vm5, %v20795_v21  ;;  %v12267_v31 = vrot.slane %v20797_v45, %v15510_v28  ;;  %v6726_v57 = vcombine.high %v20500_v53, %v20500_v53  ;;  %v20803_v53 = vld [vmem:[#allocation64_spill] sm:$0xff]  ;;  %v20805_v30 = vld [vmem:[#allocation129_spill] sm:$0xff]  ;;  %v20808_v43 = vld [vmem:[#allocation99_spill] sm:$0xff]  ;;  %v15210_v21 = vpop.f32.mrb[107].mxu0 }
 0x2eb   :  { %15115 = vmatprep.mubr.msk.f32.mxu1 %vm15403_vm1, %v20271_v55  ;;  %v11996_v59 = vrot.slane %v11982_v3, %v15510_v28  ;;  %v12234_v17 = vrot.slane %v12220_v2, %v15510_v28  ;;  %v20798_v27 = vcombine.high %v20512_v16, %v20512_v16  ;;  %v12309_v54 = vrot.slane %v20800_v63, %v15510_v28  ;;  %v20810_v2 = vld [vmem:[#allocation123_spill] sm:$0xff] }
 0x2ec   :  { %v12219_v49 = vcombine.low %v12197_v60, %v12204_v39  ;;  %v12253_v41 = vrot.slane %v12237_v29, %v15510_v28  ;;  %v12269_v19 = vcombine.low %v12260_v23, %v12267_v31  ;;  %v20802_v12 = vrot.slane %v20801_v22, %v15510_v28  ;;  %v20806_v39 = vld [vmem:[#allocation100_spill] sm:$0xff]  ;;  %v20811_v23 = vld [vmem:[#allocation131_spill] sm:$0xff]  ;;  %v20812_v31 = vld [vmem:[#allocation150_spill] sm:$0xff] }
 0x2ed   :  { %v12288_v14 = vcombine.low %v20799_v32, %v20798_v27  ;;  %v19550_v34 = vcombine.low %v11989_v62, %v11996_v59  ;;  %v12286_v58 = vcombine.low %v20803_v53, %v6726_v57  ;;  %v20804_v26 = vcombine.low %v19170_v11, %v19173_v50 }
 0x2ee   :  { %v12227_v20 = vrot.slane %v12219_v49, %v15510_v28  ;;  %v12268_v42 = vcombine.low %v20802_v12, %v12253_v41  ;;  %v12283_v16 = vrot.slane %v12269_v19, %v15510_v28  ;;  %v7069_v18 = vcombine.high %v17650_v24, %v17650_v24  ;;  %v20813_v49 = vld [vmem:[#allocation67_spill] sm:$0xff]  ;;  %v20819_v12 = vld [vmem:[#allocation154_spill] sm:$0xff] }
 0x2ef   :  { %15116 = vmatmul.mubr.msk.f32.gmra.mrb[62].mxu1 %vm8596_vm5, %v20804_v26  ;;  %v12316_v60 = vrot.slane %v12288_v14, %v15510_v28  ;;  %v12358_v8 = vrot.slane %v20805_v30, %v15510_v28  ;;  %v12302_v50 = vrot.slane %v12286_v58, %v15510_v28  ;;  %v20807_v33 = vrot.slane %v20806_v39, %v15510_v28  ;;  %v20815_v19 = vld [vmem:[#allocation151_spill] sm:$0xff] }
 0x2f0   :  { %15118 = vmatprep.mubr.msk.f32.mxu1 %vm15403_vm1, %v20271_v55  ;;  %v19571_v3 = vcombine.low %v12227_v20, %v12234_v17  ;;  %v12276_v11 = vrot.slane %v12268_v42, %v15510_v28  ;;  %v20809_v24 = vrot.slane %v20808_v43, %v15510_v28  ;;  %v12337_v0 = vcombine.low %v20810_v2, %v7069_v18  ;;  %v20821_v18 = vld [vmem:[#allocation153_spill] sm:$0xff] }
 0x2f1   :  { %v12318_v62 = vcombine.low %v12309_v54, %v12316_v60  ;;  %v12393_v45 = vrot.slane %v20811_v23, %v15510_v28  ;;  %v12407_v25 = vrot.slane %v20812_v31, %v15510_v28  ;;  %v20814_v41 = vrot.slane %v20813_v49, %v15510_v28  ;;  %v20817_v54 = vld [vmem:[#allocation132_spill] sm:$0xff]  ;;  %v20828_v23 = vld [vmem:[#allocation183_spill] sm:$0xff] }
 0x2f2   :  { %v12366_v29 = vcombine.low %v20809_v24, %v20807_v33  ;;  %v19586_v59 = vcombine.low %v12276_v11, %v12283_v16  ;;  %v12414_v27 = vrot.slane %v20815_v19, %v15510_v28  ;;  %v20816_v32 = vcombine.low %v19202_v40, %v19205_v15  ;;  %v20820_v40 = vld [vmem:[#allocation178_spill] sm:$0xff]  ;;  %v20824_v24 = vld [vmem:[#allocation157_spill] sm:$0xff]  ;;  %v20829_v31 = vld [vmem:[#allocation208_spill] sm:$0xff] }
 0x2f3   :  { %v12317_v57 = vcombine.low %v20814_v41, %v12302_v50  ;;  %v12332_v14 = vrot.slane %v12318_v62, %v15510_v28  ;;  %v12365_v63 = vrot.slane %v12337_v0, %v15510_v28  ;;  %v20818_v20 = vrot.slane %v20817_v54, %v15510_v28  ;;  %v20823_v50 = vld [vmem:[#allocation182_spill] sm:$0xff]  ;;  %v20826_v62 = vld [vmem:[#allocation184_spill] sm:$0xff] }
 0x2f4   :  { %v12374_v17 = vrot.slane %v12366_v29, %v15510_v28  ;;  %15119 = vmatmul.mubr.msk.f32.gmra.mrb[64].mxu1 %vm8596_vm5, %v20816_v32  ;;  %v12449_v42 = vrot.slane %v20819_v12, %v15510_v28  ;;  %v12416_v58 = vcombine.low %v12407_v25, %v12414_v27  ;;  %v12463_v15 = vrot.slane %v20820_v40, %v15510_v28  ;;  %v14625_v40 = vld [vmem:[%s20081_s3 + $0x50] sm:$0xff] }
 0x2f5   :  { %v12415_v22 = vcombine.low %v12393_v45, %v20818_v20  ;;  %15121 = vmatprep.mubr.msk.f32.mxu1 %vm15403_vm1, %v20271_v55  ;;  %v12325_v53 = vrot.slane %v12317_v57, %v15510_v28  ;;  %v7950_v26 = vcombine.high %v18390_v13, %v18390_v13  ;;  %v12367_v16 = vcombine.low %v12358_v8, %v12365_v63 }
 0x2f6   :  { %v20822_v30 = vrot.slane %v20821_v18, %v15510_v28  ;;  %v12491_v39 = vrot.slane %v20823_v50, %v15510_v28  ;;  %v12430_v43 = vrot.slane %v12416_v58, %v15510_v28  ;;  %v20825_v29 = vrot.slane %v20824_v24, %v15510_v28  ;;  %v20837_v18 = vld [vmem:[#allocation15_spill] sm:$0xff]  ;;  %v20844_v24 = vld [vmem:[#allocation126_spill] sm:$0xff] }
 0x2f7   :  { %v12423_v60 = vrot.slane %v12415_v22, %v15510_v28  ;;  %v19618_v33 = vcombine.low %v12325_v53, %v12332_v14  ;;  %v12484_v13 = vcombine.low %v20826_v62, %v7950_v26  ;;  %v20827_v8 = vcombine.low %v19187_v47, %v19193_v48  ;;  %v20830_v48 = vld [vmem:[#allocation58_spill] sm:$0xff]  ;;  %v20831_v14 = vld [vmem:[#allocation185_spill] sm:$0xff]  ;;  %v20835_v26 = vld [vmem:[#allocation128_spill] sm:$0xff] }
 0x2f8   :  { %v12464_v11 = vcombine.low %v20822_v30, %v12449_v42  ;;  %v12465_v21 = vcombine.low %v20825_v29, %v12463_v15  ;;  %v12381_v2 = vrot.slane %v12367_v16, %v15510_v28  ;;  %v12498_v45 = vrot.slane %v20828_v23, %v15510_v28  ;;  %v20833_v22 = vld [vmem:[#allocation61_spill] sm:$0xff]  ;;  %v20838_v30 = vld [vmem:[#allocation16_spill] sm:$0xff]  ;;  %v20840_v50 = vld [vmem:[#allocation91_spill] sm:$0xff] }
 0x2f9   :  { %15122 = vmatmul.mubr.msk.f32.gmra.mrb[66].mxu1 %vm8596_vm5, %v20827_v8  ;;  %v12540_v25 = vrot.slane %v20829_v31, %v15510_v28  ;;  %v19637_v49 = vcombine.low %v12423_v60, %v12430_v43  ;;  %v12512_v47 = vrot.slane %v12484_v13, %v15510_v28  ;;  %v12547_v57 = vrot.slane %v20830_v48, %v15510_v28  ;;  %v14626_v15 = vld [vmem:[%s20081_s3 + $0x58] sm:$0xff]  ;;  %v20843_v43 = vld [vmem:[#allocation127_spill] sm:$0xff]  ;;  %v20847_v8 = vld [vmem:[#allocation130_spill] sm:$0xff] }
 0x2fa   :  { %v12472_v0 = vrot.slane %v12464_v11, %v15510_v28  ;;  %15124 = vmatprep.mubr.msk.f32.mxu1 %vm15403_vm1, %v20271_v55  ;;  %v12479_v41 = vrot.slane %v12465_v21, %v15510_v28  ;;  %v19643_v19 = vcombine.low %v12374_v17, %v12381_v2  ;;  %v12513_v27 = vcombine.low %v12491_v39, %v12498_v45  ;;  %v20841_v39 = vld [vmem:[#allocation98_spill] sm:$0xff]  ;;  %v19696_v21 = vpop.f32.mrb[10].mxu1  ;;  %v20848_v2 = vld [vmem:[#allocation152_spill] sm:$0xff]  ;;  %v20850_v23 = vld [vmem:[#allocation155_spill] sm:$0xff] }
 0x2fb   :  { %v20832_v63 = vrot.slane %v20831_v14, %v15510_v28  ;;  %v12562_v20 = vcombine.low %v12540_v25, %v12547_v57  ;;  %v12577_v12 = vrot.slane %v20833_v22, %v15510_v28  ;;  %v20834_v42 = vcombine.low %v19242_v38, %v19231_v36  ;;  %v15027_v62 = vpop.f32.mrb[11].mxu1  ;;  %v20851_v45 = vld [vmem:[#allocation181_spill] sm:$0xff]  ;;  %v20856_v48 = vld [vmem:[#allocation23_spill] sm:$0xff] }
 0x2fc   :  { %v19645_v32 = vcombine.low %v12472_v0, %v12479_v41  ;;  %v12521_v17 = vrot.slane %v12513_v27, %v15510_v28  ;;  %v20836_v16 = vcombine.low %v19220_v9, %v20835_v26  ;;  %v15319_v60 = vpack.c.bf16 %v14626_v15, %v14625_v40  ;;  %v20854_v41 = vld [vmem:[#allocation5_spill] sm:$0xff]  ;;  %v20859_v14 = vld [vmem:[#allocation7_spill] sm:$0xff] }
 0x2fd   :  { %v12514_v54 = vcombine.low %v20832_v63, %v12512_v47  ;;  %15125 = vmatmul.mubr.msk.f32.gmra.mrb[68].mxu1 %vm8596_vm5, %v20834_v42  ;;  %v12570_v58 = vrot.slane %v12562_v20, %v15510_v28  ;;  %v20839_v11 = vcombine.low %v20837_v18, %v20838_v30  ;;  %v20842_v9 = vcombine.low %v20840_v50, %v20841_v39  ;;  %v20857_v57 = vld [vmem:[#allocation17_spill] sm:$0xff]  ;;  %v20860_v63 = vld [vmem:[#allocation20_spill] sm:$0xff] }
 0x2fe   :  { %15127 = vmatprep.mubr.msk.f32.mxu1 %vm15403_vm1, %v20271_v55  ;;  %v20845_v29 = vcombine.low %v20843_v43, %v20844_v24  ;;  %v20846_v13 = vcombine.low %v19295_v35, %v19286_v52  ;;  %v20849_v0 = vcombine.low %v20847_v8, %v20848_v2  ;;  %v20852_v31 = vcombine.low %v20850_v23, %v20851_v45  ;;  %v20853_v35 = vld [vmem:[#allocation6_spill] sm:$0xff]  ;;  %v20862_v20 = vld [vmem:[#allocation44_spill] sm:$0xff]  ;;  %v20863_v22 = vld [vmem:[#allocation21_spill] sm:$0xff] }
 0x2ff   :  { %v12528_v53 = vrot.slane %v12514_v54, %v15510_v28  ;;  %v19669_v38 = vcombine.low %v12570_v58, %v12577_v12  ;;  %v20855_v47 = vcombine.low %v20853_v35, %v20854_v41  ;;  %v20858_v27 = vcombine.low %v20856_v48, %v20857_v57  ;;  %v20865_v43 = vld [vmem:[#allocation200_spill] sm:$0xff] }
 0x300   :  { %v20861_v54 = vcombine.low %v20859_v14, %v20860_v63  ;;  %v20867_v23 = vld [vmem:[#allocation124_spill] sm:$0xff] }
 0x301   :  { %v19667_v36 = vcombine.low %v12521_v17, %v12528_v53  ;;  %15128 = vmatmul.mubr.msk.f32.gmra.mrb[70].mxu1 %vm8596_vm5, %v20836_v16  ;;  %v14648_v53 = vld [vmem:[%s20081_s3 + $0x78] sm:$0xff] }
 0x302   :  { %15134 = vmatprep.mubr.msk.f32.mxu1 %vm15403_vm1, %v20271_v55  ;;  %v19714_v25 = vpop.f32.mrb[108].mxu0 }
 0x303   :  { %v15213_v52 = vpop.f32.mrb[109].mxu0 }
 0x304   :  { %v20868_v52 = vld [vmem:[#allocation68_spill] sm:$0xff] }
 0x305   :  { %15135 = vmatmul.mubr.msk.f32.vlgmr.msra.gmra.mrb[72].mxu1 %vm8596_vm5, %v20839_v11 }
 0x306   :  { %15320 = vmatpush3.bf16.msra.mxu1 %v15319_v60  ;;  %15137 = vmatprep.mubr.msk.f32.mxu1 %vm15403_vm1, %v20271_v55 }
 0x307   :  { %15336 = vmatprep.subr.bf16.mxu1 %v20264_v44 }
 0x309   :  { %15138 = vmatmul.mubr.msk.f32.gmra.mrb[74].mxu1 %vm8596_vm5, %v20842_v9 }
 0x30a   :  { %15140 = vmatprep.mubr.msk.f32.mxu1 %vm15403_vm1, %v20271_v55 }
 0x30d   :  { %15141 = vmatmul.mubr.msk.f32.gmra.mrb[76].mxu1 %vm8596_vm5, %v20845_v29 }
 0x30e   :  { %15143 = vmatprep.mubr.msk.f32.mxu1 %vm15403_vm1, %v20271_v55 }
 0x311   :  { %15144 = vmatmul.mubr.msk.f32.gmra.mrb[78].mxu1 %vm8596_vm5, %v20846_v13  ;;  %v20866_v13 = vld [vmem:[#allocation89_spill] sm:$0xff] }
 0x312   :  { %15146 = vmatprep.mubr.msk.f32.mxu1 %vm15403_vm1, %v20271_v55 }
 0x315   :  { %15147 = vmatmul.mubr.msk.f32.gmra.mrb[80].mxu1 %vm8596_vm5, %v20849_v0 }
 0x316   :  { %15149 = vmatprep.mubr.msk.f32.mxu1 %vm15403_vm1, %v20271_v55 }
 0x319   :  { %15150 = vmatmul.mubr.msk.f32.gmra.mrb[82].mxu1 %vm8596_vm5, %v20852_v31 }
 0x31a   :  { %15152 = vmatprep.mubr.msk.f32.mxu1 %vm15403_vm1, %v20271_v55 }
 0x31d   :  { %15153 = vmatmul.mubr.msk.f32.gmra.mrb[84].mxu1 %vm8596_vm5, %v20855_v47 }
 0x31e   :  { %15155 = vmatprep.mubr.msk.f32.mxu1 %vm15403_vm1, %v20271_v55 }
 0x31f   :  { %v19754_v12 = vpop.f32.mrb[12].mxu1 }
 0x320   :  { %v15030_v42 = vpop.f32.mrb[13].mxu1 }
 0x321   :  { %15156 = vmatmul.mubr.msk.f32.gmra.mrb[86].mxu1 %vm8596_vm5, %v20858_v27 }
 0x322   :  { %15158 = vmatprep.mubr.msk.f32.mxu1 %vm15403_vm1, %v20271_v55 }
 0x325   :  { %15159 = vmatmul.mubr.msk.f32.gmra.mrb[88].mxu1 %vm8596_vm5, %v20861_v54 }
 0x326   :  { %15165 = vmatprep.mubr.msk.f32.mxu1 %vm15403_vm1, %v20271_v55 }
 0x329   :  { %15166 = vmatmul.mubr.msk.f32.vlgmr.msra.gmra.mrb[90].mxu1 %vm8596_vm5, %v20862_v20 }
 0x32a   :  { %15337 = vmatpush3.bf16.msra.mxu1 %v20863_v22  ;;  %15168 = vmatprep.mubr.msk.f32.mxu1 %vm15403_vm1, %v20271_v55 }
 0x32b   :  { %15324 = vmatprep.subr.bf16.mxu1 %v20264_v44 }
 0x32d   :  { %15169 = vmatmul.mubr.msk.f32.gmra.mrb[92].mxu1 %vm8596_vm5, %v19424_v4  ;;  %v19760_v4 = vpop.f32.mrb[110].mxu0 }
 0x32e   :  { %15171 = vmatprep.mubr.msk.f32.mxu1 %vm15403_vm1, %v20271_v55 }
 0x331   :  { %15172 = vmatmul.mubr.msk.f32.gmra.mrb[94].mxu1 %vm8596_vm5, %v19426_v61  ;;  %v15216_v61 = vpop.f32.mrb[111].mxu0 }
 0x332   :  { %15174 = vmatprep.mubr.msk.f32.mxu1 %vm15403_vm1, %v20271_v55 }
 0x335   :  { %15175 = vmatmul.mubr.msk.f32.gmra.mrb[96].mxu1 %vm8596_vm5, %v19440_v5  ;;  %v19766_v5 = vpop.f32.mrb[112].mxu0 }
 0x336   :  { %15177 = vmatprep.mubr.msk.f32.mxu1 %vm15403_vm1, %v20271_v55  ;;  %v15260_v17 = vpop.f32.mrb[113].mxu0 }
 0x339   :  { %15178 = vmatmul.mubr.msk.f32.gmra.mrb[98].mxu1 %vm8596_vm5, %v19442_v1  ;;  %v19776_v1 = vpop.f32.mrb[114].mxu0 }
 0x33a   :  { %15180 = vmatprep.mubr.msk.f32.mxu1 %vm15403_vm1, %v20271_v55 }
 0x33d   :  { %15181 = vmatmul.mubr.msk.f32.gmra.mrb[100].mxu1 %vm8596_vm5, %v19449_v56  ;;  %v14647_v56 = vld [vmem:[%s20081_s3 + $0x70] sm:$0xff] }
 0x33e   :  { %15183 = vmatprep.mubr.msk.f32.mxu1 %vm15403_vm1, %v20271_v55 }
 0x341   :  { %15184 = vmatmul.mubr.msk.f32.gmra.mrb[102].mxu1 %vm8596_vm5, %v19493_v6  ;;  %v15263_v6 = vpop.f32.mrb[115].mxu0 }
 0x342   :  { %15186 = vmatprep.mubr.msk.f32.mxu1 %vm15403_vm1, %v20271_v55  ;;  %v19793_v58 = vpop.f32.mrb[116].mxu0 }
 0x343   :  { %v15266_v40 = vpop.f32.mrb[117].mxu0 }
 0x345   :  { %15187 = vmatmul.mubr.msk.f32.gmra.mrb[104].mxu1 %vm8596_vm5, %v19503_v46  ;;  %v15325_v46 = vpack.c.bf16 %v14648_v53, %v14647_v56 }
 0x346   :  { %15189 = vmatprep.mubr.msk.f32.mxu1 %vm15403_vm1, %v20271_v55  ;;  %v8716_v26 = vpop.f32.mrb[14].mxu1 }
 0x347   :  { %v15033_v60 = vpop.f32.mrb[15].mxu1 }
 0x349   :  { %15190 = vmatmul.mubr.msk.f32.gmra.mrb[106].mxu1 %vm8596_vm5, %v19519_v37  ;;  %v20864_v37 = vld [vmem:[#allocation9_spill] sm:$0xff] }
 0x34a   :  { %15217 = vmatprep.mubr.msk.f32.mxu1 %vm15403_vm1, %v20271_v55 }
 0x34d   :  { %15218 = vmatmul.mubr.msk.f32.vlgmr.msra.gmra.mrb[108].mxu1 %vm8596_vm5, %v19487_v51  ;;  %v19803_v51 = vpop.f32.mrb[118].mxu0 }
 0x34e   :  { %15326 = vmatpush3.bf16.msra.mxu1 %v15325_v46  ;;  %15220 = vmatprep.mubr.msk.f32.mxu1 %vm15403_vm1, %v20271_v55  ;;  %v15269_v15 = vpop.f32.mrb[119].mxu0 }
 0x34f   :  { %15330 = vmatprep.subr.bf16.mxu1 %v20264_v44 }
 0x351   :  { %15221 = vmatmul.mubr.msk.f32.gmra.mrb[110].mxu1 %vm8596_vm5, %v19550_v34  ;;  %v19811_v34 = vpop.f32.mrb[120].mxu0  ;;  %v8721_v30 = vpop.f32.mrb[16].mxu1 }
 0x352   :  { %15227 = vmatprep.mubr.msk.f32.mxu1 %vm15403_vm1, %v20271_v55  ;;  %v15272_v16 = vpop.f32.mrb[121].mxu0  ;;  %v15036_v50 = vpop.f32.mrb[17].mxu1 }
 0x353   :  { %v19817_v18 = vpop.f32.mrb[122].mxu0 }
 0x355   :  { %15228 = vmatmul.mubr.msk.f32.vlgmr.msra.gmra.mrb[112].mxu1 %vm8596_vm5, %v20864_v37  ;;  %v9250_v39 = vpop.f32.mrb[18].mxu1 }
 0x356   :  { %15230 = vmatprep.mubr.msk.f32.mxu1 %vm15403_vm1, %v20271_v55  ;;  %v15043_v24 = vpop.f32.mrb[19].mxu1 }
 0x359   :  { %15231 = vmatmul.mubr.msk.f32.gmra.mrb[114].mxu1 %vm8596_vm5, %v19571_v3  ;;  %v15275_v3 = vpop.f32.mrb[123].mxu0 }
 0x35a   :  { %15233 = vmatprep.mubr.msk.f32.mxu1 %vm15403_vm1, %v20271_v55 }
 0x35d   :  { %15234 = vmatmul.mubr.msk.f32.gmra.mrb[116].mxu1 %vm8596_vm5, %v19586_v59  ;;  %v19823_v59 = vpop.f32.mrb[124].mxu0 }
 0x35e   :  { %15236 = vmatprep.mubr.msk.f32.mxu1 %vm15403_vm1, %v20271_v55  ;;  %v15278_v11 = vpop.f32.mrb[125].mxu0 }
 0x361   :  { %15237 = vmatmul.mubr.msk.f32.gmra.mrb[118].mxu1 %vm8596_vm5, %v19618_v33  ;;  %v19829_v33 = vpop.f32.mrb[126].mxu0 }
 0x362   :  { %15239 = vmatprep.mubr.msk.f32.mxu1 %vm15403_vm1, %v20271_v55  ;;  %v15281_v9 = vpop.f32.mrb[127].mxu0 }
 0x363   :  { %v19836_v29 = vpop.f32.mrb[128].mxu0 }
 0x364   :  { %v15284_v62 = vpop.f32.mrb[129].mxu0 }
 0x365   :  { %15240 = vmatmul.mubr.msk.f32.gmra.mrb[120].mxu1 %vm8596_vm5, %v19643_v19  ;;  %v9251_v19 = vadd.f32 %v9250_v39, %v20865_v43 }
 0x366   :  { %15242 = vmatprep.mubr.msk.f32.mxu1 %vm15403_vm1, %v20271_v55 }
 0x369   :  { %15243 = vmatmul.mubr.msk.f32.gmra.mrb[122].mxu1 %vm8596_vm5, %v19637_v49  ;;  %v9255_v49 = vpop.f32.mrb[20].mxu1 }
 0x36a   :  { %15245 = vmatprep.mubr.msk.f32.mxu1 %vm15403_vm1, %v20271_v55  ;;  %v9256_v8 = vadd.f32 %v9255_v49, %v20866_v13  ;;  %v15046_v2 = vpop.f32.mrb[21].mxu1 }
 0x36b   :  { %v9260_v0 = vpop.f32.mrb[22].mxu1 }
 0x36c   :  { %v9261_v45 = vadd.f32 %v9260_v0, %v20867_v23 }
 0x36d   :  { %15246 = vmatmul.mubr.msk.f32.gmra.mrb[124].mxu1 %vm8596_vm5, %v19645_v32  ;;  %v15049_v32 = vpop.f32.mrb[23].mxu1 }
 0x36e   :  { %15248 = vmatprep.mubr.msk.f32.mxu1 %vm15403_vm1, %v20271_v55  ;;  %v9265_v31 = vpop.f32.mrb[24].mxu1 }
 0x36f   :  { %v9266_v35 = vadd.f32 %v9265_v31, %v20868_v52  ;;  %v15052_v41 = vpop.f32.mrb[25].mxu1 }
 0x370   :  { %v9270_v47 = vpop.f32.mrb[26].mxu1 }
 0x371   :  { %15249 = vmatmul.mubr.msk.f32.gmra.mrb[126].mxu1 %vm8596_vm5, %v19667_v36  ;;  %v9271_v36 = vadd.f32 %v9270_v47, %v19530_v10  ;;  %v15055_v48 = vpop.f32.mrb[27].mxu1 }
 0x372   :  { %15251 = vmatprep.mubr.msk.f32.mxu1 %vm15403_vm1, %v20271_v55  ;;  %v9275_v57 = vpop.f32.mrb[28].mxu1 }
 0x373   :  { %v9276_v27 = vadd.f32 %v9275_v57, %v19696_v21  ;;  %v15058_v14 = vpop.f32.mrb[29].mxu1 }
 0x374   :  { %v9280_v63 = vpop.f32.mrb[30].mxu1 }
 0x375   :  { %15252 = vmatmul.mubr.msk.f32.gmra.mrb[128].mxu1 %vm8596_vm5, %v19669_v38  ;;  %v9281_v54 = vadd.f32 %v9280_v63, %v19754_v12  ;;  %v15061_v20 = vpop.f32.mrb[31].mxu1 }
 0x376   :  { %15293 = vmatprep.mubr.msk.f32.mxu1 %vm15403_vm1, %v20271_v55 }
 0x379   :  { %v9285_v38 = vpop.f32.mrb[32].mxu1 }
 0x37a   :  { %v9286_v22 = vadd.f32 %v9285_v38, %v8716_v26  ;;  %v15064_v42 = vpop.f32.mrb[33].mxu1 }
 0x37d   :  { %v9290_v55 = vpop.f32.mrb[34].mxu1 }
 0x37e   :  { %v9291_v61 = vadd.f32 %v9290_v55, %v8721_v30  ;;  %v15067_v17 = vpop.f32.mrb[35].mxu1 }
 0x381   :  { %v9822_v56 = vpop.f32.mrb[36].mxu1 }
 0x382   :  { %v9866_v53 = vadd.f32 %v9822_v56, %v9251_v19  ;;  %v15074_v6 = vpop.f32.mrb[37].mxu1 }
 0x385   :  { %v9827_v46 = vpop.f32.mrb[38].mxu1 }
 0x386   :  { %v9867_v10 = vadd.f32 %v9827_v46, %v9256_v8  ;;  %v15077_v40 = vpop.f32.mrb[39].mxu1 }
 0x389   :  { %v9832_v37 = vpop.f32.mrb[40].mxu1 }
 0x38a   :  { %v9868_v15 = vadd.f32 %v9832_v37, %v9261_v45  ;;  %v15080_v21 = vpop.f32.mrb[41].mxu1 }
 0x38d   :  { %v9837_v16 = vpop.f32.mrb[42].mxu1 }
 0x38e   :  { %v9869_v60 = vadd.f32 %v9837_v16, %v9266_v35  ;;  %v15083_v3 = vpop.f32.mrb[43].mxu1 }
 0x392   :  { %v9842_v12 = vpop.f32.mrb[44].mxu1 }
 0x393   :  { %v9870_v11 = vadd.f32 %v9842_v12, %v9271_v36  ;;  %v15086_v50 = vpop.f32.mrb[45].mxu1 }
 0x396   :  { %v9847_v26 = vpop.f32.mrb[46].mxu1 }
 0x397   :  { %v9871_v39 = vadd.f32 %v9847_v26, %v9276_v27  ;;  %v15089_v9 = vpop.f32.mrb[47].mxu1 }
 0x39a   :  { %v9852_v30 = vpop.f32.mrb[48].mxu1 }
 0x39b   :  { %v9872_v43 = vadd.f32 %v9852_v30, %v9281_v54  ;;  %v15092_v24 = vpop.f32.mrb[49].mxu1 }
 0x39e   :  { %v9857_v19 = vpop.f32.mrb[50].mxu1 }
 0x39f   :  { %v9873_v62 = vadd.f32 %v9857_v19, %v9286_v22  ;;  %v15095_v49 = vpop.f32.mrb[51].mxu1 }
 0x3a2   :  { %v9862_v13 = vpop.f32.mrb[52].mxu1 }
 0x3a3   :  { %v9874_v8 = vadd.f32 %v9862_v13, %v9291_v61  ;;  %v15098_v2 = vpop.f32.mrb[53].mxu1 }
 0x3af   :  { %v10403_v0 = vpop.f32.mrb[54].mxu1 }
 0x3b0   :  { %v10447_v23 = vadd.f32 %v10403_v0, %v9866_v53  ;;  %v15105_v45 = vpop.f32.mrb[55].mxu1 }
 0x3b4   :  { %v10408_v32 = vpop.f32.mrb[56].mxu1 }
 0x3b5   :  { %v10448_v31 = vadd.f32 %v10408_v32, %v9867_v10  ;;  %v15108_v52 = vpop.f32.mrb[57].mxu1 }
 0x3b9   :  { %v10413_v35 = vpop.f32.mrb[58].mxu1 }
 0x3ba   :  { %v10449_v41 = vadd.f32 %v10413_v35, %v9868_v15  ;;  %v15111_v47 = vpop.f32.mrb[59].mxu1 }
 0x3bd   :  { %v10418_v36 = vpop.f32.mrb[60].mxu1 }
 0x3be   :  { %v10450_v48 = vadd.f32 %v10418_v36, %v9869_v60  ;;  %v15114_v57 = vpop.f32.mrb[61].mxu1 }
 0x3c2   :  { %v10423_v27 = vpop.f32.mrb[62].mxu1 }
 0x3c3   :  { %v10451_v14 = vadd.f32 %v10423_v27, %v9870_v11  ;;  %v15117_v63 = vpop.f32.mrb[63].mxu1  ;;  %v20870_v27 = vld [vmem:[#allocation87_spill] sm:$0xff] }
 0x3c7   :  { %v10428_v54 = vpop.f32.mrb[64].mxu1 }
 0x3c8   :  { %v10452_v20 = vadd.f32 %v10428_v54, %v9871_v39  ;;  %v15120_v38 = vpop.f32.mrb[65].mxu1 }
 0x3c9   :  { %v20871_v38 = vld [vmem:[#allocation125_spill] sm:$0xff] }
 0x3cc   :  { %v10433_v22 = vpop.f32.mrb[66].mxu1 }
 0x3cd   :  { %v10453_v42 = vadd.f32 %v10433_v22, %v9872_v43  ;;  %v15123_v55 = vpop.f32.mrb[67].mxu1 }
 0x3ce   :  { %v14310_v55 = vld [vmem:[%s20082_s5] sm:$0xff] }
 0x3d0   :  { %v10438_v61 = vpop.f32.mrb[68].mxu1 }
 0x3d1   :  { %v10454_v17 = vadd.f32 %v10438_v61, %v9873_v62  ;;  %v15126_v56 = vpop.f32.mrb[69].mxu1  ;;  %v14311_v61 = vld [vmem:[%s20082_s5 + $0x8] sm:$0xff] }
 0x3d4   :  { %v10443_v53 = vpop.f32.mrb[70].mxu1 }
 0x3d5   :  { %v10455_v6 = vadd.f32 %v10443_v53, %v9874_v8  ;;  %v15129_v46 = vpop.f32.mrb[71].mxu1 }
 0x3d6   :  { %v14313_v46 = vld [vmem:[%s20082_s5 + $0x18] sm:$0xff] }
 0x3d8   :  { %v10984_v10 = vpop.f32.mrb[72].mxu1 }
 0x3d9   :  { %v11028_v40 = vadd.f32 %v10984_v10, %v10447_v23  ;;  %v15136_v37 = vpop.f32.mrb[73].mxu1  ;;  %v20872_v10 = vld [vmem:[#allocation104_spill] sm:$0xff] }
 0x3dc   :  { %v10989_v15 = vpop.f32.mrb[74].mxu1 }
 0x3dd   :  { %v11029_v21 = vadd.f32 %v10989_v15, %v10448_v31  ;;  %v15139_v16 = vpop.f32.mrb[75].mxu1 }
 0x3e0   :  { %v10994_v60 = vpop.f32.mrb[76].mxu1 }
 0x3e1   :  { %v11030_v3 = vadd.f32 %v10994_v60, %v10449_v41  ;;  %v15142_v12 = vpop.f32.mrb[77].mxu1  ;;  %v20869_v41 = vld [vmem:[#allocation203_spill] sm:$0xff] }
 0x3e4   :  { %v10999_v11 = vpop.f32.mrb[78].mxu1 }
 0x3e5   :  { %v11031_v50 = vadd.f32 %v10999_v11, %v10450_v48  ;;  %v15145_v26 = vpop.f32.mrb[79].mxu1 }
 0x3e8   :  { %v11004_v39 = vpop.f32.mrb[80].mxu1 }
 0x3e9   :  { %v11032_v9 = vadd.f32 %v11004_v39, %v10451_v14  ;;  %v15148_v30 = vpop.f32.mrb[81].mxu1 }
 0x3ec   :  { %v11009_v43 = vpop.f32.mrb[82].mxu1 }
 0x3ed   :  { %v11033_v24 = vadd.f32 %v11009_v43, %v10452_v20  ;;  %v15151_v19 = vpop.f32.mrb[83].mxu1 }
 0x3f0   :  { %v11014_v62 = vpop.f32.mrb[84].mxu1 }
 0x3f1   :  { %v11034_v49 = vadd.f32 %v11014_v62, %v10453_v42  ;;  %v15154_v13 = vpop.f32.mrb[85].mxu1 }
 0x3f4   :  { %v11019_v8 = vpop.f32.mrb[86].mxu1 }
 0x3f5   :  { %v11035_v2 = vadd.f32 %v11019_v8, %v10454_v17  ;;  %v15157_v0 = vpop.f32.mrb[87].mxu1  ;;  %v14312_v17 = vld [vmem:[%s20082_s5 + $0x10] sm:$0xff] }
 0x3f6   :  { %v15334_v37 = vpack.c.bf16 %v14313_v46, %v14312_v17 }
 0x3f8   :  { %v11024_v23 = vpop.f32.mrb[88].mxu1 }
 0x3f9   :  { %v11036_v45 = vadd.f32 %v11024_v23, %v10455_v6  ;;  %v15160_v32 = vpop.f32.mrb[89].mxu1  ;;  %v15331_v6 = vpack.c.bf16 %v14311_v61, %v14310_v55 }
 0x3fb   :  { %15332 = vmatpush3.bf16.msra.mxu1 %v15331_v6 }
 0x3fc   :  { %v11565_v31 = vpop.f32.mrb[90].mxu1  ;;  %15333 = vmatprep.subr.bf16.mxu1 %v20264_v44 }
 0x3fd   :  { %v11609_v52 = vadd.f32 %v11565_v31, %v11028_v40  ;;  %v15167_v35 = vpop.f32.mrb[91].mxu1 }
 0x3ff   :  { %v12126_v47 = vadd.f32 %v20869_v41, %v11609_v52  ;;  %15335 = vmatpush3.bf16.msra.mxu1 %v15334_v37 }
 0x400   :  { %v11570_v36 = vpop.f32.mrb[92].mxu1 }
 0x401   :  { %v11610_v48 = vadd.f32 %v11570_v36, %v11029_v21  ;;  %v15170_v57 = vpop.f32.mrb[93].mxu1 }
 0x403   :  { %v12127_v14 = vadd.f32 %v20870_v27, %v11610_v48 }
 0x404   :  { %v11575_v63 = vpop.f32.mrb[94].mxu1 }
 0x405   :  { %v11611_v54 = vadd.f32 %v11575_v63, %v11030_v3  ;;  %v15173_v20 = vpop.f32.mrb[95].mxu1 }
 0x407   :  { %v12128_v22 = vadd.f32 %v20871_v38, %v11611_v54 }
 0x408   :  { %v11580_v42 = vpop.f32.mrb[96].mxu1 }
 0x409   :  { %v11612_v56 = vadd.f32 %v11580_v42, %v11031_v50  ;;  %v15176_v53 = vpop.f32.mrb[97].mxu1 }
 0x40b   :  { %v12129_v40 = vadd.f32 %v20872_v10, %v11612_v56 }
 0x40c   :  { %v11585_v15 = vpop.f32.mrb[98].mxu1 }
 0x40d   :  { %v11613_v21 = vadd.f32 %v11585_v15, %v11032_v9  ;;  %v15179_v16 = vpop.f32.mrb[99].mxu1 }
 0x40f   :  { %v19872_v60 = vadd.f32 %v19569_v7, %v11613_v21 }
 0x410   :  { %v11590_v3 = vpop.f32.mrb[100].mxu1 }
 0x411   :  { %v11614_v12 = vadd.f32 %v11590_v3, %v11033_v24  ;;  %v15182_v11 = vpop.f32.mrb[101].mxu1 }
 0x413   :  { %v19875_v50 = vadd.f32 %v19714_v25, %v11614_v12 }
 0x414   :  { %v11595_v26 = vpop.f32.mrb[102].mxu1 }
 0x415   :  { %v11615_v39 = vadd.f32 %v11595_v26, %v11034_v49  ;;  %v15185_v30 = vpop.f32.mrb[103].mxu1 }
 0x417   :  { %v19878_v43 = vadd.f32 %v19760_v4, %v11615_v39  ;;  %v19887_v4 = vld [vmem:[%s20083_s4] ss:$0 sm:$0xff] }
 0x418   :  { %v11600_v19 = vpop.f32.mrb[104].mxu1 }
 0x419   :  { %v11616_v44 = vadd.f32 %v11600_v19, %v11035_v2  ;;  %v15188_v9 = vpop.f32.mrb[105].mxu1 }
 0x41c   :  { %v11605_v62 = vpop.f32.mrb[106].mxu1 }
 0x41d   :  { %v11617_v13 = vadd.f32 %v11605_v62, %v11036_v45  ;;  %v15191_v7 = vpop.f32.mrb[107].mxu1 }
 0x420   :  { %v12117_v8 = vpop.f32.mrb[108].mxu1 }
 0x421   :  { %v19880_v0 = vadd.f32 %v12117_v8, %v11616_v44  ;;  %v15219_v24 = vpop.f32.mrb[109].mxu1 }
 0x424   :  { %v12122_v23 = vpop.f32.mrb[110].mxu1 }
 0x425   :  { %v19882_v32 = vadd.f32 %v12122_v23, %v11617_v13  ;;  %v15222_v25 = vpop.f32.mrb[111].mxu1 }
 0x428   :  { %v12663_v31 = vpop.f32.mrb[112].mxu1 }
 0x429   :  { %v12707_v49 = vadd.f32 %v12663_v31, %v12126_v47  ;;  %v15229_v52 = vpop.f32.mrb[113].mxu1 }
 0x42b   :  { %v13224_v2 = vadd.f32 %v19766_v5, %v12707_v49 }
 0x42c   :  { %v12668_v45 = vpop.f32.mrb[114].mxu1 }
 0x42d   :  { %v13240_v35 = vadd.f32 %v19887_v4, %v13224_v2  ;;  %v12708_v41 = vadd.f32 %v12668_v45, %v12127_v14  ;;  %v15232_v36 = vpop.f32.mrb[115].mxu1 }
 0x42f   :  { %v13249_v48 = vmax.f32 %v13240_v35, 0.0  ;;  %v13225_v57 = vadd.f32 %v19776_v1, %v12708_v41 }
 0x430   :  { %v12673_v27 = vpop.f32.mrb[116].mxu1 }
 0x431   :  { %v13267_v63 = vcombine.high %v13249_v48, %v13249_v48  ;;  %v13274_v47 = vrot.slane %v13249_v48, %v15510_v28  ;;  %v13241_v54 = vadd.f32 %v19887_v4, %v13225_v57  ;;  %v12709_v20 = vadd.f32 %v12673_v27, %v12128_v22  ;;  %v15235_v38 = vpop.f32.mrb[117].mxu1 }
 0x433   :  { %v13281_v42 = vrot.slane %v13267_v63, %v15510_v28  ;;  %v13282_v55 = vcombine.high %v13274_v47, %v13274_v47  ;;  %v13250_v5 = vmax.f32 %v13241_v54, 0.0  ;;  %v13226_v61 = vadd.f32 %v19793_v58, %v12709_v20 }
 0x434   :  { %v12678_v14 = vpop.f32.mrb[118].mxu1  ;;  %v13290_v56 = vrot.slane %v13274_v47, %v15510_v28 }
 0x435   :  { %v13283_v17 = vcombine.high %v13281_v42, %v13281_v42  ;;  %v13304_v1 = vrot.slane %v13282_v55, %v15510_v28  ;;  %v13316_v53 = vcombine.high %v13250_v5, %v13250_v5  ;;  %v15238_v6 = vpop.f32.mrb[119].mxu1  ;;  %v13297_v46 = vrot.slane %v13281_v42, %v15510_v28 }
 0x436   :  { %v13323_v22 = vrot.slane %v13250_v5, %v15510_v28  ;;  %v13242_v10 = vadd.f32 %v19887_v4, %v13226_v61  ;;  %v12710_v37 = vadd.f32 %v12678_v14, %v12129_v40 }
 0x437   :  { %v13311_v15 = vrot.slane %v13283_v17, %v15510_v28  ;;  %v13708_v21 = vcombine.low %v13290_v56, %v13304_v1  ;;  %v14684_v16 = vcombine.high %v13290_v56, %v13304_v1  ;;  %v13330_v58 = vrot.slane %v13316_v53, %v15510_v28 }
 0x438   :  { %v13331_v3 = vcombine.high %v13323_v22, %v13323_v22  ;;  %v13339_v12 = vrot.slane %v13323_v22, %v15510_v28  ;;  %v13251_v11 = vmax.f32 %v13242_v10, 0.0  ;;  %v13227_v26 = vadd.f32 %v19803_v51, %v12710_v37  ;;  %v12683_v39 = vpop.f32.mrb[120].mxu1 }
 0x439   :  { %v13710_v30 = vcombine.low %v13297_v46, %v13311_v15  ;;  %v14685_v19 = vcombine.high %v13297_v46, %v13311_v15  ;;  %v13718_v44 = vrot.slane %v13708_v21, %v15510_v28  ;;  %v13725_v40 = vrot.slane %v14684_v16, %v15510_v28  ;;  %v15241_v9 = vpop.f32.mrb[121].mxu1 }
 0x43a   :  { %v13332_v62 = vcombine.high %v13330_v58, %v13330_v58  ;;  %v13346_v13 = vrot.slane %v13330_v58, %v15510_v28  ;;  %v13353_v7 = vrot.slane %v13331_v3, %v15510_v28  ;;  %v13361_v8 = vcombine.high %v13339_v12, %v13339_v12 }
 0x43b   :  { %v13732_v24 = vrot.slane %v13710_v30, %v15510_v28  ;;  %v13739_v23 = vrot.slane %v14685_v19, %v15510_v28  ;;  %v13740_v25 = vcombine.low %v13718_v44, %v13725_v40  ;;  %v13763_v51 = vrot.slane %v13339_v12, %v15510_v28 }
 0x43c   :  { %v13360_v31 = vrot.slane %v13332_v62, %v15510_v28  ;;  %v13362_v49 = vcombine.high %v13346_v13, %v13346_v13  ;;  %v13363_v52 = vcombine.high %v13353_v7, %v13353_v7  ;;  %v13771_v2 = vcombine.low %v13353_v7, %v13361_v8  ;;  %v19913_v45 = vpop.f32.mrb[122].mxu1 }
 0x43d   :  { %v13741_v35 = vcombine.low %v13732_v24, %v13739_v23  ;;  %v13748_v41 = vrot.slane %v13740_v25, %v15510_v28  ;;  %v13770_v36 = vrot.slane %v13763_v51, %v15510_v28  ;;  %v13365_v48 = vcombine.high %v13251_v11, %v13251_v11  ;;  %v15244_v57 = vpop.f32.mrb[123].mxu1 }
 0x43e   :  { %v13772_v27 = vcombine.low %v13363_v52, %v13346_v13  ;;  %v13773_v63 = vcombine.low %v13360_v31, %v13362_v49  ;;  %v13781_v47 = vrot.slane %v13771_v2, %v15510_v28  ;;  %v13364_v54 = vcombine.high %v13360_v31, %v13360_v31 }
 0x43f   :  { %v13755_v20 = vrot.slane %v13741_v35, %v15510_v28  ;;  %v14231_v38 = vsel %vm14230_vm6, %v13770_v36, 0.0  ;;  %v13372_v42 = vrot.slane %v13251_v11, %v15510_v28  ;;  %v13379_v55 = vrot.slane %v13365_v48, %v15510_v28 }
 0x440   :  { %v13788_v5 = vrot.slane %v13772_v27, %v15510_v28  ;;  %v13795_v61 = vrot.slane %v13773_v63, %v15510_v28  ;;  %v13243_v14 = vadd.f32 %v19887_v4, %v13227_v26  ;;  %v12711_v17 = vadd.f32 %v12683_v39, %v19872_v60  ;;  %v19926_v56 = vpop.f32.mrb[124].mxu1 }
 0x441   :  { %v13756_v1 = vcombine.low %v13748_v41, %v13755_v20  ;;  %v13380_v53 = vcombine.high %v13372_v42, %v13372_v42  ;;  %v13381_v6 = vcombine.high %v13379_v55, %v13379_v55  ;;  %v13388_v46 = vrot.slane %v13372_v42, %v15510_v28  ;;  %v15247_v22 = vpop.f32.mrb[125].mxu1 }
 0x442   :  { %v13803_v10 = vcombine.low %v13781_v47, %v13788_v5  ;;  %v13395_v37 = vrot.slane %v13379_v55, %v15510_v28  ;;  %v13252_v15 = vmax.f32 %v13243_v14, 0.0  ;;  %v13228_v21 = vadd.f32 %v19811_v34, %v12711_v17 }
 0x443   :  { %v14229_v16 = vsel %vm14228_vm7, %v13756_v1, 0.0  ;;  %v13402_v58 = vrot.slane %v13380_v53, %v15510_v28  ;;  %v13409_v60 = vrot.slane %v13381_v6, %v15510_v28  ;;  %v13774_v3 = vcombine.low %v13364_v54, %v13388_v46 }
 0x444   :  { %v13811_v12 = vrot.slane %v13803_v10, %v15510_v28  ;;  %v14232_v11 = vadd.f32 %v14231_v38, %v14229_v16  ;;  %v13414_v26 = vcombine.high %v13252_v15, %v13252_v15  ;;  %v13421_v39 = vrot.slane %v13252_v15, %v15510_v28  ;;  %v19936_v30 = vpop.f32.mrb[126].mxu1 }
 0x445   :  { %v13802_v19 = vrot.slane %v13774_v3, %v15510_v28  ;;  %v13826_v44 = vrot.slane %v13402_v58, %v15510_v28  ;;  %v14686_v34 = vcombine.high %v13388_v46, %v13402_v58  ;;  %v13835_v40 = vcombine.low %v13395_v37, %v13409_v60  ;;  %v15250_v9 = vpop.f32.mrb[127].mxu1 }
 0x446   :  { %v14233_v62 = vrot.slane %v14232_v11, 4  ;;  %v14687_v13 = vcombine.high %v13395_v37, %v13409_v60  ;;  %v13428_v7 = vrot.slane %v13414_v26, %v15510_v28  ;;  %v13429_v8 = vcombine.high %v13421_v39, %v13421_v39 }
 0x447   :  { %v13804_v24 = vcombine.low %v13795_v61, %v13802_v19  ;;  %v13833_v23 = vrot.slane %v13826_v44, %v15510_v28  ;;  %v13844_v25 = vrot.slane %v14686_v34, %v15510_v28  ;;  %v13851_v51 = vrot.slane %v13835_v40, %v15510_v28 }
 0x448   :  { %v14234_v31 = vadd.f32 %v14233_v62, %v14232_v11  ;;  %v13858_v49 = vrot.slane %v14687_v13, %v15510_v28  ;;  %v13430_v52 = vcombine.high %v13428_v7, %v13428_v7  ;;  %v13437_v2 = vrot.slane %v13421_v39, %v15510_v28  ;;  %v19946_v35 = vpop.f32.mrb[128].mxu1 }
 0x449   :  { %v13818_v41 = vrot.slane %v13804_v24, %v15510_v28  ;;  %v13866_v36 = vcombine.low %v13844_v25, %v13851_v51  ;;  %v14240_v48 = vsel %vm14230_vm6, %v13833_v23, 0.0  ;;  %v13444_v57 = vrot.slane %v13428_v7, %v15510_v28  ;;  %v15253_v27 = vpop.f32.mrb[129].mxu1 }
 0x44a   :  { %v14235_v63 = vrot.slane %v14234_v31, 2  ;;  %v13451_v47 = vrot.slane %v13429_v8, %v15510_v28  ;;  %v13458_v54 = vrot.slane %v13430_v52, %v15510_v28  ;;  %v13459_v20 = vcombine.high %v13437_v2, %v13437_v2 }
 0x44b   :  { %v13819_v38 = vcombine.low %v13811_v12, %v13818_v41  ;;  %v13874_v42 = vrot.slane %v13866_v36, %v15510_v28  ;;  %v13460_v55 = vcombine.high %v13444_v57, %v13444_v57  ;;  %v13244_v5 = vadd.f32 %v19887_v4, %v13228_v21 }
 0x44c   :  { %v14236_v61 = vadd.f32 %v14235_v63, %v14234_v31  ;;  %v13461_v14 = vcombine.high %v13451_v47, %v13451_v47  ;;  %v13837_v17 = vcombine.low %v13437_v2, %v13451_v47  ;;  %v13889_v1 = vrot.slane %v13459_v20, %v15510_v28 }
 0x44d   :  { %v14239_v53 = vsel %vm14228_vm7, %v13819_v38, 0.0  ;;  %v13898_v6 = vcombine.low %v13458_v54, %v13460_v55  ;;  %v13253_v46 = vmax.f32 %v13244_v5, 0.0  ;;  %v13462_v22 = vcombine.high %v13458_v54, %v13458_v54 }
 0x44e   :  { %v14237_v10 = vrot.slane %v14236_v61, 1  ;;  %v14241_v37 = vadd.f32 %v14240_v48, %v14239_v53  ;;  %v13865_v15 = vrot.slane %v13837_v17, %v15510_v28  ;;  %v13896_v16 = vrot.slane %v13889_v1, %v15510_v28 }
 0x44f   :  { %v13897_v58 = vcombine.low %v13461_v14, %v13444_v57  ;;  %v13914_v60 = vrot.slane %v13898_v6, %v15510_v28  ;;  %v13463_v21 = vcombine.high %v13253_v46, %v13253_v46  ;;  %v13470_v3 = vrot.slane %v13253_v46, %v15510_v28 }
 0x450   :  { %v14238_v12 = vadd.f32 %v14237_v10, %v14236_v61  ;;  %v14242_v11 = vrot.slane %v14241_v37, 4  ;;  %v13867_v26 = vcombine.low %v13858_v49, %v13865_v15  ;;  %v14249_v39 = vsel %vm14230_vm6, %v13896_v16, 0.0 }
 0x451   :  { %v13907_v19 = vrot.slane %v13897_v58, %v15510_v28  ;;  %v13477_v44 = vrot.slane %v13463_v21, %v15510_v28  ;;  %v13478_v34 = vcombine.high %v13470_v3, %v13470_v3  ;;  %v13486_v40 = vrot.slane %v13470_v3, %v15510_v28 }
 0x452   :  { %v19965_v9 = vmul.f32 0.11111111, %v14238_v12  ;;  %v14243_v62 = vadd.f32 %v14242_v11, %v14241_v37  ;;  %v13881_v13 = vrot.slane %v13867_v26, %v15510_v28  ;;  %v12712_v7 = vadd.f32 %v19913_v45, %v19875_v50 }
 0x453   :  { %v13929_v8 = vcombine.low %v13907_v19, %v13914_v60  ;;  %v13479_v24 = vcombine.high %v13477_v44, %v13477_v44  ;;  %v13493_v23 = vrot.slane %v13477_v44, %v15510_v28  ;;  %v13500_v25 = vrot.slane %v13478_v34, %v15510_v28 }
 0x454   :  { %v14244_v51 = vrot.slane %v14243_v62, 2  ;;  %v13882_v31 = vcombine.low %v13874_v42, %v13881_v13  ;;  %v13508_v49 = vcombine.high %v13486_v40, %v13486_v40  ;;  %v13899_v52 = vcombine.low %v13462_v22, %v13486_v40 }
 0x455   :  { %v13937_v2 = vrot.slane %v13929_v8, %v15510_v28  ;;  %v13507_v41 = vrot.slane %v13479_v24, %v15510_v28  ;;  %v13510_v36 = vcombine.high %v13500_v25, %v13500_v25  ;;  %v13229_v48 = vadd.f32 %v19817_v18, %v12712_v7 }
 0x456   :  { %v14245_v57 = vadd.f32 %v14244_v51, %v14243_v62  ;;  %v14248_v50 = vsel %vm14228_vm7, %v13882_v31, 0.0  ;;  %v13900_v45 = vcombine.low %v13500_v25, %v13508_v49  ;;  %v13921_v27 = vrot.slane %v13899_v52, %v15510_v28 }
 0x457   :  { %v14250_v63 = vadd.f32 %v14249_v39, %v14248_v50  ;;  %v13952_v47 = vrot.slane %v13510_v36, %v15510_v28  ;;  %v13960_v54 = vcombine.low %v13493_v23, %v13507_v41  ;;  %v14688_v20 = vcombine.high %v13493_v23, %v13507_v41 }
 0x458   :  { %v14246_v38 = vrot.slane %v14245_v57, 1  ;;  %v13928_v42 = vrot.slane %v13900_v45, %v15510_v28  ;;  %v13245_v55 = vadd.f32 %v19887_v4, %v13229_v48  ;;  %v12713_v5 = vadd.f32 %v19926_v56, %v19878_v43 }
 0x459   :  { %v14251_v18 = vrot.slane %v14250_v63, 4  ;;  %v13959_v61 = vrot.slane %v13952_v47, %v15510_v28  ;;  %v13970_v14 = vrot.slane %v13960_v54, %v15510_v28  ;;  %v13977_v17 = vrot.slane %v14688_v20, %v15510_v28 }
 0x45a   :  { %v14247_v1 = vadd.f32 %v14246_v38, %v14245_v57  ;;  %v13930_v53 = vcombine.low %v13921_v27, %v13928_v42  ;;  %v13254_v6 = vmax.f32 %v13245_v55, 0.0  ;;  %v13230_v46 = vadd.f32 %v19823_v59, %v12713_v5 }
 0x45b   :  { %v14252_v22 = vadd.f32 %v14251_v18, %v14250_v63  ;;  %v13992_v10 = vcombine.low %v13970_v14, %v13977_v17  ;;  %v14258_v37 = vsel %vm14230_vm6, %v13959_v61, 0.0  ;;  %v12714_v15 = vadd.f32 %v19936_v30, %v19880_v0 }
 0x45c   :  { %v19989_v43 = vmul.f32 0.11111111, %v14247_v1  ;;  %v13944_v56 = vrot.slane %v13930_v53, %v15510_v28  ;;  %v13512_v16 = vcombine.high %v13254_v6, %v13254_v6  ;;  %v13519_v58 = vrot.slane %v13254_v6, %v15510_v28 }
 0x45d   :  { %v14253_v60 = vrot.slane %v14252_v22, 2  ;;  %v14000_v21 = vrot.slane %v13992_v10, %v15510_v28  ;;  %v13246_v3 = vadd.f32 %v19887_v4, %v13230_v46  ;;  %v13231_v59 = vadd.f32 %v19829_v33, %v12714_v15 }
 0x45e   :  { %v13945_v12 = vcombine.low %v13937_v2, %v13944_v56  ;;  %v13526_v11 = vrot.slane %v13512_v16, %v15510_v28  ;;  %v13527_v26 = vcombine.high %v13519_v58, %v13519_v58  ;;  %v13535_v0 = vrot.slane %v13519_v58, %v15510_v28 }
 0x45f   :  { %v14254_v30 = vadd.f32 %v14253_v60, %v14252_v22  ;;  %v13255_v39 = vmax.f32 %v13246_v3, 0.0  ;;  %v13247_v19 = vadd.f32 %v19887_v4, %v13231_v59  ;;  %v20001_v44 = vadd.f32 %v19946_v35, %v19882_v32 }
 0x460   :  { %v14257_v34 = vsel %vm14228_vm7, %v13945_v12, 0.0  ;;  %v13528_v40 = vcombine.high %v13526_v11, %v13526_v11  ;;  %v13542_v62 = vrot.slane %v13526_v11, %v15510_v28  ;;  %v13549_v33 = vrot.slane %v13527_v26, %v15510_v28 }
 0x461   :  { %v14255_v13 = vrot.slane %v14254_v30, 1  ;;  %v14259_v7 = vadd.f32 %v14258_v37, %v14257_v34  ;;  %v13561_v8 = vcombine.high %v13255_v39, %v13255_v39  ;;  %v13568_v24 = vrot.slane %v13255_v39, %v15510_v28 }
 0x462   :  { %v13556_v23 = vrot.slane %v13528_v40, %v15510_v28  ;;  %v13558_v25 = vcombine.high %v13542_v62, %v13542_v62  ;;  %v13962_v51 = vcombine.low %v13535_v0, %v13549_v33  ;;  %v14689_v31 = vcombine.high %v13535_v0, %v13549_v33 }
 0x463   :  { %v14256_v49 = vadd.f32 %v14255_v13, %v14254_v30  ;;  %v14260_v32 = vrot.slane %v14259_v7, 4  ;;  %v14015_v35 = vrot.slane %v13542_v62, %v15510_v28  ;;  %v13575_v52 = vrot.slane %v13561_v8, %v15510_v28 }
 0x464   :  { %v13984_v2 = vrot.slane %v13962_v51, %v15510_v28  ;;  %v13991_v41 = vrot.slane %v14689_v31, %v15510_v28  ;;  %v14023_v36 = vcombine.low %v13556_v23, %v13558_v25  ;;  %v13560_v48 = vcombine.high %v13556_v23, %v13556_v23 }
 0x465   :  { %v14261_v57 = vadd.f32 %v14260_v32, %v14259_v7  ;;  %v14022_v50 = vrot.slane %v14015_v35, %v15510_v28  ;;  %v13576_v45 = vcombine.high %v13568_v24, %v13568_v24  ;;  %v13577_v27 = vcombine.high %v13575_v52, %v13575_v52 }
 0x466   :  { %v13993_v63 = vcombine.low %v13984_v2, %v13991_v41  ;;  %v13584_v47 = vrot.slane %v13568_v24, %v15510_v28  ;;  %v13591_v54 = vrot.slane %v13575_v52, %v15510_v28  ;;  %v14033_v20 = vrot.slane %v14023_v36, %v15510_v28 }
 0x467   :  { %v14262_v38 = vrot.slane %v14261_v57, 2  ;;  %v14267_v42 = vsel %vm14230_vm6, %v14022_v50, 0.0  ;;  %v13598_v55 = vrot.slane %v13576_v45, %v15510_v28  ;;  %v13605_v5 = vrot.slane %v13577_v27, %v15510_v28 }
 0x468   :  { %v14007_v18 = vrot.slane %v13993_v63, %v15510_v28  ;;  %v13606_v61 = vcombine.high %v13584_v47, %v13584_v47  ;;  %v14024_v14 = vcombine.low %v13560_v48, %v13584_v47  ;;  %v13256_v17 = vmax.f32 %v13247_v19, 0.0 }
 0x469   :  { %v14263_v1 = vadd.f32 %v14262_v38, %v14261_v57  ;;  %v13608_v53 = vcombine.high %v13598_v55, %v13598_v55  ;;  %v14078_v6 = vrot.slane %v13605_v5, %v15510_v28  ;;  %v14690_v46 = vcombine.high %v13591_v54, %v13605_v5 }
 0x46a   :  { %v14008_v22 = vcombine.low %v14000_v21, %v14007_v18  ;;  %v14025_v10 = vcombine.low %v13598_v55, %v13606_v61  ;;  %v14040_v37 = vrot.slane %v14024_v14, %v15510_v28  ;;  %v13610_v15 = vcombine.high %v13256_v17, %v13256_v17 }
 0x46b   :  { %v14026_v56 = vcombine.low %v13608_v53, %v13591_v54  ;;  %v14085_v16 = vrot.slane %v14078_v6, %v15510_v28  ;;  %v14096_v58 = vrot.slane %v14690_v46, %v15510_v28  ;;  %v13617_v60 = vrot.slane %v13256_v17, %v15510_v28 }
 0x46c   :  { %v14266_v3 = vsel %vm14228_vm7, %v14008_v22, 0.0  ;;  %v14047_v59 = vrot.slane %v14025_v10, %v15510_v28  ;;  %v14055_v12 = vcombine.low %v14033_v20, %v14040_v37  ;;  %v13624_v11 = vrot.slane %v13610_v15, %v15510_v28 }
 0x46d   :  { %v14268_v21 = vadd.f32 %v14267_v42, %v14266_v3  ;;  %v14054_v26 = vrot.slane %v14026_v56, %v15510_v28  ;;  %v14276_v0 = vsel %vm14230_vm6, %v14085_v16, 0.0  ;;  %v13625_v30 = vcombine.high %v13617_v60, %v13617_v60 }
 0x46e   :  { %v14063_v39 = vrot.slane %v14055_v12, %v15510_v28  ;;  %v13626_v19 = vcombine.high %v13624_v11, %v13624_v11  ;;  %v13633_v34 = vrot.slane %v13617_v60, %v15510_v28  ;;  %v13640_v40 = vrot.slane %v13624_v11, %v15510_v28 }
 0x46f   :  { %v14269_v62 = vrot.slane %v14268_v21, 4  ;;  %v14056_v33 = vcombine.low %v14047_v59, %v14054_v26  ;;  %v13647_v13 = vrot.slane %v13625_v30, %v15510_v28  ;;  %v13232_v7 = vadd.f32 %v19836_v29, %v20001_v44 }
 0x470   :  { %v13654_v8 = vrot.slane %v13626_v19, %v15510_v28  ;;  %v13656_v24 = vcombine.high %v13640_v40, %v13640_v40  ;;  %v14264_v23 = vrot.slane %v14263_v1, 1  ;;  %v14304_v25 = vmul.f32 0.11111111, %v14256_v49 }
 0x471   :  { %v14270_v51 = vadd.f32 %v14269_v62, %v14268_v21  ;;  %v14070_v31 = vrot.slane %v14056_v33, %v15510_v28  ;;  %v14087_v32 = vcombine.low %v13633_v34, %v13647_v13  ;;  %v14691_v35 = vcombine.high %v13633_v34, %v13647_v13 }
 0x472   :  { %v14089_v52 = vcombine.low %v13640_v40, %v13654_v8  ;;  %v14141_v2 = vrot.slane %v13656_v24, %v15510_v28  ;;  %v13248_v41 = vadd.f32 %v19887_v4, %v13232_v7  ;;  %v13658_v36 = vcombine.high %v13654_v8, %v13654_v8 }
 0x473   :  { %v14271_v48 = vrot.slane %v14270_v51, 2  ;;  %v14071_v57 = vcombine.low %v14063_v39, %v14070_v31  ;;  %v14103_v29 = vrot.slane %v14087_v32, %v15510_v28  ;;  %v14110_v44 = vrot.slane %v14691_v35, %v15510_v28 }
 0x474   :  { %v14117_v49 = vrot.slane %v14089_v52, %v15510_v28  ;;  %v14148_v50 = vrot.slane %v14141_v2, %v15510_v28  ;;  %v13257_v45 = vmax.f32 %v13248_v41, 0.0  ;;  %v14265_v27 = vadd.f32 %v14264_v23, %v14263_v1 }
 0x475   :  { %v14272_v63 = vadd.f32 %v14271_v48, %v14270_v51  ;;  %v14275_v47 = vsel %vm14228_vm7, %v14071_v57, 0.0  ;;  %v14118_v54 = vcombine.low %v14096_v58, %v14103_v29  ;;  %v14330_v4 = vsel %vm14329_vm8, %v19989_v43, %v19965_v9 }
 0x476   :  { %v14277_v20 = vadd.f32 %v14276_v0, %v14275_v47  ;;  %v14119_v38 = vcombine.low %v14110_v44, %v14117_v49  ;;  %v14285_v42 = vsel %vm14230_vm6, %v14148_v50, 0.0  ;;  %v13659_v55 = vcombine.high %v13257_v45, %v13257_v45 }
 0x477   :  { %v14126_v5 = vrot.slane %v14118_v54, %v15510_v28  ;;  %v13666_v18 = vrot.slane %v13257_v45, %v15510_v28  ;;  %v14273_v61 = vrot.slane %v14272_v63, 1  ;;  %v14305_v14 = vmul.f32 0.11111111, %v14265_v27 }
 0x478   :  { %v14278_v17 = vrot.slane %v14277_v20, 4  ;;  %v14133_v1 = vrot.slane %v14119_v38, %v15510_v28  ;;  %v13673_v53 = vrot.slane %v13659_v55, %v15510_v28  ;;  %v14332_v6 = vsel %vm14331_vm9, %v14304_v25, %v14330_v4 }
 0x479   :  { %v13674_v46 = vcombine.high %v13666_v18, %v13666_v18  ;;  %v13682_v9 = vrot.slane %v13666_v18, %v15510_v28  ;;  %v14274_v43 = vadd.f32 %v14273_v61, %v14272_v63  ;;  %v14334_v22 = vsel %vm14333_vm10, %v14305_v14, %v14332_v6  ;;  %v14692_v61 = vld [vmem:[%s20084_s6] ss:$0 sm:$0xff] }
 0x47a   :  { %v14134_v10 = vcombine.low %v14126_v5, %v14133_v1  ;;  %v13675_v37 = vcombine.high %v13673_v53, %v13673_v53  ;;  %v13689_v15 = vrot.slane %v13673_v53, %v15510_v28  ;;  %v14279_v56 = vadd.f32 %v14278_v17, %v14277_v20 }
 0x47b   :  { %v13696_v16 = vrot.slane %v13674_v46, %v15510_v28  ;;  %v13704_v58 = vcombine.high %v13682_v9, %v13682_v9  ;;  %v14149_v60 = vcombine.low %v13658_v36, %v13682_v9  ;;  %v14306_v3 = vmul.f32 0.11111111, %v14274_v43 }
 0x47c   :  { %v14284_v59 = vsel %vm14228_vm7, %v14134_v10, 0.0  ;;  %v13703_v12 = vrot.slane %v13675_v37, %v15510_v28  ;;  %v13705_v11 = vcombine.high %v13689_v15, %v13689_v15  ;;  %v14280_v21 = vrot.slane %v14279_v56, 2 }
 0x47d   :  { %v14286_v26 = vadd.f32 %v14285_v42, %v14284_v59  ;;  %v13706_v0 = vcombine.high %v13696_v16, %v13696_v16  ;;  %v14150_v30 = vcombine.low %v13696_v16, %v13704_v58  ;;  %v14159_v39 = vrot.slane %v14149_v60, %v15510_v28 }
 0x47e   :  { %v13707_v19 = vcombine.high %v13703_v12, %v13703_v12  ;;  %v14152_v34 = vcombine.low %v13703_v12, %v13705_v11  ;;  %v14281_v40 = vadd.f32 %v14280_v21, %v14279_v56  ;;  %v14336_v62 = vsel %vm14335_vm11, %v14306_v3, %v14334_v22 }
 0x47f   :  { %v14151_v33 = vcombine.low %v13706_v0, %v13689_v15  ;;  %v14166_v13 = vrot.slane %v14150_v30, %v15510_v28  ;;  %v14287_v7 = vrot.slane %v14286_v26, 4 }
 0x480   :  { %v14180_v8 = vrot.slane %v14152_v34, %v15510_v28  ;;  %v14282_v24 = vrot.slane %v14281_v40, 1  ;;  %v14204_v51 = vrot.slane %v13707_v19, %v15510_v28 }
 0x481   :  { %v14173_v23 = vrot.slane %v14151_v33, %v15510_v28  ;;  %v14181_v25 = vcombine.low %v14159_v39, %v14166_v13  ;;  %v14288_v31 = vadd.f32 %v14287_v7, %v14286_v26 }
 0x482   :  { %v14283_v32 = vadd.f32 %v14282_v24, %v14281_v40  ;;  %v14211_v48 = vrot.slane %v14204_v51, %v15510_v28 }
 0x483   :  { %v14182_v35 = vcombine.low %v14173_v23, %v14180_v8  ;;  %v14289_v52 = vrot.slane %v14288_v31, 2  ;;  %v14189_v41 = vrot.slane %v14181_v25, %v15510_v28 }
 0x484   :  { %v14307_v2 = vmul.f32 0.11111111, %v14283_v32  ;;  %v14294_v27 = vsel %vm14230_vm6, %v14211_v48, 0.0 }
 0x485   :  { %v14196_v36 = vrot.slane %v14182_v35, %v15510_v28  ;;  %v14290_v57 = vadd.f32 %v14289_v52, %v14288_v31 }
 0x486   :  { %v14338_v29 = vsel %vm14337_vm12, %v14307_v2, %v14336_v62 }
 0x487   :  { %v14197_v44 = vcombine.low %v14189_v41, %v14196_v36  ;;  %v14291_v49 = vrot.slane %v14290_v57, 1 }
 0x489   :  { %v14292_v50 = vadd.f32 %v14291_v49, %v14290_v57  ;;  %v14293_v45 = vsel %vm14228_vm7, %v14197_v44, 0.0 }
 0x48a   :  { %v14295_v63 = vadd.f32 %v14294_v27, %v14293_v45 }
 0x48b   :  { %v14308_v47 = vmul.f32 0.11111111, %v14292_v50 }
 0x48c   :  { %v14296_v54 = vrot.slane %v14295_v63, 4 }
 0x48d   :  { %v14340_v4 = vsel %vm14339_vm13, %v14308_v47, %v14338_v29 }
 0x48e   :  { %v14297_v20 = vadd.f32 %v14296_v54, %v14295_v63 }
 0x490   :  { %v14298_v38 = vrot.slane %v14297_v20, 2 }
 0x492   :  { %v14299_v42 = vadd.f32 %v14298_v38, %v14297_v20 }
 0x494   :  { %v14300_v55 = vrot.slane %v14299_v42, 1 }
 0x496   :  { %v14301_v5 = vadd.f32 %v14300_v55, %v14299_v42 }
 0x498   :  { %v14309_v28 = vmul.f32 0.11111111, %v14301_v5 }
 0x49a   :  { %v14342_v18 = vsel %vm14341_vm14, %v14309_v28, %v14340_v4 }
 0x49b   :  { %15294 = vmatmul.mubr.msk.f32.vlgmr.msra.gmra.mrb[130].mxu1 %vm14228_vm7, %v14342_v18 }
 0x56e   :  { %v14411_v14 = vpop.f32.mrb[130].mxu1 }
 0x56f   :  { %v14412_v17 = vadd.f32 %v14692_v61, %v14411_v14  ;;  %v15295_v1 = vpop.f32.mrb[131].mxu1 }
 0x571   :  { %14416 = vst.msk [vmem:[%s20085_s7] sm:$0xff] %vm14415_vm15, %v14412_v17 }

</bundles_post_ra>
